<compile_context>
chip_gen: v5e
topology: v5e:2x2
jax: 0.10.0
libtpu: 0.0.40
codegen_flags: <defaults>
</compile_context>

<pallas_src>
import functools

import jax
import jax.numpy as jnp
from jax import lax
from jax.experimental import pallas as pl
from jax.experimental.pallas import tpu as pltpu


def _round_up(x, m):
    return (x + m - 1) // m * m


def _cdiv(a, b):
    return (a + b - 1) // b


@functools.lru_cache(maxsize=1)
def _vmem_budget_bytes():
    """~50% of physical VMEM per core (per-generation), with a conservative fallback."""
    try:
        cap = int(pltpu.get_tpu_info().vmem_capacity_bytes)
    except Exception:
        cap = 64 * 1024 * 1024          # v7x per-TC physical VMEM (most restrictive)
    return cap // 2


# ----------------------------- Pallas kernels --------------------------------

def _epilogue(y, act):
    if act == "relu":
        return jnp.maximum(y, 0.0)
    if act == "tanh":
        return jnp.tanh(y)
    return y


def _gemm_kernel(x_ref, w_ref, b_ref, o_ref, *, act):
    # Single-K-step fast path: no accumulator scratch, no pl.when branches.
    y = jnp.dot(x_ref[...], w_ref[...], preferred_element_type=jnp.float32) + b_ref[...]
    o_ref[...] = _epilogue(y, act).astype(o_ref.dtype)


def _gemm_res_kernel(x_ref, w_ref, b_ref, r_ref, o_ref, *, act):
    y = (jnp.dot(x_ref[...], w_ref[...], preferred_element_type=jnp.float32)
         + b_ref[...] + r_ref[...].astype(jnp.float32))
    o_ref[...] = _epilogue(y, act).astype(o_ref.dtype)


def _gemm_acc_kernel(x_ref, w_ref, b_ref, o_ref, acc_ref, *, act):
    @pl.when(pl.program_id(2) == 0)
    def _():
        acc_ref[...] = jnp.zeros_like(acc_ref)

    acc_ref[...] += jnp.dot(x_ref[...], w_ref[...], preferred_element_type=jnp.float32)

    @pl.when(pl.program_id(2) == pl.num_programs(2) - 1)
    def _():
        o_ref[...] = _epilogue(acc_ref[...] + b_ref[...], act).astype(o_ref.dtype)


def _gemm_acc_res_kernel(x_ref, w_ref, b_ref, r_ref, o_ref, acc_ref, *, act):
    @pl.when(pl.program_id(2) == 0)
    def _():
        acc_ref[...] = jnp.zeros_like(acc_ref)

    acc_ref[...] += jnp.dot(x_ref[...], w_ref[...], preferred_element_type=jnp.float32)

    @pl.when(pl.program_id(2) == pl.num_programs(2) - 1)
    def _():
        y = acc_ref[...] + b_ref[...] + r_ref[...].astype(jnp.float32)
        o_ref[...] = _epilogue(y, act).astype(o_ref.dtype)


# --------------------------- tile selection -----------------------------------

def _vmem_estimate(tm, tk, tn, nk, has_res, out_bytes):
    b = 2 * tm * tk * 2             # x blocks (bf16, double-buffered)
    b += 2 * tk * tn * 2            # w blocks (bf16)
    b += 2 * 8 * tn * 4             # bias blocks (f32, sublane-padded)
    b += 2 * tm * tn * out_bytes    # out blocks
    if has_res:
        b += 2 * tm * tn * 2        # residual blocks (bf16)
    if nk > 1:
        b += tm * tn * 4            # f32 accumulator scratch
    return b


def _select_tiles(M, K_pad, N_pad, has_res, out_bytes, budget):
    # Bigger row tiles for mem-bound small-N layers; multiples of 128 when M is large.
    tm_cap = 512 if N_pad <= 512 else 256
    tm = _round_up(M, 16) if M <= tm_cap else tm_cap
    tn = N_pad
    # Megacore (v7x): if the M axis has a single tile, split N so both cores get work.
    if _round_up(M, tm) // tm == 1 and tn % 256 == 0:
        tn //= 2
    nk, tk = 1, K_pad
    for _ in range(64):
        if _vmem_estimate(tm, tk, tn, nk, has_res, out_bytes) <= budget:
            break
        if tn % 256 == 0:
            tn //= 2
        elif tm > 256:
            tm //= 2
        else:
            nk += 1
            tk = _round_up(_cdiv(K_pad, nk), 128)
    return tm, tk, tn, nk


# ------------------------------- fused GEMM -----------------------------------

def fused_gemm(x, w, bias, *, act="none", residual=None, out_dtype=jnp.bfloat16):
    """out = act((x @ w) + bias [+ residual]); x/w bf16, f32 accumulate/epilogue."""
    M, K_pad = x.shape
    Kw, N_pad = w.shape
    assert Kw == K_pad and K_pad % 128 == 0 and N_pad % 128 == 0

    out_bytes = jnp.dtype(out_dtype).itemsize
    budget = _vmem_budget_bytes()
    tm, tk, tn, nk = _select_tiles(M, K_pad, N_pad, residual is not None,
                                   out_bytes, int(budget * 0.75))

    M_pad = _round_up(M, tm)
    if M_pad != M:
        x = jnp.pad(x, ((0, M_pad - M), (0, 0)))
    K_full = nk * tk
    if K_full != K_pad:                           # only when K must be tiled for VMEM
        x = jnp.pad(x, ((0, 0), (0, K_full - K_pad)))
        w = jnp.pad(w, ((0, K_full - K_pad), (0, 0)))

    grid_m, grid_n = M_pad // tm, N_pad // tn

    args = [x, w, bias]
    if residual is not None:
        r = residual.astype(jnp.bfloat16)
        pm, pn = M_pad - r.shape[0], N_pad - r.shape[1]
        if pm or pn:
            r = jnp.pad(r, ((0, pm), (0, pn)))
        args.append(r)

    if nk == 1:
        grid = (grid_m, grid_n)
        in_specs = [pl.BlockSpec((tm, K_full), lambda i, j: (i, 0)),
                    pl.BlockSpec((K_full, tn), lambda i, j: (0, j)),
                    pl.BlockSpec((1, tn), lambda i, j: (0, j))]
        o_spec = pl.BlockSpec((tm, tn), lambda i, j: (i, j))
        if residual is not None:
            in_specs.append(pl.BlockSpec((tm, tn), lambda i, j: (i, j)))
            kern = functools.partial(_gemm_res_kernel, act=act)
        else:
            kern = functools.partial(_gemm_kernel, act=act)
        scratch = []
        dims = ("parallel", "parallel")
    else:
        grid = (grid_m, grid_n, nk)               # reduction axis last
        in_specs = [pl.BlockSpec((tm, tk), lambda i, j, k: (i, k)),
                    pl.BlockSpec((tk, tn), lambda i, j, k: (k, j)),
                    pl.BlockSpec((1, tn), lambda i, j, k: (0, j))]
        o_spec = pl.BlockSpec((tm, tn), lambda i, j, k: (i, j))
        if residual is not None:
            in_specs.append(pl.BlockSpec((tm, tn), lambda i, j, k: (i, j)))
            kern = functools.partial(_gemm_acc_res_kernel, act=act)
        else:
            kern = functools.partial(_gemm_acc_kernel, act=act)
        scratch = [pltpu.VMEM((tm, tn), jnp.float32)]
        dims = ("parallel", "parallel", "arbitrary")

    out = pl.pallas_call(
        kern,
        out_shape=jax.ShapeDtypeStruct((M_pad, N_pad), out_dtype),
        grid=grid,
        in_specs=in_specs,
        out_specs=o_spec,
        scratch_shapes=scratch,
        compiler_params=pltpu.CompilerParams(
            dimension_semantics=dims,
            vmem_limit_bytes=int(budget)),
    )(*args)
    return out[:M]


# --------------------------- conv -> GEMM glue --------------------------------

def _im2col9(x_nhwc, K_pad):
    """3x3 im2col (pad=1, stride=1) with the K zero-padding fused into the single concat."""
    B, H, W, C = x_nhwc.shape
    xp = jnp.pad(x_nhwc, ((0, 0), (1, 1), (1, 1), (0, 0)))
    cols = [xp[:, a:a + H, b:b + W, :] for a in range(3) for b in range(3)]
    K = 9 * C
    if K_pad > K:
        cols.append(jnp.zeros((B, H, W, K_pad - K), x_nhwc.dtype))
    return jnp.concatenate(cols, axis=-1).reshape(B * H * W, K_pad)


def conv3x3_bn(x_nhwc, prep, act, residual=None):
    # nn.Conv2d(Cin, Cout, 3, 1, 1, bias=False) + folded BN.
    B, H, W, _ = x_nhwc.shape
    xm = _im2col9(x_nhwc, prep["w"].shape[0])
    y = fused_gemm(xm, prep["w"], prep["b"], act=act, residual=residual)
    return y[:, :prep["N"]].reshape(B, H, W, prep["N"])


def convT4x4_s2_bn(x_nhwc, prep, act, out_dtype=jnp.bfloat16):
    # nn.ConvTranspose2d(Cin, Cout, 4, 2, 1, bias=False) + folded BN, via sub-pixel
    # decomposition: one 9-tap GEMM emits all 4 output phases (N = 4*Cout), no zero dilation.
    B, H, W, _ = x_nhwc.shape
    xm = _im2col9(x_nhwc, prep["w"].shape[0])
    y = fused_gemm(xm, prep["w"], prep["b"], act=act, out_dtype=out_dtype)
    Cout = prep["N"] // 4
    y = y[:, :prep["N"]].reshape(B, H, W, 2, 2, Cout)
    return jnp.transpose(y, (0, 1, 3, 2, 4, 5)).reshape(B, 2 * H, 2 * W, Cout)


def initial_convT_bn_relu(inp_vec, prep):
    # nn.ConvTranspose2d(Cin, Cout, 4, 1, 0, bias=False) on a 1x1 input -> 4x4 output.
    B, K = inp_vec.shape
    K_pad = prep["w"].shape[0]
    x = inp_vec.astype(jnp.bfloat16)
    if K_pad > K:
        x = jnp.pad(x, ((0, 0), (0, K_pad - K)))
    y = fused_gemm(x, prep["w"], prep["b"], act="relu")
    Cout = prep["N"] // 16
    y = y[:, :prep["N"]].reshape(B, Cout, 4, 4)     # N index = o*16 + (ky*4 + kx)
    return jnp.transpose(y, (0, 2, 3, 1))           # NHWC, bf16


# ------------------------------ model pieces ----------------------------------

def residual_block(x_nhwc, img_vec, act_vec, prep):
    # TODO(synk): the literal PyTorch ResidualBlockWithImage concatenates a 1x1 image onto an
    # HxW tensor and adds a (C+14)-channel tensor to a C-channel one (shape mismatches); we
    # implement the only runnable interpretation: tile image/action to HxW for the concat and
    # use the pre-concat x as the residual.
    B, H, W, C = x_nhwc.shape
    img_t = jnp.broadcast_to(img_vec.astype(x_nhwc.dtype)[:, None, None, :],
                             (B, H, W, img_vec.shape[-1]))
    act_t = jnp.broadcast_to(act_vec.astype(x_nhwc.dtype)[:, None, None, :],
                             (B, H, W, act_vec.shape[-1]))
    xin = jnp.concatenate([x_nhwc, img_t, act_t], axis=-1)
    h = conv3x3_bn(xin, prep["c1"], act="relu")
    res = x_nhwc.reshape(B * H * W, C)
    return conv3x3_bn(h, prep["c2"], act="none", residual=res)


def generator_forward(noise, image, action_raw, P):
    B = noise.shape[0]
    sin_cos = jnp.concatenate(
        [jnp.sin(action_raw[:, 3:]), jnp.cos(action_raw[:, 3:])], axis=-1)
    action = jnp.concatenate([action_raw[:, :3], sin_cos], axis=-1)
    img_vec = image.reshape(B, -1)
    inp = jnp.concatenate([noise.reshape(B, -1), img_vec, action], axis=-1)

    x = initial_convT_bn_relu(inp, P["initial"])
    x = residual_block(x, img_vec, action, P["res1"])
    x = convT4x4_s2_bn(x, P["up1"], act="relu")
    x = residual_block(x, img_vec, action, P["res2"])
    x = convT4x4_s2_bn(x, P["up2"], act="relu")
    x = residual_block(x, img_vec, action, P["res3"])
    x = convT4x4_s2_bn(x, P["up3"], act="relu")
    x = convT4x4_s2_bn(x, P["final"], act="tanh", out_dtype=jnp.float32)
    return jnp.transpose(x, (0, 3, 1, 2))   # NCHW, like PyTorch


# --------------------- one-time parameter preparation --------------------------

def _bn_fold(gamma, beta, mean, var, eps=1e-5):
    # TODO(synk): BatchNorm folded with eval-mode (running) stats; training-mode batch stats
    # are not reproduced.
    scale = gamma / jnp.sqrt(var + eps)
    return scale, beta - mean * scale


def _finish(wm, s_vec, b_vec):
    """Fold BN scale into weight columns, pad K/N to multiples of 128, cast to bf16."""
    K, N = wm.shape
    K_pad = _round_up(K, 128)
    N_pad = _round_up(N, 128)
    wm = wm * s_vec[None, :]
    wm = jnp.pad(wm, ((0, K_pad - K), (0, N_pad - N))).astype(jnp.bfloat16)
    b = jnp.pad(b_vec, (0, N_pad - N)).astype(jnp.float32).reshape(1, N_pad)
    return {"w": wm, "b": b, "N": N}


def _prep_initial(w, bn):                     # w: (Cin, Cout, 4, 4)
    Cin, Cout = w.shape[0], w.shape[1]
    scale, bias = _bn_fold(*bn)
    wm = w.reshape(Cin, Cout * 16)
    return _finish(wm, jnp.repeat(scale, 16), jnp.repeat(bias, 16))


def _prep_conv3x3(w, bn):                     # w: (Cout, Cin, 3, 3) PyTorch layout
    Cout, Cin = w.shape[0], w.shape[1]
    scale, bias = _bn_fold(*bn)
    wm = jnp.transpose(w, (2, 3, 1, 0)).reshape(9 * Cin, Cout)
    return _finish(wm, scale, bias)


def _prep_convT_s2(w, bn=None):               # w: (Cin, Cout, 4, 4)
    Cin, Cout = w.shape[0], w.shape[1]
    if bn is None:
        scale = jnp.ones((Cout,), jnp.float32)
        bias = jnp.zeros((Cout,), jnp.float32)
    else:
        scale, bias = _bn_fold(*bn)
    # Sub-pixel weight: 9 input taps (3x3 neighborhood of the 1-padded input) -> 4 phases.
    wm = jnp.zeros((9 * Cin, 4 * Cout), jnp.float32)
    for r in range(2):
        for s in range(2):
            p = r * 2 + s
            for a in (r, r + 1):
                for b in (s, s + 1):
                    t = a * 3 + b
                    ky = 3 + r - 2 * a
                    kx = 3 + s - 2 * b
                    wm = wm.at[t * Cin:(t + 1) * Cin, p * Cout:(p + 1) * Cout].set(w[:, :, ky, kx])
    return _finish(wm, jnp.tile(scale, 4), jnp.tile(bias, 4))


def prepare_params(R):
    P = {"initial": _prep_initial(R["initial_w"], R["initial_bn"])}
    for name in ("res1", "res2", "res3"):
        blk = R[name]
        P[name] = {"c1": _prep_conv3x3(blk["w1"], blk["bn1"]),
                   "c2": _prep_conv3x3(blk["w2"], blk["bn2"])}
    for name in ("up1", "up2", "up3"):
        P[name] = _prep_convT_s2(R[name + "_w"], R[name + "_bn"])
    P["final"] = _prep_convT_s2(R["final_w"], None)
    return P


def init_raw_params(key, size_fm, size_z, channel_size, state_features):
    keys = iter(jax.random.split(key, 64))

    def w(shape, fan_in):
        return jax.random.normal(next(keys), shape, jnp.float32) / jnp.sqrt(float(fan_in))

    def bn(c):
        gamma = 1.0 + 0.1 * jax.random.normal(next(keys), (c,), jnp.float32)
        beta = 0.1 * jax.random.normal(next(keys), (c,), jnp.float32)
        mean = 0.1 * jax.random.normal(next(keys), (c,), jnp.float32)
        var = 1.0 + 0.1 * jax.random.uniform(next(keys), (c,), jnp.float32)
        return (gamma, beta, mean, var)

    c8, c4, c2, c1 = size_fm * 8, size_fm * 4, size_fm * 2, size_fm
    extra = state_features + channel_size
    cin0 = size_z + state_features + channel_size

    R = {"initial_w": w((cin0, c8, 4, 4), cin0 * 16), "initial_bn": bn(c8)}
    for name, c in (("res1", c8), ("res2", c4), ("res3", c2)):
        R[name] = {"w1": w((c, c + extra, 3, 3), (c + extra) * 9), "bn1": bn(c),
                   "w2": w((c, c, 3, 3), c * 9), "bn2": bn(c)}
    for name, (ci, co) in (("up1", (c8, c4)), ("up2", (c4, c2)), ("up3", (c2, c1))):
        R[name + "_w"] = w((ci, co, 4, 4), ci * 16)
        R[name + "_bn"] = bn(co)
    R["final_w"] = w((c1, channel_size, 4, 4), c1 * 16)
    return R


# --------------------- pure-JAX reference (numerical check) --------------------

_DN = ("NCHW", "OIHW", "NCHW")


def _ref_prepare(R):
    """BN folded into original-layout conv weights (bf16) + f32 bias, mirroring the kernel."""
    def fold_convT(w, bn):
        if bn is None:
            s = jnp.ones((w.shape[1],), jnp.float32)
            b = jnp.zeros((w.shape[1],), jnp.float32)
        else:
            s, b = _bn_fold(*bn)
        return (w * s[None, :, None, None]).astype(jnp.bfloat16), b

    def fold_conv(w, bn):
        s, b = _bn_fold(*bn)
        return (w * s[:, None, None, None]).astype(jnp.bfloat16), b

    Q = {"initial": fold_convT(R["initial_w"], R["initial_bn"])}
    for name in ("res1", "res2", "res3"):
        blk = R[name]
        Q[name] = (fold_conv(blk["w1"], blk["bn1"]), fold_conv(blk["w2"], blk["bn2"]))
    for name in ("up1", "up2", "up3"):
        Q[name] = fold_convT(R[name + "_w"], R[name + "_bn"])
    Q["final"] = fold_convT(R["final_w"], None)
    return Q


def _ref_conv3x3(x, w, b):
    y = lax.conv_general_dilated(x, w, (1, 1), ((1, 1), (1, 1)),
                                 dimension_numbers=_DN,
                                 preferred_element_type=jnp.float32)
    return y + b[None, :, None, None]


def _ref_convT_s2(x, w_iohw, b):
    w_conv = jnp.flip(w_iohw, axis=(2, 3)).transpose(1, 0, 2, 3)
    y = lax.conv_general_dilated(x, w_conv, (1, 1), ((2, 2), (2, 2)),
                                 lhs_dilation=(2, 2), dimension_numbers=_DN,
                                 preferred_element_type=jnp.float32)
    return y + b[None, :, None, None]


def reference_forward(noise, image, action_raw, R):
    Q = _ref_prepare(R)
    B = noise.shape[0]
    sin_cos = jnp.concatenate(
        [jnp.sin(action_raw[:, 3:]), jnp.cos(action_raw[:, 3:])], axis=-1)
    action = jnp.concatenate([action_raw[:, :3], sin_cos], axis=-1)
    img_vec = image.reshape(B, -1)
    inp = jnp.concatenate([noise.reshape(B, -1), img_vec, action], axis=-1).astype(jnp.bfloat16)

    w0, b0 = Q["initial"]
    x = jnp.einsum("bc,cohw->bohw", inp.astype(jnp.float32), w0.astype(jnp.float32))
    x = jnp.maximum(x + b0[None, :, None, None], 0.0).astype(jnp.bfloat16)

    def resblock(x, q):
        (w1, b1), (w2, b2) = q
        Bz, C, H, W = x.shape
        extra = jnp.concatenate([img_vec, action], axis=-1).astype(jnp.bfloat16)
        extra_t = jnp.broadcast_to(extra[:, :, None, None], (Bz, extra.shape[1], H, W))
        xin = jnp.concatenate([x, extra_t], axis=1)
        h = jnp.maximum(_ref_conv3x3(xin, w1, b1), 0.0).astype(jnp.bfloat16)
        return (_ref_conv3x3(h, w2, b2) + x.astype(jnp.float32)).astype(jnp.bfloat16)

    def up(x, q):
        w, b = q
        return jnp.maximum(_ref_convT_s2(x, w, b), 0.0).astype(jnp.bfloat16)

    x = resblock(x, Q["res1"]); x = up(x, Q["up1"])
    x = resblock(x, Q["res2"]); x = up(x, Q["up2"])
    x = resblock(x, Q["res3"]); x = up(x, Q["up3"])
    wf, bf = Q["final"]
    return jnp.tanh(_ref_convT_s2(x, wf, bf))


# ----------------------------------- main --------------------------------------

if __name__ == "__main__":
    # Small config consistent with the module (defaults: size_fm=64, size_z=100).
    size_fm, size_z, channel_size, state_features = 8, 16, 3, 11
    B = 2

    key = jax.random.PRNGKey(0)
    k_noise, k_img, k_act, k_par = jax.random.split(key, 4)

    noise = jax.random.normal(k_noise, (B, size_z, 1, 1), jnp.float32)
    image = jax.random.normal(k_img, (B, channel_size, 1, 1), jnp.float32)
    # raw action: 3 translation dims + 4 angle dims -> sin/cos expanded to 11 features
    action = jax.random.normal(k_act, (B, 3 + (state_features - 3) // 2), jnp.float32)

    raw = init_raw_params(k_par, size_fm, size_z, channel_size, state_features)
    params = prepare_params(raw)      # one-time weight prep, hoisted out of the forward

    # Close over params so layer-shape metadata stays static under jit
    # (fixes TracerBoolConversionError from passing ints through the jit pytree).
    fwd = jax.jit(functools.partial(generator_forward, P=params))
    out = jax.block_until_ready(fwd(noise, image, action))
    assert out.shape == (B, channel_size, 64, 64), out.shape
    assert bool(jnp.all(jnp.isfinite(out))), "non-finite output"

    # Numerical check of the conv / conv-transpose lowering against a lax reference that
    # mirrors the bf16-in / f32-accumulate numerics of the Pallas path.
    ref_fn = jax.jit(functools.partial(reference_forward, R=raw))
    ref = jax.block_until_ready(ref_fn(noise, image, action))
    max_err = float(jnp.max(jnp.abs(out - ref.astype(jnp.float32))))
    assert max_err < 3e-2, f"kernel/reference mismatch: max abs err = {max_err}"

    print("KERNEL_OK")
</pallas_src>

<mosaic_0001>
module attributes {stable_mosaic.version = 11 : i64} {
  func.func @_gemm_kernel(%arg0: i32, %arg1: i32, %arg2: memref<16x128xbf16, #tpu.memory_space<vmem>>, %arg3: memref<128x512xbf16, #tpu.memory_space<vmem>>, %arg4: memref<1x512xf32, #tpu.memory_space<vmem>>, %arg5: memref<16x512xbf16, #tpu.memory_space<vmem>>) attributes {dimension_semantics = [#tpu.dimension_semantics<parallel>, #tpu.dimension_semantics<parallel>], iteration_bounds = array<i64: 1, 2>, scalar_prefetch = 0 : i64, scratch_operands = 0 : i64, tpu.core_type = #tpu.core_type<tc>, window_params = [{transform_indices = @transform_0, window_bounds = array<i64: 16, 128>}, {transform_indices = @transform_1, window_bounds = array<i64: 128, 512>}, {transform_indices = @transform_2, window_bounds = array<i64: 1, 512>}, {transform_indices = @transform_3, window_bounds = array<i64: 16, 512>}]} {
    %c0 = arith.constant 0 : index
    %c0_0 = arith.constant 0 : index
    %0 = vector.load %arg2[%c0, %c0_0] : memref<16x128xbf16, #tpu.memory_space<vmem>>, vector<16x128xbf16>
    %c0_1 = arith.constant 0 : index
    %c0_2 = arith.constant 0 : index
    %1 = vector.load %arg3[%c0_1, %c0_2] : memref<128x512xbf16, #tpu.memory_space<vmem>>, vector<128x512xbf16>
    %cst = arith.constant dense<0.000000e+00> : vector<16x512xf32>
    %2 = tpu.matmul %0, %1, %cst {dimension_numbers = #tpu.dot_dimension_numbers<[1], [0], [0], [1], [0, 0, 1, 1], [], []>} : vector<16x128xbf16>, vector<128x512xbf16>, vector<16x512xf32> -> vector<16x512xf32>
    %c0_3 = arith.constant 0 : index
    %c0_4 = arith.constant 0 : index
    %3 = vector.load %arg4[%c0_3, %c0_4] : memref<1x512xf32, #tpu.memory_space<vmem>>, vector<1x512xf32>
    %4 = vector.broadcast %3 : vector<1x512xf32> to vector<16x512xf32>
    %5 = arith.addf %2, %4 : vector<16x512xf32>
    %cst_5 = arith.constant 0.000000e+00 : f32
    %6 = vector.broadcast %cst_5 : f32 to vector<16x512xf32>
    %7 = arith.maximumf %5, %6 : vector<16x512xf32>
    %8 = arith.truncf %7 : vector<16x512xf32> to vector<16x512xbf16>
    %c0_6 = arith.constant 0 : index
    %c0_7 = arith.constant 0 : index
    %9 = vector.load %arg5[%c0_6, %c0_7] : memref<16x512xbf16, #tpu.memory_space<vmem>>, vector<16x512xbf16>
    tpu.vector_store %arg5[%c0_6, %c0_7], %8 {strides = array<i32>} : memref<16x512xbf16, #tpu.memory_space<vmem>>, vector<16x512xbf16>,
    return
  }
  func.func @transform_0(%arg0: i32, %arg1: i32) -> (i32, i32) {
    %c0_i32 = arith.constant 0 : i32
    %c0_i32_0 = arith.constant 0 : i32
    return %arg0, %c0_i32 : i32, i32
  }
  func.func @transform_1(%arg0: i32, %arg1: i32) -> (i32, i32) {
    %c0_i32 = arith.constant 0 : i32
    %c0_i32_0 = arith.constant 0 : i32
    return %c0_i32, %arg1 : i32, i32
  }
  func.func @transform_2(%arg0: i32, %arg1: i32) -> (i32, i32) {
    %c0_i32 = arith.constant 0 : i32
    %c0_i32_0 = arith.constant 0 : i32
    return %c0_i32, %arg1 : i32, i32
  }
  func.func @transform_3(%arg0: i32, %arg1: i32) -> (i32, i32) {
    %c0_i32 = arith.constant 0 : i32
    return %arg0, %arg1 : i32, i32
  }
}

module attributes {stable_mosaic.version = 11 : i64} {
  func.func @_gemm_kernel(%arg0: i32, %arg1: i32, %arg2: memref<32x768xbf16, #tpu.memory_space<vmem>>, %arg3: memref<768x128xbf16, #tpu.memory_space<vmem>>, %arg4: memref<1x128xf32, #tpu.memory_space<vmem>>, %arg5: memref<32x128xbf16, #tpu.memory_space<vmem>>) attributes {dimension_semantics = [#tpu.dimension_semantics<parallel>, #tpu.dimension_semantics<parallel>], iteration_bounds = array<i64: 1, 1>, scalar_prefetch = 0 : i64, scratch_operands = 0 : i64, tpu.core_type = #tpu.core_type<tc>, window_params = [{transform_indices = @transform_0, window_bounds = array<i64: 32, 768>}, {transform_indices = @transform_1, window_bounds = array<i64: 768, 128>}, {transform_indices = @transform_2, window_bounds = array<i64: 1, 128>}, {transform_indices = @transform_3, window_bounds = array<i64: 32, 128>}]} {
    %c0 = arith.constant 0 : index
    %c0_0 = arith.constant 0 : index
    %0 = vector.load %arg2[%c0, %c0_0] : memref<32x768xbf16, #tpu.memory_space<vmem>>, vector<32x768xbf16>
    %c0_1 = arith.constant 0 : index
    %c0_2 = arith.constant 0 : index
    %1 = vector.load %arg3[%c0_1, %c0_2] : memref<768x128xbf16, #tpu.memory_space<vmem>>, vector<768x128xbf16>
    %cst = arith.constant dense<0.000000e+00> : vector<32x128xf32>
    %2 = tpu.matmul %0, %1, %cst {dimension_numbers = #tpu.dot_dimension_numbers<[1], [0], [0], [1], [0, 0, 1, 1], [], []>} : vector<32x768xbf16>, vector<768x128xbf16>, vector<32x128xf32> -> vector<32x128xf32>
    %c0_3 = arith.constant 0 : index
    %c0_4 = arith.constant 0 : index
    %3 = vector.load %arg4[%c0_3, %c0_4] : memref<1x128xf32, #tpu.memory_space<vmem>>, vector<1x128xf32>
    %4 = vector.broadcast %3 : vector<1x128xf32> to vector<32x128xf32>
    %5 = arith.addf %2, %4 : vector<32x128xf32>
    %cst_5 = arith.constant 0.000000e+00 : f32
    %6 = vector.broadcast %cst_5 : f32 to vector<32x128xf32>
    %7 = arith.maximumf %5, %6 : vector<32x128xf32>
    %8 = arith.truncf %7 : vector<32x128xf32> to vector<32x128xbf16>
    %c0_6 = arith.constant 0 : index
    %c0_7 = arith.constant 0 : index
    %9 = vector.load %arg5[%c0_6, %c0_7] : memref<32x128xbf16, #tpu.memory_space<vmem>>, vector<32x128xbf16>
    tpu.vector_store %arg5[%c0_6, %c0_7], %8 {strides = array<i32>} : memref<32x128xbf16, #tpu.memory_space<vmem>>, vector<32x128xbf16>,
    return
  }
  func.func @transform_0(%arg0: i32, %arg1: i32) -> (i32, i32) {
    %c0_i32 = arith.constant 0 : i32
    %c0_i32_0 = arith.constant 0 : i32
    return %arg0, %c0_i32 : i32, i32
  }
  func.func @transform_1(%arg0: i32, %arg1: i32) -> (i32, i32) {
    %c0_i32 = arith.constant 0 : i32
    %c0_i32_0 = arith.constant 0 : i32
    return %c0_i32, %arg1 : i32, i32
  }
  func.func @transform_2(%arg0: i32, %arg1: i32) -> (i32, i32) {
    %c0_i32 = arith.constant 0 : i32
    %c0_i32_0 = arith.constant 0 : i32
    return %c0_i32, %arg1 : i32, i32
  }
  func.func @transform_3(%arg0: i32, %arg1: i32) -> (i32, i32) {
    %c0_i32 = arith.constant 0 : i32
    return %arg0, %arg1 : i32, i32
  }
}

module attributes {stable_mosaic.version = 11 : i64} {
  func.func @_gemm_res_kernel(%arg0: i32, %arg1: i32, %arg2: memref<32x640xbf16, #tpu.memory_space<vmem>>, %arg3: memref<640x128xbf16, #tpu.memory_space<vmem>>, %arg4: memref<1x128xf32, #tpu.memory_space<vmem>>, %arg5: memref<32x128xbf16, #tpu.memory_space<vmem>>, %arg6: memref<32x128xbf16, #tpu.memory_space<vmem>>) attributes {dimension_semantics = [#tpu.dimension_semantics<parallel>, #tpu.dimension_semantics<parallel>], iteration_bounds = array<i64: 1, 1>, scalar_prefetch = 0 : i64, scratch_operands = 0 : i64, tpu.core_type = #tpu.core_type<tc>, window_params = [{transform_indices = @transform_0, window_bounds = array<i64: 32, 640>}, {transform_indices = @transform_1, window_bounds = array<i64: 640, 128>}, {transform_indices = @transform_2, window_bounds = array<i64: 1, 128>}, {transform_indices = @transform_3, window_bounds = array<i64: 32, 128>}, {transform_indices = @transform_4, window_bounds = array<i64: 32, 128>}]} {
    %c0 = arith.constant 0 : index
    %c0_0 = arith.constant 0 : index
    %0 = vector.load %arg2[%c0, %c0_0] : memref<32x640xbf16, #tpu.memory_space<vmem>>, vector<32x640xbf16>
    %c0_1 = arith.constant 0 : index
    %c0_2 = arith.constant 0 : index
    %1 = vector.load %arg3[%c0_1, %c0_2] : memref<640x128xbf16, #tpu.memory_space<vmem>>, vector<640x128xbf16>
    %cst = arith.constant dense<0.000000e+00> : vector<32x128xf32>
    %2 = tpu.matmul %0, %1, %cst {dimension_numbers = #tpu.dot_dimension_numbers<[1], [0], [0], [1], [0, 0, 1, 1], [], []>} : vector<32x640xbf16>, vector<640x128xbf16>, vector<32x128xf32> -> vector<32x128xf32>
    %c0_3 = arith.constant 0 : index
    %c0_4 = arith.constant 0 : index
    %3 = vector.load %arg4[%c0_3, %c0_4] : memref<1x128xf32, #tpu.memory_space<vmem>>, vector<1x128xf32>
    %4 = vector.broadcast %3 : vector<1x128xf32> to vector<32x128xf32>
    %5 = arith.addf %2, %4 : vector<32x128xf32>
    %c0_5 = arith.constant 0 : index
    %c0_6 = arith.constant 0 : index
    %6 = vector.load %arg5[%c0_5, %c0_6] : memref<32x128xbf16, #tpu.memory_space<vmem>>, vector<32x128xbf16>
    %7 = arith.extf %6 : vector<32x128xbf16> to vector<32x128xf32>
    %8 = arith.addf %5, %7 : vector<32x128xf32>
    %9 = arith.truncf %8 : vector<32x128xf32> to vector<32x128xbf16>
    %c0_7 = arith.constant 0 : index
    %c0_8 = arith.constant 0 : index
    %10 = vector.load %arg6[%c0_7, %c0_8] : memref<32x128xbf16, #tpu.memory_space<vmem>>, vector<32x128xbf16>
    tpu.vector_store %arg6[%c0_7, %c0_8], %9 {strides = array<i32>} : memref<32x128xbf16, #tpu.memory_space<vmem>>, vector<32x128xbf16>,
    return
  }
  func.func @transform_0(%arg0: i32, %arg1: i32) -> (i32, i32) {
    %c0_i32 = arith.constant 0 : i32
    %c0_i32_0 = arith.constant 0 : i32
    return %arg0, %c0_i32 : i32, i32
  }
  func.func @transform_1(%arg0: i32, %arg1: i32) -> (i32, i32) {
    %c0_i32 = arith.constant 0 : i32
    %c0_i32_0 = arith.constant 0 : i32
    return %c0_i32, %arg1 : i32, i32
  }
  func.func @transform_2(%arg0: i32, %arg1: i32) -> (i32, i32) {
    %c0_i32 = arith.constant 0 : i32
    %c0_i32_0 = arith.constant 0 : i32
    return %c0_i32, %arg1 : i32, i32
  }
  func.func @transform_3(%arg0: i32, %arg1: i32) -> (i32, i32) {
    %c0_i32 = arith.constant 0 : i32
    return %arg0, %arg1 : i32, i32
  }
  func.func @transform_4(%arg0: i32, %arg1: i32) -> (i32, i32) {
    %c0_i32 = arith.constant 0 : i32
    return %arg0, %arg1 : i32, i32
  }
}

module attributes {stable_mosaic.version = 11 : i64} {
  func.func @_gemm_kernel(%arg0: i32, %arg1: i32, %arg2: memref<32x640xbf16, #tpu.memory_space<vmem>>, %arg3: memref<640x128xbf16, #tpu.memory_space<vmem>>, %arg4: memref<1x128xf32, #tpu.memory_space<vmem>>, %arg5: memref<32x128xbf16, #tpu.memory_space<vmem>>) attributes {dimension_semantics = [#tpu.dimension_semantics<parallel>, #tpu.dimension_semantics<parallel>], iteration_bounds = array<i64: 1, 1>, scalar_prefetch = 0 : i64, scratch_operands = 0 : i64, tpu.core_type = #tpu.core_type<tc>, window_params = [{transform_indices = @transform_0, window_bounds = array<i64: 32, 640>}, {transform_indices = @transform_1, window_bounds = array<i64: 640, 128>}, {transform_indices = @transform_2, window_bounds = array<i64: 1, 128>}, {transform_indices = @transform_3, window_bounds = array<i64: 32, 128>}]} {
    %c0 = arith.constant 0 : index
    %c0_0 = arith.constant 0 : index
    %0 = vector.load %arg2[%c0, %c0_0] : memref<32x640xbf16, #tpu.memory_space<vmem>>, vector<32x640xbf16>
    %c0_1 = arith.constant 0 : index
    %c0_2 = arith.constant 0 : index
    %1 = vector.load %arg3[%c0_1, %c0_2] : memref<640x128xbf16, #tpu.memory_space<vmem>>, vector<640x128xbf16>
    %cst = arith.constant dense<0.000000e+00> : vector<32x128xf32>
    %2 = tpu.matmul %0, %1, %cst {dimension_numbers = #tpu.dot_dimension_numbers<[1], [0], [0], [1], [0, 0, 1, 1], [], []>} : vector<32x640xbf16>, vector<640x128xbf16>, vector<32x128xf32> -> vector<32x128xf32>
    %c0_3 = arith.constant 0 : index
    %c0_4 = arith.constant 0 : index
    %3 = vector.load %arg4[%c0_3, %c0_4] : memref<1x128xf32, #tpu.memory_space<vmem>>, vector<1x128xf32>
    %4 = vector.broadcast %3 : vector<1x128xf32> to vector<32x128xf32>
    %5 = arith.addf %2, %4 : vector<32x128xf32>
    %cst_5 = arith.constant 0.000000e+00 : f32
    %6 = vector.broadcast %cst_5 : f32 to vector<32x128xf32>
    %7 = arith.maximumf %5, %6 : vector<32x128xf32>
    %8 = arith.truncf %7 : vector<32x128xf32> to vector<32x128xbf16>
    %c0_6 = arith.constant 0 : index
    %c0_7 = arith.constant 0 : index
    %9 = vector.load %arg5[%c0_6, %c0_7] : memref<32x128xbf16, #tpu.memory_space<vmem>>, vector<32x128xbf16>
    tpu.vector_store %arg5[%c0_6, %c0_7], %8 {strides = array<i32>} : memref<32x128xbf16, #tpu.memory_space<vmem>>, vector<32x128xbf16>,
    return
  }
  func.func @transform_0(%arg0: i32, %arg1: i32) -> (i32, i32) {
    %c0_i32 = arith.constant 0 : i32
    %c0_i32_0 = arith.constant 0 : i32
    return %arg0, %c0_i32 : i32, i32
  }
  func.func @transform_1(%arg0: i32, %arg1: i32) -> (i32, i32) {
    %c0_i32 = arith.constant 0 : i32
    %c0_i32_0 = arith.constant 0 : i32
    return %c0_i32, %arg1 : i32, i32
  }
  func.func @transform_2(%arg0: i32, %arg1: i32) -> (i32, i32) {
    %c0_i32 = arith.constant 0 : i32
    %c0_i32_0 = arith.constant 0 : i32
    return %c0_i32, %arg1 : i32, i32
  }
  func.func @transform_3(%arg0: i32, %arg1: i32) -> (i32, i32) {
    %c0_i32 = arith.constant 0 : i32
    return %arg0, %arg1 : i32, i32
  }
}

module attributes {stable_mosaic.version = 11 : i64} {
  func.func @_gemm_kernel(%arg0: i32, %arg1: i32, %arg2: memref<128x512xbf16, #tpu.memory_space<vmem>>, %arg3: memref<512x128xbf16, #tpu.memory_space<vmem>>, %arg4: memref<1x128xf32, #tpu.memory_space<vmem>>, %arg5: memref<128x128xbf16, #tpu.memory_space<vmem>>) attributes {dimension_semantics = [#tpu.dimension_semantics<parallel>, #tpu.dimension_semantics<parallel>], iteration_bounds = array<i64: 1, 1>, scalar_prefetch = 0 : i64, scratch_operands = 0 : i64, tpu.core_type = #tpu.core_type<tc>, window_params = [{transform_indices = @transform_0, window_bounds = array<i64: 128, 512>}, {transform_indices = @transform_1, window_bounds = array<i64: 512, 128>}, {transform_indices = @transform_2, window_bounds = array<i64: 1, 128>}, {transform_indices = @transform_3, window_bounds = array<i64: 128, 128>}]} {
    %c0 = arith.constant 0 : index
    %c0_0 = arith.constant 0 : index
    %0 = vector.load %arg2[%c0, %c0_0] : memref<128x512xbf16, #tpu.memory_space<vmem>>, vector<128x512xbf16>
    %c0_1 = arith.constant 0 : index
    %c0_2 = arith.constant 0 : index
    %1 = vector.load %arg3[%c0_1, %c0_2] : memref<512x128xbf16, #tpu.memory_space<vmem>>, vector<512x128xbf16>
    %cst = arith.constant dense<0.000000e+00> : vector<128x128xf32>
    %2 = tpu.matmul %0, %1, %cst {dimension_numbers = #tpu.dot_dimension_numbers<[1], [0], [0], [1], [0, 0, 1, 1], [], []>} : vector<128x512xbf16>, vector<512x128xbf16>, vector<128x128xf32> -> vector<128x128xf32>
    %c0_3 = arith.constant 0 : index
    %c0_4 = arith.constant 0 : index
    %3 = vector.load %arg4[%c0_3, %c0_4] : memref<1x128xf32, #tpu.memory_space<vmem>>, vector<1x128xf32>
    %4 = vector.broadcast %3 : vector<1x128xf32> to vector<128x128xf32>
    %5 = arith.addf %2, %4 : vector<128x128xf32>
    %cst_5 = arith.constant 0.000000e+00 : f32
    %6 = vector.broadcast %cst_5 : f32 to vector<128x128xf32>
    %7 = arith.maximumf %5, %6 : vector<128x128xf32>
    %8 = arith.truncf %7 : vector<128x128xf32> to vector<128x128xbf16>
    %c0_6 = arith.constant 0 : index
    %c0_7 = arith.constant 0 : index
    %9 = vector.load %arg5[%c0_6, %c0_7] : memref<128x128xbf16, #tpu.memory_space<vmem>>, vector<128x128xbf16>
    tpu.vector_store %arg5[%c0_6, %c0_7], %8 {strides = array<i32>} : memref<128x128xbf16, #tpu.memory_space<vmem>>, vector<128x128xbf16>,
    return
  }
  func.func @transform_0(%arg0: i32, %arg1: i32) -> (i32, i32) {
    %c0_i32 = arith.constant 0 : i32
    %c0_i32_0 = arith.constant 0 : i32
    return %arg0, %c0_i32 : i32, i32
  }
  func.func @transform_1(%arg0: i32, %arg1: i32) -> (i32, i32) {
    %c0_i32 = arith.constant 0 : i32
    %c0_i32_0 = arith.constant 0 : i32
    return %c0_i32, %arg1 : i32, i32
  }
  func.func @transform_2(%arg0: i32, %arg1: i32) -> (i32, i32) {
    %c0_i32 = arith.constant 0 : i32
    %c0_i32_0 = arith.constant 0 : i32
    return %c0_i32, %arg1 : i32, i32
  }
  func.func @transform_3(%arg0: i32, %arg1: i32) -> (i32, i32) {
    %c0_i32 = arith.constant 0 : i32
    return %arg0, %arg1 : i32, i32
  }
}

module attributes {stable_mosaic.version = 11 : i64} {
  func.func @_gemm_res_kernel(%arg0: i32, %arg1: i32, %arg2: memref<128x384xbf16, #tpu.memory_space<vmem>>, %arg3: memref<384x128xbf16, #tpu.memory_space<vmem>>, %arg4: memref<1x128xf32, #tpu.memory_space<vmem>>, %arg5: memref<128x128xbf16, #tpu.memory_space<vmem>>, %arg6: memref<128x128xbf16, #tpu.memory_space<vmem>>) attributes {dimension_semantics = [#tpu.dimension_semantics<parallel>, #tpu.dimension_semantics<parallel>], iteration_bounds = array<i64: 1, 1>, scalar_prefetch = 0 : i64, scratch_operands = 0 : i64, tpu.core_type = #tpu.core_type<tc>, window_params = [{transform_indices = @transform_0, window_bounds = array<i64: 128, 384>}, {transform_indices = @transform_1, window_bounds = array<i64: 384, 128>}, {transform_indices = @transform_2, window_bounds = array<i64: 1, 128>}, {transform_indices = @transform_3, window_bounds = array<i64: 128, 128>}, {transform_indices = @transform_4, window_bounds = array<i64: 128, 128>}]} {
    %c0 = arith.constant 0 : index
    %c0_0 = arith.constant 0 : index
    %0 = vector.load %arg2[%c0, %c0_0] : memref<128x384xbf16, #tpu.memory_space<vmem>>, vector<128x384xbf16>
    %c0_1 = arith.constant 0 : index
    %c0_2 = arith.constant 0 : index
    %1 = vector.load %arg3[%c0_1, %c0_2] : memref<384x128xbf16, #tpu.memory_space<vmem>>, vector<384x128xbf16>
    %cst = arith.constant dense<0.000000e+00> : vector<128x128xf32>
    %2 = tpu.matmul %0, %1, %cst {dimension_numbers = #tpu.dot_dimension_numbers<[1], [0], [0], [1], [0, 0, 1, 1], [], []>} : vector<128x384xbf16>, vector<384x128xbf16>, vector<128x128xf32> -> vector<128x128xf32>
    %c0_3 = arith.constant 0 : index
    %c0_4 = arith.constant 0 : index
    %3 = vector.load %arg4[%c0_3, %c0_4] : memref<1x128xf32, #tpu.memory_space<vmem>>, vector<1x128xf32>
    %4 = vector.broadcast %3 : vector<1x128xf32> to vector<128x128xf32>
    %5 = arith.addf %2, %4 : vector<128x128xf32>
    %c0_5 = arith.constant 0 : index
    %c0_6 = arith.constant 0 : index
    %6 = vector.load %arg5[%c0_5, %c0_6] : memref<128x128xbf16, #tpu.memory_space<vmem>>, vector<128x128xbf16>
    %7 = arith.extf %6 : vector<128x128xbf16> to vector<128x128xf32>
    %8 = arith.addf %5, %7 : vector<128x128xf32>
    %9 = arith.truncf %8 : vector<128x128xf32> to vector<128x128xbf16>
    %c0_7 = arith.constant 0 : index
    %c0_8 = arith.constant 0 : index
    %10 = vector.load %arg6[%c0_7, %c0_8] : memref<128x128xbf16, #tpu.memory_space<vmem>>, vector<128x128xbf16>
    tpu.vector_store %arg6[%c0_7, %c0_8], %9 {strides = array<i32>} : memref<128x128xbf16, #tpu.memory_space<vmem>>, vector<128x128xbf16>,
    return
  }
  func.func @transform_0(%arg0: i32, %arg1: i32) -> (i32, i32) {
    %c0_i32 = arith.constant 0 : i32
    %c0_i32_0 = arith.constant 0 : i32
    return %arg0, %c0_i32 : i32, i32
  }
  func.func @transform_1(%arg0: i32, %arg1: i32) -> (i32, i32) {
    %c0_i32 = arith.constant 0 : i32
    %c0_i32_0 = arith.constant 0 : i32
    return %c0_i32, %arg1 : i32, i32
  }
  func.func @transform_2(%arg0: i32, %arg1: i32) -> (i32, i32) {
    %c0_i32 = arith.constant 0 : i32
    %c0_i32_0 = arith.constant 0 : i32
    return %c0_i32, %arg1 : i32, i32
  }
  func.func @transform_3(%arg0: i32, %arg1: i32) -> (i32, i32) {
    %c0_i32 = arith.constant 0 : i32
    return %arg0, %arg1 : i32, i32
  }
  func.func @transform_4(%arg0: i32, %arg1: i32) -> (i32, i32) {
    %c0_i32 = arith.constant 0 : i32
    return %arg0, %arg1 : i32, i32
  }
}

module attributes {stable_mosaic.version = 11 : i64} {
  func.func @_gemm_kernel(%arg0: i32, %arg1: i32, %arg2: memref<128x384xbf16, #tpu.memory_space<vmem>>, %arg3: memref<384x128xbf16, #tpu.memory_space<vmem>>, %arg4: memref<1x128xf32, #tpu.memory_space<vmem>>, %arg5: memref<128x128xbf16, #tpu.memory_space<vmem>>) attributes {dimension_semantics = [#tpu.dimension_semantics<parallel>, #tpu.dimension_semantics<parallel>], iteration_bounds = array<i64: 1, 1>, scalar_prefetch = 0 : i64, scratch_operands = 0 : i64, tpu.core_type = #tpu.core_type<tc>, window_params = [{transform_indices = @transform_0, window_bounds = array<i64: 128, 384>}, {transform_indices = @transform_1, window_bounds = array<i64: 384, 128>}, {transform_indices = @transform_2, window_bounds = array<i64: 1, 128>}, {transform_indices = @transform_3, window_bounds = array<i64: 128, 128>}]} {
    %c0 = arith.constant 0 : index
    %c0_0 = arith.constant 0 : index
    %0 = vector.load %arg2[%c0, %c0_0] : memref<128x384xbf16, #tpu.memory_space<vmem>>, vector<128x384xbf16>
    %c0_1 = arith.constant 0 : index
    %c0_2 = arith.constant 0 : index
    %1 = vector.load %arg3[%c0_1, %c0_2] : memref<384x128xbf16, #tpu.memory_space<vmem>>, vector<384x128xbf16>
    %cst = arith.constant dense<0.000000e+00> : vector<128x128xf32>
    %2 = tpu.matmul %0, %1, %cst {dimension_numbers = #tpu.dot_dimension_numbers<[1], [0], [0], [1], [0, 0, 1, 1], [], []>} : vector<128x384xbf16>, vector<384x128xbf16>, vector<128x128xf32> -> vector<128x128xf32>
    %c0_3 = arith.constant 0 : index
    %c0_4 = arith.constant 0 : index
    %3 = vector.load %arg4[%c0_3, %c0_4] : memref<1x128xf32, #tpu.memory_space<vmem>>, vector<1x128xf32>
    %4 = vector.broadcast %3 : vector<1x128xf32> to vector<128x128xf32>
    %5 = arith.addf %2, %4 : vector<128x128xf32>
    %cst_5 = arith.constant 0.000000e+00 : f32
    %6 = vector.broadcast %cst_5 : f32 to vector<128x128xf32>
    %7 = arith.maximumf %5, %6 : vector<128x128xf32>
    %8 = arith.truncf %7 : vector<128x128xf32> to vector<128x128xbf16>
    %c0_6 = arith.constant 0 : index
    %c0_7 = arith.constant 0 : index
    %9 = vector.load %arg5[%c0_6, %c0_7] : memref<128x128xbf16, #tpu.memory_space<vmem>>, vector<128x128xbf16>
    tpu.vector_store %arg5[%c0_6, %c0_7], %8 {strides = array<i32>} : memref<128x128xbf16, #tpu.memory_space<vmem>>, vector<128x128xbf16>,
    return
  }
  func.func @transform_0(%arg0: i32, %arg1: i32) -> (i32, i32) {
    %c0_i32 = arith.constant 0 : i32
    %c0_i32_0 = arith.constant 0 : i32
    return %arg0, %c0_i32 : i32, i32
  }
  func.func @transform_1(%arg0: i32, %arg1: i32) -> (i32, i32) {
    %c0_i32 = arith.constant 0 : i32
    %c0_i32_0 = arith.constant 0 : i32
    return %c0_i32, %arg1 : i32, i32
  }
  func.func @transform_2(%arg0: i32, %arg1: i32) -> (i32, i32) {
    %c0_i32 = arith.constant 0 : i32
    %c0_i32_0 = arith.constant 0 : i32
    return %c0_i32, %arg1 : i32, i32
  }
  func.func @transform_3(%arg0: i32, %arg1: i32) -> (i32, i32) {
    %c0_i32 = arith.constant 0 : i32
    return %arg0, %arg1 : i32, i32
  }
}

module attributes {stable_mosaic.version = 11 : i64} {
  func.func @_gemm_kernel(%arg0: i32, %arg1: i32, %arg2: memref<512x384xbf16, #tpu.memory_space<vmem>>, %arg3: memref<384x128xbf16, #tpu.memory_space<vmem>>, %arg4: memref<1x128xf32, #tpu.memory_space<vmem>>, %arg5: memref<512x128xbf16, #tpu.memory_space<vmem>>) attributes {dimension_semantics = [#tpu.dimension_semantics<parallel>, #tpu.dimension_semantics<parallel>], iteration_bounds = array<i64: 1, 1>, scalar_prefetch = 0 : i64, scratch_operands = 0 : i64, tpu.core_type = #tpu.core_type<tc>, window_params = [{transform_indices = @transform_0, window_bounds = array<i64: 512, 384>}, {transform_indices = @transform_1, window_bounds = array<i64: 384, 128>}, {transform_indices = @transform_2, window_bounds = array<i64: 1, 128>}, {transform_indices = @transform_3, window_bounds = array<i64: 512, 128>}]} {
    %c0 = arith.constant 0 : index
    %c0_0 = arith.constant 0 : index
    %0 = vector.load %arg2[%c0, %c0_0] : memref<512x384xbf16, #tpu.memory_space<vmem>>, vector<512x384xbf16>
    %c0_1 = arith.constant 0 : index
    %c0_2 = arith.constant 0 : index
    %1 = vector.load %arg3[%c0_1, %c0_2] : memref<384x128xbf16, #tpu.memory_space<vmem>>, vector<384x128xbf16>
    %cst = arith.constant dense<0.000000e+00> : vector<512x128xf32>
    %2 = tpu.matmul %0, %1, %cst {dimension_numbers = #tpu.dot_dimension_numbers<[1], [0], [0], [1], [0, 0, 1, 1], [], []>} : vector<512x384xbf16>, vector<384x128xbf16>, vector<512x128xf32> -> vector<512x128xf32>
    %c0_3 = arith.constant 0 : index
    %c0_4 = arith.constant 0 : index
    %3 = vector.load %arg4[%c0_3, %c0_4] : memref<1x128xf32, #tpu.memory_space<vmem>>, vector<1x128xf32>
    %4 = vector.broadcast %3 : vector<1x128xf32> to vector<512x128xf32>
    %5 = arith.addf %2, %4 : vector<512x128xf32>
    %cst_5 = arith.constant 0.000000e+00 : f32
    %6 = vector.broadcast %cst_5 : f32 to vector<512x128xf32>
    %7 = arith.maximumf %5, %6 : vector<512x128xf32>
    %8 = arith.truncf %7 : vector<512x128xf32> to vector<512x128xbf16>
    %c0_6 = arith.constant 0 : index
    %c0_7 = arith.constant 0 : index
    %9 = vector.load %arg5[%c0_6, %c0_7] : memref<512x128xbf16, #tpu.memory_space<vmem>>, vector<512x128xbf16>
    tpu.vector_store %arg5[%c0_6, %c0_7], %8 {strides = array<i32>} : memref<512x128xbf16, #tpu.memory_space<vmem>>, vector<512x128xbf16>,
    return
  }
  func.func @transform_0(%arg0: i32, %arg1: i32) -> (i32, i32) {
    %c0_i32 = arith.constant 0 : i32
    %c0_i32_0 = arith.constant 0 : i32
    return %arg0, %c0_i32 : i32, i32
  }
  func.func @transform_1(%arg0: i32, %arg1: i32) -> (i32, i32) {
    %c0_i32 = arith.constant 0 : i32
    %c0_i32_0 = arith.constant 0 : i32
    return %c0_i32, %arg1 : i32, i32
  }
  func.func @transform_2(%arg0: i32, %arg1: i32) -> (i32, i32) {
    %c0_i32 = arith.constant 0 : i32
    %c0_i32_0 = arith.constant 0 : i32
    return %c0_i32, %arg1 : i32, i32
  }
  func.func @transform_3(%arg0: i32, %arg1: i32) -> (i32, i32) {
    %c0_i32 = arith.constant 0 : i32
    return %arg0, %arg1 : i32, i32
  }
}

module attributes {stable_mosaic.version = 11 : i64} {
  func.func @_gemm_res_kernel(%arg0: i32, %arg1: i32, %arg2: memref<512x256xbf16, #tpu.memory_space<vmem>>, %arg3: memref<256x128xbf16, #tpu.memory_space<vmem>>, %arg4: memref<1x128xf32, #tpu.memory_space<vmem>>, %arg5: memref<512x128xbf16, #tpu.memory_space<vmem>>, %arg6: memref<512x128xbf16, #tpu.memory_space<vmem>>) attributes {dimension_semantics = [#tpu.dimension_semantics<parallel>, #tpu.dimension_semantics<parallel>], iteration_bounds = array<i64: 1, 1>, scalar_prefetch = 0 : i64, scratch_operands = 0 : i64, tpu.core_type = #tpu.core_type<tc>, window_params = [{transform_indices = @transform_0, window_bounds = array<i64: 512, 256>}, {transform_indices = @transform_1, window_bounds = array<i64: 256, 128>}, {transform_indices = @transform_2, window_bounds = array<i64: 1, 128>}, {transform_indices = @transform_3, window_bounds = array<i64: 512, 128>}, {transform_indices = @transform_4, window_bounds = array<i64: 512, 128>}]} {
    %c0 = arith.constant 0 : index
    %c0_0 = arith.constant 0 : index
    %0 = vector.load %arg2[%c0, %c0_0] : memref<512x256xbf16, #tpu.memory_space<vmem>>, vector<512x256xbf16>
    %c0_1 = arith.constant 0 : index
    %c0_2 = arith.constant 0 : index
    %1 = vector.load %arg3[%c0_1, %c0_2] : memref<256x128xbf16, #tpu.memory_space<vmem>>, vector<256x128xbf16>
    %cst = arith.constant dense<0.000000e+00> : vector<512x128xf32>
    %2 = tpu.matmul %0, %1, %cst {dimension_numbers = #tpu.dot_dimension_numbers<[1], [0], [0], [1], [0, 0, 1, 1], [], []>} : vector<512x256xbf16>, vector<256x128xbf16>, vector<512x128xf32> -> vector<512x128xf32>
    %c0_3 = arith.constant 0 : index
    %c0_4 = arith.constant 0 : index
    %3 = vector.load %arg4[%c0_3, %c0_4] : memref<1x128xf32, #tpu.memory_space<vmem>>, vector<1x128xf32>
    %4 = vector.broadcast %3 : vector<1x128xf32> to vector<512x128xf32>
    %5 = arith.addf %2, %4 : vector<512x128xf32>
    %c0_5 = arith.constant 0 : index
    %c0_6 = arith.constant 0 : index
    %6 = vector.load %arg5[%c0_5, %c0_6] : memref<512x128xbf16, #tpu.memory_space<vmem>>, vector<512x128xbf16>
    %7 = arith.extf %6 : vector<512x128xbf16> to vector<512x128xf32>
    %8 = arith.addf %5, %7 : vector<512x128xf32>
    %9 = arith.truncf %8 : vector<512x128xf32> to vector<512x128xbf16>
    %c0_7 = arith.constant 0 : index
    %c0_8 = arith.constant 0 : index
    %10 = vector.load %arg6[%c0_7, %c0_8] : memref<512x128xbf16, #tpu.memory_space<vmem>>, vector<512x128xbf16>
    tpu.vector_store %arg6[%c0_7, %c0_8], %9 {strides = array<i32>} : memref<512x128xbf16, #tpu.memory_space<vmem>>, vector<512x128xbf16>,
    return
  }
  func.func @transform_0(%arg0: i32, %arg1: i32) -> (i32, i32) {
    %c0_i32 = arith.constant 0 : i32
    %c0_i32_0 = arith.constant 0 : i32
    return %arg0, %c0_i32 : i32, i32
  }
  func.func @transform_1(%arg0: i32, %arg1: i32) -> (i32, i32) {
    %c0_i32 = arith.constant 0 : i32
    %c0_i32_0 = arith.constant 0 : i32
    return %c0_i32, %arg1 : i32, i32
  }
  func.func @transform_2(%arg0: i32, %arg1: i32) -> (i32, i32) {
    %c0_i32 = arith.constant 0 : i32
    %c0_i32_0 = arith.constant 0 : i32
    return %c0_i32, %arg1 : i32, i32
  }
  func.func @transform_3(%arg0: i32, %arg1: i32) -> (i32, i32) {
    %c0_i32 = arith.constant 0 : i32
    return %arg0, %arg1 : i32, i32
  }
  func.func @transform_4(%arg0: i32, %arg1: i32) -> (i32, i32) {
    %c0_i32 = arith.constant 0 : i32
    return %arg0, %arg1 : i32, i32
  }
}

module attributes {stable_mosaic.version = 11 : i64} {
  func.func @_gemm_kernel(%arg0: i32, %arg1: i32, %arg2: memref<512x256xbf16, #tpu.memory_space<vmem>>, %arg3: memref<256x128xbf16, #tpu.memory_space<vmem>>, %arg4: memref<1x128xf32, #tpu.memory_space<vmem>>, %arg5: memref<512x128xbf16, #tpu.memory_space<vmem>>) attributes {dimension_semantics = [#tpu.dimension_semantics<parallel>, #tpu.dimension_semantics<parallel>], iteration_bounds = array<i64: 1, 1>, scalar_prefetch = 0 : i64, scratch_operands = 0 : i64, tpu.core_type = #tpu.core_type<tc>, window_params = [{transform_indices = @transform_0, window_bounds = array<i64: 512, 256>}, {transform_indices = @transform_1, window_bounds = array<i64: 256, 128>}, {transform_indices = @transform_2, window_bounds = array<i64: 1, 128>}, {transform_indices = @transform_3, window_bounds = array<i64: 512, 128>}]} {
    %c0 = arith.constant 0 : index
    %c0_0 = arith.constant 0 : index
    %0 = vector.load %arg2[%c0, %c0_0] : memref<512x256xbf16, #tpu.memory_space<vmem>>, vector<512x256xbf16>
    %c0_1 = arith.constant 0 : index
    %c0_2 = arith.constant 0 : index
    %1 = vector.load %arg3[%c0_1, %c0_2] : memref<256x128xbf16, #tpu.memory_space<vmem>>, vector<256x128xbf16>
    %cst = arith.constant dense<0.000000e+00> : vector<512x128xf32>
    %2 = tpu.matmul %0, %1, %cst {dimension_numbers = #tpu.dot_dimension_numbers<[1], [0], [0], [1], [0, 0, 1, 1], [], []>} : vector<512x256xbf16>, vector<256x128xbf16>, vector<512x128xf32> -> vector<512x128xf32>
    %c0_3 = arith.constant 0 : index
    %c0_4 = arith.constant 0 : index
    %3 = vector.load %arg4[%c0_3, %c0_4] : memref<1x128xf32, #tpu.memory_space<vmem>>, vector<1x128xf32>
    %4 = vector.broadcast %3 : vector<1x128xf32> to vector<512x128xf32>
    %5 = arith.addf %2, %4 : vector<512x128xf32>
    %cst_5 = arith.constant 0.000000e+00 : f32
    %6 = vector.broadcast %cst_5 : f32 to vector<512x128xf32>
    %7 = arith.maximumf %5, %6 : vector<512x128xf32>
    %8 = arith.truncf %7 : vector<512x128xf32> to vector<512x128xbf16>
    %c0_6 = arith.constant 0 : index
    %c0_7 = arith.constant 0 : index
    %9 = vector.load %arg5[%c0_6, %c0_7] : memref<512x128xbf16, #tpu.memory_space<vmem>>, vector<512x128xbf16>
    tpu.vector_store %arg5[%c0_6, %c0_7], %8 {strides = array<i32>} : memref<512x128xbf16, #tpu.memory_space<vmem>>, vector<512x128xbf16>,
    return
  }
  func.func @transform_0(%arg0: i32, %arg1: i32) -> (i32, i32) {
    %c0_i32 = arith.constant 0 : i32
    %c0_i32_0 = arith.constant 0 : i32
    return %arg0, %c0_i32 : i32, i32
  }
  func.func @transform_1(%arg0: i32, %arg1: i32) -> (i32, i32) {
    %c0_i32 = arith.constant 0 : i32
    %c0_i32_0 = arith.constant 0 : i32
    return %c0_i32, %arg1 : i32, i32
  }
  func.func @transform_2(%arg0: i32, %arg1: i32) -> (i32, i32) {
    %c0_i32 = arith.constant 0 : i32
    %c0_i32_0 = arith.constant 0 : i32
    return %c0_i32, %arg1 : i32, i32
  }
  func.func @transform_3(%arg0: i32, %arg1: i32) -> (i32, i32) {
    %c0_i32 = arith.constant 0 : i32
    return %arg0, %arg1 : i32, i32
  }
}

module attributes {stable_mosaic.version = 11 : i64} {
  func.func @_gemm_kernel(%arg0: i32, %arg1: i32, %arg2: memref<512x128xbf16, #tpu.memory_space<vmem>>, %arg3: memref<128x128xbf16, #tpu.memory_space<vmem>>, %arg4: memref<1x128xf32, #tpu.memory_space<vmem>>, %arg5: memref<512x128xf32, #tpu.memory_space<vmem>>) attributes {dimension_semantics = [#tpu.dimension_semantics<parallel>, #tpu.dimension_semantics<parallel>], iteration_bounds = array<i64: 4, 1>, scalar_prefetch = 0 : i64, scratch_operands = 0 : i64, tpu.core_type = #tpu.core_type<tc>, window_params = [{transform_indices = @transform_0, window_bounds = array<i64: 512, 128>}, {transform_indices = @transform_1, window_bounds = array<i64: 128, 128>}, {transform_indices = @transform_2, window_bounds = array<i64: 1, 128>}, {transform_indices = @transform_3, window_bounds = array<i64: 512, 128>}]} {
    %c0 = arith.constant 0 : index
    %c0_0 = arith.constant 0 : index
    %0 = vector.load %arg2[%c0, %c0_0] : memref<512x128xbf16, #tpu.memory_space<vmem>>, vector<512x128xbf16>
    %c0_1 = arith.constant 0 : index
    %c0_2 = arith.constant 0 : index
    %1 = vector.load %arg3[%c0_1, %c0_2] : memref<128x128xbf16, #tpu.memory_space<vmem>>, vector<128x128xbf16>
    %cst = arith.constant dense<0.000000e+00> : vector<512x128xf32>
    %2 = tpu.matmul %0, %1, %cst {dimension_numbers = #tpu.dot_dimension_numbers<[1], [0], [0], [1], [0, 0, 1, 1], [], []>} : vector<512x128xbf16>, vector<128x128xbf16>, vector<512x128xf32> -> vector<512x128xf32>
    %c0_3 = arith.constant 0 : index
    %c0_4 = arith.constant 0 : index
    %3 = vector.load %arg4[%c0_3, %c0_4] : memref<1x128xf32, #tpu.memory_space<vmem>>, vector<1x128xf32>
    %4 = vector.broadcast %3 : vector<1x128xf32> to vector<512x128xf32>
    %5 = arith.addf %2, %4 : vector<512x128xf32>
    %6 = math.tanh %5 : vector<512x128xf32>
    %c0_5 = arith.constant 0 : index
    %c0_6 = arith.constant 0 : index
    %7 = vector.load %arg5[%c0_5, %c0_6] : memref<512x128xf32, #tpu.memory_space<vmem>>, vector<512x128xf32>
    tpu.vector_store %arg5[%c0_5, %c0_6], %6 {strides = array<i32>} : memref<512x128xf32, #tpu.memory_space<vmem>>, vector<512x128xf32>,
    return
  }
  func.func @transform_0(%arg0: i32, %arg1: i32) -> (i32, i32) {
    %c0_i32 = arith.constant 0 : i32
    %c0_i32_0 = arith.constant 0 : i32
    return %arg0, %c0_i32 : i32, i32
  }
  func.func @transform_1(%arg0: i32, %arg1: i32) -> (i32, i32) {
    %c0_i32 = arith.constant 0 : i32
    %c0_i32_0 = arith.constant 0 : i32
    return %c0_i32, %arg1 : i32, i32
  }
  func.func @transform_2(%arg0: i32, %arg1: i32) -> (i32, i32) {
    %c0_i32 = arith.constant 0 : i32
    %c0_i32_0 = arith.constant 0 : i32
    return %c0_i32, %arg1 : i32, i32
  }
  func.func @transform_3(%arg0: i32, %arg1: i32) -> (i32, i32) {
    %c0_i32 = arith.constant 0 : i32
    return %arg0, %arg1 : i32, i32
  }
}

</mosaic_0001>

<bundles_post_ra>
// kernel: generator_forward.11
= control target key start
LH: loop header
LB: loop body
LE: loop exit
PB: predicated region body
PF: predicated region fallthrough
CT: control target
= control target key end

     0   :  { %8 = vsyncpa [#allocation3], 0  ;;  %s1287_s0 = inlined_call_operand.vmem [shape: bf16[16,128], index: 0, kind: input, shape index: {}]   ;;  %s1288_s1 = inlined_call_operand.hbm [shape: bf16[128,1024], index: 1, kind: input, shape index: {}]   ;;  %s1289_s2 = inlined_call_operand.hbm [shape: f32[1,1024], index: 2, kind: input, shape index: {}]   ;;  %s1290_s3 = inlined_call_operand.vmem [shape: bf16[16,1024], index: 3, kind: output, shape index: {}]  }
   0x1   :  { %10 = vsyncpa [#allocation3 + $0x1], 0 }
   0x2   :  { %11 = vsyncpa [#allocation5], 0 }
   0x3   :  { %13 = vsyncpa [#allocation5 + $0x1], 0  ;;  %s1083_s12 = smov 0   ;;  %s1085_s13 = smov 0  }
   0x4   :  { %s1087_s14 = smov 0   ;;  %s1089_s15 = smov 0  }
   0x5   :  { %s1091_s16 = smov 0   ;;  %s1093_s17 = smov 0  }
   0x6 LB: > { %s695_s18 = sadd.s32 4294967295, %s1058_s17   ;;  %s28_s19 = sadd.s32 1, %s1054_s16  ;;  %s1058_s17 = sphi %s1093_s17, %s19_s17   ;;  %s1054_s16 = sphi %s1091_s16, %s1299_s16   ;;  %s1050_s15 = sphi %s1089_s15, %s1298_s15   ;;  %s1046_s14 = sphi %s1087_s14, %s1297_s14   ;;  %s1042_s13 = sphi %s1085_s13, %s1296_s13   ;;  %s1038_s12 = sphi %s1083_s12, %s1295_s12  }
   0x7   : > { %p29_p0 = scmp.ge.s32.totalorder %s28_s19, 2  ;;  %s64_s20 = sadd.s32 1, %s1046_s14 }
   0x8   : > { %p71_p1 = scmp.ne.s32.totalorder %s1046_s14, %s1042_s13  ;;  %p72_p2 = scmp.eq.s32.totalorder %s1058_s17, 0 }
   0x9   : > { %s1301_s19 = smov (%p29_p0, %s28_s19), 0  ;;  %p77_p4 = scmp.ne.s32.totalorder %s1042_s13, %s1038_s12 }
   0xa   : > { %p1119_p3 = por %p72_p2, %p71_p1  ;;  %s61_s22 = ssub.s32 %s1054_s16, %s1301_s19 }
   0xb   : > { %p78_p5 = scmp.eq.s32.totalorder %s695_s18, 0  ;;  %p62_p6 = scmp.eq.s32.totalorder %s61_s22, 0 }
   0xc   : > { %p129_p7 = scmp.eq.s32.totalorder %s695_s18, 1  ;;  %p892_p10 = scmp.lt.s32.totalorder %s1058_s17, 2 }
   0xd   : > { %p1126_p8 = por %p78_p5, %p77_p4  ;;  %s1139_s26 = sand.u32 1, %s1046_s14  }
   0xe   : > { %s1131_s24 = scalar_select %p62_p6, %s1046_s14, %s64_s20  }
   0xf   : > { %p1133_p9 = por %p129_p7, %p71_p1  ;;  %s846_s27 = sshll.u32 %s1054_s16, 4 }
  0x10   : > { %s700_s28 = sshll.u32 %s1139_s26, 8  ;;  %s173_s4 = scalar_lea.hbm %s1288_s1, %s846_s27 }
  0x11   : > { %s174_s5 = sshll.u32 %s173_s4, 4  ;;  %s168_s6 = scalar_lea.vmem [#allocation2], %s700_s28  ;;  %s175_s5 = int_to_ptr.hbm [resolvable:$true] %s174_s5 }
  0x12   : > { %s176_s7 = sshll.u32 %s168_s6, 4  ;;  %p1148_p11 = pnand %p892_p10, %p1119_p3  ;;  %s177_s7 = int_to_ptr.vmem [resolvable:$true] %s176_s7 }
  0x13   : > { %p705_p12 = scmp.ge.s32.totalorder %s1058_s17, 1  ;;  %s165_s9 = scalar_lea.sflag [#allocation3], %s1139_s26 }
  0x14   : > { %s1060_s10 = smov 512   ;;  %s1061_s11 = smov 256  }
  0x15   : > { %s1062_s12 = smov 16   ;;  %p203_p13 = scmp.lt.s32.totalorder %s1058_s17, 3 }
  0x16   : > { %888 = dma.hbm_to_vmem [thread:$0]  (!%p1148_p11), %s175_s5, 4096, %s177_s7, %s165_s9, %s1060_s10, %s1061_s11, %s1062_s12  }
  0x17   : > { %s703_s18 = sshll.u32 %s1139_s26, 2  ;;  %s704_s20 = sshll.u32 %s1054_s16, 2 }
  0x18   : > { %p204_p0 = pnand %p705_p12, %p203_p13  ;;  %s194_s27 = scalar_lea.hbm %s1289_s2, %s704_s20 }
  0x19   : > { %s190_s28 = scalar_lea.vmem [#allocation4], %s703_s18  ;;  %s196_s30 = sshll.u32 %s194_s27, 4  ;;  %s197_s30 = int_to_ptr.hbm [resolvable:$true] %s196_s30 }
  0x1a   : > { %s198_s29 = sshll.u32 %s190_s28, 4  ;;  %s187_s4 = scalar_lea.sflag [#allocation5], %s1139_s26  ;;  %s199_s29 = int_to_ptr.vmem [resolvable:$true] %s198_s29 }
  0x1b   : > { %891 = dma.hbm_to_vmem [thread:$0]  (!%p1148_p11), %s197_s30, 64, %s199_s29, %s187_s4  }
  0x1c   : > { %207 = sbr.rel (%p204_p0) target bundleno = 228 (0xe4), region = 32  ;;  %s1166_s5 = sand.u32 (!%p204_p0), 1, %s1042_s13  }
  0x1d   : > { %s706_s6 = sshll.u32 (!%p204_p0), %s1166_s5, 8  ;;  %s210_s7 = scalar_lea.sflag (!%p204_p0), [#allocation3], %s1166_s5 }
  0x1e   : > { %s1170_s9 = scalar_lea.vmem (!%p204_p0), [#allocation2], %s706_s6 }
  0x21   : > { %1029 = dma.done.wait (%p1126_p8), %s210_s7, 4096  }
  0x22   : > { %1031 = vsyncadd (%p1126_p8), %s210_s7, 4294963200  ;;  %s707_s26 = sshll.u32 %s1166_s5, 2  ;;  %s220_s8 = scalar_lea.sflag [#allocation5], %s1166_s5 }
  0x23   : > { %s1178_s10 = scalar_lea.vmem [#allocation4], %s707_s26 }
  0x24   : > { %1033 = dma.done.wait (%p1126_p8), %s220_s8, 64  }
  0x25   : > { %1035 = vsyncadd (%p1126_p8), %s220_s8, 4294967232  ;;  %v827_v0 = vld [vmem:[%s1170_s9 + $0xe0] sm:$0xf]  ;;  %v878_v1 = vld [vmem:[%s1170_s9 + $0xec] sm:$0xf0]  ;;  %s708_s12 = sshll.u32 %s1166_s5, 5 }
  0x26   : > { %v876_v2 = vld [vmem:[%s1170_s9 + $0xe4] sm:$0xf]  ;;  %v828_v3 = vor.u32 %v878_v1, %v827_v0  ;;  %v829_v4 = vld [vmem:[%s1170_s9 + $0xf0] sm:$0xf0]  ;;  %v835_v5 = vld [vmem:[%s1170_s9 + $0xe8] sm:$0xf] }
  0x27   : > { %v879_v6 = vld [vmem:[%s1170_s9 + $0xf4] sm:$0xf0]  ;;  %v832_v7 = vor.u32 %v876_v2, %v829_v4  ;;  %v877_v9 = vld [vmem:[%s1170_s9 + $0xec] sm:$0xf]  ;;  %v837_v10 = vld [vmem:[%s1170_s9 + $0xf8] sm:$0xf0] }
  0x28   : > { %v836_v8 = vor.u32 %v879_v6, %v835_v5  ;;  %v811_v11 = vld [vmem:[%s1170_s9 + $0xc0] sm:$0xf]  ;;  %476 = vmatpush.bf16.msra.mxu0 %v828_v3  ;;  %v840_v12 = vor.u32 %v877_v9, %v837_v10  ;;  %v874_v13 = vld [vmem:[%s1170_s9 + $0xcc] sm:$0xf0]  ;;  %v872_v14 = vld [vmem:[%s1170_s9 + $0xc4] sm:$0xf] }
  0x29   : > { %v813_v15 = vld [vmem:[%s1170_s9 + $0xd0] sm:$0xf0]  ;;  %490 = vmatpush.bf16.msra.mxu1 %v832_v7  ;;  %v812_v16 = vor.u32 %v874_v13, %v811_v11  ;;  %v819_v18 = vld [vmem:[%s1170_s9 + $0xc8] sm:$0xf]  ;;  %v875_v19 = vld [vmem:[%s1170_s9 + $0xd4] sm:$0xf0] }
  0x2a   : > { %504 = vmatpush.bf16.msra.mxu2 %v836_v8  ;;  %v816_v17 = vor.u32 %v872_v14, %v813_v15  ;;  %v873_v20 = vld [vmem:[%s1170_s9 + $0xcc] sm:$0xf]  ;;  %518 = vmatpush.bf16.msra.mxu3 %v840_v12  ;;  %v820_v21 = vor.u32 %v875_v19, %v819_v18  ;;  %v821_v22 = vld [vmem:[%s1170_s9 + $0xd8] sm:$0xf0]  ;;  %v795_v23 = vld [vmem:[%s1170_s9 + $0xa0] sm:$0xf] }
  0x2b   : > { %v870_v24 = vld [vmem:[%s1170_s9 + $0xac] sm:$0xf0]  ;;  %v824_v25 = vor.u32 %v873_v20, %v821_v22  ;;  %v868_v26 = vld [vmem:[%s1170_s9 + $0xa4] sm:$0xf]  ;;  %v797_v27 = vld [vmem:[%s1170_s9 + $0xb0] sm:$0xf0] }
  0x2c   : > { %v803_v28 = vld [vmem:[%s1170_s9 + $0xa8] sm:$0xf]  ;;  %477 = vmatpush.bf16.msra.mxu0 %v812_v16  ;;  %v796_v29 = vor.u32 %v870_v24, %v795_v23  ;;  %v871_v30 = vld [vmem:[%s1170_s9 + $0xb4] sm:$0xf0]  ;;  %v869_v31 = vld [vmem:[%s1170_s9 + $0xac] sm:$0xf]  ;;  %v800_v33 = vor.u32 %v868_v26, %v797_v27 }
  0x2d   : > { %v805_v32 = vld [vmem:[%s1170_s9 + $0xb8] sm:$0xf0]  ;;  %491 = vmatpush.bf16.msra.mxu1 %v816_v17  ;;  %v804_v34 = vor.u32 %v871_v30, %v803_v28  ;;  %v779_v35 = vld [vmem:[%s1170_s9 + $0x80] sm:$0xf]  ;;  %v866_v36 = vld [vmem:[%s1170_s9 + $0x8c] sm:$0xf0] }
  0x2e   : > { %505 = vmatpush.bf16.msra.mxu2 %v820_v21  ;;  %v864_v37 = vld [vmem:[%s1170_s9 + $0x84] sm:$0xf]  ;;  %519 = vmatpush.bf16.msra.mxu3 %v824_v25  ;;  %v808_v38 = vor.u32 %v869_v31, %v805_v32  ;;  %v781_v39 = vld [vmem:[%s1170_s9 + $0x90] sm:$0xf0]  ;;  %v787_v40 = vld [vmem:[%s1170_s9 + $0x88] sm:$0xf]  ;;  %v780_v44 = vor.u32 %v866_v36, %v779_v35 }
  0x2f   : > { %v867_v41 = vld [vmem:[%s1170_s9 + $0x94] sm:$0xf0]  ;;  %v865_v42 = vld [vmem:[%s1170_s9 + $0x8c] sm:$0xf]  ;;  %v789_v43 = vld [vmem:[%s1170_s9 + $0x98] sm:$0xf0]  ;;  %v784_v45 = vor.u32 %v864_v37, %v781_v39 }
  0x30   : > { %478 = vmatpush.bf16.msra.mxu0 %v796_v29  ;;  %v788_v46 = vor.u32 %v867_v41, %v787_v40  ;;  %v763_v47 = vld [vmem:[%s1170_s9 + $0x60] sm:$0xf]  ;;  %v862_v48 = vld [vmem:[%s1170_s9 + $0x6c] sm:$0xf0]  ;;  %v860_v49 = vld [vmem:[%s1170_s9 + $0x64] sm:$0xf]  ;;  %v792_v50 = vor.u32 %v865_v42, %v789_v43 }
  0x31   : > { %492 = vmatpush.bf16.msra.mxu1 %v800_v33  ;;  %v765_v51 = vld [vmem:[%s1170_s9 + $0x70] sm:$0xf0]  ;;  %v771_v52 = vld [vmem:[%s1170_s9 + $0x68] sm:$0xf]  ;;  %v863_v53 = vld [vmem:[%s1170_s9 + $0x74] sm:$0xf0]  ;;  %v764_v56 = vor.u32 %v862_v48, %v763_v47 }
  0x32   : > { %506 = vmatpush.bf16.msra.mxu2 %v804_v34  ;;  %520 = vmatpush.bf16.msra.mxu3 %v808_v38  ;;  %v861_v54 = vld [vmem:[%s1170_s9 + $0x6c] sm:$0xf]  ;;  %v773_v55 = vld [vmem:[%s1170_s9 + $0x78] sm:$0xf0]  ;;  %v768_v57 = vor.u32 %v860_v49, %v765_v51  ;;  %v772_v58 = vor.u32 %v863_v53, %v771_v52  ;;  %v747_v59 = vld [vmem:[%s1170_s9 + $0x40] sm:$0xf] }
  0x33   : > { %v858_v60 = vld [vmem:[%s1170_s9 + $0x4c] sm:$0xf0]  ;;  %v856_v61 = vld [vmem:[%s1170_s9 + $0x44] sm:$0xf]  ;;  %v776_v62 = vor.u32 %v861_v54, %v773_v55  ;;  %v749_v63 = vld [vmem:[%s1170_s9 + $0x50] sm:$0xf0] }
  0x34   : > { %479 = vmatpush.bf16.msra.mxu0 %v780_v44  ;;  %v755_v0 = vld [vmem:[%s1170_s9 + $0x48] sm:$0xf]  ;;  %v859_v1 = vld [vmem:[%s1170_s9 + $0x54] sm:$0xf0]  ;;  %v857_v2 = vld [vmem:[%s1170_s9 + $0x4c] sm:$0xf]  ;;  %v748_v4 = vor.u32 %v858_v60, %v747_v59  ;;  %v752_v5 = vor.u32 %v856_v61, %v749_v63 }
  0x35   : > { %493 = vmatpush.bf16.msra.mxu1 %v784_v45  ;;  %v757_v3 = vld [vmem:[%s1170_s9 + $0x58] sm:$0xf0]  ;;  %v756_v6 = vor.u32 %v859_v1, %v755_v0  ;;  %v731_v7 = vld [vmem:[%s1170_s9 + $0x20] sm:$0xf]  ;;  %v854_v8 = vld [vmem:[%s1170_s9 + $0x2c] sm:$0xf0] }
  0x36   : > { %507 = vmatpush.bf16.msra.mxu2 %v788_v46  ;;  %521 = vmatpush.bf16.msra.mxu3 %v792_v50  ;;  %v852_v9 = vld [vmem:[%s1170_s9 + $0x24] sm:$0xf]  ;;  %v760_v10 = vor.u32 %v857_v2, %v757_v3  ;;  %v733_v11 = vld [vmem:[%s1170_s9 + $0x30] sm:$0xf0]  ;;  %v739_v12 = vld [vmem:[%s1170_s9 + $0x28] sm:$0xf]  ;;  %v732_v16 = vor.u32 %v854_v8, %v731_v7 }
  0x37   : > { %v855_v13 = vld [vmem:[%s1170_s9 + $0x34] sm:$0xf0]  ;;  %v853_v14 = vld [vmem:[%s1170_s9 + $0x2c] sm:$0xf]  ;;  %v741_v15 = vld [vmem:[%s1170_s9 + $0x38] sm:$0xf0]  ;;  %v736_v17 = vor.u32 %v852_v9, %v733_v11 }
  0x38   : > { %480 = vmatpush.bf16.msra.mxu0 %v764_v56  ;;  %v740_v18 = vor.u32 %v855_v13, %v739_v12  ;;  %v715_v19 = vld [vmem:[%s1170_s9] sm:$0xf]  ;;  %v850_v20 = vld [vmem:[%s1170_s9 + $0xc] sm:$0xf0]  ;;  %v848_v21 = vld [vmem:[%s1170_s9 + $0x4] sm:$0xf]  ;;  %v744_v22 = vor.u32 %v853_v14, %v741_v15 }
  0x39   : > { %494 = vmatpush.bf16.msra.mxu1 %v768_v57  ;;  %v717_v23 = vld [vmem:[%s1170_s9 + $0x10] sm:$0xf0]  ;;  %v723_v24 = vld [vmem:[%s1170_s9 + $0x8] sm:$0xf]  ;;  %v851_v25 = vld [vmem:[%s1170_s9 + $0x14] sm:$0xf0]  ;;  %v716_v28 = vor.u32 %v850_v20, %v715_v19 }
  0x3a   : > { %508 = vmatpush.bf16.msra.mxu2 %v772_v58  ;;  %522 = vmatpush.bf16.msra.mxu3 %v776_v62  ;;  %v849_v26 = vld [vmem:[%s1170_s9 + $0xc] sm:$0xf]  ;;  %v725_v27 = vld [vmem:[%s1170_s9 + $0x18] sm:$0xf0]  ;;  %v720_v29 = vor.u32 %v848_v21, %v717_v23  ;;  %v724_v30 = vor.u32 %v851_v25, %v723_v24  ;;  %v847_v32 = vld [vmem:[%s1287_s0] sm:$0xff]  ;;  %s1253_s18 = scalar_lea.vmem [#allocation6], %s708_s12 }
  0x3b   : > { %v728_v31 = vor.u32 %v849_v26, %v725_v27  ;;  %v300_v33 = vld [vmem:[%s1178_s10] sm:$0xf]  ;;  %s880_s20 = sshll.u32 (%p1133_p9), %s1050_s15, 4 }
  0x3c   : > { %481 = vmatpush.bf16.msra.mxu0 %v748_v4  ;;  %v302_v34 = vperm.slane %v300_v33, 0  ;;  %v303_v35 = vperm.slane %v300_v33, 1  ;;  %v304_v42 = vperm.slane %v300_v33, 2  ;;  %v305_v43 = vperm.slane %v300_v33, 3  ;;  %s560_s27 = scalar_lea.vmem (%p1133_p9), %s1290_s3, %s880_s20 }
  0x3d   : > { %495 = vmatpush.bf16.msra.mxu1 %v752_v5 }
  0x3e   : > { %509 = vmatpush.bf16.msra.mxu2 %v756_v6  ;;  %523 = vmatpush.bf16.msra.mxu3 %v760_v10 }
  0x40   : > { %482 = vmatpush.bf16.msra.mxu0 %v732_v16 }
  0x41   : > { %496 = vmatpush.bf16.msra.mxu1 %v736_v17 }
  0x42   : > { %510 = vmatpush.bf16.msra.mxu2 %v740_v18  ;;  %524 = vmatpush.bf16.msra.mxu3 %v744_v22 }
  0x44   : > { %483 = vmatpush.bf16.msra.mxu0 %v716_v28 }
  0x45   : > { %497 = vmatpush.bf16.msra.mxu1 %v720_v29 }
  0x46   : > { %511 = vmatpush.bf16.msra.mxu2 %v724_v30  ;;  %525 = vmatpush.bf16.msra.mxu3 %v728_v31 }
  0x47   : > { %484 = vmatmul.bf16.vlgmr.msra.gmra.mxu0 %v847_v32 }
  0x48   : > { %498 = vmatmul.bf16.vlgmr.msra.gmra.mxu1 %v847_v32 }
  0x49   : > { %512 = vmatmul.bf16.vlgmr.msra.gmra.mxu2 %v847_v32  ;;  %526 = vmatmul.bf16.vlgmr.msra.gmra.mxu3 %v847_v32 }
  0xc4   : > { %v485_v36 = vpop.f32.mrf.mxu0 }
  0xc5   : > { %v486_v37 = vadd.f32 %v485_v36, %v302_v34  ;;  %v499_v38 = vpop.f32.mrf.mxu1 }
  0xc6   : > { %v500_v39 = vadd.f32 %v499_v38, %v303_v35 }
  0xc7   : > { %v532_v40 = vmax.f32 %v486_v37, 0.0 }
  0xc8   : > { %v533_v41 = vmax.f32 %v500_v39, 0.0 }
  0xca   : > { %v540_v44 = vpack.c.bf16 %v533_v41, %v532_v40 }
  0xcc   : > { %v513_v45 = vpop.f32.mrf.mxu2  ;;  %544 = vst [vmem:[%s1253_s18] sm:$0xff] %v540_v44  ;;  %v527_v47 = vpop.f32.mrf.mxu3 }
  0xcd   : > { %v514_v46 = vadd.f32 %v513_v45, %v304_v42  ;;  %v487_v48 = vpop.f32.mrf.mxu0  ;;  %v528_v49 = vadd.f32 %v527_v47, %v305_v43  ;;  %v501_v51 = vpop.f32.mrf.mxu1 }
  0xce   : > { %v488_v50 = vadd.f32 %v487_v48, %v302_v34  ;;  %v502_v53 = vadd.f32 %v501_v51, %v303_v35 }
  0xcf   : > { %v534_v52 = vmax.f32 %v514_v46, 0.0  ;;  %v535_v54 = vmax.f32 %v528_v49, 0.0 }
  0xd0   : > { %v536_v55 = vmax.f32 %v488_v50, 0.0  ;;  %v537_v56 = vmax.f32 %v502_v53, 0.0 }
  0xd1   : > { %v541_v57 = vpack.c.bf16 %v535_v54, %v534_v52 }
  0xd2   : > { %v542_v58 = vpack.c.bf16 %v537_v56, %v536_v55 }
  0xd3   : > { %545 = vst [vmem:[%s1253_s18 + $0x8] sm:$0xff] %v541_v57  ;;  %v573_v2 = vld [vmem:[%s1253_s18] sm:$0xff] (%p1133_p9) }
  0xd4   : > { %v515_v59 = vpop.f32.mrf.mxu2  ;;  %546 = vst [vmem:[%s1253_s18 + $0x10] sm:$0xff] %v542_v58  ;;  %v529_v61 = vpop.f32.mrf.mxu3 }
  0xd5   : > { %v516_v60 = vadd.f32 %v515_v59, %v304_v42  ;;  %v530_v62 = vadd.f32 %v529_v61, %v305_v43  ;;  %574 = vst [vmem:[%s560_s27] sm:$0xff] (%p1133_p9), %v573_v2 }
  0xd7   : > { %v538_v63 = vmax.f32 %v516_v60, 0.0  ;;  %v539_v0 = vmax.f32 %v530_v62, 0.0  ;;  %554 = sbr.rel (!%p1133_p9) target bundleno = 228 (0xe4), region = 44 }
  0xd9   : > { %v543_v1 = vpack.c.bf16 %v539_v0, %v538_v63 }
  0xda   : > { %v575_v3 = vld [vmem:[%s1253_s18 + $0x8] sm:$0xff] (%p1133_p9) }
  0xdb   : > { %547 = vst [vmem:[%s1253_s18 + $0x18] sm:$0xff] %v543_v1  ;;  %v577_v4 = vld [vmem:[%s1253_s18 + $0x10] sm:$0xff] (%p1133_p9) }
  0xdc   : > { %576 = vst [vmem:[%s560_s27 + $0x8] sm:$0xff] %v575_v3 }
  0xdd   : > { %578 = vst [vmem:[%s560_s27 + $0x20] sm:$0xff] %v577_v4 }
  0xe2   : > { %v579_v5 = vld [vmem:[%s1253_s18 + $0x18] sm:$0xff] }
  0xe3   : > { %580 = vst [vmem:[%s560_s27 + $0x28] sm:$0xff] %v579_v5 }
  0xe4 PF: > { %s19_s17 = sadd.s32 1, %s1058_s17   ;;  %s1295_s12 = smov %s1042_s13 }
  0xe5   : > { %p16_p1 = scmp.ge.s32.totalorder %s19_s17, 4   ;;  %s1296_s13 = smov %s1046_s14 }
  0xe6   : > { %s1297_s14 = smov %s1131_s24  ;;  %s1298_s15 = smov %s1054_s16 }
  0xe7   : > { %s1299_s16 = smov %s1301_s19  ;;  %18 = sbr.rel (!%p16_p1) target bundleno = 6 (0x6), region = 111 }
  0xec   :  { %596 = vsyncpa [#allocation3], 1 }
  0xed   :  { %598 = vsyncpa [#allocation3 + $0x1], 1 }
  0xee   :  { %599 = vsyncpa [#allocation5], 1 }
  0xef   :  { %601 = vsyncpa [#allocation5 + $0x1], 1 }

// kernel: generator_forward.13
= control target key start
LH: loop header
LB: loop body
LE: loop exit
PB: predicated region body
PF: predicated region fallthrough
CT: control target
= control target key end

     0   :  { %9 = vsyncpa [#allocation3], 0  ;;  %s998_s0 = inlined_call_operand.vmem [shape: bf16[32,640], index: 0, kind: input, shape index: {}]   ;;  %s999_s1 = inlined_call_operand.hbm [shape: bf16[640,128], index: 1, kind: input, shape index: {}]   ;;  %s1000_s2 = inlined_call_operand.hbm [shape: f32[1,128], index: 2, kind: input, shape index: {}]   ;;  %s1001_s3 = inlined_call_operand.vmem [shape: bf16[32,128], index: 3, kind: input, shape index: {}]   ;;  %s1002_s4 = inlined_call_operand.vmem [shape: bf16[32,128], index: 4, kind: output, shape index: {}]  }
   0x1   :  { %s17_s17 = sshll.u32 %s999_s1, 4  ;;  %s18_s17 = int_to_ptr.hbm [resolvable:$true] %s17_s17 }
   0x2   :  { %10 = vsyncpa [#allocation5], 0  ;;  %s891_s18 = smov [#allocation2]   ;;  %s31_s22 = sshll.u32 %s1000_s2, 4  ;;  %s32_s22 = int_to_ptr.hbm [resolvable:$true] %s31_s22 }
   0x3   :  { %s19_s19 = sshll.u32 %s891_s18, 4  ;;  %s892_s23 = smov 64   ;;  %s20_s19 = int_to_ptr.vmem [resolvable:$true] %s19_s19 }
   0x4   :  { %s893_s24 = smov 4   ;;  %s894_s25 = smov [#allocation4]  }
   0x5   :  { %25 = dma.hbm_to_vmem [thread:$0]  %s18_s17, 5120, %s20_s19, [#allocation3], %s892_s23, %s892_s23, %s893_s24  }
   0x6   :  { %s33_s26 = sshll.u32 %s894_s25, 4  ;;  %s34_s26 = int_to_ptr.vmem [resolvable:$true] %s33_s26 }
   0x7   :  { %36 = dma.hbm_to_vmem [thread:$0]  %s32_s22, 16, %s34_s26, [#allocation5]  }
   0x8   :  { %887 = dma.done.wait [#allocation3], 5120  }
   0x9   :  { %888 = vsyncadd [#allocation3], 4294962176 }
   0xa   :  { %889 = dma.done.wait [#allocation5], 16  }
   0xb   :  { %890 = vsyncadd [#allocation5], 4294967280  ;;  %v773_v0 = vld [vmem:[#allocation2 + $0x38] sm:$0xff]  ;;  %v772_v4 = vld [vmem:[#allocation2 + $0x30] sm:$0xff] }
   0xc   :  { %v781_v1 = vld [vmem:[#allocation2 + $0x78] sm:$0xff]  ;;  %435 = vmatpush.bf16.msra.mxu0 %v773_v0  ;;  %v780_v5 = vld [vmem:[#allocation2 + $0x70] sm:$0xff]  ;;  %v771_v8 = vld [vmem:[#allocation2 + $0x28] sm:$0xff] }
   0xd   :  { %v789_v2 = vld [vmem:[#allocation2 + $0xb8] sm:$0xff]  ;;  %454 = vmatpush.bf16.msra.mxu1 %v781_v1  ;;  %v788_v6 = vld [vmem:[#allocation2 + $0xb0] sm:$0xff]  ;;  %v779_v9 = vld [vmem:[#allocation2 + $0x68] sm:$0xff] }
   0xe   :  { %v797_v3 = vld [vmem:[#allocation2 + $0xf8] sm:$0xff]  ;;  %473 = vmatpush.bf16.msra.mxu2 %v789_v2  ;;  %v796_v7 = vld [vmem:[#allocation2 + $0xf0] sm:$0xff]  ;;  %v787_v10 = vld [vmem:[#allocation2 + $0xa8] sm:$0xff] }
   0xf   :  { %492 = vmatpush.bf16.msra.mxu3 %v797_v3  ;;  %v795_v11 = vld [vmem:[#allocation2 + $0xe8] sm:$0xff]  ;;  %v770_v12 = vld [vmem:[#allocation2 + $0x20] sm:$0xff]  ;;  %v769_v16 = vld [vmem:[#allocation2 + $0x18] sm:$0xff] }
  0x10   :  { %436 = vmatpush.bf16.msra.mxu0 %v772_v4  ;;  %v778_v13 = vld [vmem:[#allocation2 + $0x60] sm:$0xff]  ;;  %v777_v17 = vld [vmem:[#allocation2 + $0x58] sm:$0xff]  ;;  %v768_v20 = vld [vmem:[#allocation2 + $0x10] sm:$0xff] }
  0x11   :  { %455 = vmatpush.bf16.msra.mxu1 %v780_v5  ;;  %v786_v14 = vld [vmem:[#allocation2 + $0xa0] sm:$0xff]  ;;  %v785_v18 = vld [vmem:[#allocation2 + $0x98] sm:$0xff]  ;;  %v776_v21 = vld [vmem:[#allocation2 + $0x50] sm:$0xff] }
  0x12   :  { %474 = vmatpush.bf16.msra.mxu2 %v788_v6  ;;  %v794_v15 = vld [vmem:[#allocation2 + $0xe0] sm:$0xff]  ;;  %v793_v19 = vld [vmem:[#allocation2 + $0xd8] sm:$0xff]  ;;  %v784_v22 = vld [vmem:[#allocation2 + $0x90] sm:$0xff] }
  0x13   :  { %493 = vmatpush.bf16.msra.mxu3 %v796_v7  ;;  %v792_v23 = vld [vmem:[#allocation2 + $0xd0] sm:$0xff]  ;;  %v767_v24 = vld [vmem:[#allocation2 + $0x8] sm:$0xff]  ;;  %v766_v28 = vld [vmem:[#allocation2] sm:$0xff] }
  0x14   :  { %437 = vmatpush.bf16.msra.mxu0 %v771_v8  ;;  %v775_v25 = vld [vmem:[#allocation2 + $0x48] sm:$0xff]  ;;  %v774_v29 = vld [vmem:[#allocation2 + $0x40] sm:$0xff]  ;;  %v758_v33 = vld [vmem:[%s998_s0 + $0x10] sm:$0xf0] }
  0x15   :  { %456 = vmatpush.bf16.msra.mxu1 %v779_v9  ;;  %v783_v26 = vld [vmem:[#allocation2 + $0x88] sm:$0xff]  ;;  %v782_v30 = vld [vmem:[#allocation2 + $0x80] sm:$0xff]  ;;  %v560_v35 = vld [vmem:[%s998_s0 + $0x14] sm:$0xf0] }
  0x16   :  { %475 = vmatpush.bf16.msra.mxu2 %v787_v10  ;;  %v791_v27 = vld [vmem:[#allocation2 + $0xc8] sm:$0xff]  ;;  %v790_v31 = vld [vmem:[#allocation2 + $0xc0] sm:$0xff]  ;;  %v759_v37 = vld [vmem:[%s998_s0 + $0x18] sm:$0xf0] }
  0x17   :  { %494 = vmatpush.bf16.msra.mxu3 %v795_v11  ;;  %v558_v32 = vld [vmem:[%s998_s0] sm:$0xf]  ;;  %v756_v34 = vld [vmem:[%s998_s0 + $0x4] sm:$0xf]  ;;  %v566_v36 = vld [vmem:[%s998_s0 + $0x8] sm:$0xf] }
  0x18   :  { %438 = vmatpush.bf16.msra.mxu0 %v770_v12  ;;  %v757_v38 = vld [vmem:[%s998_s0 + $0xc] sm:$0xf]  ;;  %v568_v39 = vld [vmem:[%s998_s0 + $0x1c] sm:$0xf0]  ;;  %v805_v40 = vld [vmem:[#allocation2 + $0x138] sm:$0xff]  ;;  %v559_v41 = vor.u32 %v758_v33, %v558_v32  ;;  %v563_v42 = vor.u32 %v756_v34, %v560_v35  ;;  %v567_v43 = vor.u32 %v759_v37, %v566_v36 }
  0x19   :  { %457 = vmatpush.bf16.msra.mxu1 %v778_v13  ;;  %v571_v44 = vor.u32 %v757_v38, %v568_v39  ;;  %v804_v45 = vld [vmem:[#allocation2 + $0x130] sm:$0xff]  ;;  %v803_v46 = vld [vmem:[#allocation2 + $0x128] sm:$0xff]  ;;  %v802_v47 = vld [vmem:[#allocation2 + $0x120] sm:$0xff] }
  0x1a   :  { %476 = vmatpush.bf16.msra.mxu2 %v786_v14  ;;  %v578_v48 = vld [vmem:[%s998_s0 + $0x28] sm:$0xf]  ;;  %v763_v49 = vld [vmem:[%s998_s0 + $0x38] sm:$0xf0]  ;;  %v761_v50 = vld [vmem:[%s998_s0 + $0x2c] sm:$0xf] }
  0x1b   :  { %495 = vmatpush.bf16.msra.mxu3 %v794_v15  ;;  %v580_v51 = vld [vmem:[%s998_s0 + $0x3c] sm:$0xf0]  ;;  %v586_v52 = vld [vmem:[%s998_s0 + $0x30] sm:$0xf]  ;;  %v764_v53 = vld [vmem:[%s998_s0 + $0x40] sm:$0xf0]  ;;  %v579_v57 = vor.u32 %v763_v49, %v578_v48 }
  0x1c   :  { %439 = vmatpush.bf16.msra.mxu0 %v769_v16  ;;  %v762_v54 = vld [vmem:[%s998_s0 + $0x34] sm:$0xf]  ;;  %v588_v55 = vld [vmem:[%s998_s0 + $0x44] sm:$0xf0]  ;;  %v801_v56 = vld [vmem:[#allocation2 + $0x118] sm:$0xff]  ;;  %v583_v58 = vor.u32 %v761_v50, %v580_v51  ;;  %v587_v59 = vor.u32 %v764_v53, %v586_v52 }
  0x1d   :  { %458 = vmatpush.bf16.msra.mxu1 %v777_v17  ;;  %v591_v60 = vor.u32 %v762_v54, %v588_v55  ;;  %v800_v61 = vld [vmem:[#allocation2 + $0x110] sm:$0xff]  ;;  %v799_v62 = vld [vmem:[#allocation2 + $0x108] sm:$0xff]  ;;  %v798_v63 = vld [vmem:[#allocation2 + $0x100] sm:$0xff] }
  0x1e   :  { %477 = vmatpush.bf16.msra.mxu2 %v785_v18  ;;  %v574_v0 = vld [vmem:[%s998_s0 + $0x10] sm:$0xf]  ;;  %v760_v1 = vld [vmem:[%s998_s0 + $0x20] sm:$0xf0]  ;;  %v594_v2 = vld [vmem:[%s998_s0 + $0x38] sm:$0xf] }
  0x1f   :  { %496 = vmatpush.bf16.msra.mxu3 %v793_v19  ;;  %v765_v3 = vld [vmem:[%s998_s0 + $0x48] sm:$0xf0]  ;;  %v575_v4 = vor.u32 %v760_v1, %v574_v0  ;;  %v838_v16 = vld [vmem:[#allocation4] ss:$0 sm:$0xff] }
  0x20   :  { %440 = vmatpush.bf16.msra.mxu0 %v768_v20  ;;  %v595_v5 = vor.u32 %v765_v3, %v594_v2  ;;  %v807_v36 = vld [vmem:[%s1001_s3] sm:$0xff]   ;;  %v824_v37 = vld [vmem:[%s1001_s3 + $0x8] sm:$0xff]  }
  0x21   :  { %459 = vmatpush.bf16.msra.mxu1 %v776_v21 }
  0x22   :  { %478 = vmatpush.bf16.msra.mxu2 %v784_v22 }
  0x23   :  { %497 = vmatpush.bf16.msra.mxu3 %v792_v23 }
  0x24   :  { %441 = vmatpush.bf16.msra.mxu0 %v767_v24 }
  0x25   :  { %460 = vmatpush.bf16.msra.mxu1 %v775_v25 }
  0x26   :  { %479 = vmatpush.bf16.msra.mxu2 %v783_v26 }
  0x27   :  { %498 = vmatpush.bf16.msra.mxu3 %v791_v27 }
  0x28   :  { %442 = vmatpush.bf16.msra.mxu0 %v766_v28 }
  0x29   :  { %461 = vmatpush.bf16.msra.mxu1 %v774_v29 }
  0x2a   :  { %480 = vmatpush.bf16.msra.mxu2 %v782_v30 }
  0x2b   :  { %499 = vmatpush.bf16.msra.mxu3 %v790_v31  ;;  %443 = vmatmul.bf16.vlgmr.msra.gmra.mxu0 %v559_v41  ;;  %v808_v41 = vunpack.c.l.bf16 %v807_v36 }
  0x2c   :  { %511 = vmatpush.bf16.msrb.mxu0 %v805_v40  ;;  %462 = vmatmul.bf16.vlgmr.msra.gmra.mxu1 %v563_v42  ;;  %v812_v42 = vunpack.c.l.bf16 %v824_v37 }
  0x2d   :  { %826 = vmatpush.bf16.msrb.mxu1 %v805_v40  ;;  %481 = vmatmul.bf16.vlgmr.msra.gmra.mxu2 %v567_v43  ;;  %v809_v43 = vunpack.c.h.bf16 %v807_v36 }
  0x2e   :  { %500 = vmatmul.bf16.vlgmr.msra.gmra.mxu3 %v571_v44  ;;  %v813_v44 = vunpack.c.h.bf16 %v824_v37 }
  0x30   :  { %512 = vmatpush.bf16.msrb.mxu0 %v804_v45 }
  0x31   :  { %827 = vmatpush.bf16.msrb.mxu1 %v804_v45 }
  0x34   :  { %513 = vmatpush.bf16.msrb.mxu0 %v803_v46 }
  0x35   :  { %828 = vmatpush.bf16.msrb.mxu1 %v803_v46 }
  0x38   :  { %514 = vmatpush.bf16.msrb.mxu0 %v802_v47 }
  0x39   :  { %829 = vmatpush.bf16.msrb.mxu1 %v802_v47 }
  0x3b   :  { %448 = vmatmul.bf16.gmra.mxu0 %v579_v57 }
  0x3c   :  { %515 = vmatpush.bf16.msrb.mxu0 %v801_v56  ;;  %467 = vmatmul.bf16.gmra.mxu1 %v583_v58 }
  0x3d   :  { %830 = vmatpush.bf16.msrb.mxu1 %v801_v56  ;;  %486 = vmatmul.bf16.gmra.mxu2 %v587_v59 }
  0x3e   :  { %505 = vmatmul.bf16.gmra.mxu3 %v591_v60 }
  0x40   :  { %516 = vmatpush.bf16.msrb.mxu0 %v800_v61 }
  0x41   :  { %831 = vmatpush.bf16.msrb.mxu1 %v800_v61 }
  0x44   :  { %517 = vmatpush.bf16.msrb.mxu0 %v799_v62 }
  0x45   :  { %832 = vmatpush.bf16.msrb.mxu1 %v799_v62 }
  0x48   :  { %518 = vmatpush.bf16.msrb.mxu0 %v798_v63 }
  0x49   :  { %833 = vmatpush.bf16.msrb.mxu1 %v798_v63 }
  0x4b   :  { %519 = vmatmul.bf16.vlgmr.msrb.gmra.mxu0 %v575_v4 }
  0x4c   :  { %524 = vmatmul.bf16.vlgmr.msrb.gmra.mxu1 %v595_v5 }
  0xa8   :  { %v444_v6 = vpop.f32.mrf.mxu0 }
  0xa9   :  { %v463_v7 = vpop.f32.mrf.mxu1  ;;  %v445_v20 = vadd.f32 %v838_v16, %v444_v6 }
  0xab   :  { %v464_v25 = vadd.f32 %v463_v7, %v445_v20 }
  0xb0   :  { %v482_v8 = vpop.f32.mrf.mxu2  ;;  %v446_v10 = vpop.f32.mrf.mxu0 }
  0xb1   :  { %v501_v9 = vpop.f32.mrf.mxu3  ;;  %v465_v11 = vpop.f32.mrf.mxu1  ;;  %v447_v23 = vadd.f32 %v838_v16, %v446_v10  ;;  %v483_v30 = vadd.f32 %v482_v8, %v464_v25 }
  0xb3   :  { %v466_v31 = vadd.f32 %v465_v11, %v447_v23  ;;  %v502_v38 = vadd.f32 %v501_v9, %v483_v30 }
  0xb8   :  { %v484_v12 = vpop.f32.mrf.mxu2  ;;  %v449_v13 = vpop.f32.mrf.mxu0 }
  0xb9   :  { %v468_v14 = vpop.f32.mrf.mxu1  ;;  %v503_v15 = vpop.f32.mrf.mxu3  ;;  %v450_v21 = vadd.f32 %v838_v16, %v449_v13  ;;  %v485_v34 = vadd.f32 %v484_v12, %v466_v31 }
  0xbb   :  { %v469_v26 = vadd.f32 %v468_v14, %v450_v21  ;;  %v504_v45 = vadd.f32 %v503_v15, %v485_v34 }
  0xc0   :  { %v487_v17 = vpop.f32.mrf.mxu2  ;;  %v451_v18 = vpop.f32.mrf.mxu0 }
  0xc1   :  { %v470_v19 = vpop.f32.mrf.mxu1  ;;  %v506_v22 = vpop.f32.mrf.mxu3  ;;  %v452_v24 = vadd.f32 %v838_v16, %v451_v18  ;;  %v488_v32 = vadd.f32 %v487_v17, %v469_v26 }
  0xc3   :  { %v471_v33 = vadd.f32 %v470_v19, %v452_v24  ;;  %v507_v39 = vadd.f32 %v506_v22, %v488_v32 }
  0xc8   :  { %v489_v27 = vpop.f32.mrf.mxu2  ;;  %v520_v28 = vpop.f32.mrf.mxu0 }
  0xc9   :  { %v525_v29 = vpop.f32.mrf.mxu1  ;;  %v490_v35 = vadd.f32 %v489_v27, %v471_v33  ;;  %v508_v40 = vpop.f32.mrf.mxu3  ;;  %v521_v47 = vadd.f32 %v520_v28, %v502_v38 }
  0xca   :  { %v526_v48 = vadd.f32 %v525_v29, %v507_v39 }
  0xcb   :  { %v509_v46 = vadd.f32 %v508_v40, %v490_v35  ;;  %v538_v53 = vadd.f32 %v808_v41, %v521_v47 }
  0xcc   :  { %v540_v54 = vadd.f32 %v812_v42, %v526_v48 }
  0xd0   :  { %v522_v49 = vpop.f32.mrf.mxu0 }
  0xd1   :  { %v527_v50 = vpop.f32.mrf.mxu1  ;;  %v523_v51 = vadd.f32 %v522_v49, %v504_v45 }
  0xd2   :  { %v528_v52 = vadd.f32 %v527_v50, %v509_v46 }
  0xd3   :  { %v539_v55 = vadd.f32 %v809_v43, %v523_v51 }
  0xd4   :  { %v541_v56 = vadd.f32 %v813_v44, %v528_v52 }
  0xd5   :  { %v817_v57 = vpack.c.bf16 %v539_v55, %v538_v53 }
  0xd6   :  { %v822_v58 = vpack.c.bf16 %v541_v56, %v540_v54 }
  0xd7   :  { %818 = vst [vmem:[%s1002_s4] sm:$0xff] %v817_v57  }
  0xd8   :  { %825 = vst [vmem:[%s1002_s4 + $0x8] sm:$0xff] %v822_v58  }
  0xd9   :  { %554 = vsyncpa [#allocation3], 1 }
  0xda   :  { %555 = vsyncpa [#allocation5], 1 }

// kernel: generator_forward.12
= control target key start
LH: loop header
LB: loop body
LE: loop exit
PB: predicated region body
PF: predicated region fallthrough
CT: control target
= control target key end

     0   :  { %8 = vsyncpa [#allocation3], 0  ;;  %s1128_s0 = inlined_call_operand.vmem [shape: bf16[32,768], index: 0, kind: input, shape index: {}]   ;;  %s1129_s1 = inlined_call_operand.hbm [shape: bf16[768,128], index: 1, kind: input, shape index: {}]   ;;  %s1130_s2 = inlined_call_operand.hbm [shape: f32[1,128], index: 2, kind: input, shape index: {}]   ;;  %s1131_s3 = inlined_call_operand.vmem [shape: bf16[32,128], index: 3, kind: output, shape index: {}]  }
   0x1   :  { %s16_s14 = sshll.u32 %s1129_s1, 4  ;;  %s17_s14 = int_to_ptr.hbm [resolvable:$true] %s16_s14 }
   0x2   :  { %9 = vsyncpa [#allocation5], 0  ;;  %s1020_s15 = smov [#allocation2]   ;;  %s30_s19 = sshll.u32 %s1130_s2, 4  ;;  %s31_s19 = int_to_ptr.hbm [resolvable:$true] %s30_s19 }
   0x3   :  { %s18_s16 = sshll.u32 %s1020_s15, 4  ;;  %s1021_s20 = smov 64   ;;  %s19_s16 = int_to_ptr.vmem [resolvable:$true] %s18_s16 }
   0x4   :  { %s1022_s21 = smov 4   ;;  %s1023_s22 = smov [#allocation4]  }
   0x5   :  { %24 = dma.hbm_to_vmem [thread:$0]  %s17_s14, 6144, %s19_s16, [#allocation3], %s1021_s20, %s1021_s20, %s1022_s21  }
   0x6   :  { %s32_s23 = sshll.u32 %s1023_s22, 4  ;;  %s33_s23 = int_to_ptr.vmem [resolvable:$true] %s32_s23 }
   0x7   :  { %35 = dma.hbm_to_vmem [thread:$0]  %s31_s19, 16, %s33_s23, [#allocation5]  }
   0x8   :  { %1016 = dma.done.wait [#allocation3], 6144  }
   0x9   :  { %1017 = vsyncadd [#allocation3], 4294961152 }
   0xa   :  { %1018 = dma.done.wait [#allocation5], 16  }
   0xb   :  { %1019 = vsyncadd [#allocation5], 4294967280  ;;  %v895_v0 = vld [vmem:[#allocation2 + $0x38] sm:$0xff]  ;;  %v894_v4 = vld [vmem:[#allocation2 + $0x30] sm:$0xff] }
   0xc   :  { %v903_v1 = vld [vmem:[#allocation2 + $0x78] sm:$0xff]  ;;  %504 = vmatpush.bf16.msra.mxu0 %v895_v0  ;;  %v902_v5 = vld [vmem:[#allocation2 + $0x70] sm:$0xff]  ;;  %v893_v8 = vld [vmem:[#allocation2 + $0x28] sm:$0xff] }
   0xd   :  { %v911_v2 = vld [vmem:[#allocation2 + $0xb8] sm:$0xff]  ;;  %523 = vmatpush.bf16.msra.mxu1 %v903_v1  ;;  %v910_v6 = vld [vmem:[#allocation2 + $0xb0] sm:$0xff]  ;;  %v901_v9 = vld [vmem:[#allocation2 + $0x68] sm:$0xff] }
   0xe   :  { %v919_v3 = vld [vmem:[#allocation2 + $0xf8] sm:$0xff]  ;;  %542 = vmatpush.bf16.msra.mxu2 %v911_v2  ;;  %v918_v7 = vld [vmem:[#allocation2 + $0xf0] sm:$0xff]  ;;  %v909_v10 = vld [vmem:[#allocation2 + $0xa8] sm:$0xff] }
   0xf   :  { %561 = vmatpush.bf16.msra.mxu3 %v919_v3  ;;  %v917_v11 = vld [vmem:[#allocation2 + $0xe8] sm:$0xff]  ;;  %v892_v12 = vld [vmem:[#allocation2 + $0x20] sm:$0xff]  ;;  %v891_v16 = vld [vmem:[#allocation2 + $0x18] sm:$0xff] }
  0x10   :  { %505 = vmatpush.bf16.msra.mxu0 %v894_v4  ;;  %v900_v13 = vld [vmem:[#allocation2 + $0x60] sm:$0xff]  ;;  %v899_v17 = vld [vmem:[#allocation2 + $0x58] sm:$0xff]  ;;  %v890_v20 = vld [vmem:[#allocation2 + $0x10] sm:$0xff] }
  0x11   :  { %524 = vmatpush.bf16.msra.mxu1 %v902_v5  ;;  %v908_v14 = vld [vmem:[#allocation2 + $0xa0] sm:$0xff]  ;;  %v907_v18 = vld [vmem:[#allocation2 + $0x98] sm:$0xff]  ;;  %v898_v21 = vld [vmem:[#allocation2 + $0x50] sm:$0xff] }
  0x12   :  { %543 = vmatpush.bf16.msra.mxu2 %v910_v6  ;;  %v916_v15 = vld [vmem:[#allocation2 + $0xe0] sm:$0xff]  ;;  %v915_v19 = vld [vmem:[#allocation2 + $0xd8] sm:$0xff]  ;;  %v906_v22 = vld [vmem:[#allocation2 + $0x90] sm:$0xff] }
  0x13   :  { %562 = vmatpush.bf16.msra.mxu3 %v918_v7  ;;  %v914_v23 = vld [vmem:[#allocation2 + $0xd0] sm:$0xff]  ;;  %v889_v24 = vld [vmem:[#allocation2 + $0x8] sm:$0xff]  ;;  %v888_v28 = vld [vmem:[#allocation2] sm:$0xff] }
  0x14   :  { %506 = vmatpush.bf16.msra.mxu0 %v893_v8  ;;  %v897_v25 = vld [vmem:[#allocation2 + $0x48] sm:$0xff]  ;;  %v896_v29 = vld [vmem:[#allocation2 + $0x40] sm:$0xff]  ;;  %v879_v33 = vld [vmem:[%s1128_s0 + $0x14] sm:$0xf0] }
  0x15   :  { %525 = vmatpush.bf16.msra.mxu1 %v901_v9  ;;  %v905_v26 = vld [vmem:[#allocation2 + $0x88] sm:$0xff]  ;;  %v904_v30 = vld [vmem:[#allocation2 + $0x80] sm:$0xff]  ;;  %v640_v35 = vld [vmem:[%s1128_s0 + $0x18] sm:$0xf0] }
  0x16   :  { %544 = vmatpush.bf16.msra.mxu2 %v909_v10  ;;  %v913_v27 = vld [vmem:[#allocation2 + $0xc8] sm:$0xff]  ;;  %v912_v31 = vld [vmem:[#allocation2 + $0xc0] sm:$0xff]  ;;  %v927_v40 = vld [vmem:[#allocation2 + $0x138] sm:$0xff] }
  0x17   :  { %563 = vmatpush.bf16.msra.mxu3 %v917_v11  ;;  %v638_v32 = vld [vmem:[%s1128_s0] sm:$0xf]  ;;  %v876_v34 = vld [vmem:[%s1128_s0 + $0x4] sm:$0xf]  ;;  %v646_v36 = vld [vmem:[%s1128_s0 + $0x8] sm:$0xf] }
  0x18   :  { %507 = vmatpush.bf16.msra.mxu0 %v892_v12  ;;  %v880_v37 = vld [vmem:[%s1128_s0 + $0x1c] sm:$0xf0]  ;;  %v877_v38 = vld [vmem:[%s1128_s0 + $0xc] sm:$0xf]  ;;  %v648_v39 = vld [vmem:[%s1128_s0 + $0x20] sm:$0xf0]  ;;  %v639_v41 = vor.u32 %v879_v33, %v638_v32  ;;  %v643_v42 = vor.u32 %v876_v34, %v640_v35 }
  0x19   :  { %526 = vmatpush.bf16.msra.mxu1 %v900_v13  ;;  %v647_v43 = vor.u32 %v880_v37, %v646_v36  ;;  %v651_v44 = vor.u32 %v877_v38, %v648_v39  ;;  %v935_v45 = vld [vmem:[#allocation2 + $0x178] sm:$0xff]  ;;  %v926_v46 = vld [vmem:[#allocation2 + $0x130] sm:$0xff]  ;;  %v925_v48 = vld [vmem:[#allocation2 + $0x128] sm:$0xff] }
  0x1a   :  { %545 = vmatpush.bf16.msra.mxu2 %v908_v14  ;;  %v934_v47 = vld [vmem:[#allocation2 + $0x170] sm:$0xff]  ;;  %v933_v49 = vld [vmem:[#allocation2 + $0x168] sm:$0xff]  ;;  %v924_v50 = vld [vmem:[#allocation2 + $0x120] sm:$0xff] }
  0x1b   :  { %564 = vmatpush.bf16.msra.mxu3 %v916_v15  ;;  %v932_v51 = vld [vmem:[#allocation2 + $0x160] sm:$0xff]  ;;  %v662_v52 = vld [vmem:[%s1128_s0 + $0x30] sm:$0xf]  ;;  %v885_v53 = vld [vmem:[%s1128_s0 + $0x44] sm:$0xf0] }
  0x1c   :  { %508 = vmatpush.bf16.msra.mxu0 %v891_v16  ;;  %v882_v54 = vld [vmem:[%s1128_s0 + $0x34] sm:$0xf]  ;;  %v664_v55 = vld [vmem:[%s1128_s0 + $0x48] sm:$0xf0]  ;;  %v670_v56 = vld [vmem:[%s1128_s0 + $0x38] sm:$0xf]  ;;  %v663_v61 = vor.u32 %v885_v53, %v662_v52 }
  0x1d   :  { %527 = vmatpush.bf16.msra.mxu1 %v899_v17  ;;  %v886_v57 = vld [vmem:[%s1128_s0 + $0x4c] sm:$0xf0]  ;;  %v883_v58 = vld [vmem:[%s1128_s0 + $0x3c] sm:$0xf]  ;;  %v672_v59 = vld [vmem:[%s1128_s0 + $0x50] sm:$0xf0]  ;;  %v667_v62 = vor.u32 %v882_v54, %v664_v55 }
  0x1e   :  { %546 = vmatpush.bf16.msra.mxu2 %v907_v18  ;;  %v923_v60 = vld [vmem:[#allocation2 + $0x118] sm:$0xff]  ;;  %v671_v63 = vor.u32 %v886_v57, %v670_v56  ;;  %v675_v0 = vor.u32 %v883_v58, %v672_v59  ;;  %v922_v2 = vld [vmem:[#allocation2 + $0x110] sm:$0xff]  ;;  %v921_v4 = vld [vmem:[#allocation2 + $0x108] sm:$0xff] }
  0x1f   :  { %565 = vmatpush.bf16.msra.mxu3 %v915_v19  ;;  %v931_v1 = vld [vmem:[#allocation2 + $0x158] sm:$0xff]  ;;  %v930_v3 = vld [vmem:[#allocation2 + $0x150] sm:$0xff]  ;;  %v929_v5 = vld [vmem:[#allocation2 + $0x148] sm:$0xff] }
  0x20   :  { %509 = vmatpush.bf16.msra.mxu0 %v890_v20  ;;  %v920_v6 = vld [vmem:[#allocation2 + $0x100] sm:$0xff]  ;;  %v654_v8 = vld [vmem:[%s1128_s0 + $0x10] sm:$0xf]  ;;  %v881_v9 = vld [vmem:[%s1128_s0 + $0x24] sm:$0xf0] }
  0x21   :  { %528 = vmatpush.bf16.msra.mxu1 %v898_v21  ;;  %v928_v7 = vld [vmem:[#allocation2 + $0x140] sm:$0xff]  ;;  %v887_v11 = vld [vmem:[%s1128_s0 + $0x54] sm:$0xf0]  ;;  %v878_v12 = vld [vmem:[%s1128_s0 + $0x14] sm:$0xf]  ;;  %v655_v16 = vor.u32 %v881_v9, %v654_v8 }
  0x22   :  { %547 = vmatpush.bf16.msra.mxu2 %v906_v22  ;;  %v678_v10 = vld [vmem:[%s1128_s0 + $0x40] sm:$0xf]  ;;  %v656_v13 = vld [vmem:[%s1128_s0 + $0x28] sm:$0xf0]  ;;  %v884_v14 = vld [vmem:[%s1128_s0 + $0x44] sm:$0xf] }
  0x23   :  { %566 = vmatpush.bf16.msra.mxu3 %v914_v23  ;;  %v680_v15 = vld [vmem:[%s1128_s0 + $0x58] sm:$0xf0]  ;;  %v679_v17 = vor.u32 %v887_v11, %v678_v10  ;;  %v659_v18 = vor.u32 %v878_v12, %v656_v13 }
  0x24   :  { %510 = vmatpush.bf16.msra.mxu0 %v889_v24  ;;  %v683_v19 = vor.u32 %v884_v14, %v680_v15 }
  0x25   :  { %529 = vmatpush.bf16.msra.mxu1 %v897_v25 }
  0x26   :  { %548 = vmatpush.bf16.msra.mxu2 %v905_v26 }
  0x27   :  { %567 = vmatpush.bf16.msra.mxu3 %v913_v27 }
  0x28   :  { %511 = vmatpush.bf16.msra.mxu0 %v888_v28 }
  0x29   :  { %530 = vmatpush.bf16.msra.mxu1 %v896_v29 }
  0x2a   :  { %549 = vmatpush.bf16.msra.mxu2 %v904_v30  ;;  %v967_v30 = vld [vmem:[#allocation4] ss:$0 sm:$0xff] }
  0x2b   :  { %568 = vmatpush.bf16.msra.mxu3 %v912_v31  ;;  %512 = vmatmul.bf16.vlgmr.msra.gmra.mxu0 %v639_v41 }
  0x2c   :  { %580 = vmatpush.bf16.msrb.mxu0 %v927_v40  ;;  %531 = vmatmul.bf16.vlgmr.msra.gmra.mxu1 %v643_v42 }
  0x2d   :  { %550 = vmatmul.bf16.vlgmr.msra.gmra.mxu2 %v647_v43  ;;  %599 = vmatpush.bf16.msrb.mxu1 %v935_v45 }
  0x2e   :  { %947 = vmatpush.bf16.msrb.mxu2 %v927_v40  ;;  %569 = vmatmul.bf16.vlgmr.msra.gmra.mxu3 %v651_v44 }
  0x2f   :  { %955 = vmatpush.bf16.msrb.mxu3 %v935_v45 }
  0x30   :  { %581 = vmatpush.bf16.msrb.mxu0 %v926_v46 }
  0x31   :  { %600 = vmatpush.bf16.msrb.mxu1 %v934_v47 }
  0x32   :  { %948 = vmatpush.bf16.msrb.mxu2 %v926_v46 }
  0x33   :  { %956 = vmatpush.bf16.msrb.mxu3 %v934_v47 }
  0x34   :  { %582 = vmatpush.bf16.msrb.mxu0 %v925_v48 }
  0x35   :  { %601 = vmatpush.bf16.msrb.mxu1 %v933_v49 }
  0x36   :  { %949 = vmatpush.bf16.msrb.mxu2 %v925_v48 }
  0x37   :  { %957 = vmatpush.bf16.msrb.mxu3 %v933_v49 }
  0x38   :  { %583 = vmatpush.bf16.msrb.mxu0 %v924_v50 }
  0x39   :  { %602 = vmatpush.bf16.msrb.mxu1 %v932_v51 }
  0x3a   :  { %950 = vmatpush.bf16.msrb.mxu2 %v924_v50 }
  0x3b   :  { %958 = vmatpush.bf16.msrb.mxu3 %v932_v51  ;;  %517 = vmatmul.bf16.gmra.mxu0 %v663_v61 }
  0x3c   :  { %584 = vmatpush.bf16.msrb.mxu0 %v923_v60  ;;  %536 = vmatmul.bf16.gmra.mxu1 %v667_v62 }
  0x3d   :  { %555 = vmatmul.bf16.gmra.mxu2 %v671_v63  ;;  %603 = vmatpush.bf16.msrb.mxu1 %v931_v1 }
  0x3e   :  { %951 = vmatpush.bf16.msrb.mxu2 %v923_v60  ;;  %574 = vmatmul.bf16.gmra.mxu3 %v675_v0 }
  0x3f   :  { %959 = vmatpush.bf16.msrb.mxu3 %v931_v1 }
  0x40   :  { %585 = vmatpush.bf16.msrb.mxu0 %v922_v2 }
  0x41   :  { %604 = vmatpush.bf16.msrb.mxu1 %v930_v3 }
  0x42   :  { %952 = vmatpush.bf16.msrb.mxu2 %v922_v2 }
  0x43   :  { %960 = vmatpush.bf16.msrb.mxu3 %v930_v3 }
  0x44   :  { %586 = vmatpush.bf16.msrb.mxu0 %v921_v4 }
  0x45   :  { %605 = vmatpush.bf16.msrb.mxu1 %v929_v5 }
  0x46   :  { %953 = vmatpush.bf16.msrb.mxu2 %v921_v4 }
  0x47   :  { %961 = vmatpush.bf16.msrb.mxu3 %v929_v5 }
  0x48   :  { %587 = vmatpush.bf16.msrb.mxu0 %v920_v6 }
  0x49   :  { %606 = vmatpush.bf16.msrb.mxu1 %v928_v7 }
  0x4a   :  { %954 = vmatpush.bf16.msrb.mxu2 %v920_v6 }
  0x4b   :  { %962 = vmatpush.bf16.msrb.mxu3 %v928_v7  ;;  %588 = vmatmul.bf16.vlgmr.msrb.gmra.mxu0 %v655_v16 }
  0x4c   :  { %607 = vmatmul.bf16.vlgmr.msrb.gmra.mxu1 %v659_v18 }
  0x4d   :  { %593 = vmatmul.bf16.vlgmr.msrb.gmra.mxu2 %v679_v17 }
  0x4e   :  { %612 = vmatmul.bf16.vlgmr.msrb.gmra.mxu3 %v683_v19 }
  0xa8   :  { %v513_v20 = vpop.f32.mrf.mxu0 }
  0xa9   :  { %v532_v21 = vpop.f32.mrf.mxu1  ;;  %v514_v31 = vadd.f32 %v967_v30, %v513_v20 }
  0xab   :  { %v533_v36 = vadd.f32 %v532_v21, %v514_v31 }
  0xb0   :  { %v551_v22 = vpop.f32.mrf.mxu2  ;;  %v515_v24 = vpop.f32.mrf.mxu0 }
  0xb1   :  { %v570_v23 = vpop.f32.mrf.mxu3  ;;  %v534_v25 = vpop.f32.mrf.mxu1  ;;  %v516_v37 = vadd.f32 %v967_v30, %v515_v24  ;;  %v552_v39 = vadd.f32 %v551_v22, %v533_v36 }
  0xb3   :  { %v535_v43 = vadd.f32 %v534_v25, %v516_v37  ;;  %v571_v46 = vadd.f32 %v570_v23, %v552_v39 }
  0xb8   :  { %v553_v26 = vpop.f32.mrf.mxu2  ;;  %v518_v28 = vpop.f32.mrf.mxu0 }
  0xb9   :  { %v572_v27 = vpop.f32.mrf.mxu3  ;;  %v537_v29 = vpop.f32.mrf.mxu1  ;;  %v519_v38 = vadd.f32 %v967_v30, %v518_v28  ;;  %v554_v47 = vadd.f32 %v553_v26, %v535_v43 }
  0xbb   :  { %v538_v45 = vadd.f32 %v537_v29, %v519_v38  ;;  %v573_v51 = vadd.f32 %v572_v27, %v554_v47 }
  0xc0   :  { %v556_v32 = vpop.f32.mrf.mxu2  ;;  %v520_v34 = vpop.f32.mrf.mxu0 }
  0xc1   :  { %v575_v33 = vpop.f32.mrf.mxu3  ;;  %v539_v35 = vpop.f32.mrf.mxu1  ;;  %v521_v48 = vadd.f32 %v967_v30, %v520_v34  ;;  %v557_v50 = vadd.f32 %v556_v32, %v538_v45 }
  0xc3   :  { %v540_v53 = vadd.f32 %v539_v35, %v521_v48  ;;  %v576_v58 = vadd.f32 %v575_v33, %v557_v50 }
  0xc8   :  { %v558_v40 = vpop.f32.mrf.mxu2  ;;  %v589_v42 = vpop.f32.mrf.mxu0 }
  0xc9   :  { %v577_v41 = vpop.f32.mrf.mxu3  ;;  %v608_v44 = vpop.f32.mrf.mxu1  ;;  %v590_v49 = vadd.f32 %v589_v42, %v571_v46  ;;  %v559_v59 = vadd.f32 %v558_v40, %v540_v53 }
  0xcb   :  { %v609_v56 = vadd.f32 %v608_v44, %v590_v49  ;;  %v578_v1 = vadd.f32 %v577_v41, %v559_v59 }
  0xcd   :  { %v618_v63 = vmax.f32 %v609_v56, 0.0 }
  0xd0   :  { %v594_v52 = vpop.f32.mrf.mxu2  ;;  %v591_v55 = vpop.f32.mrf.mxu0 }
  0xd1   :  { %v613_v54 = vpop.f32.mrf.mxu3  ;;  %v592_v57 = vadd.f32 %v591_v55, %v573_v51  ;;  %v610_v60 = vpop.f32.mrf.mxu1  ;;  %v595_v62 = vadd.f32 %v594_v52, %v576_v58 }
  0xd3   :  { %v611_v61 = vadd.f32 %v610_v60, %v592_v57  ;;  %v614_v4 = vadd.f32 %v613_v54, %v595_v62 }
  0xd5   :  { %v619_v0 = vmax.f32 %v611_v61, 0.0  ;;  %v620_v8 = vmax.f32 %v614_v4, 0.0 }
  0xd7   :  { %v939_v2 = vpack.c.bf16 %v619_v0, %v618_v63 }
  0xd8   :  { %v596_v3 = vpop.f32.mrf.mxu2 }
  0xd9   :  { %v597_v5 = vadd.f32 %v596_v3, %v578_v1  ;;  %940 = vst [vmem:[%s1131_s3] sm:$0xff] %v939_v2   ;;  %v615_v6 = vpop.f32.mrf.mxu3 }
  0xdb   :  { %v616_v7 = vadd.f32 %v615_v6, %v597_v5 }
  0xdd   :  { %v621_v9 = vmax.f32 %v616_v7, 0.0 }
  0xdf   :  { %v944_v10 = vpack.c.bf16 %v621_v9, %v620_v8 }
  0xe1   :  { %946 = vst [vmem:[%s1131_s3 + $0x8] sm:$0xff] %v944_v10  }
  0xe2   :  { %634 = vsyncpa [#allocation3], 1 }
  0xe3   :  { %635 = vsyncpa [#allocation5], 1 }

// kernel: generator_forward.14
= control target key start
LH: loop header
LB: loop body
LE: loop exit
PB: predicated region body
PF: predicated region fallthrough
CT: control target
= control target key end

     0   :  { %8 = vsyncpa [#allocation3], 0  ;;  %s967_s0 = inlined_call_operand.vmem [shape: bf16[32,640], index: 0, kind: input, shape index: {}]   ;;  %s968_s1 = inlined_call_operand.hbm [shape: bf16[640,128], index: 1, kind: input, shape index: {}]   ;;  %s969_s2 = inlined_call_operand.hbm [shape: f32[1,128], index: 2, kind: input, shape index: {}]   ;;  %s970_s3 = inlined_call_operand.vmem [shape: bf16[32,128], index: 3, kind: output, shape index: {}]  }
   0x1   :  { %s16_s14 = sshll.u32 %s968_s1, 4  ;;  %s17_s14 = int_to_ptr.hbm [resolvable:$true] %s16_s14 }
   0x2   :  { %9 = vsyncpa [#allocation5], 0  ;;  %s871_s15 = smov [#allocation2]   ;;  %s30_s19 = sshll.u32 %s969_s2, 4  ;;  %s31_s19 = int_to_ptr.hbm [resolvable:$true] %s30_s19 }
   0x3   :  { %s18_s16 = sshll.u32 %s871_s15, 4  ;;  %s872_s20 = smov 64   ;;  %s19_s16 = int_to_ptr.vmem [resolvable:$true] %s18_s16 }
   0x4   :  { %s873_s21 = smov 4   ;;  %s874_s22 = smov [#allocation4]  }
   0x5   :  { %24 = dma.hbm_to_vmem [thread:$0]  %s17_s14, 5120, %s19_s16, [#allocation3], %s872_s20, %s872_s20, %s873_s21  }
   0x6   :  { %s32_s23 = sshll.u32 %s874_s22, 4  ;;  %s33_s23 = int_to_ptr.vmem [resolvable:$true] %s32_s23 }
   0x7   :  { %35 = dma.hbm_to_vmem [thread:$0]  %s31_s19, 16, %s33_s23, [#allocation5]  }
   0x8   :  { %867 = dma.done.wait [#allocation3], 5120  }
   0x9   :  { %868 = vsyncadd [#allocation3], 4294962176 }
   0xa   :  { %869 = dma.done.wait [#allocation5], 16  }
   0xb   :  { %870 = vsyncadd [#allocation5], 4294967280  ;;  %v762_v0 = vld [vmem:[#allocation2 + $0x38] sm:$0xff]  ;;  %v761_v4 = vld [vmem:[#allocation2 + $0x30] sm:$0xff] }
   0xc   :  { %v770_v1 = vld [vmem:[#allocation2 + $0x78] sm:$0xff]  ;;  %432 = vmatpush.bf16.msra.mxu0 %v762_v0  ;;  %v769_v5 = vld [vmem:[#allocation2 + $0x70] sm:$0xff]  ;;  %v760_v8 = vld [vmem:[#allocation2 + $0x28] sm:$0xff] }
   0xd   :  { %v778_v2 = vld [vmem:[#allocation2 + $0xb8] sm:$0xff]  ;;  %451 = vmatpush.bf16.msra.mxu1 %v770_v1  ;;  %v777_v6 = vld [vmem:[#allocation2 + $0xb0] sm:$0xff]  ;;  %v768_v9 = vld [vmem:[#allocation2 + $0x68] sm:$0xff] }
   0xe   :  { %v786_v3 = vld [vmem:[#allocation2 + $0xf8] sm:$0xff]  ;;  %470 = vmatpush.bf16.msra.mxu2 %v778_v2  ;;  %v785_v7 = vld [vmem:[#allocation2 + $0xf0] sm:$0xff]  ;;  %v776_v10 = vld [vmem:[#allocation2 + $0xa8] sm:$0xff] }
   0xf   :  { %489 = vmatpush.bf16.msra.mxu3 %v786_v3  ;;  %v784_v11 = vld [vmem:[#allocation2 + $0xe8] sm:$0xff]  ;;  %v759_v12 = vld [vmem:[#allocation2 + $0x20] sm:$0xff]  ;;  %v758_v16 = vld [vmem:[#allocation2 + $0x18] sm:$0xff] }
  0x10   :  { %433 = vmatpush.bf16.msra.mxu0 %v761_v4  ;;  %v767_v13 = vld [vmem:[#allocation2 + $0x60] sm:$0xff]  ;;  %v766_v17 = vld [vmem:[#allocation2 + $0x58] sm:$0xff]  ;;  %v757_v20 = vld [vmem:[#allocation2 + $0x10] sm:$0xff] }
  0x11   :  { %452 = vmatpush.bf16.msra.mxu1 %v769_v5  ;;  %v775_v14 = vld [vmem:[#allocation2 + $0xa0] sm:$0xff]  ;;  %v774_v18 = vld [vmem:[#allocation2 + $0x98] sm:$0xff]  ;;  %v765_v21 = vld [vmem:[#allocation2 + $0x50] sm:$0xff] }
  0x12   :  { %471 = vmatpush.bf16.msra.mxu2 %v777_v6  ;;  %v783_v15 = vld [vmem:[#allocation2 + $0xe0] sm:$0xff]  ;;  %v782_v19 = vld [vmem:[#allocation2 + $0xd8] sm:$0xff]  ;;  %v773_v22 = vld [vmem:[#allocation2 + $0x90] sm:$0xff] }
  0x13   :  { %490 = vmatpush.bf16.msra.mxu3 %v785_v7  ;;  %v781_v23 = vld [vmem:[#allocation2 + $0xd0] sm:$0xff]  ;;  %v756_v24 = vld [vmem:[#allocation2 + $0x8] sm:$0xff]  ;;  %v755_v28 = vld [vmem:[#allocation2] sm:$0xff] }
  0x14   :  { %434 = vmatpush.bf16.msra.mxu0 %v760_v8  ;;  %v764_v25 = vld [vmem:[#allocation2 + $0x48] sm:$0xff]  ;;  %v763_v29 = vld [vmem:[#allocation2 + $0x40] sm:$0xff]  ;;  %v747_v33 = vld [vmem:[%s967_s0 + $0x10] sm:$0xf0] }
  0x15   :  { %453 = vmatpush.bf16.msra.mxu1 %v768_v9  ;;  %v772_v26 = vld [vmem:[#allocation2 + $0x88] sm:$0xff]  ;;  %v771_v30 = vld [vmem:[#allocation2 + $0x80] sm:$0xff]  ;;  %v549_v35 = vld [vmem:[%s967_s0 + $0x14] sm:$0xf0] }
  0x16   :  { %472 = vmatpush.bf16.msra.mxu2 %v776_v10  ;;  %v780_v27 = vld [vmem:[#allocation2 + $0xc8] sm:$0xff]  ;;  %v779_v31 = vld [vmem:[#allocation2 + $0xc0] sm:$0xff]  ;;  %v748_v37 = vld [vmem:[%s967_s0 + $0x18] sm:$0xf0] }
  0x17   :  { %491 = vmatpush.bf16.msra.mxu3 %v784_v11  ;;  %v547_v32 = vld [vmem:[%s967_s0] sm:$0xf]  ;;  %v745_v34 = vld [vmem:[%s967_s0 + $0x4] sm:$0xf]  ;;  %v555_v36 = vld [vmem:[%s967_s0 + $0x8] sm:$0xf] }
  0x18   :  { %435 = vmatpush.bf16.msra.mxu0 %v759_v12  ;;  %v746_v38 = vld [vmem:[%s967_s0 + $0xc] sm:$0xf]  ;;  %v557_v39 = vld [vmem:[%s967_s0 + $0x1c] sm:$0xf0]  ;;  %v794_v40 = vld [vmem:[#allocation2 + $0x138] sm:$0xff]  ;;  %v548_v41 = vor.u32 %v747_v33, %v547_v32  ;;  %v552_v42 = vor.u32 %v745_v34, %v549_v35  ;;  %v556_v43 = vor.u32 %v748_v37, %v555_v36 }
  0x19   :  { %454 = vmatpush.bf16.msra.mxu1 %v767_v13  ;;  %v560_v44 = vor.u32 %v746_v38, %v557_v39  ;;  %v793_v45 = vld [vmem:[#allocation2 + $0x130] sm:$0xff]  ;;  %v792_v46 = vld [vmem:[#allocation2 + $0x128] sm:$0xff]  ;;  %v791_v47 = vld [vmem:[#allocation2 + $0x120] sm:$0xff] }
  0x1a   :  { %473 = vmatpush.bf16.msra.mxu2 %v775_v14  ;;  %v567_v48 = vld [vmem:[%s967_s0 + $0x28] sm:$0xf]  ;;  %v752_v49 = vld [vmem:[%s967_s0 + $0x38] sm:$0xf0]  ;;  %v750_v50 = vld [vmem:[%s967_s0 + $0x2c] sm:$0xf] }
  0x1b   :  { %492 = vmatpush.bf16.msra.mxu3 %v783_v15  ;;  %v569_v51 = vld [vmem:[%s967_s0 + $0x3c] sm:$0xf0]  ;;  %v575_v52 = vld [vmem:[%s967_s0 + $0x30] sm:$0xf]  ;;  %v753_v53 = vld [vmem:[%s967_s0 + $0x40] sm:$0xf0]  ;;  %v568_v57 = vor.u32 %v752_v49, %v567_v48 }
  0x1c   :  { %436 = vmatpush.bf16.msra.mxu0 %v758_v16  ;;  %v751_v54 = vld [vmem:[%s967_s0 + $0x34] sm:$0xf]  ;;  %v577_v55 = vld [vmem:[%s967_s0 + $0x44] sm:$0xf0]  ;;  %v790_v56 = vld [vmem:[#allocation2 + $0x118] sm:$0xff]  ;;  %v572_v58 = vor.u32 %v750_v50, %v569_v51  ;;  %v576_v59 = vor.u32 %v753_v53, %v575_v52 }
  0x1d   :  { %455 = vmatpush.bf16.msra.mxu1 %v766_v17  ;;  %v580_v60 = vor.u32 %v751_v54, %v577_v55  ;;  %v789_v61 = vld [vmem:[#allocation2 + $0x110] sm:$0xff]  ;;  %v788_v62 = vld [vmem:[#allocation2 + $0x108] sm:$0xff]  ;;  %v787_v63 = vld [vmem:[#allocation2 + $0x100] sm:$0xff] }
  0x1e   :  { %474 = vmatpush.bf16.msra.mxu2 %v774_v18  ;;  %v563_v0 = vld [vmem:[%s967_s0 + $0x10] sm:$0xf]  ;;  %v749_v1 = vld [vmem:[%s967_s0 + $0x20] sm:$0xf0]  ;;  %v583_v2 = vld [vmem:[%s967_s0 + $0x38] sm:$0xf] }
  0x1f   :  { %493 = vmatpush.bf16.msra.mxu3 %v782_v19  ;;  %v754_v3 = vld [vmem:[%s967_s0 + $0x48] sm:$0xf0]  ;;  %v564_v4 = vor.u32 %v749_v1, %v563_v0  ;;  %v818_v16 = vld [vmem:[#allocation4] ss:$0 sm:$0xff] }
  0x20   :  { %437 = vmatpush.bf16.msra.mxu0 %v757_v20  ;;  %v584_v5 = vor.u32 %v754_v3, %v583_v2 }
  0x21   :  { %456 = vmatpush.bf16.msra.mxu1 %v765_v21 }
  0x22   :  { %475 = vmatpush.bf16.msra.mxu2 %v773_v22 }
  0x23   :  { %494 = vmatpush.bf16.msra.mxu3 %v781_v23 }
  0x24   :  { %438 = vmatpush.bf16.msra.mxu0 %v756_v24 }
  0x25   :  { %457 = vmatpush.bf16.msra.mxu1 %v764_v25 }
  0x26   :  { %476 = vmatpush.bf16.msra.mxu2 %v772_v26 }
  0x27   :  { %495 = vmatpush.bf16.msra.mxu3 %v780_v27 }
  0x28   :  { %439 = vmatpush.bf16.msra.mxu0 %v755_v28 }
  0x29   :  { %458 = vmatpush.bf16.msra.mxu1 %v763_v29 }
  0x2a   :  { %477 = vmatpush.bf16.msra.mxu2 %v771_v30 }
  0x2b   :  { %496 = vmatpush.bf16.msra.mxu3 %v779_v31  ;;  %440 = vmatmul.bf16.vlgmr.msra.gmra.mxu0 %v548_v41 }
  0x2c   :  { %508 = vmatpush.bf16.msrb.mxu0 %v794_v40  ;;  %459 = vmatmul.bf16.vlgmr.msra.gmra.mxu1 %v552_v42 }
  0x2d   :  { %806 = vmatpush.bf16.msrb.mxu1 %v794_v40  ;;  %478 = vmatmul.bf16.vlgmr.msra.gmra.mxu2 %v556_v43 }
  0x2e   :  { %497 = vmatmul.bf16.vlgmr.msra.gmra.mxu3 %v560_v44 }
  0x30   :  { %509 = vmatpush.bf16.msrb.mxu0 %v793_v45 }
  0x31   :  { %807 = vmatpush.bf16.msrb.mxu1 %v793_v45 }
  0x34   :  { %510 = vmatpush.bf16.msrb.mxu0 %v792_v46 }
  0x35   :  { %808 = vmatpush.bf16.msrb.mxu1 %v792_v46 }
  0x38   :  { %511 = vmatpush.bf16.msrb.mxu0 %v791_v47 }
  0x39   :  { %809 = vmatpush.bf16.msrb.mxu1 %v791_v47 }
  0x3b   :  { %445 = vmatmul.bf16.gmra.mxu0 %v568_v57 }
  0x3c   :  { %512 = vmatpush.bf16.msrb.mxu0 %v790_v56  ;;  %464 = vmatmul.bf16.gmra.mxu1 %v572_v58 }
  0x3d   :  { %810 = vmatpush.bf16.msrb.mxu1 %v790_v56  ;;  %483 = vmatmul.bf16.gmra.mxu2 %v576_v59 }
  0x3e   :  { %502 = vmatmul.bf16.gmra.mxu3 %v580_v60 }
  0x40   :  { %513 = vmatpush.bf16.msrb.mxu0 %v789_v61 }
  0x41   :  { %811 = vmatpush.bf16.msrb.mxu1 %v789_v61 }
  0x44   :  { %514 = vmatpush.bf16.msrb.mxu0 %v788_v62 }
  0x45   :  { %812 = vmatpush.bf16.msrb.mxu1 %v788_v62 }
  0x48   :  { %515 = vmatpush.bf16.msrb.mxu0 %v787_v63 }
  0x49   :  { %813 = vmatpush.bf16.msrb.mxu1 %v787_v63 }
  0x4b   :  { %516 = vmatmul.bf16.vlgmr.msrb.gmra.mxu0 %v564_v4 }
  0x4c   :  { %521 = vmatmul.bf16.vlgmr.msrb.gmra.mxu1 %v584_v5 }
  0xa8   :  { %v441_v6 = vpop.f32.mrf.mxu0 }
  0xa9   :  { %v460_v7 = vpop.f32.mrf.mxu1  ;;  %v442_v20 = vadd.f32 %v818_v16, %v441_v6 }
  0xab   :  { %v461_v25 = vadd.f32 %v460_v7, %v442_v20 }
  0xb0   :  { %v479_v8 = vpop.f32.mrf.mxu2  ;;  %v443_v10 = vpop.f32.mrf.mxu0 }
  0xb1   :  { %v498_v9 = vpop.f32.mrf.mxu3  ;;  %v462_v11 = vpop.f32.mrf.mxu1  ;;  %v444_v23 = vadd.f32 %v818_v16, %v443_v10  ;;  %v480_v30 = vadd.f32 %v479_v8, %v461_v25 }
  0xb3   :  { %v463_v31 = vadd.f32 %v462_v11, %v444_v23  ;;  %v499_v36 = vadd.f32 %v498_v9, %v480_v30 }
  0xb8   :  { %v481_v12 = vpop.f32.mrf.mxu2  ;;  %v446_v13 = vpop.f32.mrf.mxu0 }
  0xb9   :  { %v465_v14 = vpop.f32.mrf.mxu1  ;;  %v500_v15 = vpop.f32.mrf.mxu3  ;;  %v447_v21 = vadd.f32 %v818_v16, %v446_v13  ;;  %v482_v34 = vadd.f32 %v481_v12, %v463_v31 }
  0xbb   :  { %v466_v26 = vadd.f32 %v465_v14, %v447_v21  ;;  %v501_v39 = vadd.f32 %v500_v15, %v482_v34 }
  0xc0   :  { %v484_v17 = vpop.f32.mrf.mxu2  ;;  %v448_v18 = vpop.f32.mrf.mxu0 }
  0xc1   :  { %v467_v19 = vpop.f32.mrf.mxu1  ;;  %v503_v22 = vpop.f32.mrf.mxu3  ;;  %v449_v24 = vadd.f32 %v818_v16, %v448_v18  ;;  %v485_v32 = vadd.f32 %v484_v17, %v466_v26 }
  0xc3   :  { %v468_v33 = vadd.f32 %v467_v19, %v449_v24  ;;  %v504_v37 = vadd.f32 %v503_v22, %v485_v32 }
  0xc8   :  { %v486_v27 = vpop.f32.mrf.mxu2  ;;  %v517_v28 = vpop.f32.mrf.mxu0 }
  0xc9   :  { %v522_v29 = vpop.f32.mrf.mxu1  ;;  %v487_v35 = vadd.f32 %v486_v27, %v468_v33  ;;  %v505_v38 = vpop.f32.mrf.mxu3  ;;  %v518_v41 = vadd.f32 %v517_v28, %v499_v36 }
  0xca   :  { %v523_v42 = vadd.f32 %v522_v29, %v504_v37 }
  0xcb   :  { %v506_v40 = vadd.f32 %v505_v38, %v487_v35  ;;  %v527_v47 = vmax.f32 %v518_v41, 0.0 }
  0xcc   :  { %v529_v48 = vmax.f32 %v523_v42, 0.0 }
  0xd0   :  { %v519_v43 = vpop.f32.mrf.mxu0 }
  0xd1   :  { %v524_v44 = vpop.f32.mrf.mxu1  ;;  %v520_v45 = vadd.f32 %v519_v43, %v501_v39 }
  0xd2   :  { %v525_v46 = vadd.f32 %v524_v44, %v506_v40 }
  0xd3   :  { %v528_v49 = vmax.f32 %v520_v45, 0.0 }
  0xd4   :  { %v530_v50 = vmax.f32 %v525_v46, 0.0 }
  0xd5   :  { %v798_v51 = vpack.c.bf16 %v528_v49, %v527_v47 }
  0xd6   :  { %v803_v52 = vpack.c.bf16 %v530_v50, %v529_v48 }
  0xd7   :  { %799 = vst [vmem:[%s970_s3] sm:$0xff] %v798_v51  }
  0xd8   :  { %805 = vst [vmem:[%s970_s3 + $0x8] sm:$0xff] %v803_v52  }
  0xd9   :  { %543 = vsyncpa [#allocation3], 1 }
  0xda   :  { %544 = vsyncpa [#allocation5], 1 }

// kernel: generator_forward.15
= control target key start
LH: loop header
LB: loop body
LE: loop exit
PB: predicated region body
PF: predicated region fallthrough
CT: control target
= control target key end

     0   :  { %8 = vsyncpa [#allocation3], 0  ;;  %s1434_s0 = inlined_call_operand.vmem [shape: bf16[128,512], index: 0, kind: input, shape index: {}]   ;;  %s1435_s1 = inlined_call_operand.hbm [shape: bf16[512,128], index: 1, kind: input, shape index: {}]   ;;  %s1436_s2 = inlined_call_operand.hbm [shape: f32[1,128], index: 2, kind: input, shape index: {}]   ;;  %s1437_s3 = inlined_call_operand.vmem [shape: bf16[128,128], index: 3, kind: output, shape index: {}]  }
   0x1   :  { %s16_s14 = sshll.u32 %s1435_s1, 4  ;;  %s17_s14 = int_to_ptr.hbm [resolvable:$true] %s16_s14 }
   0x2   :  { %9 = vsyncpa [#allocation5], 0  ;;  %s1170_s15 = smov [#allocation2]   ;;  %s30_s19 = sshll.u32 %s1436_s2, 4  ;;  %s31_s19 = int_to_ptr.hbm [resolvable:$true] %s30_s19 }
   0x3   :  { %s18_s16 = sshll.u32 %s1170_s15, 4  ;;  %s1171_s20 = smov 64   ;;  %s19_s16 = int_to_ptr.vmem [resolvable:$true] %s18_s16 }
   0x4   :  { %s1172_s21 = smov 4   ;;  %s1173_s22 = smov [#allocation4]  }
   0x5   :  { %24 = dma.hbm_to_vmem [thread:$0]  %s17_s14, 4096, %s19_s16, [#allocation3], %s1171_s20, %s1171_s20, %s1172_s21  }
   0x6   :  { %s32_s23 = sshll.u32 %s1173_s22, 4  ;;  %s33_s23 = int_to_ptr.vmem [resolvable:$true] %s32_s23 }
   0x7   :  { %35 = dma.hbm_to_vmem [thread:$0]  %s31_s19, 16, %s33_s23, [#allocation5]  }
   0x8   :  { %1166 = dma.done.wait [#allocation3], 4096  }
   0x9   :  { %1167 = vsyncadd [#allocation3], 4294963200 }
   0xa   :  { %1168 = dma.done.wait [#allocation5], 16  }
   0xb   :  { %1169 = vsyncadd [#allocation5], 4294967280  ;;  %v1041_v0 = vld [vmem:[#allocation2 + $0x38] sm:$0xff]  ;;  %v1040_v4 = vld [vmem:[#allocation2 + $0x30] sm:$0xff] }
   0xc   :  { %v1049_v1 = vld [vmem:[#allocation2 + $0x78] sm:$0xff]  ;;  %496 = vmatpush.bf16.msra.mxu0 %v1041_v0  ;;  %v1048_v5 = vld [vmem:[#allocation2 + $0x70] sm:$0xff]  ;;  %v1039_v8 = vld [vmem:[#allocation2 + $0x28] sm:$0xff] }
   0xd   :  { %v1057_v2 = vld [vmem:[#allocation2 + $0xb8] sm:$0xff]  ;;  %545 = vmatpush.bf16.msra.mxu1 %v1049_v1  ;;  %v1056_v6 = vld [vmem:[#allocation2 + $0xb0] sm:$0xff]  ;;  %v1047_v9 = vld [vmem:[#allocation2 + $0x68] sm:$0xff] }
   0xe   :  { %v1065_v3 = vld [vmem:[#allocation2 + $0xf8] sm:$0xff]  ;;  %594 = vmatpush.bf16.msra.mxu2 %v1057_v2  ;;  %v1064_v7 = vld [vmem:[#allocation2 + $0xf0] sm:$0xff]  ;;  %v1055_v10 = vld [vmem:[#allocation2 + $0xa8] sm:$0xff] }
   0xf   :  { %643 = vmatpush.bf16.msra.mxu3 %v1065_v3  ;;  %v1063_v11 = vld [vmem:[#allocation2 + $0xe8] sm:$0xff]  ;;  %v1038_v12 = vld [vmem:[#allocation2 + $0x20] sm:$0xff]  ;;  %v1037_v16 = vld [vmem:[#allocation2 + $0x18] sm:$0xff] }
  0x10   :  { %497 = vmatpush.bf16.msra.mxu0 %v1040_v4  ;;  %v1046_v13 = vld [vmem:[#allocation2 + $0x60] sm:$0xff]  ;;  %v1045_v17 = vld [vmem:[#allocation2 + $0x58] sm:$0xff]  ;;  %v1036_v20 = vld [vmem:[#allocation2 + $0x10] sm:$0xff] }
  0x11   :  { %546 = vmatpush.bf16.msra.mxu1 %v1048_v5  ;;  %v1054_v14 = vld [vmem:[#allocation2 + $0xa0] sm:$0xff]  ;;  %v1053_v18 = vld [vmem:[#allocation2 + $0x98] sm:$0xff]  ;;  %v1044_v21 = vld [vmem:[#allocation2 + $0x50] sm:$0xff] }
  0x12   :  { %595 = vmatpush.bf16.msra.mxu2 %v1056_v6  ;;  %v1062_v15 = vld [vmem:[#allocation2 + $0xe0] sm:$0xff]  ;;  %v1061_v19 = vld [vmem:[#allocation2 + $0xd8] sm:$0xff]  ;;  %v1052_v22 = vld [vmem:[#allocation2 + $0x90] sm:$0xff] }
  0x13   :  { %644 = vmatpush.bf16.msra.mxu3 %v1064_v7  ;;  %v1060_v23 = vld [vmem:[#allocation2 + $0xd0] sm:$0xff]  ;;  %v1035_v24 = vld [vmem:[#allocation2 + $0x8] sm:$0xff]  ;;  %v1034_v28 = vld [vmem:[#allocation2] sm:$0xff] }
  0x14   :  { %498 = vmatpush.bf16.msra.mxu0 %v1039_v8  ;;  %v1043_v25 = vld [vmem:[#allocation2 + $0x48] sm:$0xff]  ;;  %v1042_v29 = vld [vmem:[#allocation2 + $0x40] sm:$0xff]  ;;  %v1004_v33 = vld [vmem:[%s1434_s0 + $0xc] sm:$0xf0] }
  0x15   :  { %547 = vmatpush.bf16.msra.mxu1 %v1047_v9  ;;  %v1051_v26 = vld [vmem:[#allocation2 + $0x88] sm:$0xff]  ;;  %v1050_v30 = vld [vmem:[#allocation2 + $0x80] sm:$0xff]  ;;  %v750_v35 = vld [vmem:[%s1434_s0 + $0x10] sm:$0xf0] }
  0x16   :  { %596 = vmatpush.bf16.msra.mxu2 %v1055_v10  ;;  %v1059_v27 = vld [vmem:[#allocation2 + $0xc8] sm:$0xff]  ;;  %v1058_v31 = vld [vmem:[#allocation2 + $0xc0] sm:$0xff]  ;;  %v1005_v37 = vld [vmem:[%s1434_s0 + $0x14] sm:$0xf0] }
  0x17   :  { %645 = vmatpush.bf16.msra.mxu3 %v1063_v11  ;;  %v748_v32 = vld [vmem:[%s1434_s0] sm:$0xf]  ;;  %v1002_v34 = vld [vmem:[%s1434_s0 + $0x4] sm:$0xf]  ;;  %v756_v36 = vld [vmem:[%s1434_s0 + $0x8] sm:$0xf] }
  0x18   :  { %499 = vmatpush.bf16.msra.mxu0 %v1038_v12  ;;  %v1003_v38 = vld [vmem:[%s1434_s0 + $0xc] sm:$0xf]  ;;  %v758_v39 = vld [vmem:[%s1434_s0 + $0x18] sm:$0xf0]  ;;  %v749_v40 = vor.u32 %v1004_v33, %v748_v32  ;;  %v753_v41 = vor.u32 %v1002_v34, %v750_v35  ;;  %v757_v42 = vor.u32 %v1005_v37, %v756_v36  ;;  %v764_v44 = vld [vmem:[%s1434_s0 + $0x20] sm:$0xf] }
  0x19   :  { %548 = vmatpush.bf16.msra.mxu1 %v1046_v13  ;;  %v761_v43 = vor.u32 %v1003_v38, %v758_v39  ;;  %v1008_v45 = vld [vmem:[%s1434_s0 + $0x2c] sm:$0xf0]  ;;  %v1006_v46 = vld [vmem:[%s1434_s0 + $0x24] sm:$0xf]  ;;  %v766_v47 = vld [vmem:[%s1434_s0 + $0x30] sm:$0xf0] }
  0x1a   :  { %597 = vmatpush.bf16.msra.mxu2 %v1054_v14  ;;  %v772_v48 = vld [vmem:[%s1434_s0 + $0x28] sm:$0xf]  ;;  %v1009_v49 = vld [vmem:[%s1434_s0 + $0x34] sm:$0xf0]  ;;  %v1007_v50 = vld [vmem:[%s1434_s0 + $0x2c] sm:$0xf]  ;;  %v765_v52 = vor.u32 %v1008_v45, %v764_v44  ;;  %v769_v53 = vor.u32 %v1006_v46, %v766_v47 }
  0x1b   :  { %646 = vmatpush.bf16.msra.mxu3 %v1062_v15  ;;  %v774_v51 = vld [vmem:[%s1434_s0 + $0x38] sm:$0xf0]  ;;  %v773_v54 = vor.u32 %v1009_v49, %v772_v48  ;;  %v780_v56 = vld [vmem:[%s1434_s0 + $0x40] sm:$0xf]  ;;  %v1012_v57 = vld [vmem:[%s1434_s0 + $0x4c] sm:$0xf0] }
  0x1c   :  { %500 = vmatpush.bf16.msra.mxu0 %v1037_v16  ;;  %v777_v55 = vor.u32 %v1007_v50, %v774_v51  ;;  %v1010_v58 = vld [vmem:[%s1434_s0 + $0x44] sm:$0xf]  ;;  %v782_v59 = vld [vmem:[%s1434_s0 + $0x50] sm:$0xf0]  ;;  %v788_v60 = vld [vmem:[%s1434_s0 + $0x48] sm:$0xf]  ;;  %v781_v0 = vor.u32 %v1012_v57, %v780_v56 }
  0x1d   :  { %549 = vmatpush.bf16.msra.mxu1 %v1045_v17  ;;  %v1013_v61 = vld [vmem:[%s1434_s0 + $0x54] sm:$0xf0]  ;;  %v1011_v62 = vld [vmem:[%s1434_s0 + $0x4c] sm:$0xf]  ;;  %v790_v63 = vld [vmem:[%s1434_s0 + $0x58] sm:$0xf0]  ;;  %v785_v1 = vor.u32 %v1010_v58, %v782_v59 }
  0x1e   :  { %598 = vmatpush.bf16.msra.mxu2 %v1053_v18  ;;  %v789_v2 = vor.u32 %v1013_v61, %v788_v60  ;;  %v793_v3 = vor.u32 %v1011_v62, %v790_v63  ;;  %v796_v4 = vld [vmem:[%s1434_s0 + $0x60] sm:$0xf]  ;;  %v1016_v5 = vld [vmem:[%s1434_s0 + $0x6c] sm:$0xf0]  ;;  %v1014_v6 = vld [vmem:[%s1434_s0 + $0x64] sm:$0xf] }
  0x1f   :  { %647 = vmatpush.bf16.msra.mxu3 %v1061_v19  ;;  %v798_v7 = vld [vmem:[%s1434_s0 + $0x70] sm:$0xf0]  ;;  %v804_v8 = vld [vmem:[%s1434_s0 + $0x68] sm:$0xf]  ;;  %v1017_v9 = vld [vmem:[%s1434_s0 + $0x74] sm:$0xf0]  ;;  %v797_v12 = vor.u32 %v1016_v5, %v796_v4 }
  0x20   :  { %501 = vmatpush.bf16.msra.mxu0 %v1036_v20  ;;  %v1015_v10 = vld [vmem:[%s1434_s0 + $0x6c] sm:$0xf]  ;;  %v806_v11 = vld [vmem:[%s1434_s0 + $0x78] sm:$0xf0]  ;;  %v801_v13 = vor.u32 %v1014_v6, %v798_v7  ;;  %v805_v14 = vor.u32 %v1017_v9, %v804_v8  ;;  %v812_v16 = vld [vmem:[%s1434_s0 + $0x80] sm:$0xf] }
  0x21   :  { %550 = vmatpush.bf16.msra.mxu1 %v1044_v21  ;;  %v809_v15 = vor.u32 %v1015_v10, %v806_v11  ;;  %v1020_v17 = vld [vmem:[%s1434_s0 + $0x8c] sm:$0xf0]  ;;  %v1018_v18 = vld [vmem:[%s1434_s0 + $0x84] sm:$0xf]  ;;  %v814_v19 = vld [vmem:[%s1434_s0 + $0x90] sm:$0xf0] }
  0x22   :  { %599 = vmatpush.bf16.msra.mxu2 %v1052_v22  ;;  %v820_v20 = vld [vmem:[%s1434_s0 + $0x88] sm:$0xf]  ;;  %v1021_v21 = vld [vmem:[%s1434_s0 + $0x94] sm:$0xf0]  ;;  %v1019_v22 = vld [vmem:[%s1434_s0 + $0x8c] sm:$0xf] }
  0x23   :  { %648 = vmatpush.bf16.msra.mxu3 %v1060_v23  ;;  %v822_v23 = vld [vmem:[%s1434_s0 + $0x98] sm:$0xf0]  ;;  %v836_v32 = vld [vmem:[%s1434_s0 + $0xa8] sm:$0xf]  ;;  %v1025_v33 = vld [vmem:[%s1434_s0 + $0xb4] sm:$0xf0] }
  0x24   :  { %502 = vmatpush.bf16.msra.mxu0 %v1035_v24  ;;  %v813_v24 = vor.u32 %v1020_v17, %v812_v16  ;;  %v1023_v34 = vld [vmem:[%s1434_s0 + $0xac] sm:$0xf]  ;;  %v838_v35 = vld [vmem:[%s1434_s0 + $0xb8] sm:$0xf0]  ;;  %v837_v38 = vor.u32 %v1025_v33, %v836_v32  ;;  %v852_v44 = vld [vmem:[%s1434_s0 + $0xc8] sm:$0xf] }
  0x25   :  { %551 = vmatpush.bf16.msra.mxu1 %v1043_v25  ;;  %v817_v25 = vor.u32 %v1018_v18, %v814_v19  ;;  %v841_v39 = vor.u32 %v1023_v34, %v838_v35  ;;  %v1029_v45 = vld [vmem:[%s1434_s0 + $0xd4] sm:$0xf0]  ;;  %v1027_v46 = vld [vmem:[%s1434_s0 + $0xcc] sm:$0xf]  ;;  %v854_v47 = vld [vmem:[%s1434_s0 + $0xd8] sm:$0xf0] }
  0x26   :  { %600 = vmatpush.bf16.msra.mxu2 %v1051_v26  ;;  %v821_v26 = vor.u32 %v1021_v21, %v820_v20  ;;  %v853_v50 = vor.u32 %v1029_v45, %v852_v44  ;;  %v857_v51 = vor.u32 %v1027_v46, %v854_v47  ;;  %v868_v56 = vld [vmem:[%s1434_s0 + $0xe8] sm:$0xf]  ;;  %v1033_v57 = vld [vmem:[%s1434_s0 + $0xf4] sm:$0xf0]  ;;  %v1031_v58 = vld [vmem:[%s1434_s0 + $0xec] sm:$0xf] }
  0x27   :  { %649 = vmatpush.bf16.msra.mxu3 %v1059_v27  ;;  %v825_v27 = vor.u32 %v1019_v22, %v822_v23  ;;  %v870_v59 = vld [vmem:[%s1434_s0 + $0xf8] sm:$0xf0]  ;;  %v869_v62 = vor.u32 %v1033_v57, %v868_v56 }
  0x28   :  { %503 = vmatpush.bf16.msra.mxu0 %v1034_v28  ;;  %v828_v28 = vld [vmem:[%s1434_s0 + $0xa0] sm:$0xf]  ;;  %v873_v63 = vor.u32 %v1031_v58, %v870_v59 }
  0x29   :  { %552 = vmatpush.bf16.msra.mxu1 %v1042_v29  ;;  %v1024_v29 = vld [vmem:[%s1434_s0 + $0xac] sm:$0xf0] }
  0x2a   :  { %601 = vmatpush.bf16.msra.mxu2 %v1050_v30  ;;  %v1022_v30 = vld [vmem:[%s1434_s0 + $0xa4] sm:$0xf]  ;;  %v829_v36 = vor.u32 %v1024_v29, %v828_v28 }
  0x2b   :  { %650 = vmatpush.bf16.msra.mxu3 %v1058_v31  ;;  %504 = vmatmul.bf16.vlgmr.msra.gmra.mxu0 %v749_v40  ;;  %v830_v31 = vld [vmem:[%s1434_s0 + $0xb0] sm:$0xf0]  ;;  %v844_v40 = vld [vmem:[%s1434_s0 + $0xc0] sm:$0xf] }
  0x2c   :  { %553 = vmatmul.bf16.vlgmr.msra.gmra.mxu1 %v753_v41  ;;  %v833_v37 = vor.u32 %v1022_v30, %v830_v31  ;;  %v1028_v41 = vld [vmem:[%s1434_s0 + $0xcc] sm:$0xf0] }
  0x2d   :  { %602 = vmatmul.bf16.vlgmr.msra.gmra.mxu2 %v757_v42  ;;  %v1026_v42 = vld [vmem:[%s1434_s0 + $0xc4] sm:$0xf]  ;;  %v845_v48 = vor.u32 %v1028_v41, %v844_v40 }
  0x2e   :  { %651 = vmatmul.bf16.vlgmr.msra.gmra.mxu3 %v761_v43  ;;  %v846_v43 = vld [vmem:[%s1434_s0 + $0xd0] sm:$0xf0] }
  0x2f   :  { %v849_v49 = vor.u32 %v1026_v42, %v846_v43 }
  0x3b   :  { %509 = vmatmul.bf16.gmra.mxu0 %v765_v52  ;;  %v860_v52 = vld [vmem:[%s1434_s0 + $0xe0] sm:$0xf] }
  0x3c   :  { %558 = vmatmul.bf16.gmra.mxu1 %v769_v53  ;;  %v1032_v53 = vld [vmem:[%s1434_s0 + $0xec] sm:$0xf0] }
  0x3d   :  { %607 = vmatmul.bf16.gmra.mxu2 %v773_v54  ;;  %v1030_v54 = vld [vmem:[%s1434_s0 + $0xe4] sm:$0xf]  ;;  %v861_v60 = vor.u32 %v1032_v53, %v860_v52 }
  0x3e   :  { %656 = vmatmul.bf16.gmra.mxu3 %v777_v55  ;;  %v862_v55 = vld [vmem:[%s1434_s0 + $0xf0] sm:$0xf0] }
  0x3f   :  { %v865_v61 = vor.u32 %v1030_v54, %v862_v55 }
  0x4b   :  { %514 = vmatmul.bf16.gmra.mxu0 %v781_v0  ;;  %v1392_v0 = vld [vmem:[#allocation4] ss:$0 sm:$0xff] }
  0x4c   :  { %563 = vmatmul.bf16.gmra.mxu1 %v785_v1 }
  0x4d   :  { %612 = vmatmul.bf16.gmra.mxu2 %v789_v2 }
  0x4e   :  { %661 = vmatmul.bf16.gmra.mxu3 %v793_v3 }
  0x5b   :  { %519 = vmatmul.bf16.gmra.mxu0 %v797_v12 }
  0x5c   :  { %568 = vmatmul.bf16.gmra.mxu1 %v801_v13 }
  0x5d   :  { %617 = vmatmul.bf16.gmra.mxu2 %v805_v14 }
  0x5e   :  { %666 = vmatmul.bf16.gmra.mxu3 %v809_v15 }
  0x6b   :  { %524 = vmatmul.bf16.gmra.mxu0 %v813_v24 }
  0x6c   :  { %573 = vmatmul.bf16.gmra.mxu1 %v817_v25 }
  0x6d   :  { %622 = vmatmul.bf16.gmra.mxu2 %v821_v26 }
  0x6e   :  { %671 = vmatmul.bf16.gmra.mxu3 %v825_v27 }
  0x7b   :  { %529 = vmatmul.bf16.gmra.mxu0 %v829_v36 }
  0x7c   :  { %578 = vmatmul.bf16.gmra.mxu1 %v833_v37 }
  0x7d   :  { %627 = vmatmul.bf16.gmra.mxu2 %v837_v38 }
  0x7e   :  { %676 = vmatmul.bf16.gmra.mxu3 %v841_v39 }
  0x8b   :  { %534 = vmatmul.bf16.gmra.mxu0 %v845_v48 }
  0x8c   :  { %583 = vmatmul.bf16.gmra.mxu1 %v849_v49 }
  0x8d   :  { %632 = vmatmul.bf16.gmra.mxu2 %v853_v50 }
  0x8e   :  { %681 = vmatmul.bf16.gmra.mxu3 %v857_v51 }
  0x9b   :  { %539 = vmatmul.bf16.gmra.mxu0 %v861_v60 }
  0x9c   :  { %588 = vmatmul.bf16.gmra.mxu1 %v865_v61 }
  0x9d   :  { %637 = vmatmul.bf16.gmra.mxu2 %v869_v62 }
  0x9e   :  { %686 = vmatmul.bf16.gmra.mxu3 %v873_v63 }
  0xa8   :  { %v505_v1 = vpop.f32.mrf.mxu0 }
  0xa9   :  { %v554_v2 = vpop.f32.mrf.mxu1  ;;  %v506_v3 = vadd.f32 %v1392_v0, %v505_v1 }
  0xab   :  { %v555_v6 = vadd.f32 %v554_v2, %v506_v3 }
  0xb0   :  { %v603_v4 = vpop.f32.mrf.mxu2  ;;  %v507_v7 = vpop.f32.mrf.mxu0 }
  0xb1   :  { %v652_v5 = vpop.f32.mrf.mxu3  ;;  %v556_v8 = vpop.f32.mrf.mxu1  ;;  %v508_v9 = vadd.f32 %v1392_v0, %v507_v7  ;;  %v604_v10 = vadd.f32 %v603_v4, %v555_v6 }
  0xb3   :  { %v557_v11 = vadd.f32 %v556_v8, %v508_v9  ;;  %v653_v14 = vadd.f32 %v652_v5, %v604_v10 }
  0xb5   :  { %v692_v19 = vmax.f32 %v653_v14, 0.0 }
  0xb8   :  { %v605_v12 = vpop.f32.mrf.mxu2  ;;  %v510_v16 = vpop.f32.mrf.mxu0 }
  0xb9   :  { %v654_v13 = vpop.f32.mrf.mxu3  ;;  %v606_v15 = vadd.f32 %v605_v12, %v557_v11  ;;  %v559_v17 = vpop.f32.mrf.mxu1  ;;  %v511_v21 = vadd.f32 %v1392_v0, %v510_v16 }
  0xbb   :  { %v655_v18 = vadd.f32 %v654_v13, %v606_v15  ;;  %v560_v25 = vadd.f32 %v559_v17, %v511_v21 }
  0xbd   :  { %v693_v20 = vmax.f32 %v655_v18, 0.0 }
  0xbf   :  { %v1069_v22 = vpack.c.bf16 %v693_v20, %v692_v19 }
  0xc0   :  { %v608_v23 = vpop.f32.mrf.mxu2  ;;  %v512_v26 = vpop.f32.mrf.mxu0 }
  0xc1   :  { %v657_v24 = vpop.f32.mrf.mxu3  ;;  %1070 = vst [vmem:[%s1437_s3] sm:$0xff] %v1069_v22   ;;  %v561_v27 = vpop.f32.mrf.mxu1  ;;  %v513_v28 = vadd.f32 %v1392_v0, %v512_v26  ;;  %v609_v29 = vadd.f32 %v608_v23, %v560_v25 }
  0xc3   :  { %v562_v30 = vadd.f32 %v561_v27, %v513_v28  ;;  %v658_v33 = vadd.f32 %v657_v24, %v609_v29 }
  0xc5   :  { %v694_v38 = vmax.f32 %v658_v33, 0.0 }
  0xc8   :  { %v610_v31 = vpop.f32.mrf.mxu2  ;;  %v515_v35 = vpop.f32.mrf.mxu0 }
  0xc9   :  { %v659_v32 = vpop.f32.mrf.mxu3  ;;  %v611_v34 = vadd.f32 %v610_v31, %v562_v30  ;;  %v564_v36 = vpop.f32.mrf.mxu1  ;;  %v516_v40 = vadd.f32 %v1392_v0, %v515_v35 }
  0xcb   :  { %v660_v37 = vadd.f32 %v659_v32, %v611_v34  ;;  %v565_v44 = vadd.f32 %v564_v36, %v516_v40 }
  0xcd   :  { %v695_v39 = vmax.f32 %v660_v37, 0.0 }
  0xcf   :  { %v1074_v41 = vpack.c.bf16 %v695_v39, %v694_v38 }
  0xd0   :  { %v613_v42 = vpop.f32.mrf.mxu2  ;;  %v517_v45 = vpop.f32.mrf.mxu0 }
  0xd1   :  { %v662_v43 = vpop.f32.mrf.mxu3  ;;  %1106 = vst [vmem:[%s1437_s3 + $0x8] sm:$0xff] %v1074_v41   ;;  %v566_v46 = vpop.f32.mrf.mxu1  ;;  %v518_v47 = vadd.f32 %v1392_v0, %v517_v45  ;;  %v614_v48 = vadd.f32 %v613_v42, %v565_v44 }
  0xd3   :  { %v567_v49 = vadd.f32 %v566_v46, %v518_v47  ;;  %v663_v52 = vadd.f32 %v662_v43, %v614_v48 }
  0xd5   :  { %v696_v57 = vmax.f32 %v663_v52, 0.0 }
  0xd8   :  { %v615_v50 = vpop.f32.mrf.mxu2  ;;  %v520_v54 = vpop.f32.mrf.mxu0 }
  0xd9   :  { %v664_v51 = vpop.f32.mrf.mxu3  ;;  %v616_v53 = vadd.f32 %v615_v50, %v567_v49  ;;  %v569_v55 = vpop.f32.mrf.mxu1  ;;  %v521_v59 = vadd.f32 %v1392_v0, %v520_v54 }
  0xdb   :  { %v665_v56 = vadd.f32 %v664_v51, %v616_v53  ;;  %v570_v63 = vadd.f32 %v569_v55, %v521_v59 }
  0xdd   :  { %v697_v58 = vmax.f32 %v665_v56, 0.0 }
  0xdf   :  { %v1079_v60 = vpack.c.bf16 %v697_v58, %v696_v57 }
  0xe0   :  { %v618_v61 = vpop.f32.mrf.mxu2  ;;  %v522_v1 = vpop.f32.mrf.mxu0 }
  0xe1   :  { %v667_v62 = vpop.f32.mrf.mxu3  ;;  %1107 = vst [vmem:[%s1437_s3 + $0x10] sm:$0xff] %v1079_v60   ;;  %v571_v2 = vpop.f32.mrf.mxu1  ;;  %v523_v3 = vadd.f32 %v1392_v0, %v522_v1  ;;  %v619_v4 = vadd.f32 %v618_v61, %v570_v63 }
  0xe3   :  { %v572_v5 = vadd.f32 %v571_v2, %v523_v3  ;;  %v668_v8 = vadd.f32 %v667_v62, %v619_v4 }
  0xe5   :  { %v698_v13 = vmax.f32 %v668_v8, 0.0 }
  0xe8   :  { %v620_v6 = vpop.f32.mrf.mxu2  ;;  %v525_v10 = vpop.f32.mrf.mxu0 }
  0xe9   :  { %v669_v7 = vpop.f32.mrf.mxu3  ;;  %v621_v9 = vadd.f32 %v620_v6, %v572_v5  ;;  %v574_v11 = vpop.f32.mrf.mxu1  ;;  %v526_v15 = vadd.f32 %v1392_v0, %v525_v10 }
  0xeb   :  { %v670_v12 = vadd.f32 %v669_v7, %v621_v9  ;;  %v575_v19 = vadd.f32 %v574_v11, %v526_v15 }
  0xed   :  { %v699_v14 = vmax.f32 %v670_v12, 0.0 }
  0xef   :  { %v1084_v16 = vpack.c.bf16 %v699_v14, %v698_v13 }
  0xf0   :  { %v623_v17 = vpop.f32.mrf.mxu2  ;;  %v527_v20 = vpop.f32.mrf.mxu0 }
  0xf1   :  { %v672_v18 = vpop.f32.mrf.mxu3  ;;  %1108 = vst [vmem:[%s1437_s3 + $0x18] sm:$0xff] %v1084_v16   ;;  %v576_v21 = vpop.f32.mrf.mxu1  ;;  %v528_v22 = vadd.f32 %v1392_v0, %v527_v20  ;;  %v624_v23 = vadd.f32 %v623_v17, %v575_v19 }
  0xf3   :  { %v577_v24 = vadd.f32 %v576_v21, %v528_v22  ;;  %v673_v27 = vadd.f32 %v672_v18, %v624_v23 }
  0xf5   :  { %v700_v32 = vmax.f32 %v673_v27, 0.0 }
  0xf8   :  { %v625_v25 = vpop.f32.mrf.mxu2  ;;  %v530_v29 = vpop.f32.mrf.mxu0 }
  0xf9   :  { %v674_v26 = vpop.f32.mrf.mxu3  ;;  %v626_v28 = vadd.f32 %v625_v25, %v577_v24  ;;  %v579_v30 = vpop.f32.mrf.mxu1  ;;  %v531_v34 = vadd.f32 %v1392_v0, %v530_v29 }
  0xfb   :  { %v675_v31 = vadd.f32 %v674_v26, %v626_v28  ;;  %v580_v38 = vadd.f32 %v579_v30, %v531_v34 }
  0xfd   :  { %v701_v33 = vmax.f32 %v675_v31, 0.0 }
  0xff   :  { %v1089_v35 = vpack.c.bf16 %v701_v33, %v700_v32 }
 0x100   :  { %v628_v36 = vpop.f32.mrf.mxu2  ;;  %v532_v39 = vpop.f32.mrf.mxu0 }
 0x101   :  { %v677_v37 = vpop.f32.mrf.mxu3  ;;  %1109 = vst [vmem:[%s1437_s3 + $0x20] sm:$0xff] %v1089_v35   ;;  %v581_v40 = vpop.f32.mrf.mxu1  ;;  %v533_v41 = vadd.f32 %v1392_v0, %v532_v39  ;;  %v629_v42 = vadd.f32 %v628_v36, %v580_v38 }
 0x103   :  { %v582_v43 = vadd.f32 %v581_v40, %v533_v41  ;;  %v678_v46 = vadd.f32 %v677_v37, %v629_v42 }
 0x105   :  { %v702_v51 = vmax.f32 %v678_v46, 0.0 }
 0x108   :  { %v630_v44 = vpop.f32.mrf.mxu2  ;;  %v535_v48 = vpop.f32.mrf.mxu0 }
 0x109   :  { %v679_v45 = vpop.f32.mrf.mxu3  ;;  %v631_v47 = vadd.f32 %v630_v44, %v582_v43  ;;  %v584_v49 = vpop.f32.mrf.mxu1  ;;  %v536_v53 = vadd.f32 %v1392_v0, %v535_v48 }
 0x10b   :  { %v680_v50 = vadd.f32 %v679_v45, %v631_v47  ;;  %v585_v57 = vadd.f32 %v584_v49, %v536_v53 }
 0x10d   :  { %v703_v52 = vmax.f32 %v680_v50, 0.0 }
 0x10f   :  { %v1094_v54 = vpack.c.bf16 %v703_v52, %v702_v51 }
 0x110   :  { %v633_v55 = vpop.f32.mrf.mxu2  ;;  %v537_v58 = vpop.f32.mrf.mxu0 }
 0x111   :  { %v682_v56 = vpop.f32.mrf.mxu3  ;;  %1110 = vst [vmem:[%s1437_s3 + $0x28] sm:$0xff] %v1094_v54   ;;  %v586_v59 = vpop.f32.mrf.mxu1  ;;  %v538_v60 = vadd.f32 %v1392_v0, %v537_v58  ;;  %v634_v61 = vadd.f32 %v633_v55, %v585_v57 }
 0x113   :  { %v587_v62 = vadd.f32 %v586_v59, %v538_v60  ;;  %v683_v2 = vadd.f32 %v682_v56, %v634_v61 }
 0x115   :  { %v704_v7 = vmax.f32 %v683_v2, 0.0 }
 0x118   :  { %v635_v63 = vpop.f32.mrf.mxu2  ;;  %v540_v4 = vpop.f32.mrf.mxu0 }
 0x119   :  { %v684_v1 = vpop.f32.mrf.mxu3  ;;  %v636_v3 = vadd.f32 %v635_v63, %v587_v62  ;;  %v589_v6 = vpop.f32.mrf.mxu1  ;;  %v541_v9 = vadd.f32 %v1392_v0, %v540_v4 }
 0x11b   :  { %v685_v5 = vadd.f32 %v684_v1, %v636_v3  ;;  %v590_v13 = vadd.f32 %v589_v6, %v541_v9 }
 0x11d   :  { %v705_v8 = vmax.f32 %v685_v5, 0.0 }
 0x11f   :  { %v1099_v10 = vpack.c.bf16 %v705_v8, %v704_v7 }
 0x120   :  { %v638_v11 = vpop.f32.mrf.mxu2  ;;  %v542_v14 = vpop.f32.mrf.mxu0 }
 0x121   :  { %v687_v12 = vpop.f32.mrf.mxu3  ;;  %1111 = vst [vmem:[%s1437_s3 + $0x30] sm:$0xff] %v1099_v10   ;;  %v543_v15 = vadd.f32 %v1392_v0, %v542_v14  ;;  %v639_v16 = vadd.f32 %v638_v11, %v590_v13  ;;  %v591_v17 = vpop.f32.mrf.mxu1 }
 0x123   :  { %v592_v18 = vadd.f32 %v591_v17, %v543_v15  ;;  %v688_v20 = vadd.f32 %v687_v12, %v639_v16 }
 0x125   :  { %v706_v24 = vmax.f32 %v688_v20, 0.0 }
 0x128   :  { %v640_v19 = vpop.f32.mrf.mxu2 }
 0x129   :  { %v641_v21 = vadd.f32 %v640_v19, %v592_v18  ;;  %v689_v22 = vpop.f32.mrf.mxu3 }
 0x12b   :  { %v690_v23 = vadd.f32 %v689_v22, %v641_v21 }
 0x12d   :  { %v707_v25 = vmax.f32 %v690_v23, 0.0 }
 0x12f   :  { %v1104_v26 = vpack.c.bf16 %v707_v25, %v706_v24 }
 0x131   :  { %1112 = vst [vmem:[%s1437_s3 + $0x38] sm:$0xff] %v1104_v26  }
 0x132   :  { %744 = vsyncpa [#allocation3], 1 }
 0x133   :  { %745 = vsyncpa [#allocation5], 1 }

// kernel: generator_forward.16
= control target key start
LH: loop header
LB: loop body
LE: loop exit
PB: predicated region body
PF: predicated region fallthrough
CT: control target
= control target key end

     0   :  { %9 = vsyncpa [#allocation3], 0  ;;  %s1343_s0 = inlined_call_operand.vmem [shape: bf16[128,384], index: 0, kind: input, shape index: {}]   ;;  %s1344_s1 = inlined_call_operand.hbm [shape: bf16[384,128], index: 1, kind: input, shape index: {}]   ;;  %s1345_s2 = inlined_call_operand.hbm [shape: f32[1,128], index: 2, kind: input, shape index: {}]   ;;  %s1346_s3 = inlined_call_operand.vmem [shape: bf16[128,128], index: 3, kind: input, shape index: {}]   ;;  %s1347_s4 = inlined_call_operand.vmem [shape: bf16[128,128], index: 4, kind: output, shape index: {}]  }
   0x1   :  { %s17_s17 = sshll.u32 %s1344_s1, 4  ;;  %s18_s17 = int_to_ptr.hbm [resolvable:$true] %s17_s17 }
   0x2   :  { %10 = vsyncpa [#allocation5], 0  ;;  %s1043_s18 = smov [#allocation2]   ;;  %s31_s22 = sshll.u32 %s1345_s2, 4  ;;  %s32_s22 = int_to_ptr.hbm [resolvable:$true] %s31_s22 }
   0x3   :  { %s19_s19 = sshll.u32 %s1043_s18, 4  ;;  %s1044_s23 = smov 64   ;;  %s20_s19 = int_to_ptr.vmem [resolvable:$true] %s19_s19 }
   0x4   :  { %s1045_s24 = smov 4   ;;  %s1046_s25 = smov [#allocation4]  }
   0x5   :  { %25 = dma.hbm_to_vmem [thread:$0]  %s18_s17, 3072, %s20_s19, [#allocation3], %s1044_s23, %s1044_s23, %s1045_s24  }
   0x6   :  { %s33_s26 = sshll.u32 %s1046_s25, 4  ;;  %s34_s26 = int_to_ptr.vmem [resolvable:$true] %s33_s26 }
   0x7   :  { %36 = dma.hbm_to_vmem [thread:$0]  %s32_s22, 16, %s34_s26, [#allocation5]  }
   0x8   :  { %1039 = dma.done.wait [#allocation3], 3072  }
   0x9   :  { %1040 = vsyncadd [#allocation3], 4294964224 }
   0xa   :  { %1041 = dma.done.wait [#allocation5], 16  }
   0xb   :  { %1042 = vsyncadd [#allocation5], 4294967280  ;;  %v859_v0 = vld [vmem:[#allocation2 + $0x38] sm:$0xff]  ;;  %v858_v3 = vld [vmem:[#allocation2 + $0x30] sm:$0xff] }
   0xc   :  { %v1078_v1 = vld [vmem:[#allocation2 + $0x78] sm:$0xff]  ;;  %403 = vmatpush.bf16.msra.mxu0 %v859_v0  ;;  %962 = vmatpush.bf16.msra.mxu3 %v859_v0  ;;  %v1084_v4 = vld [vmem:[#allocation2 + $0x70] sm:$0xff]  ;;  %v857_v6 = vld [vmem:[#allocation2 + $0x28] sm:$0xff] }
   0xd   :  { %v1080_v2 = vld [vmem:[#allocation2 + $0xb8] sm:$0xff]  ;;  %452 = vmatpush.bf16.msra.mxu1 %v1078_v1  ;;  %v1086_v5 = vld [vmem:[#allocation2 + $0xb0] sm:$0xff]  ;;  %v865_v7 = vld [vmem:[#allocation2 + $0x68] sm:$0xff] }
   0xe   :  { %501 = vmatpush.bf16.msra.mxu2 %v1080_v2  ;;  %v1090_v8 = vld [vmem:[#allocation2 + $0xa8] sm:$0xff]  ;;  %v856_v9 = vld [vmem:[#allocation2 + $0x20] sm:$0xff]  ;;  %v855_v12 = vld [vmem:[#allocation2 + $0x18] sm:$0xff] }
   0xf   :  { %v864_v10 = vld [vmem:[#allocation2 + $0x60] sm:$0xff]  ;;  %v863_v13 = vld [vmem:[#allocation2 + $0x58] sm:$0xff]  ;;  %v854_v15 = vld [vmem:[#allocation2 + $0x10] sm:$0xff] }
  0x10   :  { %404 = vmatpush.bf16.msra.mxu0 %v858_v3  ;;  %963 = vmatpush.bf16.msra.mxu3 %v858_v3  ;;  %v1093_v11 = vld [vmem:[#allocation2 + $0xa0] sm:$0xff]  ;;  %v1096_v14 = vld [vmem:[#allocation2 + $0x98] sm:$0xff]  ;;  %v862_v16 = vld [vmem:[#allocation2 + $0x50] sm:$0xff] }
  0x11   :  { %453 = vmatpush.bf16.msra.mxu1 %v1084_v4  ;;  %v1099_v17 = vld [vmem:[#allocation2 + $0x90] sm:$0xff]  ;;  %v853_v18 = vld [vmem:[#allocation2 + $0x8] sm:$0xff]  ;;  %v852_v21 = vld [vmem:[#allocation2] sm:$0xff] }
  0x12   :  { %502 = vmatpush.bf16.msra.mxu2 %v1086_v5  ;;  %v861_v19 = vld [vmem:[#allocation2 + $0x48] sm:$0xff]  ;;  %v860_v22 = vld [vmem:[#allocation2 + $0x40] sm:$0xff]  ;;  %v710_v26 = vld [vmem:[%s1343_s0 + $0x90] sm:$0xf] }
  0x13   :  { %v1102_v20 = vld [vmem:[#allocation2 + $0x88] sm:$0xff]  ;;  %v1104_v23 = vld [vmem:[#allocation2 + $0x80] sm:$0xff]  ;;  %v847_v27 = vld [vmem:[%s1343_s0 + $0x98] sm:$0xf0] }
  0x14   :  { %405 = vmatpush.bf16.msra.mxu0 %v857_v6  ;;  %964 = vmatpush.bf16.msra.mxu3 %v857_v6  ;;  %v638_v24 = vld [vmem:[%s1343_s0] sm:$0xf]  ;;  %v829_v25 = vld [vmem:[%s1343_s0 + $0x8] sm:$0xf0]  ;;  %v828_v28 = vld [vmem:[%s1343_s0 + $0x4] sm:$0xf]  ;;  %v711_v33 = vor.u32 %v847_v27, %v710_v26 }
  0x15   :  { %454 = vmatpush.bf16.msra.mxu1 %v865_v7  ;;  %v640_v29 = vld [vmem:[%s1343_s0 + $0xc] sm:$0xf0]  ;;  %v646_v30 = vld [vmem:[%s1343_s0 + $0x8] sm:$0xf]  ;;  %v830_v31 = vld [vmem:[%s1343_s0 + $0x10] sm:$0xf0]  ;;  %v639_v32 = vor.u32 %v829_v25, %v638_v24 }
  0x16   :  { %503 = vmatpush.bf16.msra.mxu2 %v1090_v8  ;;  %v643_v34 = vor.u32 %v828_v28, %v640_v29  ;;  %v647_v35 = vor.u32 %v830_v31, %v646_v30  ;;  %v650_v36 = vld [vmem:[%s1343_s0 + $0x18] sm:$0xf]  ;;  %v832_v37 = vld [vmem:[%s1343_s0 + $0x20] sm:$0xf0]  ;;  %v722_v38 = vld [vmem:[%s1343_s0 + $0xa8] sm:$0xf] }
  0x17   :  { %v850_v39 = vld [vmem:[%s1343_s0 + $0xb0] sm:$0xf0]  ;;  %v831_v40 = vld [vmem:[%s1343_s0 + $0x1c] sm:$0xf]  ;;  %v652_v41 = vld [vmem:[%s1343_s0 + $0x24] sm:$0xf0]  ;;  %v651_v44 = vor.u32 %v832_v37, %v650_v36 }
  0x18   :  { %406 = vmatpush.bf16.msra.mxu0 %v856_v9  ;;  %965 = vmatpush.bf16.msra.mxu3 %v856_v9  ;;  %v658_v42 = vld [vmem:[%s1343_s0 + $0x20] sm:$0xf]  ;;  %v833_v43 = vld [vmem:[%s1343_s0 + $0x28] sm:$0xf0]  ;;  %v723_v45 = vor.u32 %v850_v39, %v722_v38  ;;  %v655_v46 = vor.u32 %v831_v40, %v652_v41  ;;  %v662_v48 = vld [vmem:[%s1343_s0 + $0x30] sm:$0xf] }
  0x19   :  { %455 = vmatpush.bf16.msra.mxu1 %v864_v10  ;;  %v659_v47 = vor.u32 %v833_v43, %v658_v42  ;;  %v835_v49 = vld [vmem:[%s1343_s0 + $0x38] sm:$0xf0]  ;;  %v834_v50 = vld [vmem:[%s1343_s0 + $0x34] sm:$0xf]  ;;  %v712_v52 = vld [vmem:[%s1343_s0 + $0x9c] sm:$0xf0] }
  0x1a   :  { %504 = vmatpush.bf16.msra.mxu2 %v1093_v11  ;;  %v846_v51 = vld [vmem:[%s1343_s0 + $0x94] sm:$0xf]  ;;  %v664_v53 = vld [vmem:[%s1343_s0 + $0x3c] sm:$0xf0]  ;;  %v670_v54 = vld [vmem:[%s1343_s0 + $0x38] sm:$0xf]  ;;  %v663_v56 = vor.u32 %v835_v49, %v662_v48 }
  0x1b   :  { %v836_v55 = vld [vmem:[%s1343_s0 + $0x40] sm:$0xf0]  ;;  %v715_v57 = vor.u32 %v846_v51, %v712_v52  ;;  %v667_v58 = vor.u32 %v834_v50, %v664_v53  ;;  %v674_v60 = vld [vmem:[%s1343_s0 + $0x48] sm:$0xf]  ;;  %v838_v61 = vld [vmem:[%s1343_s0 + $0x50] sm:$0xf0] }
  0x1c   :  { %407 = vmatpush.bf16.msra.mxu0 %v855_v12  ;;  %966 = vmatpush.bf16.msra.mxu3 %v855_v12  ;;  %v671_v59 = vor.u32 %v836_v55, %v670_v54  ;;  %v837_v62 = vld [vmem:[%s1343_s0 + $0x4c] sm:$0xf]  ;;  %v724_v0 = vld [vmem:[%s1343_s0 + $0xb4] sm:$0xf0]  ;;  %v839_v3 = vld [vmem:[%s1343_s0 + $0x58] sm:$0xf0] }
  0x1d   :  { %456 = vmatpush.bf16.msra.mxu1 %v863_v13  ;;  %v849_v63 = vld [vmem:[%s1343_s0 + $0xac] sm:$0xf]  ;;  %v848_v12 = vld [vmem:[%s1343_s0 + $0xa0] sm:$0xf0]  ;;  %v851_v24 = vld [vmem:[%s1343_s0 + $0xb8] sm:$0xf0] }
  0x1e   :  { %505 = vmatpush.bf16.msra.mxu2 %v1096_v14  ;;  %v841_v9 = vld [vmem:[%s1343_s0 + $0x68] sm:$0xf0]  ;;  %v700_v25 = vld [vmem:[%s1343_s0 + $0x84] sm:$0xf0]  ;;  %v706_v26 = vld [vmem:[%s1343_s0 + $0x80] sm:$0xf] }
  0x1f   :  { %v845_v27 = vld [vmem:[%s1343_s0 + $0x88] sm:$0xf0]  ;;  %v877_v42 = vld [vmem:[%s1346_s3] sm:$0xff]  }
  0x20   :  { %408 = vmatpush.bf16.msra.mxu0 %v854_v15  ;;  %967 = vmatpush.bf16.msra.mxu3 %v854_v15  ;;  %v842_v15 = vld [vmem:[%s1343_s0 + $0x70] sm:$0xf0]  ;;  %v707_v31 = vor.u32 %v845_v27, %v706_v26 }
  0x21   :  { %457 = vmatpush.bf16.msra.mxu1 %v862_v16 }
  0x22   :  { %506 = vmatpush.bf16.msra.mxu2 %v1099_v17 }
  0x24   :  { %409 = vmatpush.bf16.msra.mxu0 %v853_v18  ;;  %968 = vmatpush.bf16.msra.mxu3 %v853_v18 }
  0x25   :  { %458 = vmatpush.bf16.msra.mxu1 %v861_v19 }
  0x26   :  { %507 = vmatpush.bf16.msra.mxu2 %v1102_v20 }
  0x28   :  { %410 = vmatpush.bf16.msra.mxu0 %v852_v21  ;;  %969 = vmatpush.bf16.msra.mxu3 %v852_v21  ;;  %v844_v21 = vld [vmem:[%s1343_s0 + $0x80] sm:$0xf0] }
  0x29   :  { %459 = vmatpush.bf16.msra.mxu1 %v860_v22 }
  0x2a   :  { %508 = vmatpush.bf16.msra.mxu2 %v1104_v23 }
  0x2b   :  { %411 = vmatmul.bf16.vlgmr.msra.gmra.mxu0 %v639_v32  ;;  %441 = vmatmul.bf16.vlgmr.msra.gmra.mxu3 %v711_v33 }
  0x2c   :  { %970 = vmatpush.bf16.msrb.mxu3 %v1078_v1  ;;  %460 = vmatmul.bf16.vlgmr.msra.gmra.mxu1 %v643_v34  ;;  %v676_v1 = vld [vmem:[%s1343_s0 + $0x54] sm:$0xf0]  ;;  %v1262_v34 = vld [vmem:[#allocation4] ss:$0 sm:$0xff] }
  0x2d   :  { %509 = vmatmul.bf16.vlgmr.msra.gmra.mxu2 %v647_v35  ;;  %v679_v6 = vor.u32 %v837_v62, %v676_v1  ;;  %v948_v62 = vld [vmem:[%s1346_s3 + $0x8] sm:$0xff]  }
  0x30   :  { %971 = vmatpush.bf16.msrb.mxu3 %v1084_v4  ;;  %v675_v4 = vor.u32 %v838_v61, %v674_v60 }
  0x34   :  { %972 = vmatpush.bf16.msrb.mxu3 %v865_v7 }
  0x38   :  { %973 = vmatpush.bf16.msrb.mxu3 %v864_v10  ;;  %v840_v10 = vld [vmem:[%s1343_s0 + $0x64] sm:$0xf] }
  0x3b   :  { %416 = vmatmul.bf16.gmra.mxu0 %v651_v44  ;;  %446 = vmatmul.bf16.gmra.mxu3 %v723_v45  ;;  %v878_v44 = vunpack.c.l.bf16 %v877_v42 }
  0x3c   :  { %974 = vmatpush.bf16.msrb.mxu3 %v863_v13  ;;  %465 = vmatmul.bf16.gmra.mxu1 %v655_v46  ;;  %v688_v13 = vld [vmem:[%s1343_s0 + $0x6c] sm:$0xf0] }
  0x3d   :  { %514 = vmatmul.bf16.gmra.mxu2 %v659_v47  ;;  %v691_v18 = vor.u32 %v840_v10, %v688_v13  ;;  %v879_v47 = vunpack.c.h.bf16 %v877_v42 }
  0x40   :  { %975 = vmatpush.bf16.msrb.mxu3 %v862_v16 }
  0x44   :  { %976 = vmatpush.bf16.msrb.mxu3 %v861_v19 }
  0x48   :  { %977 = vmatpush.bf16.msrb.mxu3 %v860_v22  ;;  %v843_v22 = vld [vmem:[%s1343_s0 + $0x7c] sm:$0xf] }
  0x49   :  { %v703_v30 = vor.u32 %v843_v22, %v700_v25 }
  0x4b   :  { %421 = vmatmul.bf16.gmra.mxu0 %v663_v56  ;;  %490 = vmatmul.bf16.vlgmr.msrb.gmra.mxu3 %v715_v57 }
  0x4c   :  { %978 = vmatpush.bf16.msra.mxu3 %v1080_v2  ;;  %470 = vmatmul.bf16.gmra.mxu1 %v667_v58  ;;  %v682_v2 = vld [vmem:[%s1343_s0 + $0x50] sm:$0xf] }
  0x4d   :  { %519 = vmatmul.bf16.gmra.mxu2 %v671_v59  ;;  %v683_v7 = vor.u32 %v839_v3, %v682_v2  ;;  %v883_v3 = vunpack.c.h.bf16 %v948_v62 }
  0x50   :  { %979 = vmatpush.bf16.msra.mxu3 %v1086_v5  ;;  %v727_v5 = vor.u32 %v849_v63, %v724_v0  ;;  %v882_v0 = vunpack.c.l.bf16 %v948_v62  ;;  %v953_v62 = vld [vmem:[%s1346_s3 + $0x30] sm:$0xff]  }
  0x54   :  { %980 = vmatpush.bf16.msra.mxu3 %v1090_v8  ;;  %v686_v8 = vld [vmem:[%s1343_s0 + $0x60] sm:$0xf] }
  0x55   :  { %v687_v16 = vor.u32 %v841_v9, %v686_v8 }
  0x58   :  { %981 = vmatpush.bf16.msra.mxu3 %v1093_v11  ;;  %v718_v11 = vld [vmem:[%s1343_s0 + $0x98] sm:$0xf] }
  0x5b   :  { %426 = vmatmul.bf16.gmra.mxu0 %v675_v4  ;;  %495 = vmatmul.bf16.gmra.mxu3 %v727_v5 }
  0x5c   :  { %982 = vmatpush.bf16.msra.mxu3 %v1096_v14  ;;  %475 = vmatmul.bf16.gmra.mxu1 %v679_v6  ;;  %v694_v14 = vld [vmem:[%s1343_s0 + $0x68] sm:$0xf] }
  0x5d   :  { %524 = vmatmul.bf16.gmra.mxu2 %v683_v7  ;;  %v695_v19 = vor.u32 %v842_v15, %v694_v14 }
  0x60   :  { %983 = vmatpush.bf16.msra.mxu3 %v1099_v17  ;;  %v719_v17 = vor.u32 %v848_v12, %v718_v11 }
  0x64   :  { %984 = vmatpush.bf16.msra.mxu3 %v1102_v20  ;;  %v698_v20 = vld [vmem:[%s1343_s0 + $0x78] sm:$0xf] }
  0x65   :  { %v699_v28 = vor.u32 %v844_v21, %v698_v20 }
  0x68   :  { %985 = vmatpush.bf16.msra.mxu3 %v1104_v23  ;;  %v730_v23 = vld [vmem:[%s1343_s0 + $0xb0] sm:$0xf] }
  0x69   :  { %v731_v29 = vor.u32 %v851_v24, %v730_v23 }
  0x6b   :  { %431 = vmatmul.bf16.gmra.mxu0 %v687_v16  ;;  %539 = vmatmul.bf16.vlgmr.msra.gmra.mxu3 %v719_v17 }
  0x6c   :  { %480 = vmatmul.bf16.gmra.mxu1 %v691_v18  ;;  %v949_v18 = vld [vmem:[%s1346_s3 + $0x10] sm:$0xff]  }
  0x6d   :  { %529 = vmatmul.bf16.gmra.mxu2 %v695_v19  ;;  %v886_v20 = vunpack.c.l.bf16 %v949_v18  ;;  %v887_v23 = vunpack.c.h.bf16 %v949_v18 }
  0x7b   :  { %436 = vmatmul.bf16.gmra.mxu0 %v699_v28  ;;  %544 = vmatmul.bf16.gmra.mxu3 %v731_v29 }
  0x7c   :  { %485 = vmatmul.bf16.gmra.mxu1 %v703_v30 }
  0x7d   :  { %534 = vmatmul.bf16.gmra.mxu2 %v707_v31 }
  0xa8   :  { %v412_v32 = vpop.f32.mrf.mxu0 }
  0xa9   :  { %v461_v33 = vpop.f32.mrf.mxu1  ;;  %v413_v35 = vadd.f32 %v1262_v34, %v412_v32 }
  0xab   :  { %v462_v40 = vadd.f32 %v461_v33, %v413_v35 }
  0xae   :  { %v1265_v36 = vpop.f32.mrf.mxu3 }
  0xb0   :  { %v510_v37 = vpop.f32.mrf.mxu2  ;;  %v414_v38 = vpop.f32.mrf.mxu0 }
  0xb1   :  { %v463_v39 = vpop.f32.mrf.mxu1  ;;  %v415_v41 = vadd.f32 %v1262_v34, %v414_v38  ;;  %v511_v43 = vadd.f32 %v510_v37, %v462_v40  ;;  %v950_v40 = vld [vmem:[%s1346_s3 + $0x18] sm:$0xff]  }
  0xb2   :  { %v890_v42 = vunpack.c.l.bf16 %v950_v40 }
  0xb3   :  { %v464_v45 = vadd.f32 %v463_v39, %v415_v41  ;;  %v582_v52 = vadd.f32 %v878_v44, %v511_v43 }
  0xb6   :  { %v1271_v46 = vpop.f32.mrf.mxu3 }
  0xb8   :  { %v512_v48 = vpop.f32.mrf.mxu2  ;;  %v417_v50 = vpop.f32.mrf.mxu0 }
  0xb9   :  { %v513_v49 = vadd.f32 %v512_v48, %v464_v45  ;;  %v466_v51 = vpop.f32.mrf.mxu1  ;;  %v418_v55 = vadd.f32 %v1262_v34, %v417_v50  ;;  %v891_v45 = vunpack.c.h.bf16 %v950_v40 }
  0xbb   :  { %v583_v53 = vadd.f32 %v879_v47, %v513_v49  ;;  %v467_v60 = vadd.f32 %v466_v51, %v418_v55 }
  0xbd   :  { %v911_v54 = vpack.c.bf16 %v583_v53, %v582_v52 }
  0xbe   :  { %v1277_v56 = vpop.f32.mrf.mxu3 }
  0xbf   :  { %912 = vst [vmem:[%s1347_s4] sm:$0xff] %v911_v54  }
  0xc0   :  { %v515_v57 = vpop.f32.mrf.mxu2  ;;  %v419_v58 = vpop.f32.mrf.mxu0 }
  0xc1   :  { %v468_v59 = vpop.f32.mrf.mxu1  ;;  %v420_v61 = vadd.f32 %v1262_v34, %v419_v58  ;;  %v516_v63 = vadd.f32 %v515_v57, %v467_v60 }
  0xc3   :  { %v469_v1 = vadd.f32 %v468_v59, %v420_v61  ;;  %v584_v8 = vadd.f32 %v882_v0, %v516_v63  ;;  %v443_v59 = vadd.f32 %v1262_v34, %v1265_v36  ;;  %v445_v0 = vadd.f32 %v1262_v34, %v1271_v46 }
  0xc4   :  { %v903_v36 = vunpack.c.h.bf16 %v953_v62 }
  0xc6   :  { %v1283_v2 = vpop.f32.mrf.mxu3 }
  0xc8   :  { %v517_v4 = vpop.f32.mrf.mxu2  ;;  %v422_v6 = vpop.f32.mrf.mxu0 }
  0xc9   :  { %v518_v5 = vadd.f32 %v517_v4, %v469_v1  ;;  %v471_v7 = vpop.f32.mrf.mxu1  ;;  %v423_v11 = vadd.f32 %v1262_v34, %v422_v6  ;;  %v902_v6 = vunpack.c.l.bf16 %v953_v62 }
  0xcb   :  { %v585_v9 = vadd.f32 %v883_v3, %v518_v5  ;;  %v472_v16 = vadd.f32 %v471_v7, %v423_v11  ;;  %v951_v3 = vld [vmem:[%s1346_s3 + $0x20] sm:$0xff]  }
  0xcd   :  { %v916_v10 = vpack.c.bf16 %v585_v9, %v584_v8  ;;  %v894_v8 = vunpack.c.l.bf16 %v951_v3 }
  0xce   :  { %v491_v12 = vpop.f32.mrf.mxu3 }
  0xcf   :  { %955 = vst [vmem:[%s1347_s4 + $0x8] sm:$0xff] %v916_v10   ;;  %v492_v1 = vadd.f32 %v491_v12, %v443_v59  ;;  %v895_v10 = vunpack.c.h.bf16 %v951_v3 }
  0xd0   :  { %v520_v13 = vpop.f32.mrf.mxu2  ;;  %v424_v14 = vpop.f32.mrf.mxu0 }
  0xd1   :  { %v473_v15 = vpop.f32.mrf.mxu1  ;;  %v425_v17 = vadd.f32 %v1262_v34, %v424_v14  ;;  %v521_v19 = vadd.f32 %v520_v13, %v472_v16 }
  0xd3   :  { %v474_v21 = vadd.f32 %v473_v15, %v425_v17  ;;  %v586_v28 = vadd.f32 %v886_v20, %v521_v19 }
  0xd6   :  { %v493_v22 = vpop.f32.mrf.mxu3 }
  0xd7   :  { %v494_v4 = vadd.f32 %v493_v22, %v445_v0 }
  0xd8   :  { %v522_v24 = vpop.f32.mrf.mxu2  ;;  %v427_v26 = vpop.f32.mrf.mxu0 }
  0xd9   :  { %v523_v25 = vadd.f32 %v522_v24, %v474_v21  ;;  %v476_v27 = vpop.f32.mrf.mxu1  ;;  %v428_v31 = vadd.f32 %v1262_v34, %v427_v26  ;;  %v448_v26 = vadd.f32 %v1262_v34, %v1277_v56 }
  0xdb   :  { %v587_v29 = vadd.f32 %v887_v23, %v523_v25  ;;  %v477_v38 = vadd.f32 %v476_v27, %v428_v31 }
  0xdd   :  { %v921_v30 = vpack.c.bf16 %v587_v29, %v586_v28  ;;  %v954_v28 = vld [vmem:[%s1346_s3 + $0x38] sm:$0xff]  }
  0xde   :  { %v1297_v32 = vpop.f32.mrf.mxu3 }
  0xdf   :  { %956 = vst [vmem:[%s1347_s4 + $0x10] sm:$0xff] %v921_v30   ;;  %v450_v30 = vadd.f32 %v1262_v34, %v1283_v2  ;;  %v497_v31 = vadd.f32 %v1297_v32, %v448_v26 }
  0xe0   :  { %v525_v33 = vpop.f32.mrf.mxu2  ;;  %v429_v35 = vpop.f32.mrf.mxu0 }
  0xe1   :  { %v478_v37 = vpop.f32.mrf.mxu1  ;;  %v430_v39 = vadd.f32 %v1262_v34, %v429_v35  ;;  %v526_v41 = vadd.f32 %v525_v33, %v477_v38  ;;  %v952_v33 = vld [vmem:[%s1346_s3 + $0x28] sm:$0xff]   ;;  %v906_v38 = vunpack.c.l.bf16 %v954_v28 }
  0xe3   :  { %v479_v43 = vadd.f32 %v478_v37, %v430_v39  ;;  %v588_v51 = vadd.f32 %v890_v42, %v526_v41  ;;  %v907_v39 = vunpack.c.h.bf16 %v954_v28  ;;  %v898_v41 = vunpack.c.l.bf16 %v952_v33 }
  0xe6   :  { %v498_v44 = vpop.f32.mrf.mxu3 }
  0xe7   :  { %v499_v35 = vadd.f32 %v498_v44, %v450_v30 }
  0xe8   :  { %v527_v47 = vpop.f32.mrf.mxu2  ;;  %v432_v49 = vpop.f32.mrf.mxu0 }
  0xe9   :  { %v528_v48 = vadd.f32 %v527_v47, %v479_v43  ;;  %v481_v50 = vpop.f32.mrf.mxu1  ;;  %v433_v54 = vadd.f32 %v1262_v34, %v432_v49  ;;  %v899_v43 = vunpack.c.h.bf16 %v952_v33 }
  0xeb   :  { %v589_v52 = vadd.f32 %v891_v45, %v528_v48  ;;  %v482_v61 = vadd.f32 %v481_v50, %v433_v54 }
  0xed   :  { %v926_v53 = vpack.c.bf16 %v589_v52, %v588_v51 }
  0xee   :  { %v540_v55 = vpop.f32.mrf.mxu3 }
  0xef   :  { %957 = vst [vmem:[%s1347_s4 + $0x18] sm:$0xff] %v926_v53   ;;  %v541_v5 = vadd.f32 %v540_v55, %v492_v1 }
  0xf0   :  { %v530_v57 = vpop.f32.mrf.mxu2  ;;  %v434_v58 = vpop.f32.mrf.mxu0 }
  0xf1   :  { %v483_v60 = vpop.f32.mrf.mxu1  ;;  %v435_v63 = vadd.f32 %v1262_v34, %v434_v58  ;;  %v531_v7 = vadd.f32 %v530_v57, %v482_v61  ;;  %v594_v17 = vadd.f32 %v902_v6, %v541_v5 }
  0xf3   :  { %v484_v9 = vadd.f32 %v483_v60, %v435_v63  ;;  %v590_v12 = vadd.f32 %v894_v8, %v531_v7 }
  0xf6   :  { %v542_v11 = vpop.f32.mrf.mxu3 }
  0xf7   :  { %v543_v14 = vadd.f32 %v542_v11, %v494_v4 }
  0xf8   :  { %v532_v13 = vpop.f32.mrf.mxu2  ;;  %v437_v16 = vpop.f32.mrf.mxu0 }
  0xf9   :  { %v533_v15 = vadd.f32 %v532_v13, %v484_v9  ;;  %v595_v46 = vadd.f32 %v903_v36, %v543_v14  ;;  %v486_v20 = vpop.f32.mrf.mxu1  ;;  %v438_v22 = vadd.f32 %v1262_v34, %v437_v16 }
  0xfb   :  { %v591_v18 = vadd.f32 %v895_v10, %v533_v15  ;;  %v941_v19 = vpack.c.bf16 %v595_v46, %v594_v17  ;;  %v487_v27 = vadd.f32 %v486_v20, %v438_v22 }
  0xfd   :  { %v931_v21 = vpack.c.bf16 %v591_v18, %v590_v12  ;;  %960 = vst [vmem:[%s1347_s4 + $0x30] sm:$0xff] %v941_v19  }
  0xfe   :  { %v545_v23 = vpop.f32.mrf.mxu3 }
  0xff   :  { %958 = vst [vmem:[%s1347_s4 + $0x20] sm:$0xff] %v931_v21   ;;  %v546_v37 = vadd.f32 %v545_v23, %v497_v31 }
 0x100   :  { %v535_v24 = vpop.f32.mrf.mxu2  ;;  %v439_v25 = vpop.f32.mrf.mxu0 }
 0x101   :  { %v440_v29 = vadd.f32 %v1262_v34, %v439_v25  ;;  %v488_v56 = vpop.f32.mrf.mxu1  ;;  %v536_v40 = vadd.f32 %v535_v24, %v487_v27  ;;  %v596_v34 = vadd.f32 %v906_v38, %v546_v37 }
 0x103   :  { %v489_v42 = vadd.f32 %v488_v56, %v440_v29  ;;  %v592_v32 = vadd.f32 %v898_v41, %v536_v40 }
 0x106   :  { %v547_v45 = vpop.f32.mrf.mxu3 }
 0x107   :  { %v548_v48 = vadd.f32 %v547_v45, %v499_v35 }
 0x108   :  { %v537_v47 = vpop.f32.mrf.mxu2 }
 0x109   :  { %v538_v49 = vadd.f32 %v537_v47, %v489_v42  ;;  %v597_v2 = vadd.f32 %v907_v39, %v548_v48 }
 0x10b   :  { %v593_v50 = vadd.f32 %v899_v43, %v538_v49  ;;  %v946_v51 = vpack.c.bf16 %v597_v2, %v596_v34 }
 0x10d   :  { %v936_v52 = vpack.c.bf16 %v593_v50, %v592_v32  ;;  %961 = vst [vmem:[%s1347_s4 + $0x38] sm:$0xff] %v946_v51  }
 0x10f   :  { %959 = vst [vmem:[%s1347_s4 + $0x28] sm:$0xff] %v936_v52  }
 0x110   :  { %634 = vsyncpa [#allocation3], 1 }
 0x111   :  { %635 = vsyncpa [#allocation5], 1 }

// kernel: generator_forward.17
= control target key start
LH: loop header
LB: loop body
LE: loop exit
PB: predicated region body
PF: predicated region fallthrough
CT: control target
= control target key end

     0   :  { %8 = vsyncpa [#allocation3], 0  ;;  %s1237_s0 = inlined_call_operand.vmem [shape: bf16[128,384], index: 0, kind: input, shape index: {}]   ;;  %s1238_s1 = inlined_call_operand.hbm [shape: bf16[384,128], index: 1, kind: input, shape index: {}]   ;;  %s1239_s2 = inlined_call_operand.hbm [shape: f32[1,128], index: 2, kind: input, shape index: {}]   ;;  %s1240_s3 = inlined_call_operand.vmem [shape: bf16[128,128], index: 3, kind: output, shape index: {}]  }
   0x1   :  { %s16_s14 = sshll.u32 %s1238_s1, 4  ;;  %s17_s14 = int_to_ptr.hbm [resolvable:$true] %s16_s14 }
   0x2   :  { %9 = vsyncpa [#allocation5], 0  ;;  %s969_s15 = smov [#allocation2]   ;;  %s30_s19 = sshll.u32 %s1239_s2, 4  ;;  %s31_s19 = int_to_ptr.hbm [resolvable:$true] %s30_s19 }
   0x3   :  { %s18_s16 = sshll.u32 %s969_s15, 4  ;;  %s970_s20 = smov 64   ;;  %s19_s16 = int_to_ptr.vmem [resolvable:$true] %s18_s16 }
   0x4   :  { %s971_s21 = smov 4   ;;  %s972_s22 = smov [#allocation4]  }
   0x5   :  { %24 = dma.hbm_to_vmem [thread:$0]  %s17_s14, 3072, %s19_s16, [#allocation3], %s970_s20, %s970_s20, %s971_s21  }
   0x6   :  { %s32_s23 = sshll.u32 %s972_s22, 4  ;;  %s33_s23 = int_to_ptr.vmem [resolvable:$true] %s32_s23 }
   0x7   :  { %35 = dma.hbm_to_vmem [thread:$0]  %s31_s19, 16, %s33_s23, [#allocation5]  }
   0x8   :  { %965 = dma.done.wait [#allocation3], 3072  }
   0x9   :  { %966 = vsyncadd [#allocation3], 4294964224 }
   0xa   :  { %967 = dma.done.wait [#allocation5], 16  }
   0xb   :  { %968 = vsyncadd [#allocation5], 4294967280  ;;  %v824_v0 = vld [vmem:[#allocation2 + $0x38] sm:$0xff]  ;;  %v823_v3 = vld [vmem:[#allocation2 + $0x30] sm:$0xff] }
   0xc   :  { %v999_v1 = vld [vmem:[#allocation2 + $0x78] sm:$0xff]  ;;  %400 = vmatpush.bf16.msra.mxu0 %v824_v0  ;;  %888 = vmatpush.bf16.msra.mxu3 %v824_v0  ;;  %v1005_v4 = vld [vmem:[#allocation2 + $0x70] sm:$0xff]  ;;  %v822_v6 = vld [vmem:[#allocation2 + $0x28] sm:$0xff] }
   0xd   :  { %v1001_v2 = vld [vmem:[#allocation2 + $0xb8] sm:$0xff]  ;;  %449 = vmatpush.bf16.msra.mxu1 %v999_v1  ;;  %v1007_v5 = vld [vmem:[#allocation2 + $0xb0] sm:$0xff]  ;;  %v830_v7 = vld [vmem:[#allocation2 + $0x68] sm:$0xff] }
   0xe   :  { %498 = vmatpush.bf16.msra.mxu2 %v1001_v2  ;;  %v1011_v8 = vld [vmem:[#allocation2 + $0xa8] sm:$0xff]  ;;  %v821_v9 = vld [vmem:[#allocation2 + $0x20] sm:$0xff]  ;;  %v820_v12 = vld [vmem:[#allocation2 + $0x18] sm:$0xff] }
   0xf   :  { %v829_v10 = vld [vmem:[#allocation2 + $0x60] sm:$0xff]  ;;  %v828_v13 = vld [vmem:[#allocation2 + $0x58] sm:$0xff]  ;;  %v819_v15 = vld [vmem:[#allocation2 + $0x10] sm:$0xff] }
  0x10   :  { %401 = vmatpush.bf16.msra.mxu0 %v823_v3  ;;  %889 = vmatpush.bf16.msra.mxu3 %v823_v3  ;;  %v1014_v11 = vld [vmem:[#allocation2 + $0xa0] sm:$0xff]  ;;  %v1017_v14 = vld [vmem:[#allocation2 + $0x98] sm:$0xff]  ;;  %v827_v16 = vld [vmem:[#allocation2 + $0x50] sm:$0xff] }
  0x11   :  { %450 = vmatpush.bf16.msra.mxu1 %v1005_v4  ;;  %v1020_v17 = vld [vmem:[#allocation2 + $0x90] sm:$0xff]  ;;  %v818_v18 = vld [vmem:[#allocation2 + $0x8] sm:$0xff]  ;;  %v817_v21 = vld [vmem:[#allocation2] sm:$0xff] }
  0x12   :  { %499 = vmatpush.bf16.msra.mxu2 %v1007_v5  ;;  %v826_v19 = vld [vmem:[#allocation2 + $0x48] sm:$0xff]  ;;  %v825_v22 = vld [vmem:[#allocation2 + $0x40] sm:$0xff]  ;;  %v675_v26 = vld [vmem:[%s1237_s0 + $0x90] sm:$0xf] }
  0x13   :  { %v1023_v20 = vld [vmem:[#allocation2 + $0x88] sm:$0xff]  ;;  %v1025_v23 = vld [vmem:[#allocation2 + $0x80] sm:$0xff]  ;;  %v812_v27 = vld [vmem:[%s1237_s0 + $0x98] sm:$0xf0] }
  0x14   :  { %402 = vmatpush.bf16.msra.mxu0 %v822_v6  ;;  %890 = vmatpush.bf16.msra.mxu3 %v822_v6  ;;  %v603_v24 = vld [vmem:[%s1237_s0] sm:$0xf]  ;;  %v794_v25 = vld [vmem:[%s1237_s0 + $0x8] sm:$0xf0]  ;;  %v793_v28 = vld [vmem:[%s1237_s0 + $0x4] sm:$0xf]  ;;  %v676_v33 = vor.u32 %v812_v27, %v675_v26 }
  0x15   :  { %451 = vmatpush.bf16.msra.mxu1 %v830_v7  ;;  %v605_v29 = vld [vmem:[%s1237_s0 + $0xc] sm:$0xf0]  ;;  %v611_v30 = vld [vmem:[%s1237_s0 + $0x8] sm:$0xf]  ;;  %v795_v31 = vld [vmem:[%s1237_s0 + $0x10] sm:$0xf0]  ;;  %v604_v32 = vor.u32 %v794_v25, %v603_v24 }
  0x16   :  { %500 = vmatpush.bf16.msra.mxu2 %v1011_v8  ;;  %v608_v34 = vor.u32 %v793_v28, %v605_v29  ;;  %v612_v35 = vor.u32 %v795_v31, %v611_v30  ;;  %v615_v36 = vld [vmem:[%s1237_s0 + $0x18] sm:$0xf]  ;;  %v797_v37 = vld [vmem:[%s1237_s0 + $0x20] sm:$0xf0]  ;;  %v687_v38 = vld [vmem:[%s1237_s0 + $0xa8] sm:$0xf] }
  0x17   :  { %v815_v39 = vld [vmem:[%s1237_s0 + $0xb0] sm:$0xf0]  ;;  %v796_v40 = vld [vmem:[%s1237_s0 + $0x1c] sm:$0xf]  ;;  %v617_v41 = vld [vmem:[%s1237_s0 + $0x24] sm:$0xf0]  ;;  %v616_v44 = vor.u32 %v797_v37, %v615_v36 }
  0x18   :  { %403 = vmatpush.bf16.msra.mxu0 %v821_v9  ;;  %891 = vmatpush.bf16.msra.mxu3 %v821_v9  ;;  %v623_v42 = vld [vmem:[%s1237_s0 + $0x20] sm:$0xf]  ;;  %v798_v43 = vld [vmem:[%s1237_s0 + $0x28] sm:$0xf0]  ;;  %v688_v45 = vor.u32 %v815_v39, %v687_v38  ;;  %v620_v46 = vor.u32 %v796_v40, %v617_v41  ;;  %v627_v48 = vld [vmem:[%s1237_s0 + $0x30] sm:$0xf] }
  0x19   :  { %452 = vmatpush.bf16.msra.mxu1 %v829_v10  ;;  %v624_v47 = vor.u32 %v798_v43, %v623_v42  ;;  %v800_v49 = vld [vmem:[%s1237_s0 + $0x38] sm:$0xf0]  ;;  %v799_v50 = vld [vmem:[%s1237_s0 + $0x34] sm:$0xf]  ;;  %v677_v52 = vld [vmem:[%s1237_s0 + $0x9c] sm:$0xf0] }
  0x1a   :  { %501 = vmatpush.bf16.msra.mxu2 %v1014_v11  ;;  %v811_v51 = vld [vmem:[%s1237_s0 + $0x94] sm:$0xf]  ;;  %v629_v53 = vld [vmem:[%s1237_s0 + $0x3c] sm:$0xf0]  ;;  %v635_v54 = vld [vmem:[%s1237_s0 + $0x38] sm:$0xf]  ;;  %v628_v56 = vor.u32 %v800_v49, %v627_v48 }
  0x1b   :  { %v801_v55 = vld [vmem:[%s1237_s0 + $0x40] sm:$0xf0]  ;;  %v680_v57 = vor.u32 %v811_v51, %v677_v52  ;;  %v632_v58 = vor.u32 %v799_v50, %v629_v53  ;;  %v639_v60 = vld [vmem:[%s1237_s0 + $0x48] sm:$0xf]  ;;  %v803_v61 = vld [vmem:[%s1237_s0 + $0x50] sm:$0xf0] }
  0x1c   :  { %404 = vmatpush.bf16.msra.mxu0 %v820_v12  ;;  %892 = vmatpush.bf16.msra.mxu3 %v820_v12  ;;  %v636_v59 = vor.u32 %v801_v55, %v635_v54  ;;  %v802_v62 = vld [vmem:[%s1237_s0 + $0x4c] sm:$0xf]  ;;  %v689_v0 = vld [vmem:[%s1237_s0 + $0xb4] sm:$0xf0]  ;;  %v804_v3 = vld [vmem:[%s1237_s0 + $0x58] sm:$0xf0] }
  0x1d   :  { %453 = vmatpush.bf16.msra.mxu1 %v828_v13  ;;  %v814_v63 = vld [vmem:[%s1237_s0 + $0xac] sm:$0xf]  ;;  %v813_v12 = vld [vmem:[%s1237_s0 + $0xa0] sm:$0xf0]  ;;  %v816_v24 = vld [vmem:[%s1237_s0 + $0xb8] sm:$0xf0] }
  0x1e   :  { %502 = vmatpush.bf16.msra.mxu2 %v1017_v14  ;;  %v806_v9 = vld [vmem:[%s1237_s0 + $0x68] sm:$0xf0]  ;;  %v665_v25 = vld [vmem:[%s1237_s0 + $0x84] sm:$0xf0]  ;;  %v671_v26 = vld [vmem:[%s1237_s0 + $0x80] sm:$0xf] }
  0x1f   :  { %v810_v27 = vld [vmem:[%s1237_s0 + $0x88] sm:$0xf0] }
  0x20   :  { %405 = vmatpush.bf16.msra.mxu0 %v819_v15  ;;  %893 = vmatpush.bf16.msra.mxu3 %v819_v15  ;;  %v807_v15 = vld [vmem:[%s1237_s0 + $0x70] sm:$0xf0]  ;;  %v672_v31 = vor.u32 %v810_v27, %v671_v26 }
  0x21   :  { %454 = vmatpush.bf16.msra.mxu1 %v827_v16 }
  0x22   :  { %503 = vmatpush.bf16.msra.mxu2 %v1020_v17 }
  0x24   :  { %406 = vmatpush.bf16.msra.mxu0 %v818_v18  ;;  %894 = vmatpush.bf16.msra.mxu3 %v818_v18 }
  0x25   :  { %455 = vmatpush.bf16.msra.mxu1 %v826_v19 }
  0x26   :  { %504 = vmatpush.bf16.msra.mxu2 %v1023_v20 }
  0x28   :  { %407 = vmatpush.bf16.msra.mxu0 %v817_v21  ;;  %895 = vmatpush.bf16.msra.mxu3 %v817_v21  ;;  %v809_v21 = vld [vmem:[%s1237_s0 + $0x80] sm:$0xf0] }
  0x29   :  { %456 = vmatpush.bf16.msra.mxu1 %v825_v22 }
  0x2a   :  { %505 = vmatpush.bf16.msra.mxu2 %v1025_v23 }
  0x2b   :  { %408 = vmatmul.bf16.vlgmr.msra.gmra.mxu0 %v604_v32  ;;  %438 = vmatmul.bf16.vlgmr.msra.gmra.mxu3 %v676_v33 }
  0x2c   :  { %896 = vmatpush.bf16.msrb.mxu3 %v999_v1  ;;  %457 = vmatmul.bf16.vlgmr.msra.gmra.mxu1 %v608_v34  ;;  %v641_v1 = vld [vmem:[%s1237_s0 + $0x54] sm:$0xf0]  ;;  %v1183_v34 = vld [vmem:[#allocation4] ss:$0 sm:$0xff] }
  0x2d   :  { %506 = vmatmul.bf16.vlgmr.msra.gmra.mxu2 %v612_v35  ;;  %v644_v6 = vor.u32 %v802_v62, %v641_v1 }
  0x30   :  { %897 = vmatpush.bf16.msrb.mxu3 %v1005_v4  ;;  %v640_v4 = vor.u32 %v803_v61, %v639_v60 }
  0x34   :  { %898 = vmatpush.bf16.msrb.mxu3 %v830_v7 }
  0x38   :  { %899 = vmatpush.bf16.msrb.mxu3 %v829_v10  ;;  %v805_v10 = vld [vmem:[%s1237_s0 + $0x64] sm:$0xf] }
  0x3b   :  { %413 = vmatmul.bf16.gmra.mxu0 %v616_v44  ;;  %443 = vmatmul.bf16.gmra.mxu3 %v688_v45 }
  0x3c   :  { %900 = vmatpush.bf16.msrb.mxu3 %v828_v13  ;;  %462 = vmatmul.bf16.gmra.mxu1 %v620_v46  ;;  %v653_v13 = vld [vmem:[%s1237_s0 + $0x6c] sm:$0xf0] }
  0x3d   :  { %511 = vmatmul.bf16.gmra.mxu2 %v624_v47  ;;  %v656_v18 = vor.u32 %v805_v10, %v653_v13 }
  0x40   :  { %901 = vmatpush.bf16.msrb.mxu3 %v827_v16 }
  0x44   :  { %902 = vmatpush.bf16.msrb.mxu3 %v826_v19 }
  0x48   :  { %903 = vmatpush.bf16.msrb.mxu3 %v825_v22  ;;  %v808_v22 = vld [vmem:[%s1237_s0 + $0x7c] sm:$0xf] }
  0x49   :  { %v668_v30 = vor.u32 %v808_v22, %v665_v25 }
  0x4b   :  { %418 = vmatmul.bf16.gmra.mxu0 %v628_v56  ;;  %487 = vmatmul.bf16.vlgmr.msrb.gmra.mxu3 %v680_v57 }
  0x4c   :  { %904 = vmatpush.bf16.msra.mxu3 %v1001_v2  ;;  %467 = vmatmul.bf16.gmra.mxu1 %v632_v58  ;;  %v647_v2 = vld [vmem:[%s1237_s0 + $0x50] sm:$0xf] }
  0x4d   :  { %516 = vmatmul.bf16.gmra.mxu2 %v636_v59  ;;  %v648_v7 = vor.u32 %v804_v3, %v647_v2 }
  0x50   :  { %905 = vmatpush.bf16.msra.mxu3 %v1007_v5  ;;  %v692_v5 = vor.u32 %v814_v63, %v689_v0 }
  0x54   :  { %906 = vmatpush.bf16.msra.mxu3 %v1011_v8  ;;  %v651_v8 = vld [vmem:[%s1237_s0 + $0x60] sm:$0xf] }
  0x55   :  { %v652_v16 = vor.u32 %v806_v9, %v651_v8 }
  0x58   :  { %907 = vmatpush.bf16.msra.mxu3 %v1014_v11  ;;  %v683_v11 = vld [vmem:[%s1237_s0 + $0x98] sm:$0xf] }
  0x5b   :  { %423 = vmatmul.bf16.gmra.mxu0 %v640_v4  ;;  %492 = vmatmul.bf16.gmra.mxu3 %v692_v5 }
  0x5c   :  { %908 = vmatpush.bf16.msra.mxu3 %v1017_v14  ;;  %472 = vmatmul.bf16.gmra.mxu1 %v644_v6  ;;  %v659_v14 = vld [vmem:[%s1237_s0 + $0x68] sm:$0xf] }
  0x5d   :  { %521 = vmatmul.bf16.gmra.mxu2 %v648_v7  ;;  %v660_v19 = vor.u32 %v807_v15, %v659_v14 }
  0x60   :  { %909 = vmatpush.bf16.msra.mxu3 %v1020_v17  ;;  %v684_v17 = vor.u32 %v813_v12, %v683_v11 }
  0x64   :  { %910 = vmatpush.bf16.msra.mxu3 %v1023_v20  ;;  %v663_v20 = vld [vmem:[%s1237_s0 + $0x78] sm:$0xf] }
  0x65   :  { %v664_v28 = vor.u32 %v809_v21, %v663_v20 }
  0x68   :  { %911 = vmatpush.bf16.msra.mxu3 %v1025_v23  ;;  %v695_v23 = vld [vmem:[%s1237_s0 + $0xb0] sm:$0xf] }
  0x69   :  { %v696_v29 = vor.u32 %v816_v24, %v695_v23 }
  0x6b   :  { %428 = vmatmul.bf16.gmra.mxu0 %v652_v16  ;;  %536 = vmatmul.bf16.vlgmr.msra.gmra.mxu3 %v684_v17 }
  0x6c   :  { %477 = vmatmul.bf16.gmra.mxu1 %v656_v18 }
  0x6d   :  { %526 = vmatmul.bf16.gmra.mxu2 %v660_v19 }
  0x7b   :  { %433 = vmatmul.bf16.gmra.mxu0 %v664_v28  ;;  %541 = vmatmul.bf16.gmra.mxu3 %v696_v29 }
  0x7c   :  { %482 = vmatmul.bf16.gmra.mxu1 %v668_v30 }
  0x7d   :  { %531 = vmatmul.bf16.gmra.mxu2 %v672_v31 }
  0xa8   :  { %v409_v32 = vpop.f32.mrf.mxu0 }
  0xa9   :  { %v458_v33 = vpop.f32.mrf.mxu1  ;;  %v410_v35 = vadd.f32 %v1183_v34, %v409_v32 }
  0xab   :  { %v459_v40 = vadd.f32 %v458_v33, %v410_v35 }
  0xae   :  { %v1186_v36 = vpop.f32.mrf.mxu3 }
  0xb0   :  { %v507_v37 = vpop.f32.mrf.mxu2  ;;  %v411_v38 = vpop.f32.mrf.mxu0 }
  0xb1   :  { %v460_v39 = vpop.f32.mrf.mxu1  ;;  %v412_v41 = vadd.f32 %v1183_v34, %v411_v38  ;;  %v508_v42 = vadd.f32 %v507_v37, %v459_v40 }
  0xb3   :  { %v461_v43 = vadd.f32 %v460_v39, %v412_v41  ;;  %v547_v49 = vmax.f32 %v508_v42, 0.0 }
  0xb6   :  { %v1189_v44 = vpop.f32.mrf.mxu3 }
  0xb8   :  { %v509_v45 = vpop.f32.mrf.mxu2  ;;  %v414_v47 = vpop.f32.mrf.mxu0 }
  0xb9   :  { %v510_v46 = vadd.f32 %v509_v45, %v461_v43  ;;  %v463_v48 = vpop.f32.mrf.mxu1  ;;  %v415_v52 = vadd.f32 %v1183_v34, %v414_v47 }
  0xbb   :  { %v548_v50 = vmax.f32 %v510_v46, 0.0  ;;  %v464_v57 = vadd.f32 %v463_v48, %v415_v52  ;;  %v440_v46 = vadd.f32 %v1183_v34, %v1186_v36 }
  0xbd   :  { %v844_v51 = vpack.c.bf16 %v548_v50, %v547_v49  ;;  %v442_v50 = vadd.f32 %v1183_v34, %v1189_v44 }
  0xbe   :  { %v1195_v53 = vpop.f32.mrf.mxu3 }
  0xbf   :  { %845 = vst [vmem:[%s1240_s3] sm:$0xff] %v844_v51  }
  0xc0   :  { %v512_v54 = vpop.f32.mrf.mxu2  ;;  %v416_v55 = vpop.f32.mrf.mxu0 }
  0xc1   :  { %v465_v56 = vpop.f32.mrf.mxu1  ;;  %v417_v58 = vadd.f32 %v1183_v34, %v416_v55  ;;  %v513_v59 = vadd.f32 %v512_v54, %v464_v57 }
  0xc3   :  { %v466_v60 = vadd.f32 %v465_v56, %v417_v58  ;;  %v549_v2 = vmax.f32 %v513_v59, 0.0 }
  0xc6   :  { %v1198_v61 = vpop.f32.mrf.mxu3 }
  0xc8   :  { %v514_v62 = vpop.f32.mrf.mxu2  ;;  %v419_v0 = vpop.f32.mrf.mxu0 }
  0xc9   :  { %v515_v63 = vadd.f32 %v514_v62, %v466_v60  ;;  %v468_v1 = vpop.f32.mrf.mxu1  ;;  %v420_v5 = vadd.f32 %v1183_v34, %v419_v0 }
  0xcb   :  { %v550_v3 = vmax.f32 %v515_v63, 0.0  ;;  %v469_v10 = vadd.f32 %v468_v1, %v420_v5 }
  0xcd   :  { %v849_v4 = vpack.c.bf16 %v550_v3, %v549_v2 }
  0xce   :  { %v488_v6 = vpop.f32.mrf.mxu3 }
  0xcf   :  { %881 = vst [vmem:[%s1240_s3 + $0x8] sm:$0xff] %v849_v4   ;;  %v489_v51 = vadd.f32 %v488_v6, %v440_v46 }
  0xd0   :  { %v517_v7 = vpop.f32.mrf.mxu2  ;;  %v421_v8 = vpop.f32.mrf.mxu0 }
  0xd1   :  { %v470_v9 = vpop.f32.mrf.mxu1  ;;  %v422_v11 = vadd.f32 %v1183_v34, %v421_v8  ;;  %v518_v12 = vadd.f32 %v517_v7, %v469_v10  ;;  %v445_v8 = vadd.f32 %v1183_v34, %v1195_v53 }
  0xd3   :  { %v471_v13 = vadd.f32 %v470_v9, %v422_v11  ;;  %v551_v19 = vmax.f32 %v518_v12, 0.0  ;;  %v447_v11 = vadd.f32 %v1183_v34, %v1198_v61 }
  0xd6   :  { %v490_v14 = vpop.f32.mrf.mxu3 }
  0xd7   :  { %v491_v52 = vadd.f32 %v490_v14, %v442_v50 }
  0xd8   :  { %v519_v15 = vpop.f32.mrf.mxu2  ;;  %v424_v17 = vpop.f32.mrf.mxu0 }
  0xd9   :  { %v520_v16 = vadd.f32 %v519_v15, %v471_v13  ;;  %v473_v18 = vpop.f32.mrf.mxu1  ;;  %v425_v22 = vadd.f32 %v1183_v34, %v424_v17 }
  0xdb   :  { %v552_v20 = vmax.f32 %v520_v16, 0.0  ;;  %v474_v27 = vadd.f32 %v473_v18, %v425_v22 }
  0xdd   :  { %v854_v21 = vpack.c.bf16 %v552_v20, %v551_v19 }
  0xde   :  { %v493_v23 = vpop.f32.mrf.mxu3 }
  0xdf   :  { %882 = vst [vmem:[%s1240_s3 + $0x10] sm:$0xff] %v854_v21   ;;  %v494_v12 = vadd.f32 %v493_v23, %v445_v8 }
  0xe0   :  { %v522_v24 = vpop.f32.mrf.mxu2  ;;  %v426_v25 = vpop.f32.mrf.mxu0 }
  0xe1   :  { %v475_v26 = vpop.f32.mrf.mxu1  ;;  %v427_v28 = vadd.f32 %v1183_v34, %v426_v25  ;;  %v523_v29 = vadd.f32 %v522_v24, %v474_v27 }
  0xe3   :  { %v476_v30 = vadd.f32 %v475_v26, %v427_v28  ;;  %v553_v38 = vmax.f32 %v523_v29, 0.0 }
  0xe6   :  { %v495_v31 = vpop.f32.mrf.mxu3 }
  0xe7   :  { %v496_v13 = vadd.f32 %v495_v31, %v447_v11 }
  0xe8   :  { %v524_v32 = vpop.f32.mrf.mxu2  ;;  %v429_v35 = vpop.f32.mrf.mxu0 }
  0xe9   :  { %v525_v33 = vadd.f32 %v524_v32, %v476_v30  ;;  %v478_v37 = vpop.f32.mrf.mxu1  ;;  %v430_v41 = vadd.f32 %v1183_v34, %v429_v35 }
  0xeb   :  { %v554_v39 = vmax.f32 %v525_v33, 0.0  ;;  %v479_v48 = vadd.f32 %v478_v37, %v430_v41 }
  0xed   :  { %v859_v40 = vpack.c.bf16 %v554_v39, %v553_v38 }
  0xee   :  { %v537_v42 = vpop.f32.mrf.mxu3 }
  0xef   :  { %883 = vst [vmem:[%s1240_s3 + $0x18] sm:$0xff] %v859_v40   ;;  %v538_v54 = vadd.f32 %v537_v42, %v489_v51 }
  0xf0   :  { %v527_v43 = vpop.f32.mrf.mxu2  ;;  %v431_v45 = vpop.f32.mrf.mxu0 }
  0xf1   :  { %v480_v47 = vpop.f32.mrf.mxu1  ;;  %v432_v49 = vadd.f32 %v1183_v34, %v431_v45  ;;  %v528_v55 = vadd.f32 %v527_v43, %v479_v48  ;;  %v559_v63 = vmax.f32 %v538_v54, 0.0 }
  0xf3   :  { %v481_v56 = vadd.f32 %v480_v47, %v432_v49  ;;  %v555_v36 = vmax.f32 %v528_v55, 0.0 }
  0xf6   :  { %v539_v57 = vpop.f32.mrf.mxu3 }
  0xf7   :  { %v540_v59 = vadd.f32 %v539_v57, %v491_v52 }
  0xf8   :  { %v529_v58 = vpop.f32.mrf.mxu2  ;;  %v434_v62 = vpop.f32.mrf.mxu0 }
  0xf9   :  { %v530_v60 = vadd.f32 %v529_v58, %v481_v56  ;;  %v560_v0 = vmax.f32 %v540_v59, 0.0  ;;  %v483_v3 = vpop.f32.mrf.mxu1  ;;  %v435_v44 = vadd.f32 %v1183_v34, %v434_v62 }
  0xfb   :  { %v556_v1 = vmax.f32 %v530_v60, 0.0  ;;  %v874_v2 = vpack.c.bf16 %v560_v0, %v559_v63  ;;  %v484_v9 = vadd.f32 %v483_v3, %v435_v44 }
  0xfd   :  { %v864_v4 = vpack.c.bf16 %v556_v1, %v555_v36  ;;  %886 = vst [vmem:[%s1240_s3 + $0x30] sm:$0xff] %v874_v2  }
  0xfe   :  { %v542_v5 = vpop.f32.mrf.mxu3 }
  0xff   :  { %884 = vst [vmem:[%s1240_s3 + $0x20] sm:$0xff] %v864_v4   ;;  %v543_v14 = vadd.f32 %v542_v5, %v494_v12 }
 0x100   :  { %v532_v6 = vpop.f32.mrf.mxu2  ;;  %v436_v7 = vpop.f32.mrf.mxu0 }
 0x101   :  { %v437_v10 = vadd.f32 %v1183_v34, %v436_v7  ;;  %v485_v15 = vpop.f32.mrf.mxu1  ;;  %v533_v16 = vadd.f32 %v532_v6, %v484_v9  ;;  %v561_v22 = vmax.f32 %v543_v14, 0.0 }
 0x103   :  { %v486_v17 = vadd.f32 %v485_v15, %v437_v10  ;;  %v557_v25 = vmax.f32 %v533_v16, 0.0 }
 0x106   :  { %v544_v18 = vpop.f32.mrf.mxu3 }
 0x107   :  { %v545_v20 = vadd.f32 %v544_v18, %v496_v13 }
 0x108   :  { %v534_v19 = vpop.f32.mrf.mxu2 }
 0x109   :  { %v535_v21 = vadd.f32 %v534_v19, %v486_v17  ;;  %v562_v24 = vmax.f32 %v545_v20, 0.0 }
 0x10b   :  { %v558_v53 = vmax.f32 %v535_v21, 0.0  ;;  %v879_v26 = vpack.c.bf16 %v562_v24, %v561_v22 }
 0x10d   :  { %v869_v27 = vpack.c.bf16 %v558_v53, %v557_v25  ;;  %887 = vst [vmem:[%s1240_s3 + $0x38] sm:$0xff] %v879_v26  }
 0x10f   :  { %885 = vst [vmem:[%s1240_s3 + $0x28] sm:$0xff] %v869_v27  }
 0x110   :  { %599 = vsyncpa [#allocation3], 1 }
 0x111   :  { %600 = vsyncpa [#allocation5], 1 }

// kernel: generator_forward.18
= control target key start
LH: loop header
LB: loop body
LE: loop exit
PB: predicated region body
PF: predicated region fallthrough
CT: control target
= control target key end

     0   :  { %s3344_s1 = inlined_call_operand.vmem [shape: bf16[384,128], index: 1, kind: input, shape index: {}]   ;;  %s3345_s2 = inlined_call_operand.vmem [shape: f32[1,128], index: 2, kind: input, shape index: {}]   ;;  %s3346_s0 = inlined_call_operand.vmem [shape: bf16[512,384], index: 0, kind: input, shape index: {}]   ;;  %s3347_s3 = inlined_call_operand.vmem [shape: bf16[512,128], index: 3, kind: output, shape index: {}]  }
   0x1   :  { %v2136_v0 = vld [vmem:[%s3344_s1 + $0x38] sm:$0xff]  ;;  %v2135_v3 = vld [vmem:[%s3344_s1 + $0x30] sm:$0xff]  ;;  %v2134_v6 = vld [vmem:[%s3344_s1 + $0x28] sm:$0xff] }
   0x2   :  { %v2396_v1 = vld [vmem:[%s3344_s1 + $0x78] sm:$0xff]  ;;  %850 = vmatpush.bf16.msra.mxu0 %v2136_v0  ;;  %2344 = vmatpush.bf16.msra.mxu3 %v2136_v0  ;;  %v2411_v4 = vld [vmem:[%s3344_s1 + $0x70] sm:$0xff]  ;;  %v2142_v7 = vld [vmem:[%s3344_s1 + $0x68] sm:$0xff] }
   0x3   :  { %v2401_v2 = vld [vmem:[%s3344_s1 + $0xb8] sm:$0xff]  ;;  %1019 = vmatpush.bf16.msra.mxu1 %v2396_v1  ;;  %v2416_v5 = vld [vmem:[%s3344_s1 + $0xb0] sm:$0xff]  ;;  %v2429_v8 = vld [vmem:[%s3344_s1 + $0xa8] sm:$0xff] }
   0x4   :  { %1188 = vmatpush.bf16.msra.mxu2 %v2401_v2  ;;  %v2133_v9 = vld [vmem:[%s3344_s1 + $0x20] sm:$0xff]  ;;  %v2132_v12 = vld [vmem:[%s3344_s1 + $0x18] sm:$0xff]  ;;  %v2131_v15 = vld [vmem:[%s3344_s1 + $0x10] sm:$0xff] }
   0x5   :  { %v2141_v10 = vld [vmem:[%s3344_s1 + $0x60] sm:$0xff]  ;;  %v2140_v13 = vld [vmem:[%s3344_s1 + $0x58] sm:$0xff]  ;;  %v2139_v16 = vld [vmem:[%s3344_s1 + $0x50] sm:$0xff] }
   0x6   :  { %851 = vmatpush.bf16.msra.mxu0 %v2135_v3  ;;  %2345 = vmatpush.bf16.msra.mxu3 %v2135_v3  ;;  %v2441_v11 = vld [vmem:[%s3344_s1 + $0xa0] sm:$0xff]  ;;  %v2453_v14 = vld [vmem:[%s3344_s1 + $0x98] sm:$0xff]  ;;  %v2465_v17 = vld [vmem:[%s3344_s1 + $0x90] sm:$0xff] }
   0x7   :  { %1020 = vmatpush.bf16.msra.mxu1 %v2411_v4  ;;  %v2130_v18 = vld [vmem:[%s3344_s1 + $0x8] sm:$0xff]  ;;  %v2129_v21 = vld [vmem:[%s3344_s1] sm:$0xff]  ;;  %v1557_v29 = vld [vmem:[%s3346_s0 + $0xc] sm:$0xf0] }
   0x8   :  { %1189 = vmatpush.bf16.msra.mxu2 %v2416_v5  ;;  %v2138_v19 = vld [vmem:[%s3344_s1 + $0x48] sm:$0xff]  ;;  %v2137_v22 = vld [vmem:[%s3344_s1 + $0x40] sm:$0xff]  ;;  %v2035_v31 = vld [vmem:[%s3346_s0 + $0x10] sm:$0xf0] }
   0x9   :  { %v2477_v20 = vld [vmem:[%s3344_s1 + $0x88] sm:$0xff]  ;;  %v2488_v23 = vld [vmem:[%s3344_s1 + $0x80] sm:$0xff]  ;;  %v1567_v36 = vld [vmem:[%s3346_s0 + $0x18] sm:$0xf] }
   0xa   :  { %852 = vmatpush.bf16.msra.mxu0 %v2134_v6  ;;  %2346 = vmatpush.bf16.msra.mxu3 %v2134_v6  ;;  %v1555_v24 = vld [vmem:[%s3346_s0] sm:$0xf]  ;;  %v2034_v25 = vld [vmem:[%s3346_s0 + $0x8] sm:$0xf0]  ;;  %v2033_v28 = vld [vmem:[%s3346_s0 + $0x4] sm:$0xf] }
   0xb   :  { %1021 = vmatpush.bf16.msra.mxu1 %v2142_v7  ;;  %v1843_v26 = vld [vmem:[%s3346_s0 + $0x240] sm:$0xf]  ;;  %v2106_v27 = vld [vmem:[%s3346_s0 + $0x248] sm:$0xf0]  ;;  %v1563_v30 = vld [vmem:[%s3346_s0 + $0x8] sm:$0xf]  ;;  %v1556_v32 = vor.u32 %v2034_v25, %v1555_v24  ;;  %v1560_v34 = vor.u32 %v2033_v28, %v1557_v29 }
   0xc   :  { %1190 = vmatpush.bf16.msra.mxu2 %v2429_v8  ;;  %v1844_v33 = vor.u32 %v2106_v27, %v1843_v26  ;;  %v1564_v35 = vor.u32 %v2035_v31, %v1563_v30  ;;  %v2037_v37 = vld [vmem:[%s3346_s0 + $0x20] sm:$0xf0]  ;;  %v1855_v38 = vld [vmem:[%s3346_s0 + $0x258] sm:$0xf]  ;;  %v2036_v40 = vld [vmem:[%s3346_s0 + $0x1c] sm:$0xf] }
   0xd   :  { %v2109_v39 = vld [vmem:[%s3346_s0 + $0x260] sm:$0xf0]  ;;  %v1569_v41 = vld [vmem:[%s3346_s0 + $0x24] sm:$0xf0]  ;;  %v1575_v42 = vld [vmem:[%s3346_s0 + $0x20] sm:$0xf]  ;;  %v1568_v44 = vor.u32 %v2037_v37, %v1567_v36 }
   0xe   :  { %853 = vmatpush.bf16.msra.mxu0 %v2133_v9  ;;  %2347 = vmatpush.bf16.msra.mxu3 %v2133_v9  ;;  %v2038_v43 = vld [vmem:[%s3346_s0 + $0x28] sm:$0xf0]  ;;  %v1856_v45 = vor.u32 %v2109_v39, %v1855_v38  ;;  %v1572_v46 = vor.u32 %v2036_v40, %v1569_v41  ;;  %v1579_v48 = vld [vmem:[%s3346_s0 + $0x30] sm:$0xf]  ;;  %v2040_v49 = vld [vmem:[%s3346_s0 + $0x38] sm:$0xf0] }
   0xf   :  { %1022 = vmatpush.bf16.msra.mxu1 %v2141_v10  ;;  %v1576_v47 = vor.u32 %v2038_v43, %v1575_v42  ;;  %v1867_v50 = vld [vmem:[%s3346_s0 + $0x270] sm:$0xf]  ;;  %v2112_v51 = vld [vmem:[%s3346_s0 + $0x278] sm:$0xf0]  ;;  %v2039_v52 = vld [vmem:[%s3346_s0 + $0x34] sm:$0xf]  ;;  %v1580_v56 = vor.u32 %v2040_v49, %v1579_v48 }
  0x10   :  { %1191 = vmatpush.bf16.msra.mxu2 %v2441_v11  ;;  %v1581_v53 = vld [vmem:[%s3346_s0 + $0x3c] sm:$0xf0]  ;;  %v1587_v54 = vld [vmem:[%s3346_s0 + $0x38] sm:$0xf]  ;;  %v2041_v55 = vld [vmem:[%s3346_s0 + $0x40] sm:$0xf0]  ;;  %v1868_v57 = vor.u32 %v2112_v51, %v1867_v50 }
  0x11   :  { %v1584_v58 = vor.u32 %v2039_v52, %v1581_v53  ;;  %v1588_v59 = vor.u32 %v2041_v55, %v1587_v54  ;;  %v1591_v60 = vld [vmem:[%s3346_s0 + $0x48] sm:$0xf]  ;;  %v2043_v61 = vld [vmem:[%s3346_s0 + $0x50] sm:$0xf0]  ;;  %v2042_v0 = vld [vmem:[%s3346_s0 + $0x4c] sm:$0xf] }
  0x12   :  { %854 = vmatpush.bf16.msra.mxu0 %v2132_v12  ;;  %2348 = vmatpush.bf16.msra.mxu3 %v2132_v12  ;;  %v1879_v62 = vld [vmem:[%s3346_s0 + $0x288] sm:$0xf]  ;;  %v2115_v63 = vld [vmem:[%s3346_s0 + $0x290] sm:$0xf0]  ;;  %v2044_v3 = vld [vmem:[%s3346_s0 + $0x58] sm:$0xf0] }
  0x13   :  { %1023 = vmatpush.bf16.msra.mxu1 %v2140_v13  ;;  %v2046_v9 = vld [vmem:[%s3346_s0 + $0x68] sm:$0xf0]  ;;  %v2045_v12 = vld [vmem:[%s3346_s0 + $0x64] sm:$0xf]  ;;  %v2048_v24 = vld [vmem:[%s3346_s0 + $0x7c] sm:$0xf] }
  0x14   :  { %1192 = vmatpush.bf16.msra.mxu2 %v2453_v14  ;;  %v1617_v25 = vld [vmem:[%s3346_s0 + $0x84] sm:$0xf0]  ;;  %v1623_v26 = vld [vmem:[%s3346_s0 + $0x80] sm:$0xf]  ;;  %v2050_v27 = vld [vmem:[%s3346_s0 + $0x88] sm:$0xf0] }
  0x15   :  { %v1620_v30 = vor.u32 %v2048_v24, %v1617_v25  ;;  %v1624_v31 = vor.u32 %v2050_v27, %v1623_v26  ;;  %v2051_v36 = vld [vmem:[%s3346_s0 + $0x94] sm:$0xf]  ;;  %v1629_v37 = vld [vmem:[%s3346_s0 + $0x9c] sm:$0xf0]  ;;  %v1635_v38 = vld [vmem:[%s3346_s0 + $0x98] sm:$0xf] }
  0x16   :  { %855 = vmatpush.bf16.msra.mxu0 %v2131_v15  ;;  %2349 = vmatpush.bf16.msra.mxu3 %v2131_v15  ;;  %v2047_v15 = vld [vmem:[%s3346_s0 + $0x70] sm:$0xf0]  ;;  %v2053_v39 = vld [vmem:[%s3346_s0 + $0xa0] sm:$0xf0]  ;;  %v1632_v42 = vor.u32 %v2051_v36, %v1629_v37  ;;  %v2054_v48 = vld [vmem:[%s3346_s0 + $0xac] sm:$0xf] }
  0x17   :  { %1024 = vmatpush.bf16.msra.mxu1 %v2139_v16  ;;  %v1636_v43 = vor.u32 %v2053_v39, %v1635_v38  ;;  %v1641_v49 = vld [vmem:[%s3346_s0 + $0xb4] sm:$0xf0]  ;;  %v1647_v50 = vld [vmem:[%s3346_s0 + $0xb0] sm:$0xf]  ;;  %v2056_v51 = vld [vmem:[%s3346_s0 + $0xb8] sm:$0xf0] }
  0x18   :  { %1193 = vmatpush.bf16.msra.mxu2 %v2465_v17  ;;  %v1644_v54 = vor.u32 %v2054_v48, %v1641_v49  ;;  %v1648_v55 = vor.u32 %v2056_v51, %v1647_v50  ;;  %v1677_v48 = vld [vmem:[%s3346_s0 + $0xfc] sm:$0xf0]  ;;  %v1683_v49 = vld [vmem:[%s3346_s0 + $0xf8] sm:$0xf]  ;;  %v2065_v50 = vld [vmem:[%s3346_s0 + $0x100] sm:$0xf0] }
  0x1a   :  { %856 = vmatpush.bf16.msra.mxu0 %v2130_v18  ;;  %2350 = vmatpush.bf16.msra.mxu3 %v2130_v18 }
  0x1b   :  { %1025 = vmatpush.bf16.msra.mxu1 %v2138_v19 }
  0x1c   :  { %1194 = vmatpush.bf16.msra.mxu2 %v2477_v20 }
  0x1e   :  { %857 = vmatpush.bf16.msra.mxu0 %v2129_v21  ;;  %2351 = vmatpush.bf16.msra.mxu3 %v2129_v21  ;;  %v2049_v21 = vld [vmem:[%s3346_s0 + $0x80] sm:$0xf0] }
  0x1f   :  { %1026 = vmatpush.bf16.msra.mxu1 %v2137_v22 }
  0x20   :  { %1195 = vmatpush.bf16.msra.mxu2 %v2488_v23 }
  0x21   :  { %858 = vmatmul.bf16.vlgmr.msra.gmra.mxu0 %v1556_v32  ;;  %978 = vmatmul.bf16.vlgmr.msra.gmra.mxu3 %v1844_v33  ;;  %v1627_v32 = vld [vmem:[%s3346_s0 + $0x90] sm:$0xf]  ;;  %v2052_v33 = vld [vmem:[%s3346_s0 + $0x98] sm:$0xf0] }
  0x22   :  { %2352 = vmatpush.bf16.msrb.mxu3 %v2396_v1  ;;  %1027 = vmatmul.bf16.vlgmr.msra.gmra.mxu1 %v1560_v34  ;;  %v1593_v1 = vld [vmem:[%s3346_s0 + $0x54] sm:$0xf0]  ;;  %v1915_v34 = vld [vmem:[%s3346_s0 + $0x2d0] sm:$0xf]  ;;  %v1628_v40 = vor.u32 %v2052_v33, %v1627_v32 }
  0x23   :  { %1196 = vmatmul.bf16.vlgmr.msra.gmra.mxu2 %v1564_v35  ;;  %v1596_v6 = vor.u32 %v2042_v0, %v1593_v1  ;;  %v2124_v35 = vld [vmem:[%s3346_s0 + $0x2d8] sm:$0xf0] }
  0x24   :  { %v1916_v41 = vor.u32 %v2124_v35, %v1915_v34 }
  0x26   :  { %2353 = vmatpush.bf16.msrb.mxu3 %v2411_v4  ;;  %v1592_v4 = vor.u32 %v2043_v61, %v1591_v60  ;;  %v1845_v60 = vld [vmem:[%s3346_s0 + $0x24c] sm:$0xf0] }
  0x27   :  { %v1653_v61 = vld [vmem:[%s3346_s0 + $0xcc] sm:$0xf0] }
  0x2a   :  { %2354 = vmatpush.bf16.msrb.mxu3 %v2142_v7 }
  0x2e   :  { %2355 = vmatpush.bf16.msrb.mxu3 %v2141_v10  ;;  %v1891_v10 = vld [vmem:[%s3346_s0 + $0x2a0] sm:$0xf] }
  0x31   :  { %863 = vmatmul.bf16.gmra.mxu0 %v1568_v44  ;;  %983 = vmatmul.bf16.gmra.mxu3 %v1856_v45  ;;  %v1639_v44 = vld [vmem:[%s3346_s0 + $0xa8] sm:$0xf]  ;;  %v2055_v45 = vld [vmem:[%s3346_s0 + $0xb0] sm:$0xf0] }
  0x32   :  { %2356 = vmatpush.bf16.msrb.mxu3 %v2140_v13  ;;  %1032 = vmatmul.bf16.gmra.mxu1 %v1572_v46  ;;  %v1605_v13 = vld [vmem:[%s3346_s0 + $0x6c] sm:$0xf0]  ;;  %v1927_v46 = vld [vmem:[%s3346_s0 + $0x2e8] sm:$0xf]  ;;  %v1640_v52 = vor.u32 %v2055_v45, %v1639_v44  ;;  %v2064_v44 = vld [vmem:[%s3346_s0 + $0xf8] sm:$0xf0] }
  0x33   :  { %1201 = vmatmul.bf16.gmra.mxu2 %v1576_v47  ;;  %v1608_v18 = vor.u32 %v2045_v12, %v1605_v13  ;;  %v2127_v47 = vld [vmem:[%s3346_s0 + $0x2f0] sm:$0xf0] }
  0x34   :  { %v1928_v53 = vor.u32 %v2127_v47, %v1927_v46  ;;  %v2063_v45 = vld [vmem:[%s3346_s0 + $0xf4] sm:$0xf]  ;;  %v1869_v47 = vld [vmem:[%s3346_s0 + $0x27c] sm:$0xf0] }
  0x35   :  { %v2111_v46 = vld [vmem:[%s3346_s0 + $0x274] sm:$0xf] }
  0x36   :  { %2357 = vmatpush.bf16.msrb.mxu3 %v2139_v16 }
  0x3a   :  { %2358 = vmatpush.bf16.msrb.mxu3 %v2138_v19 }
  0x3e   :  { %2359 = vmatpush.bf16.msrb.mxu3 %v2137_v22  ;;  %v1903_v22 = vld [vmem:[%s3346_s0 + $0x2b8] sm:$0xf] }
  0x41   :  { %868 = vmatmul.bf16.gmra.mxu0 %v1580_v56  ;;  %988 = vmatmul.bf16.gmra.mxu3 %v1868_v57  ;;  %v1651_v56 = vld [vmem:[%s3346_s0 + $0xc0] sm:$0xf]  ;;  %v2058_v57 = vld [vmem:[%s3346_s0 + $0xc8] sm:$0xf0] }
  0x42   :  { %2360 = vmatpush.bf16.msra.mxu3 %v2401_v2  ;;  %1037 = vmatmul.bf16.gmra.mxu1 %v1584_v58  ;;  %v1599_v2 = vld [vmem:[%s3346_s0 + $0x50] sm:$0xf]  ;;  %v2057_v58 = vld [vmem:[%s3346_s0 + $0xc4] sm:$0xf]  ;;  %v1652_v0 = vor.u32 %v2058_v57, %v1651_v56  ;;  %v1872_v56 = vor.u32 %v2111_v46, %v1869_v47  ;;  %v1707_v47 = vld [vmem:[%s3346_s0 + $0x128] sm:$0xf] }
  0x43   :  { %1206 = vmatmul.bf16.gmra.mxu2 %v1588_v59  ;;  %v1600_v7 = vor.u32 %v2044_v3, %v1599_v2  ;;  %v2105_v59 = vld [vmem:[%s3346_s0 + $0x244] sm:$0xf]  ;;  %v1656_v3 = vor.u32 %v2057_v58, %v1653_v61  ;;  %v1701_v46 = vld [vmem:[%s3346_s0 + $0x12c] sm:$0xf0] }
  0x44   :  { %v1848_v1 = vor.u32 %v2105_v59, %v1845_v60  ;;  %v1680_v59 = vor.u32 %v2063_v45, %v1677_v48  ;;  %v1684_v60 = vor.u32 %v2065_v50, %v1683_v49  ;;  %v1893_v45 = vld [vmem:[%s3346_s0 + $0x2ac] sm:$0xf0]  ;;  %v2071_v48 = vld [vmem:[%s3346_s0 + $0x130] sm:$0xf0] }
  0x46   :  { %2361 = vmatpush.bf16.msra.mxu3 %v2416_v5  ;;  %v1880_v5 = vor.u32 %v2115_v63, %v1879_v62  ;;  %v1659_v62 = vld [vmem:[%s3346_s0 + $0xc8] sm:$0xf]  ;;  %v2059_v63 = vld [vmem:[%s3346_s0 + $0xd0] sm:$0xf0] }
  0x4a   :  { %2362 = vmatpush.bf16.msra.mxu3 %v2429_v8  ;;  %v1603_v8 = vld [vmem:[%s3346_s0 + $0x60] sm:$0xf] }
  0x4b   :  { %v1604_v16 = vor.u32 %v2046_v9, %v1603_v8 }
  0x4e   :  { %2363 = vmatpush.bf16.msra.mxu3 %v2441_v11  ;;  %v2118_v11 = vld [vmem:[%s3346_s0 + $0x2a8] sm:$0xf0] }
  0x51   :  { %873 = vmatmul.bf16.gmra.mxu0 %v1592_v4  ;;  %993 = vmatmul.bf16.gmra.mxu3 %v1880_v5  ;;  %v1660_v4 = vor.u32 %v2059_v63, %v1659_v62 }
  0x52   :  { %2364 = vmatpush.bf16.msra.mxu3 %v2453_v14  ;;  %1042 = vmatmul.bf16.gmra.mxu1 %v1596_v6  ;;  %v1611_v14 = vld [vmem:[%s3346_s0 + $0x68] sm:$0xf]  ;;  %v2721_v6 = vld [vmem:[%s3345_s2] ss:$0 sm:$0xff] }
  0x53   :  { %1211 = vmatmul.bf16.gmra.mxu2 %v1600_v7  ;;  %v1612_v19 = vor.u32 %v2047_v15, %v1611_v14  ;;  %v1663_v14 = vld [vmem:[%s3346_s0 + $0xd8] sm:$0xf]  ;;  %v2061_v15 = vld [vmem:[%s3346_s0 + $0xe0] sm:$0xf0] }
  0x54   :  { %v1664_v26 = vor.u32 %v2061_v15, %v1663_v14  ;;  %v1881_v14 = vld [vmem:[%s3346_s0 + $0x294] sm:$0xf0] }
  0x55   :  { %v1689_v15 = vld [vmem:[%s3346_s0 + $0x114] sm:$0xf0] }
  0x56   :  { %2365 = vmatpush.bf16.msra.mxu3 %v2465_v17  ;;  %v1892_v17 = vor.u32 %v2118_v11, %v1891_v10 }
  0x5a   :  { %2366 = vmatpush.bf16.msra.mxu3 %v2477_v20  ;;  %v1615_v20 = vld [vmem:[%s3346_s0 + $0x78] sm:$0xf] }
  0x5b   :  { %v1616_v28 = vor.u32 %v2049_v21, %v1615_v20  ;;  %v1671_v20 = vld [vmem:[%s3346_s0 + $0xe0] sm:$0xf]  ;;  %v2062_v21 = vld [vmem:[%s3346_s0 + $0xe8] sm:$0xf0] }
  0x5e   :  { %2367 = vmatpush.bf16.msra.mxu3 %v2488_v23  ;;  %v2121_v23 = vld [vmem:[%s3346_s0 + $0x2c0] sm:$0xf0] }
  0x5f   :  { %v1904_v29 = vor.u32 %v2121_v23, %v1903_v22 }
  0x61   :  { %878 = vmatmul.bf16.gmra.mxu0 %v1604_v16  ;;  %998 = vmatmul.bf16.gmra.mxu3 %v1892_v17  ;;  %v2060_v16 = vld [vmem:[%s3346_s0 + $0xdc] sm:$0xf] }
  0x62   :  { %1047 = vmatmul.bf16.gmra.mxu1 %v1608_v18  ;;  %v2108_v17 = vld [vmem:[%s3346_s0 + $0x25c] sm:$0xf]  ;;  %v1857_v18 = vld [vmem:[%s3346_s0 + $0x264] sm:$0xf0] }
  0x63   :  { %1216 = vmatmul.bf16.gmra.mxu2 %v1612_v19  ;;  %v1665_v19 = vld [vmem:[%s3346_s0 + $0xe4] sm:$0xf0]  ;;  %v1860_v27 = vor.u32 %v2108_v17, %v1857_v18  ;;  %v2068_v17 = vld [vmem:[%s3346_s0 + $0x118] sm:$0xf0] }
  0x71   :  { %883 = vmatmul.bf16.gmra.mxu0 %v1616_v28  ;;  %1003 = vmatmul.bf16.gmra.mxu3 %v1904_v29 }
  0x72   :  { %1052 = vmatmul.bf16.gmra.mxu1 %v1620_v30  ;;  %v1668_v30 = vor.u32 %v2060_v16, %v1665_v19  ;;  %v1695_v16 = vld [vmem:[%s3346_s0 + $0x110] sm:$0xf] }
  0x73   :  { %1221 = vmatmul.bf16.gmra.mxu2 %v1624_v31  ;;  %v1672_v31 = vor.u32 %v2062_v21, %v1671_v20 }
  0x81   :  { %888 = vmatmul.bf16.gmra.mxu0 %v1628_v40  ;;  %1008 = vmatmul.bf16.gmra.mxu3 %v1916_v41 }
  0x82   :  { %1057 = vmatmul.bf16.gmra.mxu1 %v1632_v42 }
  0x83   :  { %1226 = vmatmul.bf16.gmra.mxu2 %v1636_v43  ;;  %v1675_v43 = vld [vmem:[%s3346_s0 + $0xf0] sm:$0xf] }
  0x91   :  { %893 = vmatmul.bf16.gmra.mxu0 %v1640_v52  ;;  %1013 = vmatmul.bf16.gmra.mxu3 %v1928_v53 }
  0x92   :  { %1062 = vmatmul.bf16.gmra.mxu1 %v1644_v54 }
  0x93   :  { %1231 = vmatmul.bf16.gmra.mxu2 %v1648_v55  ;;  %v1676_v55 = vor.u32 %v2064_v44, %v1675_v43  ;;  %v2069_v43 = vld [vmem:[%s3346_s0 + $0x124] sm:$0xf] }
  0x94   :  { %v2117_v44 = vld [vmem:[%s3346_s0 + $0x2a4] sm:$0xf] }
  0x9e   :  { %v859_v2 = vpop.f32.mrf.mxu0 }
  0x9f   :  { %v1028_v5 = vpop.f32.mrf.mxu1  ;;  %v860_v7 = vadd.f32 %v2721_v6, %v859_v2 }
  0xa1   :  { %898 = vmatmul.bf16.gmra.mxu0 %v1652_v0  ;;  %1147 = vmatmul.bf16.vlgmr.msrb.gmra.mxu3 %v1848_v1  ;;  %v1029_v12 = vadd.f32 %v1028_v5, %v860_v7 }
  0xa2   :  { %1067 = vmatmul.bf16.gmra.mxu1 %v1656_v3 }
  0xa3   :  { %1236 = vmatmul.bf16.gmra.mxu2 %v1660_v4 }
  0xa4   :  { %v2724_v8 = vpop.f32.mrf.mxu3 }
  0xa6   :  { %v1197_v9 = vpop.f32.mrf.mxu2  ;;  %v861_v10 = vpop.f32.mrf.mxu0 }
  0xa7   :  { %v1030_v11 = vpop.f32.mrf.mxu1  ;;  %v862_v13 = vadd.f32 %v2721_v6, %v861_v10  ;;  %v1198_v22 = vadd.f32 %v1197_v9, %v1029_v12  ;;  %v1687_v10 = vld [vmem:[%s3346_s0 + $0x108] sm:$0xf]  ;;  %v2066_v12 = vld [vmem:[%s3346_s0 + $0x10c] sm:$0xf] }
  0xa9   :  { %v1031_v23 = vadd.f32 %v1030_v11, %v862_v13  ;;  %v1357_v33 = vmax.f32 %v1198_v22, 0.0  ;;  %v2067_v11 = vld [vmem:[%s3346_s0 + $0x110] sm:$0xf0]  ;;  %v2114_v13 = vld [vmem:[%s3346_s0 + $0x28c] sm:$0xf] }
  0xaa   :  { %v1688_v22 = vor.u32 %v2067_v11, %v1687_v10  ;;  %v1711_v10 = vld [vmem:[%s3346_s0 + $0x138] sm:$0xf]  ;;  %v2073_v11 = vld [vmem:[%s3346_s0 + $0x140] sm:$0xf0] }
  0xac   :  { %v2751_v24 = vpop.f32.mrf.mxu3 }
  0xae   :  { %v1199_v25 = vpop.f32.mrf.mxu2  ;;  %v864_v29 = vpop.f32.mrf.mxu0 }
  0xaf   :  { %v1200_v28 = vadd.f32 %v1199_v25, %v1031_v23  ;;  %v1033_v32 = vpop.f32.mrf.mxu1  ;;  %v865_v36 = vadd.f32 %v2721_v6, %v864_v29  ;;  %v1884_v23 = vor.u32 %v2114_v13, %v1881_v14  ;;  %v2120_v13 = vld [vmem:[%s3346_s0 + $0x2bc] sm:$0xf]  ;;  %v1905_v14 = vld [vmem:[%s3346_s0 + $0x2c4] sm:$0xf0] }
  0xb1   :  { %v1358_v34 = vmax.f32 %v1200_v28, 0.0  ;;  %903 = vmatmul.bf16.gmra.mxu0 %v1664_v26  ;;  %1152 = vmatmul.bf16.gmra.mxu3 %v1860_v27  ;;  %v1034_v41 = vadd.f32 %v1033_v32, %v865_v36  ;;  %v1692_v27 = vor.u32 %v2066_v12, %v1689_v15  ;;  %v1696_v28 = vor.u32 %v2068_v17, %v1695_v16  ;;  %v2072_v12 = vld [vmem:[%s3346_s0 + $0x13c] sm:$0xf]  ;;  %v1713_v15 = vld [vmem:[%s3346_s0 + $0x144] sm:$0xf0] }
  0xb2   :  { %1072 = vmatmul.bf16.gmra.mxu1 %v1668_v30  ;;  %v1719_v16 = vld [vmem:[%s3346_s0 + $0x140] sm:$0xf]  ;;  %v2074_v17 = vld [vmem:[%s3346_s0 + $0x148] sm:$0xf0] }
  0xb3   :  { %v2156_v35 = vpack.c.bf16 %v1358_v34, %v1357_v33  ;;  %1241 = vmatmul.bf16.gmra.mxu2 %v1672_v31 }
  0xb4   :  { %v2757_v37 = vpop.f32.mrf.mxu3 }
  0xb5   :  { %2157 = vst [vmem:[%s3347_s3] sm:$0xff] %v2156_v35  }
  0xb6   :  { %v1202_v38 = vpop.f32.mrf.mxu2  ;;  %v866_v39 = vpop.f32.mrf.mxu0 }
  0xb7   :  { %v1035_v40 = vpop.f32.mrf.mxu1  ;;  %v867_v42 = vadd.f32 %v2721_v6, %v866_v39  ;;  %v1203_v51 = vadd.f32 %v1202_v38, %v1034_v41  ;;  %v1699_v41 = vld [vmem:[%s3346_s0 + $0x120] sm:$0xf] }
  0xb9   :  { %v1036_v52 = vadd.f32 %v1035_v40, %v867_v42  ;;  %v1359_v62 = vmax.f32 %v1203_v51, 0.0  ;;  %v2070_v42 = vld [vmem:[%s3346_s0 + $0x128] sm:$0xf0] }
  0xbc   :  { %v2784_v53 = vpop.f32.mrf.mxu3 }
  0xbe   :  { %v1204_v54 = vpop.f32.mrf.mxu2  ;;  %v869_v58 = vpop.f32.mrf.mxu0 }
  0xbf   :  { %v1205_v57 = vadd.f32 %v1204_v54, %v1036_v52  ;;  %v1038_v61 = vpop.f32.mrf.mxu1  ;;  %v870_v1 = vadd.f32 %v2721_v6, %v869_v58  ;;  %v1700_v54 = vor.u32 %v2070_v42, %v1699_v41  ;;  %v1704_v58 = vor.u32 %v2069_v43, %v1701_v46  ;;  %v1723_v43 = vld [vmem:[%s3346_s0 + $0x150] sm:$0xf]  ;;  %v2123_v46 = vld [vmem:[%s3346_s0 + $0x2d4] sm:$0xf] }
  0xc1   :  { %v1360_v63 = vmax.f32 %v1205_v57, 0.0  ;;  %908 = vmatmul.bf16.gmra.mxu0 %v1676_v55  ;;  %1157 = vmatmul.bf16.gmra.mxu3 %v1872_v56  ;;  %v1039_v7 = vadd.f32 %v1038_v61, %v870_v1  ;;  %v1896_v55 = vor.u32 %v2117_v44, %v1893_v45  ;;  %v2076_v44 = vld [vmem:[%s3346_s0 + $0x158] sm:$0xf0]  ;;  %v2075_v45 = vld [vmem:[%s3346_s0 + $0x154] sm:$0xf] }
  0xc2   :  { %1077 = vmatmul.bf16.gmra.mxu1 %v1680_v59  ;;  %v1708_v59 = vor.u32 %v2071_v48, %v1707_v47  ;;  %v1917_v47 = vld [vmem:[%s3346_s0 + $0x2dc] sm:$0xf0] }
  0xc3   :  { %v2161_v0 = vpack.c.bf16 %v1360_v63, %v1359_v62  ;;  %1246 = vmatmul.bf16.gmra.mxu2 %v1684_v60  ;;  %v1725_v48 = vld [vmem:[%s3346_s0 + $0x15c] sm:$0xf0] }
  0xc4   :  { %v2790_v2 = vpop.f32.mrf.mxu3 }
  0xc5   :  { %2313 = vst [vmem:[%s3347_s3 + $0x8] sm:$0xff] %v2161_v0  }
  0xc6   :  { %v1207_v3 = vpop.f32.mrf.mxu2  ;;  %v871_v4 = vpop.f32.mrf.mxu0 }
  0xc7   :  { %v1040_v5 = vpop.f32.mrf.mxu1  ;;  %v872_v9 = vadd.f32 %v2721_v6, %v871_v4  ;;  %v1208_v18 = vadd.f32 %v1207_v3, %v1039_v7 }
  0xc9   :  { %v1041_v19 = vadd.f32 %v1040_v5, %v872_v9  ;;  %v1361_v30 = vmax.f32 %v1208_v18, 0.0 }
  0xcc   :  { %v2817_v20 = vpop.f32.mrf.mxu3 }
  0xce   :  { %v1209_v21 = vpop.f32.mrf.mxu2  ;;  %v874_v26 = vpop.f32.mrf.mxu0 }
  0xcf   :  { %v1210_v25 = vadd.f32 %v1209_v21, %v1041_v19  ;;  %v1043_v29 = vpop.f32.mrf.mxu1  ;;  %v875_v33 = vadd.f32 %v2721_v6, %v874_v26 }
  0xd1   :  { %v1362_v31 = vmax.f32 %v1210_v25, 0.0  ;;  %913 = vmatmul.bf16.gmra.mxu0 %v1688_v22  ;;  %1162 = vmatmul.bf16.gmra.mxu3 %v1884_v23  ;;  %v1044_v39 = vadd.f32 %v1043_v29, %v875_v33  ;;  %v1712_v23 = vor.u32 %v2073_v11, %v1711_v10  ;;  %v1908_v25 = vor.u32 %v2120_v13, %v1905_v14  ;;  %v1735_v14 = vld [vmem:[%s3346_s0 + $0x168] sm:$0xf] }
  0xd2   :  { %1082 = vmatmul.bf16.gmra.mxu1 %v1692_v27  ;;  %v1720_v29 = vor.u32 %v2074_v17, %v1719_v16  ;;  %v2078_v16 = vld [vmem:[%s3346_s0 + $0x16c] sm:$0xf] }
  0xd3   :  { %v2166_v32 = vpack.c.bf16 %v1362_v31, %v1361_v30  ;;  %1251 = vmatmul.bf16.gmra.mxu2 %v1696_v28  ;;  %v1716_v28 = vor.u32 %v2072_v12, %v1713_v15  ;;  %v2079_v15 = vld [vmem:[%s3346_s0 + $0x170] sm:$0xf0]  ;;  %v2126_v17 = vld [vmem:[%s3346_s0 + $0x2ec] sm:$0xf] }
  0xd4   :  { %v2823_v34 = vpop.f32.mrf.mxu3 }
  0xd5   :  { %2314 = vst [vmem:[%s3347_s3 + $0x10] sm:$0xff] %v2166_v32  }
  0xd6   :  { %v1212_v35 = vpop.f32.mrf.mxu2  ;;  %v876_v36 = vpop.f32.mrf.mxu0 }
  0xd7   :  { %v1045_v38 = vpop.f32.mrf.mxu1  ;;  %v877_v40 = vadd.f32 %v2721_v6, %v876_v36  ;;  %v1213_v49 = vadd.f32 %v1212_v35, %v1044_v39 }
  0xd9   :  { %v1046_v50 = vadd.f32 %v1045_v38, %v877_v40  ;;  %v1363_v61 = vmax.f32 %v1213_v49, 0.0  ;;  %v1731_v49 = vld [vmem:[%s3346_s0 + $0x158] sm:$0xf] }
  0xdc   :  { %v2850_v51 = vpop.f32.mrf.mxu3 }
  0xde   :  { %v1214_v52 = vpop.f32.mrf.mxu2  ;;  %v879_v57 = vpop.f32.mrf.mxu0 }
  0xdf   :  { %v1215_v56 = vadd.f32 %v1214_v52, %v1046_v50  ;;  %v1048_v60 = vpop.f32.mrf.mxu1  ;;  %v880_v0 = vadd.f32 %v2721_v6, %v879_v57  ;;  %v2077_v50 = vld [vmem:[%s3346_s0 + $0x160] sm:$0xf0]  ;;  %v1724_v57 = vor.u32 %v2076_v44, %v1723_v43 }
  0xe1   :  { %v1364_v62 = vmax.f32 %v1215_v56, 0.0  ;;  %918 = vmatmul.bf16.gmra.mxu0 %v1700_v54  ;;  %1167 = vmatmul.bf16.gmra.mxu3 %v1896_v55  ;;  %v1049_v7 = vadd.f32 %v1048_v60, %v880_v0 }
  0xe2   :  { %1087 = vmatmul.bf16.gmra.mxu1 %v1704_v58  ;;  %v1920_v58 = vor.u32 %v2123_v46, %v1917_v47 }
  0xe3   :  { %v2171_v63 = vpack.c.bf16 %v1364_v62, %v1363_v61  ;;  %1256 = vmatmul.bf16.gmra.mxu2 %v1708_v59  ;;  %v1728_v61 = vor.u32 %v2075_v45, %v1725_v48  ;;  %v1732_v62 = vor.u32 %v2077_v50, %v1731_v49  ;;  %v1747_v49 = vld [vmem:[%s3346_s0 + $0x180] sm:$0xf]  ;;  %v2082_v50 = vld [vmem:[%s3346_s0 + $0x188] sm:$0xf0] }
  0xe4   :  { %v2856_v1 = vpop.f32.mrf.mxu3 }
  0xe5   :  { %2315 = vst [vmem:[%s3347_s3 + $0x18] sm:$0xff] %v2171_v63  }
  0xe6   :  { %v1217_v3 = vpop.f32.mrf.mxu2  ;;  %v881_v4 = vpop.f32.mrf.mxu0 }
  0xe7   :  { %v1050_v5 = vpop.f32.mrf.mxu1  ;;  %v882_v9 = vadd.f32 %v2721_v6, %v881_v4  ;;  %v1218_v18 = vadd.f32 %v1217_v3, %v1049_v7 }
  0xe9   :  { %v1051_v19 = vadd.f32 %v1050_v5, %v882_v9  ;;  %v1365_v31 = vmax.f32 %v1218_v18, 0.0  ;;  %v1929_v18 = vld [vmem:[%s3346_s0 + $0x2f4] sm:$0xf0] }
  0xec   :  { %v2883_v21 = vpop.f32.mrf.mxu3 }
  0xee   :  { %v1219_v22 = vpop.f32.mrf.mxu2  ;;  %v884_v27 = vpop.f32.mrf.mxu0 }
  0xef   :  { %v1220_v26 = vadd.f32 %v1219_v22, %v1051_v19  ;;  %v1053_v30 = vpop.f32.mrf.mxu1  ;;  %v885_v35 = vadd.f32 %v2721_v6, %v884_v27  ;;  %v1737_v19 = vld [vmem:[%s3346_s0 + $0x174] sm:$0xf0]  ;;  %v1743_v22 = vld [vmem:[%s3346_s0 + $0x170] sm:$0xf] }
  0xf1   :  { %v1366_v32 = vmax.f32 %v1220_v26, 0.0  ;;  %923 = vmatmul.bf16.gmra.mxu0 %v1712_v23  ;;  %1172 = vmatmul.bf16.gmra.mxu3 %v1908_v25  ;;  %v1054_v41 = vadd.f32 %v1053_v30, %v885_v35  ;;  %v2080_v23 = vld [vmem:[%s3346_s0 + $0x178] sm:$0xf0]  ;;  %v1932_v30 = vor.u32 %v2126_v17, %v1929_v18 }
  0xf2   :  { %1092 = vmatmul.bf16.gmra.mxu1 %v1716_v28  ;;  %v1744_v35 = vor.u32 %v2080_v23, %v1743_v22 }
  0xf3   :  { %v2176_v33 = vpack.c.bf16 %v1366_v32, %v1365_v31  ;;  %1261 = vmatmul.bf16.gmra.mxu2 %v1720_v29  ;;  %v1736_v29 = vor.u32 %v2079_v15, %v1735_v14  ;;  %v980_v15 = vadd.f32 %v2721_v6, %v2724_v8  ;;  %v2085_v8 = vld [vmem:[%s3346_s0 + $0x1a0] sm:$0xf0] }
  0xf4   :  { %v2889_v36 = vpop.f32.mrf.mxu3 }
  0xf5   :  { %2316 = vst [vmem:[%s3347_s3 + $0x20] sm:$0xff] %v2176_v33   ;;  %v1740_v33 = vor.u32 %v2078_v16, %v1737_v19 }
  0xf6   :  { %v1222_v38 = vpop.f32.mrf.mxu2  ;;  %v886_v39 = vpop.f32.mrf.mxu0 }
  0xf7   :  { %v1055_v40 = vpop.f32.mrf.mxu1  ;;  %v887_v42 = vadd.f32 %v2721_v6, %v886_v39  ;;  %v1223_v52 = vadd.f32 %v1222_v38, %v1054_v41 }
  0xf9   :  { %v1056_v54 = vadd.f32 %v1055_v40, %v887_v42  ;;  %v1367_v0 = vmax.f32 %v1223_v52, 0.0  ;;  %v2081_v52 = vld [vmem:[%s3346_s0 + $0x184] sm:$0xf] }
  0xfc   :  { %v2916_v55 = vpop.f32.mrf.mxu3 }
  0xfe   :  { %v1224_v56 = vpop.f32.mrf.mxu2  ;;  %v889_v60 = vpop.f32.mrf.mxu0 }
  0xff   :  { %v1225_v59 = vadd.f32 %v1224_v56, %v1056_v54  ;;  %v1058_v63 = vpop.f32.mrf.mxu1  ;;  %v890_v5 = vadd.f32 %v2721_v6, %v889_v60  ;;  %v1851_v54 = vld [vmem:[%s3346_s0 + $0x248] sm:$0xf]  ;;  %v2107_v56 = vld [vmem:[%s3346_s0 + $0x250] sm:$0xf0] }
 0x101   :  { %v1368_v3 = vmax.f32 %v1225_v59, 0.0  ;;  %928 = vmatmul.bf16.gmra.mxu0 %v1724_v57  ;;  %1177 = vmatmul.bf16.gmra.mxu3 %v1920_v58  ;;  %v1059_v12 = vadd.f32 %v1058_v63, %v890_v5  ;;  %v1749_v57 = vld [vmem:[%s3346_s0 + $0x18c] sm:$0xf0]  ;;  %v1755_v58 = vld [vmem:[%s3346_s0 + $0x188] sm:$0xf] }
 0x102   :  { %1097 = vmatmul.bf16.gmra.mxu1 %v1728_v61  ;;  %v2083_v59 = vld [vmem:[%s3346_s0 + $0x190] sm:$0xf0] }
 0x103   :  { %v2181_v4 = vpack.c.bf16 %v1368_v3, %v1367_v0  ;;  %1266 = vmatmul.bf16.gmra.mxu2 %v1732_v62  ;;  %v1748_v0 = vor.u32 %v2082_v50, %v1747_v49  ;;  %v1852_v3 = vor.u32 %v2107_v56, %v1851_v54 }
 0x104   :  { %v2922_v7 = vpop.f32.mrf.mxu3 }
 0x105   :  { %2317 = vst [vmem:[%s3347_s3 + $0x28] sm:$0xff] %v2181_v4  }
 0x106   :  { %v1227_v9 = vpop.f32.mrf.mxu2  ;;  %v891_v10 = vpop.f32.mrf.mxu0 }
 0x107   :  { %v1060_v11 = vpop.f32.mrf.mxu1  ;;  %v892_v13 = vadd.f32 %v2721_v6, %v891_v10  ;;  %v1228_v25 = vadd.f32 %v1227_v9, %v1059_v12  ;;  %v1752_v9 = vor.u32 %v2081_v52, %v1749_v57  ;;  %v1756_v10 = vor.u32 %v2083_v59, %v1755_v58 }
 0x108   :  { %v985_v57 = vadd.f32 %v2721_v6, %v2757_v37  ;;  %v2088_v37 = vld [vmem:[%s3346_s0 + $0x1b8] sm:$0xf0] }
 0x109   :  { %v1061_v26 = vadd.f32 %v1060_v11, %v892_v13  ;;  %v1369_v39 = vmax.f32 %v1228_v25, 0.0 }
 0x10c   :  { %v2949_v27 = vpop.f32.mrf.mxu3 }
 0x10e   :  { %v1229_v28 = vpop.f32.mrf.mxu2  ;;  %v894_v32 = vpop.f32.mrf.mxu0 }
 0x10f   :  { %v1230_v31 = vadd.f32 %v1229_v28, %v1061_v26  ;;  %v1063_v38 = vpop.f32.mrf.mxu1  ;;  %v895_v42 = vadd.f32 %v2721_v6, %v894_v32  ;;  %v1759_v28 = vld [vmem:[%s3346_s0 + $0x198] sm:$0xf]  ;;  %v982_v32 = vadd.f32 %v2721_v6, %v2751_v24 }
 0x111   :  { %v1370_v40 = vmax.f32 %v1230_v31, 0.0  ;;  %933 = vmatmul.bf16.gmra.mxu0 %v1736_v29  ;;  %1182 = vmatmul.bf16.gmra.mxu3 %v1932_v30  ;;  %v1064_v47 = vadd.f32 %v1063_v38, %v895_v42  ;;  %v2084_v29 = vld [vmem:[%s3346_s0 + $0x19c] sm:$0xf]  ;;  %v1863_v30 = vld [vmem:[%s3346_s0 + $0x260] sm:$0xf] }
 0x112   :  { %1102 = vmatmul.bf16.gmra.mxu1 %v1740_v33  ;;  %v2110_v31 = vld [vmem:[%s3346_s0 + $0x268] sm:$0xf0]  ;;  %v1761_v33 = vld [vmem:[%s3346_s0 + $0x1a4] sm:$0xf0] }
 0x113   :  { %v2186_v41 = vpack.c.bf16 %v1370_v40, %v1369_v39  ;;  %1271 = vmatmul.bf16.gmra.mxu2 %v1744_v35  ;;  %v1767_v35 = vld [vmem:[%s3346_s0 + $0x1a0] sm:$0xf]  ;;  %v2086_v38 = vld [vmem:[%s3346_s0 + $0x1a8] sm:$0xf0]  ;;  %v1864_v24 = vor.u32 %v2110_v31, %v1863_v30 }
 0x114   :  { %v2955_v43 = vpop.f32.mrf.mxu3  ;;  %v1768_v49 = vor.u32 %v2086_v38, %v1767_v35  ;;  %v990_v35 = vadd.f32 %v2721_v6, %v2790_v2  ;;  %v2091_v2 = vld [vmem:[%s3346_s0 + $0x1d0] sm:$0xf0] }
 0x115   :  { %2318 = vst [vmem:[%s3347_s3 + $0x30] sm:$0xff] %v2186_v41  }
 0x116   :  { %v1232_v44 = vpop.f32.mrf.mxu2  ;;  %v896_v45 = vpop.f32.mrf.mxu0 }
 0x117   :  { %v1065_v46 = vpop.f32.mrf.mxu1  ;;  %v897_v48 = vadd.f32 %v2721_v6, %v896_v45  ;;  %v1233_v60 = vadd.f32 %v1232_v44, %v1064_v47  ;;  %v1760_v45 = vor.u32 %v2085_v8, %v1759_v28 }
 0x119   :  { %v1066_v61 = vadd.f32 %v1065_v46, %v897_v48  ;;  %v1371_v12 = vmax.f32 %v1233_v60, 0.0  ;;  %v1764_v48 = vor.u32 %v2084_v29, %v1761_v33 }
 0x11c   :  { %v2982_v62 = vpop.f32.mrf.mxu3 }
 0x11e   :  { %v1234_v63 = vpop.f32.mrf.mxu2  ;;  %v899_v5 = vpop.f32.mrf.mxu0 }
 0x11f   :  { %v1235_v4 = vadd.f32 %v1234_v63, %v1066_v61  ;;  %v1068_v11 = vpop.f32.mrf.mxu1  ;;  %v900_v16 = vadd.f32 %v2721_v6, %v899_v5  ;;  %v1771_v5 = vld [vmem:[%s3346_s0 + $0x1b0] sm:$0xf] }
 0x121   :  { %v1372_v13 = vmax.f32 %v1235_v4, 0.0  ;;  %938 = vmatmul.bf16.gmra.mxu0 %v1748_v0  ;;  %1316 = vmatmul.bf16.vlgmr.msra.gmra.mxu3 %v1852_v3  ;;  %v1069_v25 = vadd.f32 %v1068_v11, %v900_v16  ;;  %v2113_v11 = vld [vmem:[%s3346_s0 + $0x280] sm:$0xf0] }
 0x122   :  { %1107 = vmatmul.bf16.gmra.mxu1 %v1752_v9  ;;  %v2087_v9 = vld [vmem:[%s3346_s0 + $0x1b4] sm:$0xf] }
 0x123   :  { %v2191_v14 = vpack.c.bf16 %v1372_v13, %v1371_v12  ;;  %1276 = vmatmul.bf16.gmra.mxu2 %v1756_v10  ;;  %v1875_v10 = vld [vmem:[%s3346_s0 + $0x278] sm:$0xf]  ;;  %v987_v12 = vadd.f32 %v2721_v6, %v2784_v53  ;;  %v1773_v13 = vld [vmem:[%s3346_s0 + $0x1bc] sm:$0xf0] }
 0x124   :  { %v1148_v17 = vpop.f32.mrf.mxu3  ;;  %v1876_v53 = vor.u32 %v2113_v11, %v1875_v10  ;;  %v1776_v8 = vor.u32 %v2087_v9, %v1773_v13 }
 0x125   :  { %2319 = vst [vmem:[%s3347_s3 + $0x38] sm:$0xff] %v2191_v14   ;;  %v2990_v18 = vadd.f32 %v1148_v17, %v980_v15  ;;  %v1779_v14 = vld [vmem:[%s3346_s0 + $0x1b8] sm:$0xf]  ;;  %v2089_v15 = vld [vmem:[%s3346_s0 + $0x1c0] sm:$0xf0] }
 0x126   :  { %v1237_v19 = vpop.f32.mrf.mxu2  ;;  %v901_v22 = vpop.f32.mrf.mxu0  ;;  %v1780_v29 = vor.u32 %v2089_v15, %v1779_v14  ;;  %v995_v14 = vadd.f32 %v2721_v6, %v2823_v34  ;;  %v2094_v34 = vld [vmem:[%s3346_s0 + $0x1e8] sm:$0xf0] }
 0x127   :  { %v1070_v23 = vpop.f32.mrf.mxu1  ;;  %v902_v26 = vadd.f32 %v2721_v6, %v901_v22  ;;  %v1238_v39 = vadd.f32 %v1237_v19, %v1069_v25  ;;  %v1772_v25 = vor.u32 %v2088_v37, %v1771_v5 }
 0x129   :  { %v1071_v40 = vadd.f32 %v1070_v23, %v902_v26  ;;  %v1373_v52 = vmax.f32 %v1238_v39, 0.0 }
 0x12c   :  { %v1150_v41 = vpop.f32.mrf.mxu3 }
 0x12d   :  { %v3019_v42 = vadd.f32 %v1150_v41, %v982_v32 }
 0x12e   :  { %v1239_v44 = vpop.f32.mrf.mxu2  ;;  %v904_v47 = vpop.f32.mrf.mxu0 }
 0x12f   :  { %v1240_v46 = vadd.f32 %v1239_v44, %v1071_v40  ;;  %v1073_v50 = vpop.f32.mrf.mxu1  ;;  %v905_v58 = vadd.f32 %v2721_v6, %v904_v47  ;;  %v1783_v47 = vld [vmem:[%s3346_s0 + $0x1c8] sm:$0xf] }
 0x131   :  { %v1374_v54 = vmax.f32 %v1240_v46, 0.0  ;;  %943 = vmatmul.bf16.gmra.mxu0 %v1760_v45  ;;  %1321 = vmatmul.bf16.gmra.mxu3 %v1864_v24  ;;  %v1074_v3 = vadd.f32 %v1073_v50, %v905_v58  ;;  %v2116_v50 = vld [vmem:[%s3346_s0 + $0x298] sm:$0xf0] }
 0x132   :  { %1112 = vmatmul.bf16.gmra.mxu1 %v1764_v48  ;;  %v2090_v48 = vld [vmem:[%s3346_s0 + $0x1cc] sm:$0xf] }
 0x133   :  { %v2196_v56 = vpack.c.bf16 %v1374_v54, %v1373_v52  ;;  %1281 = vmatmul.bf16.gmra.mxu2 %v1768_v49  ;;  %v1887_v49 = vld [vmem:[%s3346_s0 + $0x290] sm:$0xf]  ;;  %v992_v52 = vadd.f32 %v2721_v6, %v2817_v20  ;;  %v1785_v54 = vld [vmem:[%s3346_s0 + $0x1d4] sm:$0xf0] }
 0x134   :  { %v1153_v59 = vpop.f32.mrf.mxu3  ;;  %v1888_v20 = vor.u32 %v2116_v50, %v1887_v49  ;;  %v1788_v37 = vor.u32 %v2090_v48, %v1785_v54 }
 0x135   :  { %2320 = vst [vmem:[%s3347_s3 + $0x40] sm:$0xff] %v2196_v56   ;;  %v3027_v60 = vadd.f32 %v1153_v59, %v985_v57  ;;  %v1791_v56 = vld [vmem:[%s3346_s0 + $0x1d0] sm:$0xf]  ;;  %v2092_v57 = vld [vmem:[%s3346_s0 + $0x1d8] sm:$0xf0] }
 0x136   :  { %v1242_v61 = vpop.f32.mrf.mxu2  ;;  %v906_v63 = vpop.f32.mrf.mxu0  ;;  %v1792_v9 = vor.u32 %v2092_v57, %v1791_v56  ;;  %v1000_v56 = vadd.f32 %v2721_v6, %v2856_v1  ;;  %v2097_v1 = vld [vmem:[%s3346_s0 + $0x200] sm:$0xf0] }
 0x137   :  { %v1075_v0 = vpop.f32.mrf.mxu1  ;;  %v907_v4 = vadd.f32 %v2721_v6, %v906_v63  ;;  %v1243_v16 = vadd.f32 %v1242_v61, %v1074_v3  ;;  %v1784_v3 = vor.u32 %v2091_v2, %v1783_v47 }
 0x139   :  { %v1076_v17 = vadd.f32 %v1075_v0, %v907_v4  ;;  %v1375_v31 = vmax.f32 %v1243_v16, 0.0 }
 0x13c   :  { %v1155_v19 = vpop.f32.mrf.mxu3 }
 0x13d   :  { %v3056_v22 = vadd.f32 %v1155_v19, %v987_v12 }
 0x13e   :  { %v1244_v23 = vpop.f32.mrf.mxu2  ;;  %v909_v28 = vpop.f32.mrf.mxu0 }
 0x13f   :  { %v1245_v26 = vadd.f32 %v1244_v23, %v1076_v17  ;;  %v1078_v30 = vpop.f32.mrf.mxu1  ;;  %v910_v38 = vadd.f32 %v2721_v6, %v909_v28  ;;  %v1795_v28 = vld [vmem:[%s3346_s0 + $0x1e0] sm:$0xf] }
 0x141   :  { %v1376_v32 = vmax.f32 %v1245_v26, 0.0  ;;  %948 = vmatmul.bf16.gmra.mxu0 %v1772_v25  ;;  %1326 = vmatmul.bf16.gmra.mxu3 %v1876_v53  ;;  %v1079_v24 = vadd.f32 %v1078_v30, %v910_v38  ;;  %v2119_v30 = vld [vmem:[%s3346_s0 + $0x2b0] sm:$0xf0] }
 0x142   :  { %1117 = vmatmul.bf16.gmra.mxu1 %v1776_v8  ;;  %v2093_v8 = vld [vmem:[%s3346_s0 + $0x1e4] sm:$0xf] }
 0x143   :  { %v2201_v33 = vpack.c.bf16 %v1376_v32, %v1375_v31  ;;  %1286 = vmatmul.bf16.gmra.mxu2 %v1780_v29  ;;  %v1899_v29 = vld [vmem:[%s3346_s0 + $0x2a8] sm:$0xf]  ;;  %v997_v31 = vadd.f32 %v2721_v6, %v2850_v51  ;;  %v1797_v32 = vld [vmem:[%s3346_s0 + $0x1ec] sm:$0xf0] }
 0x144   :  { %v1158_v39 = vpop.f32.mrf.mxu3  ;;  %v1900_v51 = vor.u32 %v2119_v30, %v1899_v29  ;;  %v1800_v2 = vor.u32 %v2093_v8, %v1797_v32 }
 0x145   :  { %2321 = vst [vmem:[%s3347_s3 + $0x48] sm:$0xff] %v2201_v33   ;;  %v3064_v40 = vadd.f32 %v1158_v39, %v990_v35  ;;  %v1803_v33 = vld [vmem:[%s3346_s0 + $0x1e8] sm:$0xf]  ;;  %v2095_v35 = vld [vmem:[%s3346_s0 + $0x1f0] sm:$0xf0] }
 0x146   :  { %v1247_v41 = vpop.f32.mrf.mxu2  ;;  %v911_v44 = vpop.f32.mrf.mxu0  ;;  %v1804_v48 = vor.u32 %v2095_v35, %v1803_v33  ;;  %v1005_v33 = vadd.f32 %v2721_v6, %v2889_v36  ;;  %v2100_v36 = vld [vmem:[%s3346_s0 + $0x218] sm:$0xf0] }
 0x147   :  { %v1080_v45 = vpop.f32.mrf.mxu1  ;;  %v912_v46 = vadd.f32 %v2721_v6, %v911_v44  ;;  %v1248_v58 = vadd.f32 %v1247_v41, %v1079_v24  ;;  %v1796_v24 = vor.u32 %v2094_v34, %v1795_v28 }
 0x149   :  { %v1081_v59 = vadd.f32 %v1080_v45, %v912_v46  ;;  %v1377_v11 = vmax.f32 %v1248_v58, 0.0 }
 0x14c   :  { %v1160_v61 = vpop.f32.mrf.mxu3 }
 0x14d   :  { %v3093_v63 = vadd.f32 %v1160_v61, %v992_v52 }
 0x14e   :  { %v1249_v0 = vpop.f32.mrf.mxu2  ;;  %v914_v5 = vpop.f32.mrf.mxu0 }
 0x14f   :  { %v1250_v4 = vadd.f32 %v1249_v0, %v1081_v59  ;;  %v1083_v10 = vpop.f32.mrf.mxu1  ;;  %v915_v15 = vadd.f32 %v2721_v6, %v914_v5  ;;  %v1807_v5 = vld [vmem:[%s3346_s0 + $0x1f8] sm:$0xf] }
 0x151   :  { %v1378_v12 = vmax.f32 %v1250_v4, 0.0  ;;  %953 = vmatmul.bf16.gmra.mxu0 %v1784_v3  ;;  %1331 = vmatmul.bf16.gmra.mxu3 %v1888_v20  ;;  %v1084_v53 = vadd.f32 %v1083_v10, %v915_v15  ;;  %v2122_v10 = vld [vmem:[%s3346_s0 + $0x2c8] sm:$0xf0] }
 0x152   :  { %1122 = vmatmul.bf16.gmra.mxu1 %v1788_v37  ;;  %v2096_v37 = vld [vmem:[%s3346_s0 + $0x1fc] sm:$0xf] }
 0x153   :  { %v2206_v13 = vpack.c.bf16 %v1378_v12, %v1377_v11  ;;  %1291 = vmatmul.bf16.gmra.mxu2 %v1792_v9  ;;  %v1911_v9 = vld [vmem:[%s3346_s0 + $0x2c0] sm:$0xf]  ;;  %v1002_v11 = vadd.f32 %v2721_v6, %v2883_v21  ;;  %v1809_v12 = vld [vmem:[%s3346_s0 + $0x204] sm:$0xf0] }
 0x154   :  { %v1163_v16 = vpop.f32.mrf.mxu3  ;;  %v1912_v21 = vor.u32 %v2122_v10, %v1911_v9  ;;  %v1812_v34 = vor.u32 %v2096_v37, %v1809_v12 }
 0x155   :  { %2322 = vst [vmem:[%s3347_s3 + $0x50] sm:$0xff] %v2206_v13   ;;  %v3101_v17 = vadd.f32 %v1163_v16, %v995_v14  ;;  %v1815_v13 = vld [vmem:[%s3346_s0 + $0x200] sm:$0xf]  ;;  %v2098_v14 = vld [vmem:[%s3346_s0 + $0x208] sm:$0xf0] }
 0x156   :  { %v1252_v19 = vpop.f32.mrf.mxu2  ;;  %v916_v23 = vpop.f32.mrf.mxu0  ;;  %v1816_v8 = vor.u32 %v2098_v14, %v1815_v13  ;;  %v1010_v13 = vadd.f32 %v2721_v6, %v2922_v7 }
 0x157   :  { %v1085_v25 = vpop.f32.mrf.mxu1  ;;  %v917_v26 = vadd.f32 %v2721_v6, %v916_v23  ;;  %v1253_v38 = vadd.f32 %v1252_v19, %v1084_v53  ;;  %v1808_v53 = vor.u32 %v2097_v1, %v1807_v5 }
 0x159   :  { %v1086_v39 = vadd.f32 %v1085_v25, %v917_v26  ;;  %v1379_v50 = vmax.f32 %v1253_v38, 0.0 }
 0x15c   :  { %v1165_v41 = vpop.f32.mrf.mxu3 }
 0x15d   :  { %v3130_v44 = vadd.f32 %v1165_v41, %v997_v31 }
 0x15e   :  { %v1254_v45 = vpop.f32.mrf.mxu2  ;;  %v919_v47 = vpop.f32.mrf.mxu0 }
 0x15f   :  { %v1255_v46 = vadd.f32 %v1254_v45, %v1086_v39  ;;  %v1088_v49 = vpop.f32.mrf.mxu1  ;;  %v920_v57 = vadd.f32 %v2721_v6, %v919_v47  ;;  %v1819_v47 = vld [vmem:[%s3346_s0 + $0x210] sm:$0xf] }
 0x161   :  { %v1380_v52 = vmax.f32 %v1255_v46, 0.0  ;;  %958 = vmatmul.bf16.gmra.mxu0 %v1796_v24  ;;  %1336 = vmatmul.bf16.gmra.mxu3 %v1900_v51  ;;  %v1089_v20 = vadd.f32 %v1088_v49, %v920_v57  ;;  %v2125_v49 = vld [vmem:[%s3346_s0 + $0x2e0] sm:$0xf0] }
 0x162   :  { %1127 = vmatmul.bf16.gmra.mxu1 %v1800_v2  ;;  %v2099_v2 = vld [vmem:[%s3346_s0 + $0x214] sm:$0xf] }
 0x163   :  { %v2211_v54 = vpack.c.bf16 %v1380_v52, %v1379_v50  ;;  %1296 = vmatmul.bf16.gmra.mxu2 %v1804_v48  ;;  %v1923_v48 = vld [vmem:[%s3346_s0 + $0x2d8] sm:$0xf]  ;;  %v1007_v50 = vadd.f32 %v2721_v6, %v2916_v55  ;;  %v1821_v52 = vld [vmem:[%s3346_s0 + $0x21c] sm:$0xf0] }
 0x164   :  { %v1168_v58 = vpop.f32.mrf.mxu3  ;;  %v1924_v55 = vor.u32 %v2125_v49, %v1923_v48  ;;  %v1824_v1 = vor.u32 %v2099_v2, %v1821_v52 }
 0x165   :  { %2323 = vst [vmem:[%s3347_s3 + $0x58] sm:$0xff] %v2211_v54   ;;  %v3138_v59 = vadd.f32 %v1168_v58, %v1000_v56  ;;  %v1827_v54 = vld [vmem:[%s3346_s0 + $0x218] sm:$0xf]  ;;  %v2101_v56 = vld [vmem:[%s3346_s0 + $0x220] sm:$0xf0] }
 0x166   :  { %v1257_v61 = vpop.f32.mrf.mxu2  ;;  %v921_v0 = vpop.f32.mrf.mxu0  ;;  %v1828_v37 = vor.u32 %v2101_v56, %v1827_v54 }
 0x167   :  { %v1090_v3 = vpop.f32.mrf.mxu1  ;;  %v922_v4 = vadd.f32 %v2721_v6, %v921_v0  ;;  %v1258_v15 = vadd.f32 %v1257_v61, %v1089_v20  ;;  %v1820_v20 = vor.u32 %v2100_v36, %v1819_v47 }
 0x169   :  { %v1091_v16 = vadd.f32 %v1090_v3, %v922_v4  ;;  %v1381_v30 = vmax.f32 %v1258_v15, 0.0 }
 0x16c   :  { %v1170_v19 = vpop.f32.mrf.mxu3 }
 0x16d   :  { %v3167_v23 = vadd.f32 %v1170_v19, %v1002_v11 }
 0x16e   :  { %v1259_v25 = vpop.f32.mrf.mxu2  ;;  %v924_v28 = vpop.f32.mrf.mxu0 }
 0x16f   :  { %v1260_v26 = vadd.f32 %v1259_v25, %v1091_v16  ;;  %v1093_v29 = vpop.f32.mrf.mxu1  ;;  %v925_v35 = vadd.f32 %v2721_v6, %v924_v28  ;;  %v1831_v28 = vld [vmem:[%s3346_s0 + $0x228] sm:$0xf] }
 0x171   :  { %v1382_v31 = vmax.f32 %v1260_v26, 0.0  ;;  %963 = vmatmul.bf16.gmra.mxu0 %v1808_v53  ;;  %1341 = vmatmul.bf16.gmra.mxu3 %v1912_v21  ;;  %v1094_v51 = vadd.f32 %v1093_v29, %v925_v35  ;;  %v3217_v26 = vld [vmem:[%s3345_s2] ss:$0 sm:$0xff]  ;;  %v2128_v29 = vld [vmem:[%s3346_s0 + $0x2f8] sm:$0xf0] }
 0x172   :  { %1132 = vmatmul.bf16.gmra.mxu1 %v1812_v34  ;;  %v2102_v34 = vld [vmem:[%s3346_s0 + $0x22c] sm:$0xf]  ;;  %v1015_v54 = vadd.f32 %v3217_v26, %v2955_v43 }
 0x173   :  { %v2216_v32 = vpack.c.bf16 %v1382_v31, %v1381_v30  ;;  %1301 = vmatmul.bf16.gmra.mxu2 %v1816_v8  ;;  %v1935_v8 = vld [vmem:[%s3346_s0 + $0x2f0] sm:$0xf]  ;;  %v1012_v30 = vadd.f32 %v3217_v26, %v2949_v27  ;;  %v1833_v31 = vld [vmem:[%s3346_s0 + $0x234] sm:$0xf0] }
 0x174   :  { %v1173_v38 = vpop.f32.mrf.mxu3  ;;  %v1936_v27 = vor.u32 %v2128_v29, %v1935_v8  ;;  %v1836_v36 = vor.u32 %v2102_v34, %v1833_v31 }
 0x175   :  { %2324 = vst [vmem:[%s3347_s3 + $0x60] sm:$0xff] %v2216_v32   ;;  %v3175_v39 = vadd.f32 %v1173_v38, %v1005_v33  ;;  %v1839_v32 = vld [vmem:[%s3346_s0 + $0x230] sm:$0xf]  ;;  %v2104_v33 = vld [vmem:[%s3346_s0 + $0x238] sm:$0xf0] }
 0x176   :  { %v1262_v41 = vpop.f32.mrf.mxu2  ;;  %v926_v45 = vpop.f32.mrf.mxu0  ;;  %v1840_v2 = vor.u32 %v2104_v33, %v1839_v32 }
 0x177   :  { %v1095_v24 = vpop.f32.mrf.mxu1  ;;  %v927_v46 = vadd.f32 %v2721_v6, %v926_v45  ;;  %v1263_v57 = vadd.f32 %v1262_v41, %v1094_v51 }
 0x179   :  { %v1096_v58 = vadd.f32 %v1095_v24, %v927_v46  ;;  %v1383_v10 = vmax.f32 %v1263_v57, 0.0 }
 0x17c   :  { %v1175_v61 = vpop.f32.mrf.mxu3 }
 0x17d   :  { %v3204_v0 = vadd.f32 %v1175_v61, %v1007_v50 }
 0x17e   :  { %v1264_v3 = vpop.f32.mrf.mxu2  ;;  %v929_v5 = vpop.f32.mrf.mxu0 }
 0x17f   :  { %v1265_v4 = vadd.f32 %v1264_v3, %v1096_v58  ;;  %v1098_v9 = vpop.f32.mrf.mxu1  ;;  %v930_v14 = vadd.f32 %v2721_v6, %v929_v5  ;;  %v2103_v6 = vld [vmem:[%s3346_s0 + $0x230] sm:$0xf0]  ;;  %v1017_v5 = vadd.f32 %v3217_v26, %v2982_v62 }
 0x180   :  { %v1832_v51 = vor.u32 %v2103_v6, %v1831_v28 }
 0x181   :  { %v1384_v11 = vmax.f32 %v1265_v4, 0.0  ;;  %968 = vmatmul.bf16.gmra.mxu0 %v1820_v20  ;;  %1346 = vmatmul.bf16.gmra.mxu3 %v1924_v55  ;;  %v1099_v21 = vadd.f32 %v1098_v9, %v930_v14 }
 0x182   :  { %1137 = vmatmul.bf16.gmra.mxu1 %v1824_v1 }
 0x183   :  { %v2221_v12 = vpack.c.bf16 %v1384_v11, %v1383_v10  ;;  %1306 = vmatmul.bf16.gmra.mxu2 %v1828_v37 }
 0x184   :  { %v1178_v15 = vpop.f32.mrf.mxu3 }
 0x185   :  { %2325 = vst [vmem:[%s3347_s3 + $0x68] sm:$0xff] %v2221_v12   ;;  %v3212_v16 = vadd.f32 %v1178_v15, %v1010_v13 }
 0x186   :  { %v1267_v19 = vpop.f32.mrf.mxu2  ;;  %v931_v25 = vpop.f32.mrf.mxu0 }
 0x187   :  { %v1100_v53 = vpop.f32.mrf.mxu1  ;;  %v932_v7 = vadd.f32 %v3217_v26, %v931_v25  ;;  %v1268_v35 = vadd.f32 %v1267_v19, %v1099_v21 }
 0x189   :  { %v1101_v38 = vadd.f32 %v1100_v53, %v932_v7  ;;  %v1385_v49 = vmax.f32 %v1268_v35, 0.0 }
 0x18c   :  { %v1180_v41 = vpop.f32.mrf.mxu3 }
 0x18d   :  { %v3246_v45 = vadd.f32 %v1180_v41, %v1012_v30 }
 0x18e   :  { %v1269_v24 = vpop.f32.mrf.mxu2  ;;  %v934_v47 = vpop.f32.mrf.mxu0 }
 0x18f   :  { %v1270_v46 = vadd.f32 %v1269_v24, %v1101_v38  ;;  %v1103_v48 = vpop.f32.mrf.mxu1  ;;  %v935_v56 = vadd.f32 %v3217_v26, %v934_v47 }
 0x191   :  { %v1386_v50 = vmax.f32 %v1270_v46, 0.0  ;;  %973 = vmatmul.bf16.gmra.mxu0 %v1832_v51  ;;  %1351 = vmatmul.bf16.gmra.mxu3 %v1936_v27  ;;  %v1104_v55 = vadd.f32 %v1103_v48, %v935_v56 }
 0x192   :  { %1142 = vmatmul.bf16.gmra.mxu1 %v1836_v36 }
 0x193   :  { %v2226_v52 = vpack.c.bf16 %v1386_v50, %v1385_v49  ;;  %1311 = vmatmul.bf16.gmra.mxu2 %v1840_v2 }
 0x194   :  { %v1183_v57 = vpop.f32.mrf.mxu3 }
 0x195   :  { %2326 = vst [vmem:[%s3347_s3 + $0x70] sm:$0xff] %v2226_v52   ;;  %v3254_v58 = vadd.f32 %v1183_v57, %v1015_v54 }
 0x196   :  { %v1272_v61 = vpop.f32.mrf.mxu2  ;;  %v936_v3 = vpop.f32.mrf.mxu0 }
 0x197   :  { %v1105_v20 = vpop.f32.mrf.mxu1  ;;  %v937_v4 = vadd.f32 %v3217_v26, %v936_v3  ;;  %v1273_v1 = vadd.f32 %v1272_v61, %v1104_v55 }
 0x199   :  { %v1106_v43 = vadd.f32 %v1105_v20, %v937_v4  ;;  %v1387_v14 = vmax.f32 %v1273_v1, 0.0 }
 0x19c   :  { %v1185_v37 = vpop.f32.mrf.mxu3 }
 0x19d   :  { %v3259_v9 = vadd.f32 %v1185_v37, %v1017_v5 }
 0x19e   :  { %v1274_v10 = vpop.f32.mrf.mxu2  ;;  %v939_v12 = vpop.f32.mrf.mxu0 }
 0x19f   :  { %v1275_v11 = vadd.f32 %v1274_v10, %v1106_v43  ;;  %v1108_v13 = vpop.f32.mrf.mxu1  ;;  %v940_v25 = vadd.f32 %v3217_v26, %v939_v12 }
 0x1a1   :  { %v1388_v15 = vmax.f32 %v1275_v11, 0.0  ;;  %v1109_v28 = vadd.f32 %v1108_v13, %v940_v25 }
 0x1a3   :  { %v2231_v19 = vpack.c.bf16 %v1388_v15, %v1387_v14 }
 0x1a4   :  { %v1317_v53 = vpop.f32.mrf.mxu3 }
 0x1a5   :  { %2327 = vst [vmem:[%s3347_s3 + $0x78] sm:$0xff] %v2231_v19   ;;  %v1318_v34 = vadd.f32 %v1317_v53, %v2990_v18 }
 0x1a6   :  { %v1277_v62 = vpop.f32.mrf.mxu2  ;;  %v941_v21 = vpop.f32.mrf.mxu0 }
 0x1a7   :  { %v1110_v7 = vpop.f32.mrf.mxu1  ;;  %v942_v6 = vadd.f32 %v3217_v26, %v941_v21  ;;  %v1278_v8 = vadd.f32 %v1277_v62, %v1109_v28  ;;  %v1405_v38 = vmax.f32 %v1318_v34, 0.0 }
 0x1a9   :  { %v1111_v29 = vadd.f32 %v1110_v7, %v942_v6  ;;  %v1389_v51 = vmax.f32 %v1278_v8, 0.0 }
 0x1ac   :  { %v1319_v30 = vpop.f32.mrf.mxu3 }
 0x1ad   :  { %v1320_v32 = vadd.f32 %v1319_v30, %v3019_v42 }
 0x1ae   :  { %v1279_v31 = vpop.f32.mrf.mxu2  ;;  %v944_v35 = vpop.f32.mrf.mxu0 }
 0x1af   :  { %v1280_v33 = vadd.f32 %v1279_v31, %v1111_v29  ;;  %v1406_v41 = vmax.f32 %v1320_v32, 0.0  ;;  %v1113_v24 = vpop.f32.mrf.mxu1  ;;  %v945_v18 = vadd.f32 %v3217_v26, %v944_v35 }
 0x1b1   :  { %v1390_v27 = vmax.f32 %v1280_v33, 0.0  ;;  %v2276_v46 = vpack.c.bf16 %v1406_v41, %v1405_v38  ;;  %v1114_v49 = vadd.f32 %v1113_v24, %v945_v18 }
 0x1b3   :  { %v2236_v47 = vpack.c.bf16 %v1390_v27, %v1389_v51  ;;  %2336 = vst [vmem:[%s3347_s3 + $0xc0] sm:$0xff] %v2276_v46  }
 0x1b4   :  { %v1322_v42 = vpop.f32.mrf.mxu3 }
 0x1b5   :  { %2328 = vst [vmem:[%s3347_s3 + $0x80] sm:$0xff] %v2236_v47   ;;  %v1323_v52 = vadd.f32 %v1322_v42, %v3027_v60 }
 0x1b6   :  { %v1282_v36 = vpop.f32.mrf.mxu2  ;;  %v946_v2 = vpop.f32.mrf.mxu0 }
 0x1b7   :  { %v1115_v48 = vpop.f32.mrf.mxu1  ;;  %v947_v50 = vadd.f32 %v3217_v26, %v946_v2  ;;  %v1283_v54 = vadd.f32 %v1282_v36, %v1114_v49  ;;  %v1407_v4 = vmax.f32 %v1323_v52, 0.0 }
 0x1b9   :  { %v1116_v56 = vadd.f32 %v1115_v48, %v947_v50  ;;  %v1391_v43 = vmax.f32 %v1283_v54, 0.0 }
 0x1bc   :  { %v1324_v57 = vpop.f32.mrf.mxu3 }
 0x1bd   :  { %v1325_v3 = vadd.f32 %v1324_v57, %v3056_v22 }
 0x1be   :  { %v1284_v61 = vpop.f32.mrf.mxu2  ;;  %v949_v55 = vpop.f32.mrf.mxu0 }
 0x1bf   :  { %v1285_v20 = vadd.f32 %v1284_v61, %v1116_v56  ;;  %v1408_v5 = vmax.f32 %v1325_v3, 0.0  ;;  %v1118_v1 = vpop.f32.mrf.mxu1  ;;  %v950_v60 = vadd.f32 %v3217_v26, %v949_v55 }
 0x1c1   :  { %v1392_v37 = vmax.f32 %v1285_v20, 0.0  ;;  %v2281_v10 = vpack.c.bf16 %v1408_v5, %v1407_v4  ;;  %v1119_v15 = vadd.f32 %v1118_v1, %v950_v60 }
 0x1c3   :  { %v2241_v11 = vpack.c.bf16 %v1392_v37, %v1391_v43  ;;  %2337 = vst [vmem:[%s3347_s3 + $0xc8] sm:$0xff] %v2281_v10  }
 0x1c4   :  { %v1327_v22 = vpop.f32.mrf.mxu3 }
 0x1c5   :  { %2329 = vst [vmem:[%s3347_s3 + $0x88] sm:$0xff] %v2241_v11   ;;  %v1328_v25 = vadd.f32 %v1327_v22, %v3064_v40 }
 0x1c6   :  { %v1287_v12 = vpop.f32.mrf.mxu2  ;;  %v951_v13 = vpop.f32.mrf.mxu0 }
 0x1c7   :  { %v1120_v14 = vpop.f32.mrf.mxu1  ;;  %v952_v19 = vadd.f32 %v3217_v26, %v951_v13  ;;  %v1288_v53 = vadd.f32 %v1287_v12, %v1119_v15  ;;  %v1409_v8 = vmax.f32 %v1328_v25, 0.0 }
 0x1c9   :  { %v1121_v62 = vadd.f32 %v1120_v14, %v952_v19  ;;  %v1393_v31 = vmax.f32 %v1288_v53, 0.0 }
 0x1cc   :  { %v1329_v21 = vpop.f32.mrf.mxu3 }
 0x1cd   :  { %v1330_v28 = vadd.f32 %v1329_v21, %v3093_v63 }
 0x1ce   :  { %v1289_v7 = vpop.f32.mrf.mxu2  ;;  %v954_v34 = vpop.f32.mrf.mxu0 }
 0x1cf   :  { %v1290_v6 = vadd.f32 %v1289_v7, %v1121_v62  ;;  %v1410_v29 = vmax.f32 %v1330_v28, 0.0  ;;  %v1123_v30 = vpop.f32.mrf.mxu1  ;;  %v955_v40 = vadd.f32 %v3217_v26, %v954_v34 }
 0x1d1   :  { %v1394_v32 = vmax.f32 %v1290_v6, 0.0  ;;  %v2286_v33 = vpack.c.bf16 %v1410_v29, %v1409_v8  ;;  %v1124_v51 = vadd.f32 %v1123_v30, %v955_v40 }
 0x1d3   :  { %v2246_v35 = vpack.c.bf16 %v1394_v32, %v1393_v31  ;;  %2338 = vst [vmem:[%s3347_s3 + $0xd0] sm:$0xff] %v2286_v33  }
 0x1d4   :  { %v1332_v63 = vpop.f32.mrf.mxu3 }
 0x1d5   :  { %2330 = vst [vmem:[%s3347_s3 + $0x90] sm:$0xff] %v2246_v35   ;;  %v1333_v46 = vadd.f32 %v1332_v63, %v3101_v17 }
 0x1d6   :  { %v1292_v38 = vpop.f32.mrf.mxu2  ;;  %v956_v41 = vpop.f32.mrf.mxu0 }
 0x1d7   :  { %v1125_v24 = vpop.f32.mrf.mxu1  ;;  %v957_v27 = vadd.f32 %v3217_v26, %v956_v41  ;;  %v1293_v47 = vadd.f32 %v1292_v38, %v1124_v51  ;;  %v1411_v50 = vmax.f32 %v1333_v46, 0.0 }
 0x1d9   :  { %v1126_v18 = vadd.f32 %v1125_v24, %v957_v27  ;;  %v1395_v56 = vmax.f32 %v1293_v47, 0.0 }
 0x1dc   :  { %v1334_v42 = vpop.f32.mrf.mxu3 }
 0x1dd   :  { %v1335_v2 = vadd.f32 %v1334_v42, %v3130_v44 }
 0x1de   :  { %v1294_v36 = vpop.f32.mrf.mxu2  ;;  %v959_v49 = vpop.f32.mrf.mxu0 }
 0x1df   :  { %v1295_v48 = vadd.f32 %v1294_v36, %v1126_v18  ;;  %v1412_v52 = vmax.f32 %v1335_v2, 0.0  ;;  %v1128_v54 = vpop.f32.mrf.mxu1  ;;  %v960_v17 = vadd.f32 %v3217_v26, %v959_v49 }
 0x1e1   :  { %v1396_v57 = vmax.f32 %v1295_v48, 0.0  ;;  %v2291_v61 = vpack.c.bf16 %v1412_v52, %v1411_v50  ;;  %v1129_v5 = vadd.f32 %v1128_v54, %v960_v17 }
 0x1e3   :  { %v2251_v3 = vpack.c.bf16 %v1396_v57, %v1395_v56  ;;  %2339 = vst [vmem:[%s3347_s3 + $0xd8] sm:$0xff] %v2291_v61  }
 0x1e4   :  { %v1337_v44 = vpop.f32.mrf.mxu3 }
 0x1e5   :  { %2331 = vst [vmem:[%s3347_s3 + $0x98] sm:$0xff] %v2251_v3   ;;  %v1338_v43 = vadd.f32 %v1337_v44, %v3138_v59 }
 0x1e6   :  { %v1297_v20 = vpop.f32.mrf.mxu2  ;;  %v961_v55 = vpop.f32.mrf.mxu0 }
 0x1e7   :  { %v1130_v4 = vpop.f32.mrf.mxu1  ;;  %v962_v1 = vadd.f32 %v3217_v26, %v961_v55  ;;  %v1298_v37 = vadd.f32 %v1297_v20, %v1129_v5  ;;  %v1413_v14 = vmax.f32 %v1338_v43, 0.0 }
 0x1e9   :  { %v1131_v10 = vadd.f32 %v1130_v4, %v962_v1  ;;  %v1397_v25 = vmax.f32 %v1298_v37, 0.0 }
 0x1ec   :  { %v1339_v11 = vpop.f32.mrf.mxu3 }
 0x1ed   :  { %v1340_v22 = vadd.f32 %v1339_v11, %v3167_v23 }
 0x1ee   :  { %v1299_v60 = vpop.f32.mrf.mxu2  ;;  %v964_v13 = vpop.f32.mrf.mxu0 }
 0x1ef   :  { %v1300_v12 = vadd.f32 %v1299_v60, %v1131_v10  ;;  %v1414_v15 = vmax.f32 %v1340_v22, 0.0  ;;  %v1133_v19 = vpop.f32.mrf.mxu1  ;;  %v965_v59 = vadd.f32 %v3217_v26, %v964_v13 }
 0x1f1   :  { %v1398_v53 = vmax.f32 %v1300_v12, 0.0  ;;  %v2296_v62 = vpack.c.bf16 %v1414_v15, %v1413_v14  ;;  %v1134_v34 = vadd.f32 %v1133_v19, %v965_v59 }
 0x1f3   :  { %v2256_v21 = vpack.c.bf16 %v1398_v53, %v1397_v25  ;;  %2340 = vst [vmem:[%s3347_s3 + $0xe0] sm:$0xff] %v2296_v62  }
 0x1f4   :  { %v1342_v23 = vpop.f32.mrf.mxu3 }
 0x1f5   :  { %2332 = vst [vmem:[%s3347_s3 + $0xa0] sm:$0xff] %v2256_v21   ;;  %v1343_v29 = vadd.f32 %v1342_v23, %v3175_v39 }
 0x1f6   :  { %v1302_v7 = vpop.f32.mrf.mxu2  ;;  %v966_v28 = vpop.f32.mrf.mxu0 }
 0x1f7   :  { %v1135_v6 = vpop.f32.mrf.mxu1  ;;  %v967_v8 = vadd.f32 %v3217_v26, %v966_v28  ;;  %v1303_v30 = vadd.f32 %v1302_v7, %v1134_v34  ;;  %v1415_v38 = vmax.f32 %v1343_v29, 0.0 }
 0x1f9   :  { %v1136_v31 = vadd.f32 %v1135_v6, %v967_v8  ;;  %v1399_v51 = vmax.f32 %v1303_v30, 0.0 }
 0x1fc   :  { %v1344_v32 = vpop.f32.mrf.mxu3 }
 0x1fd   :  { %v1345_v35 = vadd.f32 %v1344_v32, %v3204_v0 }
 0x1fe   :  { %v1304_v33 = vpop.f32.mrf.mxu2  ;;  %v969_v63 = vpop.f32.mrf.mxu0 }
 0x1ff   :  { %v1305_v40 = vadd.f32 %v1304_v33, %v1136_v31  ;;  %v1416_v41 = vmax.f32 %v1345_v35, 0.0  ;;  %v1138_v24 = vpop.f32.mrf.mxu1  ;;  %v970_v39 = vadd.f32 %v3217_v26, %v969_v63 }
 0x201   :  { %v1400_v27 = vmax.f32 %v1305_v40, 0.0  ;;  %v2301_v46 = vpack.c.bf16 %v1416_v41, %v1415_v38  ;;  %v1139_v2 = vadd.f32 %v1138_v24, %v970_v39 }
 0x203   :  { %v2261_v47 = vpack.c.bf16 %v1400_v27, %v1399_v51  ;;  %2341 = vst [vmem:[%s3347_s3 + $0xe8] sm:$0xff] %v2301_v46  }
 0x204   :  { %v1347_v0 = vpop.f32.mrf.mxu3 }
 0x205   :  { %2333 = vst [vmem:[%s3347_s3 + $0xa8] sm:$0xff] %v2261_v47   ;;  %v1348_v49 = vadd.f32 %v1347_v0, %v3212_v16 }
 0x206   :  { %v1307_v18 = vpop.f32.mrf.mxu2  ;;  %v971_v42 = vpop.f32.mrf.mxu0 }
 0x207   :  { %v1140_v36 = vpop.f32.mrf.mxu1  ;;  %v972_v48 = vadd.f32 %v3217_v26, %v971_v42  ;;  %v1308_v50 = vadd.f32 %v1307_v18, %v1139_v2  ;;  %v1417_v17 = vmax.f32 %v1348_v49, 0.0 }
 0x209   :  { %v1141_v52 = vadd.f32 %v1140_v36, %v972_v48  ;;  %v1401_v20 = vmax.f32 %v1308_v50, 0.0 }
 0x20c   :  { %v1349_v54 = vpop.f32.mrf.mxu3 }
 0x20d   :  { %v1350_v57 = vadd.f32 %v1349_v54, %v3246_v45 }
 0x20e   :  { %v1309_v56 = vpop.f32.mrf.mxu2  ;;  %v974_v3 = vpop.f32.mrf.mxu0 }
 0x20f   :  { %v1310_v61 = vadd.f32 %v1309_v56, %v1141_v52  ;;  %v1418_v44 = vmax.f32 %v1350_v57, 0.0  ;;  %v1143_v5 = vpop.f32.mrf.mxu1  ;;  %v975_v16 = vadd.f32 %v3217_v26, %v974_v3 }
 0x211   :  { %v1402_v55 = vmax.f32 %v1310_v61, 0.0  ;;  %v2306_v4 = vpack.c.bf16 %v1418_v44, %v1417_v17  ;;  %v1144_v10 = vadd.f32 %v1143_v5, %v975_v16 }
 0x213   :  { %v2266_v1 = vpack.c.bf16 %v1402_v55, %v1401_v20  ;;  %2342 = vst [vmem:[%s3347_s3 + $0xf0] sm:$0xff] %v2306_v4  }
 0x214   :  { %v1352_v45 = vpop.f32.mrf.mxu3 }
 0x215   :  { %2334 = vst [vmem:[%s3347_s3 + $0xb0] sm:$0xff] %v2266_v1   ;;  %v1353_v60 = vadd.f32 %v1352_v45, %v3254_v58 }
 0x216   :  { %v1312_v43 = vpop.f32.mrf.mxu2  ;;  %v976_v37 = vpop.f32.mrf.mxu0 }
 0x217   :  { %v977_v11 = vadd.f32 %v3217_v26, %v976_v37  ;;  %v1145_v22 = vpop.f32.mrf.mxu1  ;;  %v1313_v12 = vadd.f32 %v1312_v43, %v1144_v10  ;;  %v1419_v53 = vmax.f32 %v1353_v60, 0.0 }
 0x219   :  { %v1146_v13 = vadd.f32 %v1145_v22, %v977_v11  ;;  %v1403_v21 = vmax.f32 %v1313_v12, 0.0 }
 0x21c   :  { %v1354_v14 = vpop.f32.mrf.mxu3 }
 0x21d   :  { %v1355_v19 = vadd.f32 %v1354_v14, %v3259_v9 }
 0x21e   :  { %v1314_v15 = vpop.f32.mrf.mxu2 }
 0x21f   :  { %v1315_v25 = vadd.f32 %v1314_v15, %v1146_v13  ;;  %v1420_v62 = vmax.f32 %v1355_v19, 0.0 }
 0x221   :  { %v1404_v59 = vmax.f32 %v1315_v25, 0.0  ;;  %v2311_v23 = vpack.c.bf16 %v1420_v62, %v1419_v53 }
 0x223   :  { %v2271_v7 = vpack.c.bf16 %v1404_v59, %v1403_v21  ;;  %2343 = vst [vmem:[%s3347_s3 + $0xf8] sm:$0xff] %v2311_v23  }
 0x225   :  { %2335 = vst [vmem:[%s3347_s3 + $0xb8] sm:$0xff] %v2271_v7  }

// kernel: generator_forward.19
= control target key start
LH: loop header
LB: loop body
LE: loop exit
PB: predicated region body
PF: predicated region fallthrough
CT: control target
= control target key end

     0   :  { %s2686_s1 = inlined_call_operand.vmem [shape: bf16[256,128], index: 1, kind: input, shape index: {}]   ;;  %s2687_s2 = inlined_call_operand.vmem [shape: f32[1,128], index: 2, kind: input, shape index: {}]   ;;  %s2688_s0 = inlined_call_operand.vmem [shape: bf16[512,256], index: 0, kind: input, shape index: {}]   ;;  %s2689_s3 = inlined_call_operand.vmem [shape: bf16[512,128], index: 3, kind: input, shape index: {}]   ;;  %s2690_s4 = inlined_call_operand.vmem [shape: bf16[512,128], index: 4, kind: output, shape index: {}]  }
   0x1   :  { %v1586_v0 = vld [vmem:[%s2686_s1 + $0x38] sm:$0xff]  ;;  %v1585_v2 = vld [vmem:[%s2686_s1 + $0x30] sm:$0xff]  ;;  %v1584_v4 = vld [vmem:[%s2686_s1 + $0x28] sm:$0xff] }
   0x2   :  { %v1594_v1 = vld [vmem:[%s2686_s1 + $0x78] sm:$0xff]  ;;  %533 = vmatpush.bf16.msra.mxu0 %v1586_v0  ;;  %1945 = vmatpush.bf16.msra.mxu2 %v1586_v0  ;;  %v1593_v3 = vld [vmem:[%s2686_s1 + $0x70] sm:$0xff]  ;;  %v1592_v5 = vld [vmem:[%s2686_s1 + $0x68] sm:$0xff] }
   0x3   :  { %702 = vmatpush.bf16.msra.mxu1 %v1594_v1  ;;  %1953 = vmatpush.bf16.msra.mxu3 %v1594_v1  ;;  %v1583_v6 = vld [vmem:[%s2686_s1 + $0x20] sm:$0xff]  ;;  %v1582_v8 = vld [vmem:[%s2686_s1 + $0x18] sm:$0xff]  ;;  %v1581_v10 = vld [vmem:[%s2686_s1 + $0x10] sm:$0xff] }
   0x4   :  { %v1591_v7 = vld [vmem:[%s2686_s1 + $0x60] sm:$0xff]  ;;  %v1590_v9 = vld [vmem:[%s2686_s1 + $0x58] sm:$0xff]  ;;  %v1589_v11 = vld [vmem:[%s2686_s1 + $0x50] sm:$0xff] }
   0x5   :  { %v1580_v12 = vld [vmem:[%s2686_s1 + $0x8] sm:$0xff]  ;;  %v1579_v14 = vld [vmem:[%s2686_s1] sm:$0xff]  ;;  %v1205_v28 = vld [vmem:[%s2688_s0 + $0x10] sm:$0xf] }
   0x6   :  { %534 = vmatpush.bf16.msra.mxu0 %v1585_v2  ;;  %1946 = vmatpush.bf16.msra.mxu2 %v1585_v2  ;;  %v1588_v13 = vld [vmem:[%s2686_s1 + $0x48] sm:$0xff]  ;;  %v1587_v15 = vld [vmem:[%s2686_s1 + $0x40] sm:$0xff]  ;;  %v1518_v29 = vld [vmem:[%s2688_s0 + $0x14] sm:$0xf0] }
   0x7   :  { %703 = vmatpush.bf16.msra.mxu1 %v1593_v3  ;;  %1954 = vmatpush.bf16.msra.mxu3 %v1593_v3  ;;  %v1197_v16 = vld [vmem:[%s2688_s0] sm:$0xf]  ;;  %v1516_v17 = vld [vmem:[%s2688_s0 + $0x4] sm:$0xf0]  ;;  %v1515_v20 = vld [vmem:[%s2688_s0 + $0x4] sm:$0xf]  ;;  %v1206_v36 = vor.u32 %v1518_v29, %v1205_v28 }
   0x8   :  { %v1325_v18 = vld [vmem:[%s2688_s0 + $0x100] sm:$0xf]  ;;  %v1548_v19 = vld [vmem:[%s2688_s0 + $0x104] sm:$0xf0]  ;;  %v1199_v21 = vld [vmem:[%s2688_s0 + $0x8] sm:$0xf0]  ;;  %v1198_v24 = vor.u32 %v1516_v17, %v1197_v16 }
   0x9   :  { %v1547_v22 = vld [vmem:[%s2688_s0 + $0x104] sm:$0xf]  ;;  %v1327_v23 = vld [vmem:[%s2688_s0 + $0x108] sm:$0xf0]  ;;  %v1326_v25 = vor.u32 %v1548_v19, %v1325_v18  ;;  %v1202_v26 = vor.u32 %v1515_v20, %v1199_v21  ;;  %v1333_v30 = vld [vmem:[%s2688_s0 + $0x110] sm:$0xf] }
   0xa   :  { %535 = vmatpush.bf16.msra.mxu0 %v1584_v4  ;;  %1947 = vmatpush.bf16.msra.mxu2 %v1584_v4  ;;  %v1330_v27 = vor.u32 %v1547_v22, %v1327_v23  ;;  %v1550_v31 = vld [vmem:[%s2688_s0 + $0x114] sm:$0xf0]  ;;  %v1517_v32 = vld [vmem:[%s2688_s0 + $0x14] sm:$0xf]  ;;  %v1207_v33 = vld [vmem:[%s2688_s0 + $0x18] sm:$0xf0] }
   0xb   :  { %704 = vmatpush.bf16.msra.mxu1 %v1592_v5  ;;  %1955 = vmatpush.bf16.msra.mxu3 %v1592_v5  ;;  %v1549_v34 = vld [vmem:[%s2688_s0 + $0x114] sm:$0xf]  ;;  %v1335_v35 = vld [vmem:[%s2688_s0 + $0x118] sm:$0xf0]  ;;  %v1334_v37 = vor.u32 %v1550_v31, %v1333_v30  ;;  %v1210_v38 = vor.u32 %v1517_v32, %v1207_v33  ;;  %v1213_v40 = vld [vmem:[%s2688_s0 + $0x20] sm:$0xf] }
   0xc   :  { %v1338_v39 = vor.u32 %v1549_v34, %v1335_v35  ;;  %v1520_v41 = vld [vmem:[%s2688_s0 + $0x24] sm:$0xf0]  ;;  %v1341_v42 = vld [vmem:[%s2688_s0 + $0x120] sm:$0xf]  ;;  %v1519_v44 = vld [vmem:[%s2688_s0 + $0x24] sm:$0xf] }
   0xd   :  { %v1552_v43 = vld [vmem:[%s2688_s0 + $0x124] sm:$0xf0]  ;;  %v1215_v45 = vld [vmem:[%s2688_s0 + $0x28] sm:$0xf0]  ;;  %v1551_v46 = vld [vmem:[%s2688_s0 + $0x124] sm:$0xf]  ;;  %v1214_v48 = vor.u32 %v1520_v41, %v1213_v40 }
   0xe   :  { %536 = vmatpush.bf16.msra.mxu0 %v1583_v6  ;;  %1948 = vmatpush.bf16.msra.mxu2 %v1583_v6  ;;  %v1343_v47 = vld [vmem:[%s2688_s0 + $0x128] sm:$0xf0]  ;;  %v1342_v49 = vor.u32 %v1552_v43, %v1341_v42  ;;  %v1218_v50 = vor.u32 %v1519_v44, %v1215_v45  ;;  %v1221_v52 = vld [vmem:[%s2688_s0 + $0x30] sm:$0xf]  ;;  %v1522_v53 = vld [vmem:[%s2688_s0 + $0x34] sm:$0xf0] }
   0xf   :  { %705 = vmatpush.bf16.msra.mxu1 %v1591_v7  ;;  %1956 = vmatpush.bf16.msra.mxu3 %v1591_v7  ;;  %v1346_v51 = vor.u32 %v1551_v46, %v1343_v47  ;;  %v1349_v54 = vld [vmem:[%s2688_s0 + $0x130] sm:$0xf]  ;;  %v1554_v55 = vld [vmem:[%s2688_s0 + $0x134] sm:$0xf0]  ;;  %v1521_v56 = vld [vmem:[%s2688_s0 + $0x34] sm:$0xf]  ;;  %v1222_v60 = vor.u32 %v1522_v53, %v1221_v52 }
  0x10   :  { %v1223_v57 = vld [vmem:[%s2688_s0 + $0x38] sm:$0xf0]  ;;  %v1553_v58 = vld [vmem:[%s2688_s0 + $0x134] sm:$0xf]  ;;  %v1350_v61 = vor.u32 %v1554_v55, %v1349_v54  ;;  %v1229_v0 = vld [vmem:[%s2688_s0 + $0x40] sm:$0xf] }
  0x11   :  { %v1351_v59 = vld [vmem:[%s2688_s0 + $0x138] sm:$0xf0]  ;;  %v1226_v62 = vor.u32 %v1521_v56, %v1223_v57  ;;  %v1524_v1 = vld [vmem:[%s2688_s0 + $0x44] sm:$0xf0]  ;;  %v1357_v2 = vld [vmem:[%s2688_s0 + $0x140] sm:$0xf] }
  0x12   :  { %537 = vmatpush.bf16.msra.mxu0 %v1582_v8  ;;  %1949 = vmatpush.bf16.msra.mxu2 %v1582_v8  ;;  %v1354_v63 = vor.u32 %v1553_v58, %v1351_v59  ;;  %v1556_v3 = vld [vmem:[%s2688_s0 + $0x144] sm:$0xf0]  ;;  %v1523_v4 = vld [vmem:[%s2688_s0 + $0x44] sm:$0xf]  ;;  %v1231_v5 = vld [vmem:[%s2688_s0 + $0x48] sm:$0xf0]  ;;  %v1230_v8 = vor.u32 %v1524_v1, %v1229_v0 }
  0x13   :  { %706 = vmatpush.bf16.msra.mxu1 %v1590_v9  ;;  %1957 = vmatpush.bf16.msra.mxu3 %v1590_v9  ;;  %v1555_v6 = vld [vmem:[%s2688_s0 + $0x144] sm:$0xf]  ;;  %v1359_v7 = vld [vmem:[%s2688_s0 + $0x148] sm:$0xf0]  ;;  %v1358_v9 = vor.u32 %v1556_v3, %v1357_v2  ;;  %v1525_v16 = vld [vmem:[%s2688_s0 + $0x54] sm:$0xf] }
  0x14   :  { %v1239_v17 = vld [vmem:[%s2688_s0 + $0x58] sm:$0xf0]  ;;  %v1557_v18 = vld [vmem:[%s2688_s0 + $0x154] sm:$0xf]  ;;  %v1527_v28 = vld [vmem:[%s2688_s0 + $0x64] sm:$0xf] }
  0x15   :  { %v1367_v19 = vld [vmem:[%s2688_s0 + $0x158] sm:$0xf0]  ;;  %v1242_v22 = vor.u32 %v1525_v16, %v1239_v17  ;;  %v1247_v29 = vld [vmem:[%s2688_s0 + $0x68] sm:$0xf0]  ;;  %v1559_v30 = vld [vmem:[%s2688_s0 + $0x164] sm:$0xf] }
  0x16   :  { %538 = vmatpush.bf16.msra.mxu0 %v1581_v10  ;;  %1950 = vmatpush.bf16.msra.mxu2 %v1581_v10  ;;  %v1234_v10 = vor.u32 %v1523_v4, %v1231_v5  ;;  %v1370_v23 = vor.u32 %v1557_v18, %v1367_v19  ;;  %v1375_v31 = vld [vmem:[%s2688_s0 + $0x168] sm:$0xf0]  ;;  %v1250_v34 = vor.u32 %v1527_v28, %v1247_v29  ;;  %v1529_v40 = vld [vmem:[%s2688_s0 + $0x74] sm:$0xf]  ;;  %v1255_v41 = vld [vmem:[%s2688_s0 + $0x78] sm:$0xf0] }
  0x17   :  { %707 = vmatpush.bf16.msra.mxu1 %v1589_v11  ;;  %1958 = vmatpush.bf16.msra.mxu3 %v1589_v11  ;;  %v1362_v11 = vor.u32 %v1555_v6, %v1359_v7  ;;  %v1378_v35 = vor.u32 %v1559_v30, %v1375_v31  ;;  %v1561_v42 = vld [vmem:[%s2688_s0 + $0x174] sm:$0xf]  ;;  %v1383_v43 = vld [vmem:[%s2688_s0 + $0x178] sm:$0xf0]  ;;  %v1258_v46 = vor.u32 %v1529_v40, %v1255_v41  ;;  %v1531_v52 = vld [vmem:[%s2688_s0 + $0x84] sm:$0xf] }
  0x18   :  { %v1386_v47 = vor.u32 %v1561_v42, %v1383_v43  ;;  %v1263_v53 = vld [vmem:[%s2688_s0 + $0x88] sm:$0xf0]  ;;  %v1563_v54 = vld [vmem:[%s2688_s0 + $0x184] sm:$0xf]  ;;  %v1533_v16 = vld [vmem:[%s2688_s0 + $0x94] sm:$0xf] }
  0x19   :  { %v1391_v55 = vld [vmem:[%s2688_s0 + $0x188] sm:$0xf0]  ;;  %v1266_v59 = vor.u32 %v1531_v52, %v1263_v53  ;;  %v1596_v0 = vld [vmem:[%s2689_s3] sm:$0xff]   ;;  %v1271_v19 = vld [vmem:[%s2688_s0 + $0x98] sm:$0xf0] }
  0x1a   :  { %539 = vmatpush.bf16.msra.mxu0 %v1580_v12  ;;  %1951 = vmatpush.bf16.msra.mxu2 %v1580_v12  ;;  %v1237_v12 = vld [vmem:[%s2688_s0 + $0x50] sm:$0xf]  ;;  %v1597_v5 = vunpack.c.l.bf16 %v1596_v0  ;;  %v1883_v40 = vld [vmem:[%s2689_s3 + $0x8] sm:$0xff]   ;;  %v1277_v52 = vld [vmem:[%s2688_s0 + $0xa0] sm:$0xf] }
  0x1b   :  { %708 = vmatpush.bf16.msra.mxu1 %v1588_v13  ;;  %1959 = vmatpush.bf16.msra.mxu3 %v1588_v13  ;;  %v1526_v13 = vld [vmem:[%s2688_s0 + $0x54] sm:$0xf0]  ;;  %v1536_v53 = vld [vmem:[%s2688_s0 + $0xa4] sm:$0xf0] }
  0x1c   :  { %v1238_v20 = vor.u32 %v1526_v13, %v1237_v12  ;;  %v1269_v12 = vld [vmem:[%s2688_s0 + $0x90] sm:$0xf]  ;;  %v1534_v13 = vld [vmem:[%s2688_s0 + $0x94] sm:$0xf0] }
  0x1e   :  { %540 = vmatpush.bf16.msra.mxu0 %v1579_v14  ;;  %1952 = vmatpush.bf16.msra.mxu2 %v1579_v14  ;;  %v1365_v14 = vld [vmem:[%s2688_s0 + $0x150] sm:$0xf] }
  0x1f   :  { %709 = vmatpush.bf16.msra.mxu1 %v1587_v15  ;;  %1960 = vmatpush.bf16.msra.mxu3 %v1587_v15  ;;  %v1558_v15 = vld [vmem:[%s2688_s0 + $0x154] sm:$0xf0] }
  0x20   :  { %v1366_v21 = vor.u32 %v1558_v15, %v1365_v14  ;;  %v1397_v14 = vld [vmem:[%s2688_s0 + $0x190] sm:$0xf]  ;;  %v1566_v15 = vld [vmem:[%s2688_s0 + $0x194] sm:$0xf0] }
  0x21   :  { %541 = vmatmul.bf16.vlgmr.msra.gmra.mxu0 %v1198_v24  ;;  %621 = vmatmul.bf16.vlgmr.msra.gmra.mxu2 %v1326_v25  ;;  %v1245_v24 = vld [vmem:[%s2688_s0 + $0x60] sm:$0xf]  ;;  %v1528_v25 = vld [vmem:[%s2688_s0 + $0x64] sm:$0xf0]  ;;  %v1398_v30 = vor.u32 %v1566_v15, %v1397_v14 }
  0x22   :  { %710 = vmatmul.bf16.vlgmr.msra.gmra.mxu1 %v1202_v26  ;;  %790 = vmatmul.bf16.vlgmr.msra.gmra.mxu3 %v1330_v27  ;;  %v1373_v26 = vld [vmem:[%s2688_s0 + $0x160] sm:$0xf]  ;;  %v1560_v27 = vld [vmem:[%s2688_s0 + $0x164] sm:$0xf0]  ;;  %v1246_v32 = vor.u32 %v1528_v25, %v1245_v24  ;;  %v1270_v25 = vor.u32 %v1534_v13, %v1269_v12 }
  0x23   :  { %v1374_v33 = vor.u32 %v1560_v27, %v1373_v26 }
  0x31   :  { %546 = vmatmul.bf16.gmra.mxu0 %v1206_v36  ;;  %626 = vmatmul.bf16.gmra.mxu2 %v1334_v37  ;;  %v1253_v36 = vld [vmem:[%s2688_s0 + $0x70] sm:$0xf]  ;;  %v1530_v37 = vld [vmem:[%s2688_s0 + $0x74] sm:$0xf0] }
  0x32   :  { %715 = vmatmul.bf16.gmra.mxu1 %v1210_v38  ;;  %795 = vmatmul.bf16.gmra.mxu3 %v1338_v39  ;;  %v1381_v38 = vld [vmem:[%s2688_s0 + $0x170] sm:$0xf]  ;;  %v1562_v39 = vld [vmem:[%s2688_s0 + $0x174] sm:$0xf0]  ;;  %v1254_v44 = vor.u32 %v1530_v37, %v1253_v36 }
  0x33   :  { %v1382_v45 = vor.u32 %v1562_v39, %v1381_v38 }
  0x41   :  { %551 = vmatmul.bf16.gmra.mxu0 %v1214_v48  ;;  %631 = vmatmul.bf16.gmra.mxu2 %v1342_v49  ;;  %v1261_v48 = vld [vmem:[%s2688_s0 + $0x80] sm:$0xf]  ;;  %v1532_v49 = vld [vmem:[%s2688_s0 + $0x84] sm:$0xf0] }
  0x42   :  { %720 = vmatmul.bf16.gmra.mxu1 %v1218_v50  ;;  %800 = vmatmul.bf16.gmra.mxu3 %v1346_v51  ;;  %v1389_v50 = vld [vmem:[%s2688_s0 + $0x180] sm:$0xf]  ;;  %v1564_v51 = vld [vmem:[%s2688_s0 + $0x184] sm:$0xf0]  ;;  %v1262_v56 = vor.u32 %v1532_v49, %v1261_v48  ;;  %v1602_v48 = vunpack.c.h.bf16 %v1883_v40 }
  0x43   :  { %v1390_v57 = vor.u32 %v1564_v51, %v1389_v50  ;;  %v1899_v50 = vld [vmem:[%s2689_s3 + $0x88] sm:$0xff]  }
  0x51   :  { %556 = vmatmul.bf16.gmra.mxu0 %v1222_v60  ;;  %636 = vmatmul.bf16.gmra.mxu2 %v1350_v61  ;;  %v1394_v60 = vor.u32 %v1563_v54, %v1391_v55  ;;  %v2255_v61 = vld [vmem:[%s2687_s2] ss:$0 sm:$0xff]  ;;  %v1568_v55 = vld [vmem:[%s2688_s0 + $0x1a4] sm:$0xf0] }
  0x52   :  { %725 = vmatmul.bf16.gmra.mxu1 %v1226_v62  ;;  %805 = vmatmul.bf16.gmra.mxu3 %v1354_v63  ;;  %v1405_v54 = vld [vmem:[%s2688_s0 + $0x1a0] sm:$0xf] }
  0x61   :  { %561 = vmatmul.bf16.gmra.mxu0 %v1230_v8  ;;  %641 = vmatmul.bf16.gmra.mxu2 %v1358_v9  ;;  %v1598_v8 = vunpack.c.h.bf16 %v1596_v0 }
  0x62   :  { %730 = vmatmul.bf16.gmra.mxu1 %v1234_v10  ;;  %810 = vmatmul.bf16.gmra.mxu3 %v1362_v11  ;;  %v1898_v10 = vld [vmem:[%s2689_s3 + $0x80] sm:$0xff]  }
  0x63   :  { %v1662_v24 = vunpack.c.h.bf16 %v1898_v10 }
  0x71   :  { %566 = vmatmul.bf16.gmra.mxu0 %v1238_v20  ;;  %646 = vmatmul.bf16.gmra.mxu2 %v1366_v21  ;;  %v1565_v20 = vld [vmem:[%s2688_s0 + $0x194] sm:$0xf]  ;;  %v1399_v21 = vld [vmem:[%s2688_s0 + $0x198] sm:$0xf0] }
  0x72   :  { %735 = vmatmul.bf16.gmra.mxu1 %v1242_v22  ;;  %815 = vmatmul.bf16.gmra.mxu3 %v1370_v23  ;;  %v1661_v22 = vunpack.c.l.bf16 %v1898_v10 }
  0x81   :  { %571 = vmatmul.bf16.gmra.mxu0 %v1246_v32  ;;  %651 = vmatmul.bf16.gmra.mxu2 %v1374_v33  ;;  %v1274_v32 = vor.u32 %v1533_v16, %v1271_v19  ;;  %v1402_v33 = vor.u32 %v1565_v20, %v1399_v21 }
  0x82   :  { %740 = vmatmul.bf16.gmra.mxu1 %v1250_v34  ;;  %820 = vmatmul.bf16.gmra.mxu3 %v1378_v35 }
  0x91   :  { %576 = vmatmul.bf16.gmra.mxu0 %v1254_v44  ;;  %656 = vmatmul.bf16.gmra.mxu2 %v1382_v45  ;;  %v1601_v45 = vunpack.c.l.bf16 %v1883_v40 }
  0x92   :  { %745 = vmatmul.bf16.gmra.mxu1 %v1258_v46  ;;  %825 = vmatmul.bf16.gmra.mxu3 %v1386_v47 }
  0x9e   :  { %v542_v58 = vpop.f32.mrf.mxu0 }
  0x9f   :  { %v711_v62 = vpop.f32.mrf.mxu1  ;;  %v543_v63 = vadd.f32 %v2255_v61, %v542_v58 }
  0xa1   :  { %581 = vmatmul.bf16.gmra.mxu0 %v1262_v56  ;;  %661 = vmatmul.bf16.gmra.mxu2 %v1390_v57  ;;  %v712_v4 = vadd.f32 %v711_v62, %v543_v63  ;;  %v1535_v56 = vld [vmem:[%s2688_s0 + $0xa4] sm:$0xf]  ;;  %v1407_v62 = vld [vmem:[%s2688_s0 + $0x1a8] sm:$0xf0]  ;;  %v1665_v63 = vunpack.c.l.bf16 %v1899_v50 }
  0xa2   :  { %750 = vmatmul.bf16.gmra.mxu1 %v1266_v59  ;;  %830 = vmatmul.bf16.gmra.mxu3 %v1394_v60  ;;  %v1279_v59 = vld [vmem:[%s2688_s0 + $0xa8] sm:$0xf0]  ;;  %v1567_v60 = vld [vmem:[%s2688_s0 + $0x1a4] sm:$0xf] }
  0xa3   :  { %v999_v17 = vadd.f32 %v1597_v5, %v712_v4  ;;  %v1410_v10 = vor.u32 %v1567_v60, %v1407_v62 }
  0xa4   :  { %v622_v1 = vpop.f32.mrf.mxu2 }
  0xa5   :  { %v791_v2 = vpop.f32.mrf.mxu3  ;;  %v623_v9 = vadd.f32 %v2255_v61, %v622_v1  ;;  %v1666_v1 = vunpack.c.h.bf16 %v1899_v50 }
  0xa6   :  { %v544_v3 = vpop.f32.mrf.mxu0 }
  0xa7   :  { %v545_v6 = vadd.f32 %v2255_v61, %v544_v3  ;;  %v713_v7 = vpop.f32.mrf.mxu1  ;;  %v792_v26 = vadd.f32 %v791_v2, %v623_v9  ;;  %v1278_v2 = vor.u32 %v1536_v53, %v1277_v52  ;;  %v1282_v9 = vor.u32 %v1535_v56, %v1279_v59 }
  0xa9   :  { %v714_v11 = vadd.f32 %v713_v7, %v545_v6  ;;  %v1031_v36 = vadd.f32 %v1661_v22, %v792_v26  ;;  %v1406_v7 = vor.u32 %v1568_v55, %v1405_v54 }
  0xab   :  { %v1000_v18 = vadd.f32 %v1598_v8, %v714_v11 }
  0xac   :  { %v624_v23 = vpop.f32.mrf.mxu2 }
  0xad   :  { %v1726_v27 = vpack.c.bf16 %v1000_v18, %v999_v17  ;;  %v625_v28 = vadd.f32 %v2255_v61, %v624_v23  ;;  %v793_v29 = vpop.f32.mrf.mxu3  ;;  %v1884_v17 = vld [vmem:[%s2689_s3 + $0x10] sm:$0xff]  }
  0xae   :  { %v547_v31 = vpop.f32.mrf.mxu0  ;;  %v1605_v22 = vunpack.c.l.bf16 %v1884_v17 }
  0xaf   :  { %1727 = vst [vmem:[%s2690_s4] sm:$0xff] %v1726_v27   ;;  %v794_v34 = vadd.f32 %v793_v29, %v625_v28  ;;  %v716_v35 = vpop.f32.mrf.mxu1  ;;  %v548_v39 = vadd.f32 %v2255_v61, %v547_v31  ;;  %v1900_v27 = vld [vmem:[%s2689_s3 + $0x90] sm:$0xff]  }
  0xb0   :  { %v1285_v29 = vld [vmem:[%s2688_s0 + $0xb0] sm:$0xf] }
  0xb1   :  { %v1032_v37 = vadd.f32 %v1662_v24, %v794_v34  ;;  %586 = vmatmul.bf16.gmra.mxu0 %v1270_v25  ;;  %666 = vmatmul.bf16.gmra.mxu2 %v1398_v30  ;;  %v717_v44 = vadd.f32 %v716_v35, %v548_v39  ;;  %v1606_v25 = vunpack.c.h.bf16 %v1884_v17  ;;  %v1538_v30 = vld [vmem:[%s2688_s0 + $0xb4] sm:$0xf0]  ;;  %v1413_v31 = vld [vmem:[%s2688_s0 + $0x1b0] sm:$0xf]  ;;  %v1669_v39 = vunpack.c.l.bf16 %v1900_v27 }
  0xb2   :  { %755 = vmatmul.bf16.gmra.mxu1 %v1274_v32  ;;  %835 = vmatmul.bf16.gmra.mxu3 %v1402_v33  ;;  %v1570_v32 = vld [vmem:[%s2688_s0 + $0x1b4] sm:$0xf0]  ;;  %v1537_v33 = vld [vmem:[%s2688_s0 + $0xb4] sm:$0xf] }
  0xb3   :  { %v1806_v38 = vpack.c.bf16 %v1032_v37, %v1031_v36  ;;  %v1001_v57 = vadd.f32 %v1601_v45, %v717_v44  ;;  %v1287_v36 = vld [vmem:[%s2688_s0 + $0xb8] sm:$0xf0]  ;;  %v1569_v37 = vld [vmem:[%s2688_s0 + $0x1b4] sm:$0xf] }
  0xb4   :  { %v627_v41 = vpop.f32.mrf.mxu2 }
  0xb5   :  { %1929 = vst [vmem:[%s2690_s4 + $0x80] sm:$0xff] %v1806_v38   ;;  %v796_v42 = vpop.f32.mrf.mxu3  ;;  %v628_v49 = vadd.f32 %v2255_v61, %v627_v41  ;;  %v1415_v38 = vld [vmem:[%s2688_s0 + $0x1b8] sm:$0xf0]  ;;  %v1670_v41 = vunpack.c.h.bf16 %v1900_v27 }
  0xb6   :  { %v549_v43 = vpop.f32.mrf.mxu0  ;;  %v1418_v50 = vor.u32 %v1569_v37, %v1415_v38 }
  0xb7   :  { %v550_v46 = vadd.f32 %v2255_v61, %v549_v43  ;;  %v718_v47 = vpop.f32.mrf.mxu1  ;;  %v797_v3 = vadd.f32 %v796_v42, %v628_v49  ;;  %v1286_v42 = vor.u32 %v1538_v30, %v1285_v29  ;;  %v1290_v49 = vor.u32 %v1537_v33, %v1287_v36 }
  0xb9   :  { %v719_v51 = vadd.f32 %v718_v47, %v550_v46  ;;  %v1033_v13 = vadd.f32 %v1665_v63, %v797_v3  ;;  %v1414_v47 = vor.u32 %v1570_v32, %v1413_v31 }
  0xbb   :  { %v1002_v58 = vadd.f32 %v1602_v48, %v719_v51 }
  0xbc   :  { %v629_v0 = vpop.f32.mrf.mxu2 }
  0xbd   :  { %v1731_v4 = vpack.c.bf16 %v1002_v58, %v1001_v57  ;;  %v630_v5 = vadd.f32 %v2255_v61, %v629_v0  ;;  %v798_v6 = vpop.f32.mrf.mxu3  ;;  %v1885_v57 = vld [vmem:[%s2689_s3 + $0x18] sm:$0xff]  }
  0xbe   :  { %v552_v8 = vpop.f32.mrf.mxu0  ;;  %v1609_v63 = vunpack.c.l.bf16 %v1885_v57 }
  0xbf   :  { %1914 = vst [vmem:[%s2690_s4 + $0x8] sm:$0xff] %v1731_v4   ;;  %v799_v11 = vadd.f32 %v798_v6, %v630_v5  ;;  %v721_v12 = vpop.f32.mrf.mxu1  ;;  %v553_v16 = vadd.f32 %v2255_v61, %v552_v8  ;;  %v1901_v4 = vld [vmem:[%s2689_s3 + $0x98] sm:$0xff]   ;;  %v1293_v6 = vld [vmem:[%s2688_s0 + $0xc0] sm:$0xf] }
  0xc0   :  { %v1421_v8 = vld [vmem:[%s2688_s0 + $0x1c0] sm:$0xf] }
  0xc1   :  { %v1034_v14 = vadd.f32 %v1666_v1, %v799_v11  ;;  %591 = vmatmul.bf16.gmra.mxu0 %v1278_v2  ;;  %671 = vmatmul.bf16.gmra.mxu2 %v1406_v7  ;;  %v722_v21 = vadd.f32 %v721_v12, %v553_v16  ;;  %v1610_v2 = vunpack.c.h.bf16 %v1885_v57  ;;  %v1540_v7 = vld [vmem:[%s2688_s0 + $0xc4] sm:$0xf0]  ;;  %v1673_v16 = vunpack.c.l.bf16 %v1901_v4 }
  0xc2   :  { %760 = vmatmul.bf16.gmra.mxu1 %v1282_v9  ;;  %840 = vmatmul.bf16.gmra.mxu3 %v1410_v10  ;;  %v1572_v9 = vld [vmem:[%s2688_s0 + $0x1c4] sm:$0xf0]  ;;  %v1539_v10 = vld [vmem:[%s2688_s0 + $0xc4] sm:$0xf] }
  0xc3   :  { %v1811_v15 = vpack.c.bf16 %v1034_v14, %v1033_v13  ;;  %v1003_v34 = vadd.f32 %v1605_v22, %v722_v21  ;;  %v1295_v13 = vld [vmem:[%s2688_s0 + $0xc8] sm:$0xf0]  ;;  %v1571_v14 = vld [vmem:[%s2688_s0 + $0x1c4] sm:$0xf] }
  0xc4   :  { %v632_v18 = vpop.f32.mrf.mxu2 }
  0xc5   :  { %1930 = vst [vmem:[%s2690_s4 + $0x88] sm:$0xff] %v1811_v15   ;;  %v801_v19 = vpop.f32.mrf.mxu3  ;;  %v633_v26 = vadd.f32 %v2255_v61, %v632_v18  ;;  %v1423_v15 = vld [vmem:[%s2688_s0 + $0x1c8] sm:$0xf0]  ;;  %v1674_v18 = vunpack.c.h.bf16 %v1901_v4 }
  0xc6   :  { %v554_v20 = vpop.f32.mrf.mxu0  ;;  %v1426_v27 = vor.u32 %v1571_v14, %v1423_v15 }
  0xc7   :  { %v555_v23 = vadd.f32 %v2255_v61, %v554_v20  ;;  %v723_v24 = vpop.f32.mrf.mxu1  ;;  %v802_v43 = vadd.f32 %v801_v19, %v633_v26  ;;  %v1294_v19 = vor.u32 %v1540_v7, %v1293_v6  ;;  %v1298_v26 = vor.u32 %v1539_v10, %v1295_v13 }
  0xc9   :  { %v724_v28 = vadd.f32 %v723_v24, %v555_v23  ;;  %v1035_v53 = vadd.f32 %v1669_v39, %v802_v43  ;;  %v1422_v24 = vor.u32 %v1572_v9, %v1421_v8 }
  0xcb   :  { %v1004_v35 = vadd.f32 %v1606_v25, %v724_v28 }
  0xcc   :  { %v634_v40 = vpop.f32.mrf.mxu2 }
  0xcd   :  { %v1736_v44 = vpack.c.bf16 %v1004_v35, %v1003_v34  ;;  %v635_v45 = vadd.f32 %v2255_v61, %v634_v40  ;;  %v803_v46 = vpop.f32.mrf.mxu3  ;;  %v1886_v34 = vld [vmem:[%s2689_s3 + $0x20] sm:$0xff]  }
  0xce   :  { %v557_v48 = vpop.f32.mrf.mxu0  ;;  %v1613_v39 = vunpack.c.l.bf16 %v1886_v34 }
  0xcf   :  { %1915 = vst [vmem:[%s2690_s4 + $0x10] sm:$0xff] %v1736_v44   ;;  %v804_v51 = vadd.f32 %v803_v46, %v635_v45  ;;  %v726_v52 = vpop.f32.mrf.mxu1  ;;  %v558_v56 = vadd.f32 %v2255_v61, %v557_v48  ;;  %v1902_v44 = vld [vmem:[%s2689_s3 + $0xa0] sm:$0xff]   ;;  %v1301_v46 = vld [vmem:[%s2688_s0 + $0xd0] sm:$0xf] }
  0xd0   :  { %v1429_v48 = vld [vmem:[%s2688_s0 + $0x1d0] sm:$0xf] }
  0xd1   :  { %v1036_v54 = vadd.f32 %v1670_v41, %v804_v51  ;;  %596 = vmatmul.bf16.gmra.mxu0 %v1286_v42  ;;  %676 = vmatmul.bf16.gmra.mxu2 %v1414_v47  ;;  %v727_v62 = vadd.f32 %v726_v52, %v558_v56  ;;  %v1614_v42 = vunpack.c.h.bf16 %v1886_v34  ;;  %v1542_v47 = vld [vmem:[%s2688_s0 + $0xd4] sm:$0xf0]  ;;  %v1677_v56 = vunpack.c.l.bf16 %v1902_v44 }
  0xd2   :  { %765 = vmatmul.bf16.gmra.mxu1 %v1290_v49  ;;  %845 = vmatmul.bf16.gmra.mxu3 %v1418_v50  ;;  %v1574_v49 = vld [vmem:[%s2688_s0 + $0x1d4] sm:$0xf0]  ;;  %v1541_v50 = vld [vmem:[%s2688_s0 + $0xd4] sm:$0xf] }
  0xd3   :  { %v1816_v55 = vpack.c.bf16 %v1036_v54, %v1035_v53  ;;  %v1005_v11 = vadd.f32 %v1609_v63, %v727_v62  ;;  %v1303_v53 = vld [vmem:[%s2688_s0 + $0xd8] sm:$0xf0]  ;;  %v1573_v54 = vld [vmem:[%s2688_s0 + $0x1d4] sm:$0xf] }
  0xd4   :  { %v637_v58 = vpop.f32.mrf.mxu2 }
  0xd5   :  { %1931 = vst [vmem:[%s2690_s4 + $0x90] sm:$0xff] %v1816_v55   ;;  %v806_v59 = vpop.f32.mrf.mxu3  ;;  %v638_v3 = vadd.f32 %v2255_v61, %v637_v58  ;;  %v1431_v55 = vld [vmem:[%s2688_s0 + $0x1d8] sm:$0xf0]  ;;  %v1678_v58 = vunpack.c.h.bf16 %v1902_v44 }
  0xd6   :  { %v559_v60 = vpop.f32.mrf.mxu0  ;;  %v1434_v4 = vor.u32 %v1573_v54, %v1431_v55 }
  0xd7   :  { %v560_v0 = vadd.f32 %v2255_v61, %v559_v60  ;;  %v728_v1 = vpop.f32.mrf.mxu1  ;;  %v807_v20 = vadd.f32 %v806_v59, %v638_v3  ;;  %v1302_v59 = vor.u32 %v1542_v47, %v1301_v46  ;;  %v1306_v3 = vor.u32 %v1541_v50, %v1303_v53 }
  0xd9   :  { %v729_v5 = vadd.f32 %v728_v1, %v560_v0  ;;  %v1037_v30 = vadd.f32 %v1673_v16, %v807_v20  ;;  %v1430_v1 = vor.u32 %v1574_v49, %v1429_v48 }
  0xdb   :  { %v1006_v12 = vadd.f32 %v1610_v2, %v729_v5 }
  0xdc   :  { %v639_v17 = vpop.f32.mrf.mxu2 }
  0xdd   :  { %v1741_v21 = vpack.c.bf16 %v1006_v12, %v1005_v11  ;;  %v640_v22 = vadd.f32 %v2255_v61, %v639_v17  ;;  %v808_v23 = vpop.f32.mrf.mxu3  ;;  %v1887_v11 = vld [vmem:[%s2689_s3 + $0x28] sm:$0xff]  }
  0xde   :  { %v562_v25 = vpop.f32.mrf.mxu0  ;;  %v1617_v16 = vunpack.c.l.bf16 %v1887_v11 }
  0xdf   :  { %1916 = vst [vmem:[%s2690_s4 + $0x18] sm:$0xff] %v1741_v21   ;;  %v809_v28 = vadd.f32 %v808_v23, %v640_v22  ;;  %v731_v29 = vpop.f32.mrf.mxu1  ;;  %v563_v33 = vadd.f32 %v2255_v61, %v562_v25  ;;  %v1903_v21 = vld [vmem:[%s2689_s3 + $0xa8] sm:$0xff]   ;;  %v1309_v23 = vld [vmem:[%s2688_s0 + $0xe0] sm:$0xf] }
  0xe0   :  { %v1437_v25 = vld [vmem:[%s2688_s0 + $0x1e0] sm:$0xf] }
  0xe1   :  { %v1038_v31 = vadd.f32 %v1674_v18, %v809_v28  ;;  %601 = vmatmul.bf16.gmra.mxu0 %v1294_v19  ;;  %681 = vmatmul.bf16.gmra.mxu2 %v1422_v24  ;;  %v732_v38 = vadd.f32 %v731_v29, %v563_v33  ;;  %v1618_v19 = vunpack.c.h.bf16 %v1887_v11  ;;  %v1544_v24 = vld [vmem:[%s2688_s0 + $0xe4] sm:$0xf0]  ;;  %v1681_v33 = vunpack.c.l.bf16 %v1903_v21 }
  0xe2   :  { %770 = vmatmul.bf16.gmra.mxu1 %v1298_v26  ;;  %850 = vmatmul.bf16.gmra.mxu3 %v1426_v27  ;;  %v1576_v26 = vld [vmem:[%s2688_s0 + $0x1e4] sm:$0xf0]  ;;  %v1543_v27 = vld [vmem:[%s2688_s0 + $0xe4] sm:$0xf] }
  0xe3   :  { %v1821_v32 = vpack.c.bf16 %v1038_v31, %v1037_v30  ;;  %v1007_v51 = vadd.f32 %v1613_v39, %v732_v38  ;;  %v1311_v30 = vld [vmem:[%s2688_s0 + $0xe8] sm:$0xf0]  ;;  %v1575_v31 = vld [vmem:[%s2688_s0 + $0x1e4] sm:$0xf] }
  0xe4   :  { %v642_v35 = vpop.f32.mrf.mxu2 }
  0xe5   :  { %1932 = vst [vmem:[%s2690_s4 + $0x98] sm:$0xff] %v1821_v32   ;;  %v811_v36 = vpop.f32.mrf.mxu3  ;;  %v643_v43 = vadd.f32 %v2255_v61, %v642_v35  ;;  %v1439_v32 = vld [vmem:[%s2688_s0 + $0x1e8] sm:$0xf0]  ;;  %v1682_v35 = vunpack.c.h.bf16 %v1903_v21 }
  0xe6   :  { %v564_v37 = vpop.f32.mrf.mxu0  ;;  %v1442_v44 = vor.u32 %v1575_v31, %v1439_v32 }
  0xe7   :  { %v565_v40 = vadd.f32 %v2255_v61, %v564_v37  ;;  %v733_v41 = vpop.f32.mrf.mxu1  ;;  %v812_v60 = vadd.f32 %v811_v36, %v643_v43  ;;  %v1310_v36 = vor.u32 %v1544_v24, %v1309_v23  ;;  %v1314_v43 = vor.u32 %v1543_v27, %v1311_v30 }
  0xe9   :  { %v734_v45 = vadd.f32 %v733_v41, %v565_v40  ;;  %v1039_v7 = vadd.f32 %v1677_v56, %v812_v60  ;;  %v1438_v41 = vor.u32 %v1576_v26, %v1437_v25 }
  0xeb   :  { %v1008_v52 = vadd.f32 %v1614_v42, %v734_v45 }
  0xec   :  { %v644_v57 = vpop.f32.mrf.mxu2 }
  0xed   :  { %v1746_v62 = vpack.c.bf16 %v1008_v52, %v1007_v51  ;;  %v645_v63 = vadd.f32 %v2255_v61, %v644_v57  ;;  %v813_v0 = vpop.f32.mrf.mxu3  ;;  %v1888_v51 = vld [vmem:[%s2689_s3 + $0x30] sm:$0xff]  }
  0xee   :  { %v567_v2 = vpop.f32.mrf.mxu0  ;;  %v1621_v56 = vunpack.c.l.bf16 %v1888_v51 }
  0xef   :  { %1917 = vst [vmem:[%s2690_s4 + $0x20] sm:$0xff] %v1746_v62   ;;  %v814_v5 = vadd.f32 %v813_v0, %v645_v63  ;;  %v736_v6 = vpop.f32.mrf.mxu1  ;;  %v568_v10 = vadd.f32 %v2255_v61, %v567_v2  ;;  %v1904_v62 = vld [vmem:[%s2689_s3 + $0xb0] sm:$0xff]  }
  0xf0   :  { %v1317_v0 = vld [vmem:[%s2688_s0 + $0xf0] sm:$0xf] }
  0xf1   :  { %v1040_v8 = vadd.f32 %v1678_v58, %v814_v5  ;;  %606 = vmatmul.bf16.gmra.mxu0 %v1302_v59  ;;  %686 = vmatmul.bf16.gmra.mxu2 %v1430_v1  ;;  %v737_v15 = vadd.f32 %v736_v6, %v568_v10  ;;  %v1622_v59 = vunpack.c.h.bf16 %v1888_v51  ;;  %v1546_v1 = vld [vmem:[%s2688_s0 + $0xf4] sm:$0xf0]  ;;  %v1445_v2 = vld [vmem:[%s2688_s0 + $0x1f0] sm:$0xf]  ;;  %v1685_v10 = vunpack.c.l.bf16 %v1904_v62 }
  0xf2   :  { %775 = vmatmul.bf16.gmra.mxu1 %v1306_v3  ;;  %855 = vmatmul.bf16.gmra.mxu3 %v1434_v4  ;;  %v1578_v3 = vld [vmem:[%s2688_s0 + $0x1f4] sm:$0xf0]  ;;  %v1545_v4 = vld [vmem:[%s2688_s0 + $0xf4] sm:$0xf] }
  0xf3   :  { %v1826_v9 = vpack.c.bf16 %v1040_v8, %v1039_v7  ;;  %v1009_v28 = vadd.f32 %v1617_v16, %v737_v15  ;;  %v1319_v7 = vld [vmem:[%s2688_s0 + $0xf8] sm:$0xf0]  ;;  %v1577_v8 = vld [vmem:[%s2688_s0 + $0x1f4] sm:$0xf] }
  0xf4   :  { %v647_v12 = vpop.f32.mrf.mxu2 }
  0xf5   :  { %1933 = vst [vmem:[%s2690_s4 + $0xa0] sm:$0xff] %v1826_v9   ;;  %v816_v13 = vpop.f32.mrf.mxu3  ;;  %v648_v20 = vadd.f32 %v2255_v61, %v647_v12  ;;  %v1447_v9 = vld [vmem:[%s2688_s0 + $0x1f8] sm:$0xf0]  ;;  %v1686_v12 = vunpack.c.h.bf16 %v1904_v62 }
  0xf6   :  { %v569_v14 = vpop.f32.mrf.mxu0  ;;  %v1450_v21 = vor.u32 %v1577_v8, %v1447_v9 }
  0xf7   :  { %v570_v17 = vadd.f32 %v2255_v61, %v569_v14  ;;  %v738_v18 = vpop.f32.mrf.mxu1  ;;  %v817_v37 = vadd.f32 %v816_v13, %v648_v20  ;;  %v1318_v13 = vor.u32 %v1546_v1, %v1317_v0  ;;  %v1322_v20 = vor.u32 %v1545_v4, %v1319_v7 }
  0xf9   :  { %v739_v22 = vadd.f32 %v738_v18, %v570_v17  ;;  %v1041_v47 = vadd.f32 %v1681_v33, %v817_v37  ;;  %v1446_v18 = vor.u32 %v1578_v3, %v1445_v2  ;;  %v1906_v3 = vld [vmem:[%s2689_s3 + $0xc0] sm:$0xff]  }
  0xfa   :  { %v1693_v7 = vunpack.c.l.bf16 %v1906_v3 }
  0xfb   :  { %v1010_v29 = vadd.f32 %v1618_v19, %v739_v22 }
  0xfc   :  { %v649_v34 = vpop.f32.mrf.mxu2 }
  0xfd   :  { %v1751_v38 = vpack.c.bf16 %v1010_v29, %v1009_v28  ;;  %v650_v39 = vadd.f32 %v2255_v61, %v649_v34  ;;  %v818_v40 = vpop.f32.mrf.mxu3  ;;  %v1889_v28 = vld [vmem:[%s2689_s3 + $0x38] sm:$0xff]  }
  0xfe   :  { %v572_v42 = vpop.f32.mrf.mxu0  ;;  %v1625_v33 = vunpack.c.l.bf16 %v1889_v28 }
  0xff   :  { %1918 = vst [vmem:[%s2690_s4 + $0x28] sm:$0xff] %v1751_v38   ;;  %v819_v45 = vadd.f32 %v818_v40, %v650_v39  ;;  %v741_v46 = vpop.f32.mrf.mxu1  ;;  %v573_v50 = vadd.f32 %v2255_v61, %v572_v42  ;;  %v1905_v38 = vld [vmem:[%s2689_s3 + $0xb8] sm:$0xff]  }
 0x100   :  { %v1689_v42 = vunpack.c.l.bf16 %v1905_v38 }
 0x101   :  { %v1042_v48 = vadd.f32 %v1682_v35, %v819_v45  ;;  %611 = vmatmul.bf16.gmra.mxu0 %v1310_v36  ;;  %691 = vmatmul.bf16.gmra.mxu2 %v1438_v41  ;;  %v742_v55 = vadd.f32 %v741_v46, %v573_v50  ;;  %v1626_v36 = vunpack.c.h.bf16 %v1889_v28 }
 0x102   :  { %780 = vmatmul.bf16.gmra.mxu1 %v1314_v43  ;;  %860 = vmatmul.bf16.gmra.mxu3 %v1442_v44 }
 0x103   :  { %v1831_v49 = vpack.c.bf16 %v1042_v48, %v1041_v47  ;;  %v1011_v5 = vadd.f32 %v1621_v56, %v742_v55  ;;  %v1690_v48 = vunpack.c.h.bf16 %v1905_v38  ;;  %v1890_v56 = vld [vmem:[%s2689_s3 + $0x40] sm:$0xff]  }
 0x104   :  { %v652_v52 = vpop.f32.mrf.mxu2  ;;  %v1629_v62 = vunpack.c.l.bf16 %v1890_v56  ;;  %v1630_v1 = vunpack.c.h.bf16 %v1890_v56 }
 0x105   :  { %1934 = vst [vmem:[%s2690_s4 + $0xa8] sm:$0xff] %v1831_v49   ;;  %v821_v53 = vpop.f32.mrf.mxu3  ;;  %v653_v60 = vadd.f32 %v2255_v61, %v652_v52 }
 0x106   :  { %v574_v54 = vpop.f32.mrf.mxu0 }
 0x107   :  { %v575_v57 = vadd.f32 %v2255_v61, %v574_v54  ;;  %v743_v58 = vpop.f32.mrf.mxu1  ;;  %v822_v14 = vadd.f32 %v821_v53, %v653_v60 }
 0x109   :  { %v744_v63 = vadd.f32 %v743_v58, %v575_v57  ;;  %v1043_v24 = vadd.f32 %v1685_v10, %v822_v14 }
 0x10b   :  { %v1012_v6 = vadd.f32 %v1622_v59, %v744_v63 }
 0x10c   :  { %v654_v11 = vpop.f32.mrf.mxu2 }
 0x10d   :  { %v1756_v15 = vpack.c.bf16 %v1012_v6, %v1011_v5  ;;  %v655_v16 = vadd.f32 %v2255_v61, %v654_v11  ;;  %v823_v17 = vpop.f32.mrf.mxu3 }
 0x10e   :  { %v577_v19 = vpop.f32.mrf.mxu0 }
 0x10f   :  { %1919 = vst [vmem:[%s2690_s4 + $0x30] sm:$0xff] %v1756_v15   ;;  %v824_v22 = vadd.f32 %v823_v17, %v655_v16  ;;  %v746_v23 = vpop.f32.mrf.mxu1  ;;  %v578_v27 = vadd.f32 %v2255_v61, %v577_v19 }
 0x111   :  { %v1044_v25 = vadd.f32 %v1686_v12, %v824_v22  ;;  %616 = vmatmul.bf16.gmra.mxu0 %v1318_v13  ;;  %696 = vmatmul.bf16.gmra.mxu2 %v1446_v18  ;;  %v747_v32 = vadd.f32 %v746_v23, %v578_v27  ;;  %v1694_v13 = vunpack.c.h.bf16 %v1906_v3 }
 0x112   :  { %785 = vmatmul.bf16.gmra.mxu1 %v1322_v20  ;;  %865 = vmatmul.bf16.gmra.mxu3 %v1450_v21  ;;  %v1891_v21 = vld [vmem:[%s2689_s3 + $0x48] sm:$0xff]  }
 0x113   :  { %v1836_v26 = vpack.c.bf16 %v1044_v25, %v1043_v24  ;;  %v1013_v40 = vadd.f32 %v1625_v33, %v747_v32 }
 0x114   :  { %v657_v29 = vpop.f32.mrf.mxu2 }
 0x115   :  { %1935 = vst [vmem:[%s2690_s4 + $0xb0] sm:$0xff] %v1836_v26   ;;  %v826_v30 = vpop.f32.mrf.mxu3  ;;  %v658_v37 = vadd.f32 %v2255_v61, %v657_v29  ;;  %v1633_v26 = vunpack.c.l.bf16 %v1891_v21  ;;  %v1634_v29 = vunpack.c.h.bf16 %v1891_v21 }
 0x116   :  { %v579_v31 = vpop.f32.mrf.mxu0 }
 0x117   :  { %v580_v34 = vadd.f32 %v2255_v61, %v579_v31  ;;  %v748_v35 = vpop.f32.mrf.mxu1  ;;  %v827_v44 = vadd.f32 %v826_v30, %v658_v37  ;;  %v1907_v31 = vld [vmem:[%s2689_s3 + $0xc8] sm:$0xff]  }
 0x119   :  { %v749_v39 = vadd.f32 %v748_v35, %v580_v34  ;;  %v1045_v52 = vadd.f32 %v1689_v42, %v827_v44  ;;  %v1697_v35 = vunpack.c.l.bf16 %v1907_v31 }
 0x11b   :  { %v1014_v41 = vadd.f32 %v1626_v36, %v749_v39 }
 0x11c   :  { %v659_v43 = vpop.f32.mrf.mxu2 }
 0x11d   :  { %v1761_v45 = vpack.c.bf16 %v1014_v41, %v1013_v40  ;;  %v660_v46 = vadd.f32 %v2255_v61, %v659_v43  ;;  %v828_v47 = vpop.f32.mrf.mxu3  ;;  %v1698_v41 = vunpack.c.h.bf16 %v1907_v31 }
 0x11e   :  { %v582_v49 = vpop.f32.mrf.mxu0 }
 0x11f   :  { %1920 = vst [vmem:[%s2690_s4 + $0x38] sm:$0xff] %v1761_v45   ;;  %v829_v50 = vadd.f32 %v828_v47, %v660_v46  ;;  %v751_v51 = vpop.f32.mrf.mxu1  ;;  %v583_v55 = vadd.f32 %v2255_v61, %v582_v49  ;;  %v1892_v49 = vld [vmem:[%s2689_s3 + $0x50] sm:$0xff]  }
 0x121   :  { %v1046_v53 = vadd.f32 %v1690_v48, %v829_v50  ;;  %v752_v60 = vadd.f32 %v751_v51, %v583_v55 }
 0x123   :  { %v1841_v54 = vpack.c.bf16 %v1046_v53, %v1045_v52  ;;  %v1015_v5 = vadd.f32 %v1629_v62, %v752_v60 }
 0x124   :  { %v662_v57 = vpop.f32.mrf.mxu2 }
 0x125   :  { %1936 = vst [vmem:[%s2690_s4 + $0xb8] sm:$0xff] %v1841_v54   ;;  %v831_v58 = vpop.f32.mrf.mxu3  ;;  %v663_v2 = vadd.f32 %v2255_v61, %v662_v57  ;;  %v1637_v54 = vunpack.c.l.bf16 %v1892_v49  ;;  %v1638_v57 = vunpack.c.h.bf16 %v1892_v49 }
 0x126   :  { %v584_v59 = vpop.f32.mrf.mxu0 }
 0x127   :  { %v585_v63 = vadd.f32 %v2255_v61, %v584_v59  ;;  %v753_v0 = vpop.f32.mrf.mxu1  ;;  %v832_v9 = vadd.f32 %v831_v58, %v663_v2  ;;  %v1908_v59 = vld [vmem:[%s2689_s3 + $0xd0] sm:$0xff]  }
 0x129   :  { %v754_v4 = vadd.f32 %v753_v0, %v585_v63  ;;  %v1047_v17 = vadd.f32 %v1693_v7, %v832_v9  ;;  %v1701_v0 = vunpack.c.l.bf16 %v1908_v59 }
 0x12b   :  { %v1016_v6 = vadd.f32 %v1630_v1, %v754_v4 }
 0x12c   :  { %v664_v8 = vpop.f32.mrf.mxu2 }
 0x12d   :  { %v1766_v10 = vpack.c.bf16 %v1016_v6, %v1015_v5  ;;  %v665_v11 = vadd.f32 %v2255_v61, %v664_v8  ;;  %v833_v12 = vpop.f32.mrf.mxu3  ;;  %v1702_v6 = vunpack.c.h.bf16 %v1908_v59 }
 0x12e   :  { %v587_v14 = vpop.f32.mrf.mxu0 }
 0x12f   :  { %1921 = vst [vmem:[%s2690_s4 + $0x40] sm:$0xff] %v1766_v10   ;;  %v834_v15 = vadd.f32 %v833_v12, %v665_v11  ;;  %v756_v16 = vpop.f32.mrf.mxu1  ;;  %v588_v20 = vadd.f32 %v2255_v61, %v587_v14  ;;  %v1893_v14 = vld [vmem:[%s2689_s3 + $0x58] sm:$0xff]  }
 0x131   :  { %v1048_v18 = vadd.f32 %v1694_v13, %v834_v15  ;;  %v757_v25 = vadd.f32 %v756_v16, %v588_v20 }
 0x133   :  { %v1846_v19 = vpack.c.bf16 %v1048_v18, %v1047_v17  ;;  %v1017_v33 = vadd.f32 %v1633_v26, %v757_v25 }
 0x134   :  { %v667_v22 = vpop.f32.mrf.mxu2 }
 0x135   :  { %1937 = vst [vmem:[%s2690_s4 + $0xc0] sm:$0xff] %v1846_v19   ;;  %v836_v23 = vpop.f32.mrf.mxu3  ;;  %v668_v30 = vadd.f32 %v2255_v61, %v667_v22  ;;  %v1641_v19 = vunpack.c.l.bf16 %v1893_v14  ;;  %v1642_v22 = vunpack.c.h.bf16 %v1893_v14 }
 0x136   :  { %v589_v24 = vpop.f32.mrf.mxu0 }
 0x137   :  { %v590_v27 = vadd.f32 %v2255_v61, %v589_v24  ;;  %v758_v28 = vpop.f32.mrf.mxu1  ;;  %v837_v37 = vadd.f32 %v836_v23, %v668_v30  ;;  %v1909_v24 = vld [vmem:[%s2689_s3 + $0xd8] sm:$0xff]  }
 0x139   :  { %v759_v32 = vadd.f32 %v758_v28, %v590_v27  ;;  %v1049_v45 = vadd.f32 %v1697_v35, %v837_v37  ;;  %v1705_v28 = vunpack.c.l.bf16 %v1909_v24 }
 0x13b   :  { %v1018_v34 = vadd.f32 %v1634_v29, %v759_v32 }
 0x13c   :  { %v669_v36 = vpop.f32.mrf.mxu2 }
 0x13d   :  { %v1771_v38 = vpack.c.bf16 %v1018_v34, %v1017_v33  ;;  %v670_v39 = vadd.f32 %v2255_v61, %v669_v36  ;;  %v838_v40 = vpop.f32.mrf.mxu3  ;;  %v1706_v34 = vunpack.c.h.bf16 %v1909_v24 }
 0x13e   :  { %v592_v42 = vpop.f32.mrf.mxu0 }
 0x13f   :  { %1922 = vst [vmem:[%s2690_s4 + $0x48] sm:$0xff] %v1771_v38   ;;  %v839_v43 = vadd.f32 %v838_v40, %v670_v39  ;;  %v761_v44 = vpop.f32.mrf.mxu1  ;;  %v593_v48 = vadd.f32 %v2255_v61, %v592_v42  ;;  %v1894_v42 = vld [vmem:[%s2689_s3 + $0x60] sm:$0xff]  }
 0x141   :  { %v1050_v46 = vadd.f32 %v1698_v41, %v839_v43  ;;  %v762_v53 = vadd.f32 %v761_v44, %v593_v48 }
 0x143   :  { %v1851_v47 = vpack.c.bf16 %v1050_v46, %v1049_v45  ;;  %v1019_v62 = vadd.f32 %v1637_v54, %v762_v53 }
 0x144   :  { %v672_v50 = vpop.f32.mrf.mxu2 }
 0x145   :  { %1938 = vst [vmem:[%s2690_s4 + $0xc8] sm:$0xff] %v1851_v47   ;;  %v841_v51 = vpop.f32.mrf.mxu3  ;;  %v673_v58 = vadd.f32 %v2255_v61, %v672_v50  ;;  %v1645_v47 = vunpack.c.l.bf16 %v1894_v42  ;;  %v1646_v50 = vunpack.c.h.bf16 %v1894_v42 }
 0x146   :  { %v594_v52 = vpop.f32.mrf.mxu0 }
 0x147   :  { %v595_v55 = vadd.f32 %v2255_v61, %v594_v52  ;;  %v763_v56 = vpop.f32.mrf.mxu1  ;;  %v842_v2 = vadd.f32 %v841_v51, %v673_v58  ;;  %v1910_v52 = vld [vmem:[%s2689_s3 + $0xe0] sm:$0xff]  }
 0x149   :  { %v764_v60 = vadd.f32 %v763_v56, %v595_v55  ;;  %v1051_v10 = vadd.f32 %v1701_v0, %v842_v2  ;;  %v1709_v56 = vunpack.c.l.bf16 %v1910_v52 }
 0x14b   :  { %v1020_v63 = vadd.f32 %v1638_v57, %v764_v60 }
 0x14c   :  { %v674_v1 = vpop.f32.mrf.mxu2 }
 0x14d   :  { %v1776_v3 = vpack.c.bf16 %v1020_v63, %v1019_v62  ;;  %v675_v4 = vadd.f32 %v2255_v61, %v674_v1  ;;  %v843_v5 = vpop.f32.mrf.mxu3  ;;  %v1710_v63 = vunpack.c.h.bf16 %v1910_v52 }
 0x14e   :  { %v597_v7 = vpop.f32.mrf.mxu0 }
 0x14f   :  { %1923 = vst [vmem:[%s2690_s4 + $0x50] sm:$0xff] %v1776_v3   ;;  %v844_v8 = vadd.f32 %v843_v5, %v675_v4  ;;  %v766_v9 = vpop.f32.mrf.mxu1  ;;  %v598_v13 = vadd.f32 %v2255_v61, %v597_v7  ;;  %v1895_v7 = vld [vmem:[%s2689_s3 + $0x68] sm:$0xff]  }
 0x151   :  { %v1052_v11 = vadd.f32 %v1702_v6, %v844_v8  ;;  %v767_v18 = vadd.f32 %v766_v9, %v598_v13  ;;  %v2640_v13 = vld [vmem:[%s2687_s2] ss:$0 sm:$0xff] }
 0x153   :  { %v1856_v12 = vpack.c.bf16 %v1052_v11, %v1051_v10  ;;  %v1021_v26 = vadd.f32 %v1641_v19, %v767_v18 }
 0x154   :  { %v677_v15 = vpop.f32.mrf.mxu2 }
 0x155   :  { %1939 = vst [vmem:[%s2690_s4 + $0xd0] sm:$0xff] %v1856_v12   ;;  %v846_v16 = vpop.f32.mrf.mxu3  ;;  %v678_v23 = vadd.f32 %v2255_v61, %v677_v15  ;;  %v1649_v12 = vunpack.c.l.bf16 %v1895_v7  ;;  %v1650_v15 = vunpack.c.h.bf16 %v1895_v7 }
 0x156   :  { %v599_v17 = vpop.f32.mrf.mxu0 }
 0x157   :  { %v600_v20 = vadd.f32 %v2255_v61, %v599_v17  ;;  %v768_v21 = vpop.f32.mrf.mxu1  ;;  %v847_v30 = vadd.f32 %v846_v16, %v678_v23  ;;  %v1911_v17 = vld [vmem:[%s2689_s3 + $0xe8] sm:$0xff]  }
 0x159   :  { %v769_v25 = vadd.f32 %v768_v21, %v600_v20  ;;  %v1053_v38 = vadd.f32 %v1705_v28, %v847_v30  ;;  %v1713_v21 = vunpack.c.l.bf16 %v1911_v17 }
 0x15b   :  { %v1022_v27 = vadd.f32 %v1642_v22, %v769_v25 }
 0x15c   :  { %v679_v29 = vpop.f32.mrf.mxu2 }
 0x15d   :  { %v1781_v31 = vpack.c.bf16 %v1022_v27, %v1021_v26  ;;  %v680_v32 = vadd.f32 %v2255_v61, %v679_v29  ;;  %v848_v33 = vpop.f32.mrf.mxu3  ;;  %v1714_v27 = vunpack.c.h.bf16 %v1911_v17 }
 0x15e   :  { %v602_v35 = vpop.f32.mrf.mxu0 }
 0x15f   :  { %1924 = vst [vmem:[%s2690_s4 + $0x58] sm:$0xff] %v1781_v31   ;;  %v849_v36 = vadd.f32 %v848_v33, %v680_v32  ;;  %v771_v37 = vpop.f32.mrf.mxu1  ;;  %v603_v41 = vadd.f32 %v2255_v61, %v602_v35  ;;  %v1896_v35 = vld [vmem:[%s2689_s3 + $0x70] sm:$0xff]  }
 0x161   :  { %v1054_v39 = vadd.f32 %v1706_v34, %v849_v36  ;;  %v772_v46 = vadd.f32 %v771_v37, %v603_v41 }
 0x163   :  { %v1861_v40 = vpack.c.bf16 %v1054_v39, %v1053_v38  ;;  %v1023_v54 = vadd.f32 %v1645_v47, %v772_v46 }
 0x164   :  { %v682_v43 = vpop.f32.mrf.mxu2 }
 0x165   :  { %1940 = vst [vmem:[%s2690_s4 + $0xd8] sm:$0xff] %v1861_v40   ;;  %v851_v44 = vpop.f32.mrf.mxu3  ;;  %v683_v51 = vadd.f32 %v2255_v61, %v682_v43  ;;  %v1653_v40 = vunpack.c.l.bf16 %v1896_v35  ;;  %v1654_v43 = vunpack.c.h.bf16 %v1896_v35 }
 0x166   :  { %v604_v45 = vpop.f32.mrf.mxu0 }
 0x167   :  { %v605_v48 = vadd.f32 %v2255_v61, %v604_v45  ;;  %v773_v49 = vpop.f32.mrf.mxu1  ;;  %v852_v58 = vadd.f32 %v851_v44, %v683_v51  ;;  %v1912_v45 = vld [vmem:[%s2689_s3 + $0xf0] sm:$0xff]  }
 0x169   :  { %v774_v53 = vadd.f32 %v773_v49, %v605_v48  ;;  %v1055_v3 = vadd.f32 %v1709_v56, %v852_v58  ;;  %v1717_v49 = vunpack.c.l.bf16 %v1912_v45 }
 0x16b   :  { %v1024_v55 = vadd.f32 %v1646_v50, %v774_v53 }
 0x16c   :  { %v684_v57 = vpop.f32.mrf.mxu2 }
 0x16d   :  { %v1786_v59 = vpack.c.bf16 %v1024_v55, %v1023_v54  ;;  %v685_v60 = vadd.f32 %v2255_v61, %v684_v57  ;;  %v853_v62 = vpop.f32.mrf.mxu3  ;;  %v1718_v55 = vunpack.c.h.bf16 %v1912_v45 }
 0x16e   :  { %v607_v0 = vpop.f32.mrf.mxu0 }
 0x16f   :  { %1925 = vst [vmem:[%s2690_s4 + $0x60] sm:$0xff] %v1786_v59   ;;  %v854_v1 = vadd.f32 %v853_v62, %v685_v60  ;;  %v776_v2 = vpop.f32.mrf.mxu1  ;;  %v608_v6 = vadd.f32 %v2255_v61, %v607_v0  ;;  %v1897_v0 = vld [vmem:[%s2689_s3 + $0x78] sm:$0xff]  }
 0x170   :  { %v1658_v7 = vunpack.c.h.bf16 %v1897_v0 }
 0x171   :  { %v1056_v4 = vadd.f32 %v1710_v63, %v854_v1  ;;  %v777_v11 = vadd.f32 %v776_v2, %v608_v6 }
 0x173   :  { %v1866_v5 = vpack.c.bf16 %v1056_v4, %v1055_v3  ;;  %v1025_v19 = vadd.f32 %v1649_v12, %v777_v11 }
 0x174   :  { %v687_v8 = vpop.f32.mrf.mxu2 }
 0x175   :  { %1941 = vst [vmem:[%s2690_s4 + $0xe0] sm:$0xff] %v1866_v5   ;;  %v856_v9 = vpop.f32.mrf.mxu3  ;;  %v688_v16 = vadd.f32 %v2640_v13, %v687_v8  ;;  %v1657_v5 = vunpack.c.l.bf16 %v1897_v0 }
 0x176   :  { %v609_v10 = vpop.f32.mrf.mxu0 }
 0x177   :  { %v610_v61 = vadd.f32 %v2640_v13, %v609_v10  ;;  %v778_v14 = vpop.f32.mrf.mxu1  ;;  %v857_v23 = vadd.f32 %v856_v9, %v688_v16  ;;  %v1913_v10 = vld [vmem:[%s2689_s3 + $0xf8] sm:$0xff]  }
 0x179   :  { %v779_v18 = vadd.f32 %v778_v14, %v610_v61  ;;  %v1057_v31 = vadd.f32 %v1713_v21, %v857_v23  ;;  %v1721_v14 = vunpack.c.l.bf16 %v1913_v10 }
 0x17b   :  { %v1026_v20 = vadd.f32 %v1650_v15, %v779_v18 }
 0x17c   :  { %v689_v22 = vpop.f32.mrf.mxu2 }
 0x17d   :  { %v1791_v24 = vpack.c.bf16 %v1026_v20, %v1025_v19  ;;  %v690_v25 = vadd.f32 %v2640_v13, %v689_v22  ;;  %v858_v26 = vpop.f32.mrf.mxu3  ;;  %v1722_v19 = vunpack.c.h.bf16 %v1913_v10 }
 0x17e   :  { %v612_v28 = vpop.f32.mrf.mxu0 }
 0x17f   :  { %1926 = vst [vmem:[%s2690_s4 + $0x68] sm:$0xff] %v1791_v24   ;;  %v859_v29 = vadd.f32 %v858_v26, %v690_v25  ;;  %v781_v30 = vpop.f32.mrf.mxu1  ;;  %v613_v34 = vadd.f32 %v2640_v13, %v612_v28 }
 0x181   :  { %v1058_v32 = vadd.f32 %v1714_v27, %v859_v29  ;;  %v782_v39 = vadd.f32 %v781_v30, %v613_v34 }
 0x183   :  { %v1871_v33 = vpack.c.bf16 %v1058_v32, %v1057_v31  ;;  %v1027_v47 = vadd.f32 %v1653_v40, %v782_v39 }
 0x184   :  { %v692_v36 = vpop.f32.mrf.mxu2 }
 0x185   :  { %1942 = vst [vmem:[%s2690_s4 + $0xe8] sm:$0xff] %v1871_v33   ;;  %v861_v37 = vpop.f32.mrf.mxu3  ;;  %v693_v44 = vadd.f32 %v2640_v13, %v692_v36 }
 0x186   :  { %v614_v38 = vpop.f32.mrf.mxu0 }
 0x187   :  { %v615_v41 = vadd.f32 %v2640_v13, %v614_v38  ;;  %v783_v42 = vpop.f32.mrf.mxu1  ;;  %v862_v51 = vadd.f32 %v861_v37, %v693_v44 }
 0x189   :  { %v784_v46 = vadd.f32 %v783_v42, %v615_v41  ;;  %v1059_v59 = vadd.f32 %v1717_v49, %v862_v51 }
 0x18b   :  { %v1028_v48 = vadd.f32 %v1654_v43, %v784_v46 }
 0x18c   :  { %v694_v50 = vpop.f32.mrf.mxu2 }
 0x18d   :  { %v1796_v52 = vpack.c.bf16 %v1028_v48, %v1027_v47  ;;  %v695_v53 = vadd.f32 %v2640_v13, %v694_v50  ;;  %v863_v54 = vpop.f32.mrf.mxu3 }
 0x18e   :  { %v617_v56 = vpop.f32.mrf.mxu0 }
 0x18f   :  { %1927 = vst [vmem:[%s2690_s4 + $0x70] sm:$0xff] %v1796_v52   ;;  %v864_v57 = vadd.f32 %v863_v54, %v695_v53  ;;  %v786_v58 = vpop.f32.mrf.mxu1  ;;  %v618_v63 = vadd.f32 %v2640_v13, %v617_v56 }
 0x191   :  { %v1060_v60 = vadd.f32 %v1718_v55, %v864_v57  ;;  %v787_v4 = vadd.f32 %v786_v58, %v618_v63 }
 0x193   :  { %v1876_v62 = vpack.c.bf16 %v1060_v60, %v1059_v59  ;;  %v1029_v12 = vadd.f32 %v1657_v5, %v787_v4 }
 0x194   :  { %v697_v1 = vpop.f32.mrf.mxu2 }
 0x195   :  { %1943 = vst [vmem:[%s2690_s4 + $0xf0] sm:$0xff] %v1876_v62   ;;  %v866_v2 = vpop.f32.mrf.mxu3  ;;  %v698_v9 = vadd.f32 %v2640_v13, %v697_v1 }
 0x196   :  { %v619_v3 = vpop.f32.mrf.mxu0 }
 0x197   :  { %v620_v6 = vadd.f32 %v2640_v13, %v619_v3  ;;  %v788_v8 = vpop.f32.mrf.mxu1  ;;  %v867_v16 = vadd.f32 %v866_v2, %v698_v9 }
 0x199   :  { %v789_v11 = vadd.f32 %v788_v8, %v620_v6  ;;  %v1061_v22 = vadd.f32 %v1721_v14, %v867_v16 }
 0x19b   :  { %v1030_v61 = vadd.f32 %v1658_v7, %v789_v11 }
 0x19c   :  { %v699_v15 = vpop.f32.mrf.mxu2 }
 0x19d   :  { %v1801_v17 = vpack.c.bf16 %v1030_v61, %v1029_v12  ;;  %v700_v18 = vadd.f32 %v2640_v13, %v699_v15  ;;  %v868_v20 = vpop.f32.mrf.mxu3 }
 0x19f   :  { %1928 = vst [vmem:[%s2690_s4 + $0x78] sm:$0xff] %v1801_v17   ;;  %v869_v21 = vadd.f32 %v868_v20, %v700_v18 }
 0x1a1   :  { %v1062_v23 = vadd.f32 %v1722_v19, %v869_v21 }
 0x1a3   :  { %v1881_v24 = vpack.c.bf16 %v1062_v23, %v1061_v22 }
 0x1a5   :  { %1944 = vst [vmem:[%s2690_s4 + $0xf8] sm:$0xff] %v1881_v24  }

// kernel: generator_forward.20
= control target key start
LH: loop header
LB: loop body
LE: loop exit
PB: predicated region body
PF: predicated region fallthrough
CT: control target
= control target key end

     0   :  { %s2289_s1 = inlined_call_operand.vmem [shape: bf16[256,128], index: 1, kind: input, shape index: {}]   ;;  %s2290_s2 = inlined_call_operand.vmem [shape: f32[1,128], index: 2, kind: input, shape index: {}]   ;;  %s2291_s0 = inlined_call_operand.vmem [shape: bf16[512,256], index: 0, kind: input, shape index: {}]   ;;  %s2292_s3 = inlined_call_operand.vmem [shape: bf16[512,128], index: 3, kind: output, shape index: {}]  }
   0x1   :  { %v1455_v0 = vld [vmem:[%s2289_s1 + $0x38] sm:$0xff]  ;;  %v1454_v2 = vld [vmem:[%s2289_s1 + $0x30] sm:$0xff]  ;;  %v1453_v4 = vld [vmem:[%s2289_s1 + $0x28] sm:$0xff] }
   0x2   :  { %v1463_v1 = vld [vmem:[%s2289_s1 + $0x78] sm:$0xff]  ;;  %530 = vmatpush.bf16.msra.mxu0 %v1455_v0  ;;  %1655 = vmatpush.bf16.msra.mxu2 %v1455_v0  ;;  %v1462_v3 = vld [vmem:[%s2289_s1 + $0x70] sm:$0xff]  ;;  %v1461_v5 = vld [vmem:[%s2289_s1 + $0x68] sm:$0xff] }
   0x3   :  { %699 = vmatpush.bf16.msra.mxu1 %v1463_v1  ;;  %1663 = vmatpush.bf16.msra.mxu3 %v1463_v1  ;;  %v1452_v6 = vld [vmem:[%s2289_s1 + $0x20] sm:$0xff]  ;;  %v1451_v8 = vld [vmem:[%s2289_s1 + $0x18] sm:$0xff]  ;;  %v1450_v10 = vld [vmem:[%s2289_s1 + $0x10] sm:$0xff] }
   0x4   :  { %v1460_v7 = vld [vmem:[%s2289_s1 + $0x60] sm:$0xff]  ;;  %v1459_v9 = vld [vmem:[%s2289_s1 + $0x58] sm:$0xff]  ;;  %v1458_v11 = vld [vmem:[%s2289_s1 + $0x50] sm:$0xff] }
   0x5   :  { %v1449_v12 = vld [vmem:[%s2289_s1 + $0x8] sm:$0xff]  ;;  %v1448_v14 = vld [vmem:[%s2289_s1] sm:$0xff]  ;;  %v1074_v28 = vld [vmem:[%s2291_s0 + $0x10] sm:$0xf] }
   0x6   :  { %531 = vmatpush.bf16.msra.mxu0 %v1454_v2  ;;  %1656 = vmatpush.bf16.msra.mxu2 %v1454_v2  ;;  %v1457_v13 = vld [vmem:[%s2289_s1 + $0x48] sm:$0xff]  ;;  %v1456_v15 = vld [vmem:[%s2289_s1 + $0x40] sm:$0xff]  ;;  %v1387_v29 = vld [vmem:[%s2291_s0 + $0x14] sm:$0xf0] }
   0x7   :  { %700 = vmatpush.bf16.msra.mxu1 %v1462_v3  ;;  %1664 = vmatpush.bf16.msra.mxu3 %v1462_v3  ;;  %v1066_v16 = vld [vmem:[%s2291_s0] sm:$0xf]  ;;  %v1385_v17 = vld [vmem:[%s2291_s0 + $0x4] sm:$0xf0]  ;;  %v1384_v20 = vld [vmem:[%s2291_s0 + $0x4] sm:$0xf]  ;;  %v1075_v36 = vor.u32 %v1387_v29, %v1074_v28 }
   0x8   :  { %v1194_v18 = vld [vmem:[%s2291_s0 + $0x100] sm:$0xf]  ;;  %v1417_v19 = vld [vmem:[%s2291_s0 + $0x104] sm:$0xf0]  ;;  %v1068_v21 = vld [vmem:[%s2291_s0 + $0x8] sm:$0xf0]  ;;  %v1067_v24 = vor.u32 %v1385_v17, %v1066_v16 }
   0x9   :  { %v1416_v22 = vld [vmem:[%s2291_s0 + $0x104] sm:$0xf]  ;;  %v1196_v23 = vld [vmem:[%s2291_s0 + $0x108] sm:$0xf0]  ;;  %v1195_v25 = vor.u32 %v1417_v19, %v1194_v18  ;;  %v1071_v26 = vor.u32 %v1384_v20, %v1068_v21  ;;  %v1202_v30 = vld [vmem:[%s2291_s0 + $0x110] sm:$0xf] }
   0xa   :  { %532 = vmatpush.bf16.msra.mxu0 %v1453_v4  ;;  %1657 = vmatpush.bf16.msra.mxu2 %v1453_v4  ;;  %v1199_v27 = vor.u32 %v1416_v22, %v1196_v23  ;;  %v1419_v31 = vld [vmem:[%s2291_s0 + $0x114] sm:$0xf0]  ;;  %v1386_v32 = vld [vmem:[%s2291_s0 + $0x14] sm:$0xf]  ;;  %v1076_v33 = vld [vmem:[%s2291_s0 + $0x18] sm:$0xf0] }
   0xb   :  { %701 = vmatpush.bf16.msra.mxu1 %v1461_v5  ;;  %1665 = vmatpush.bf16.msra.mxu3 %v1461_v5  ;;  %v1418_v34 = vld [vmem:[%s2291_s0 + $0x114] sm:$0xf]  ;;  %v1204_v35 = vld [vmem:[%s2291_s0 + $0x118] sm:$0xf0]  ;;  %v1203_v37 = vor.u32 %v1419_v31, %v1202_v30  ;;  %v1079_v38 = vor.u32 %v1386_v32, %v1076_v33  ;;  %v1082_v40 = vld [vmem:[%s2291_s0 + $0x20] sm:$0xf] }
   0xc   :  { %v1207_v39 = vor.u32 %v1418_v34, %v1204_v35  ;;  %v1389_v41 = vld [vmem:[%s2291_s0 + $0x24] sm:$0xf0]  ;;  %v1210_v42 = vld [vmem:[%s2291_s0 + $0x120] sm:$0xf]  ;;  %v1388_v44 = vld [vmem:[%s2291_s0 + $0x24] sm:$0xf] }
   0xd   :  { %v1421_v43 = vld [vmem:[%s2291_s0 + $0x124] sm:$0xf0]  ;;  %v1084_v45 = vld [vmem:[%s2291_s0 + $0x28] sm:$0xf0]  ;;  %v1420_v46 = vld [vmem:[%s2291_s0 + $0x124] sm:$0xf]  ;;  %v1083_v48 = vor.u32 %v1389_v41, %v1082_v40 }
   0xe   :  { %533 = vmatpush.bf16.msra.mxu0 %v1452_v6  ;;  %1658 = vmatpush.bf16.msra.mxu2 %v1452_v6  ;;  %v1212_v47 = vld [vmem:[%s2291_s0 + $0x128] sm:$0xf0]  ;;  %v1211_v49 = vor.u32 %v1421_v43, %v1210_v42  ;;  %v1087_v50 = vor.u32 %v1388_v44, %v1084_v45  ;;  %v1090_v52 = vld [vmem:[%s2291_s0 + $0x30] sm:$0xf]  ;;  %v1391_v53 = vld [vmem:[%s2291_s0 + $0x34] sm:$0xf0] }
   0xf   :  { %702 = vmatpush.bf16.msra.mxu1 %v1460_v7  ;;  %1666 = vmatpush.bf16.msra.mxu3 %v1460_v7  ;;  %v1215_v51 = vor.u32 %v1420_v46, %v1212_v47  ;;  %v1218_v54 = vld [vmem:[%s2291_s0 + $0x130] sm:$0xf]  ;;  %v1423_v55 = vld [vmem:[%s2291_s0 + $0x134] sm:$0xf0]  ;;  %v1390_v56 = vld [vmem:[%s2291_s0 + $0x34] sm:$0xf]  ;;  %v1091_v60 = vor.u32 %v1391_v53, %v1090_v52 }
  0x10   :  { %v1092_v57 = vld [vmem:[%s2291_s0 + $0x38] sm:$0xf0]  ;;  %v1422_v58 = vld [vmem:[%s2291_s0 + $0x134] sm:$0xf]  ;;  %v1219_v61 = vor.u32 %v1423_v55, %v1218_v54  ;;  %v1098_v0 = vld [vmem:[%s2291_s0 + $0x40] sm:$0xf] }
  0x11   :  { %v1220_v59 = vld [vmem:[%s2291_s0 + $0x138] sm:$0xf0]  ;;  %v1095_v62 = vor.u32 %v1390_v56, %v1092_v57  ;;  %v1393_v1 = vld [vmem:[%s2291_s0 + $0x44] sm:$0xf0]  ;;  %v1226_v2 = vld [vmem:[%s2291_s0 + $0x140] sm:$0xf] }
  0x12   :  { %534 = vmatpush.bf16.msra.mxu0 %v1451_v8  ;;  %1659 = vmatpush.bf16.msra.mxu2 %v1451_v8  ;;  %v1223_v63 = vor.u32 %v1422_v58, %v1220_v59  ;;  %v1425_v3 = vld [vmem:[%s2291_s0 + $0x144] sm:$0xf0]  ;;  %v1392_v4 = vld [vmem:[%s2291_s0 + $0x44] sm:$0xf]  ;;  %v1100_v5 = vld [vmem:[%s2291_s0 + $0x48] sm:$0xf0]  ;;  %v1099_v8 = vor.u32 %v1393_v1, %v1098_v0 }
  0x13   :  { %703 = vmatpush.bf16.msra.mxu1 %v1459_v9  ;;  %1667 = vmatpush.bf16.msra.mxu3 %v1459_v9  ;;  %v1424_v6 = vld [vmem:[%s2291_s0 + $0x144] sm:$0xf]  ;;  %v1228_v7 = vld [vmem:[%s2291_s0 + $0x148] sm:$0xf0]  ;;  %v1227_v9 = vor.u32 %v1425_v3, %v1226_v2  ;;  %v1394_v16 = vld [vmem:[%s2291_s0 + $0x54] sm:$0xf] }
  0x14   :  { %v1108_v17 = vld [vmem:[%s2291_s0 + $0x58] sm:$0xf0]  ;;  %v1426_v18 = vld [vmem:[%s2291_s0 + $0x154] sm:$0xf]  ;;  %v1396_v28 = vld [vmem:[%s2291_s0 + $0x64] sm:$0xf] }
  0x15   :  { %v1236_v19 = vld [vmem:[%s2291_s0 + $0x158] sm:$0xf0]  ;;  %v1111_v22 = vor.u32 %v1394_v16, %v1108_v17  ;;  %v1116_v29 = vld [vmem:[%s2291_s0 + $0x68] sm:$0xf0]  ;;  %v1428_v30 = vld [vmem:[%s2291_s0 + $0x164] sm:$0xf] }
  0x16   :  { %535 = vmatpush.bf16.msra.mxu0 %v1450_v10  ;;  %1660 = vmatpush.bf16.msra.mxu2 %v1450_v10  ;;  %v1103_v10 = vor.u32 %v1392_v4, %v1100_v5  ;;  %v1239_v23 = vor.u32 %v1426_v18, %v1236_v19  ;;  %v1244_v31 = vld [vmem:[%s2291_s0 + $0x168] sm:$0xf0]  ;;  %v1119_v34 = vor.u32 %v1396_v28, %v1116_v29  ;;  %v1398_v40 = vld [vmem:[%s2291_s0 + $0x74] sm:$0xf]  ;;  %v1124_v41 = vld [vmem:[%s2291_s0 + $0x78] sm:$0xf0] }
  0x17   :  { %704 = vmatpush.bf16.msra.mxu1 %v1458_v11  ;;  %1668 = vmatpush.bf16.msra.mxu3 %v1458_v11  ;;  %v1231_v11 = vor.u32 %v1424_v6, %v1228_v7  ;;  %v1247_v35 = vor.u32 %v1428_v30, %v1244_v31  ;;  %v1430_v42 = vld [vmem:[%s2291_s0 + $0x174] sm:$0xf]  ;;  %v1252_v43 = vld [vmem:[%s2291_s0 + $0x178] sm:$0xf0]  ;;  %v1127_v46 = vor.u32 %v1398_v40, %v1124_v41  ;;  %v1400_v52 = vld [vmem:[%s2291_s0 + $0x84] sm:$0xf] }
  0x18   :  { %v1255_v47 = vor.u32 %v1430_v42, %v1252_v43  ;;  %v1132_v53 = vld [vmem:[%s2291_s0 + $0x88] sm:$0xf0]  ;;  %v1432_v54 = vld [vmem:[%s2291_s0 + $0x184] sm:$0xf]  ;;  %v1434_v16 = vld [vmem:[%s2291_s0 + $0x194] sm:$0xf] }
  0x19   :  { %v1260_v55 = vld [vmem:[%s2291_s0 + $0x188] sm:$0xf0]  ;;  %v1135_v59 = vor.u32 %v1400_v52, %v1132_v53  ;;  %v1268_v17 = vld [vmem:[%s2291_s0 + $0x198] sm:$0xf0]  ;;  %v1146_v42 = vld [vmem:[%s2291_s0 + $0xa0] sm:$0xf] }
  0x1a   :  { %536 = vmatpush.bf16.msra.mxu0 %v1449_v12  ;;  %1661 = vmatpush.bf16.msra.mxu2 %v1449_v12  ;;  %v1106_v12 = vld [vmem:[%s2291_s0 + $0x50] sm:$0xf]  ;;  %v1405_v43 = vld [vmem:[%s2291_s0 + $0xa4] sm:$0xf0] }
  0x1b   :  { %705 = vmatpush.bf16.msra.mxu1 %v1457_v13  ;;  %1669 = vmatpush.bf16.msra.mxu3 %v1457_v13  ;;  %v1395_v13 = vld [vmem:[%s2291_s0 + $0x54] sm:$0xf0]  ;;  %v1147_v53 = vor.u32 %v1405_v43, %v1146_v42 }
  0x1c   :  { %v1107_v20 = vor.u32 %v1395_v13, %v1106_v12  ;;  %v1402_v12 = vld [vmem:[%s2291_s0 + $0x94] sm:$0xf]  ;;  %v1140_v13 = vld [vmem:[%s2291_s0 + $0x98] sm:$0xf0] }
  0x1e   :  { %537 = vmatpush.bf16.msra.mxu0 %v1448_v14  ;;  %1662 = vmatpush.bf16.msra.mxu2 %v1448_v14  ;;  %v1234_v14 = vld [vmem:[%s2291_s0 + $0x150] sm:$0xf] }
  0x1f   :  { %706 = vmatpush.bf16.msra.mxu1 %v1456_v15  ;;  %1670 = vmatpush.bf16.msra.mxu3 %v1456_v15  ;;  %v1427_v15 = vld [vmem:[%s2291_s0 + $0x154] sm:$0xf0] }
  0x20   :  { %v1235_v21 = vor.u32 %v1427_v15, %v1234_v14 }
  0x21   :  { %538 = vmatmul.bf16.vlgmr.msra.gmra.mxu0 %v1067_v24  ;;  %618 = vmatmul.bf16.vlgmr.msra.gmra.mxu2 %v1195_v25  ;;  %v1114_v24 = vld [vmem:[%s2291_s0 + $0x60] sm:$0xf]  ;;  %v1397_v25 = vld [vmem:[%s2291_s0 + $0x64] sm:$0xf0] }
  0x22   :  { %707 = vmatmul.bf16.vlgmr.msra.gmra.mxu1 %v1071_v26  ;;  %787 = vmatmul.bf16.vlgmr.msra.gmra.mxu3 %v1199_v27  ;;  %v1242_v26 = vld [vmem:[%s2291_s0 + $0x160] sm:$0xf]  ;;  %v1429_v27 = vld [vmem:[%s2291_s0 + $0x164] sm:$0xf0]  ;;  %v1115_v32 = vor.u32 %v1397_v25, %v1114_v24 }
  0x23   :  { %v1243_v33 = vor.u32 %v1429_v27, %v1242_v26  ;;  %v1143_v26 = vor.u32 %v1402_v12, %v1140_v13  ;;  %v1271_v27 = vor.u32 %v1434_v16, %v1268_v17  ;;  %v1154_v13 = vld [vmem:[%s2291_s0 + $0xb0] sm:$0xf]  ;;  %v1439_v16 = vld [vmem:[%s2291_s0 + $0x1b4] sm:$0xf0]  ;;  %v1406_v17 = vld [vmem:[%s2291_s0 + $0xb4] sm:$0xf] }
  0x31   :  { %543 = vmatmul.bf16.gmra.mxu0 %v1075_v36  ;;  %623 = vmatmul.bf16.gmra.mxu2 %v1203_v37  ;;  %v1122_v36 = vld [vmem:[%s2291_s0 + $0x70] sm:$0xf]  ;;  %v1399_v37 = vld [vmem:[%s2291_s0 + $0x74] sm:$0xf0] }
  0x32   :  { %712 = vmatmul.bf16.gmra.mxu1 %v1079_v38  ;;  %792 = vmatmul.bf16.gmra.mxu3 %v1207_v39  ;;  %v1250_v38 = vld [vmem:[%s2291_s0 + $0x170] sm:$0xf]  ;;  %v1431_v39 = vld [vmem:[%s2291_s0 + $0x174] sm:$0xf0]  ;;  %v1123_v44 = vor.u32 %v1399_v37, %v1122_v36 }
  0x33   :  { %v1251_v45 = vor.u32 %v1431_v39, %v1250_v38 }
  0x41   :  { %548 = vmatmul.bf16.gmra.mxu0 %v1083_v48  ;;  %628 = vmatmul.bf16.gmra.mxu2 %v1211_v49  ;;  %v1130_v48 = vld [vmem:[%s2291_s0 + $0x80] sm:$0xf]  ;;  %v1401_v49 = vld [vmem:[%s2291_s0 + $0x84] sm:$0xf0] }
  0x42   :  { %717 = vmatmul.bf16.gmra.mxu1 %v1087_v50  ;;  %797 = vmatmul.bf16.gmra.mxu3 %v1215_v51  ;;  %v1258_v50 = vld [vmem:[%s2291_s0 + $0x180] sm:$0xf]  ;;  %v1433_v51 = vld [vmem:[%s2291_s0 + $0x184] sm:$0xf0]  ;;  %v1131_v56 = vor.u32 %v1401_v49, %v1130_v48 }
  0x43   :  { %v1259_v57 = vor.u32 %v1433_v51, %v1258_v50  ;;  %v1436_v50 = vld [vmem:[%s2291_s0 + $0x1a4] sm:$0xf]  ;;  %v1276_v51 = vld [vmem:[%s2291_s0 + $0x1a8] sm:$0xf0] }
  0x51   :  { %553 = vmatmul.bf16.gmra.mxu0 %v1091_v60  ;;  %633 = vmatmul.bf16.gmra.mxu2 %v1219_v61  ;;  %v1263_v60 = vor.u32 %v1432_v54, %v1260_v55  ;;  %v1959_v61 = vld [vmem:[%s2290_s2] ss:$0 sm:$0xff] }
  0x52   :  { %722 = vmatmul.bf16.gmra.mxu1 %v1095_v62  ;;  %802 = vmatmul.bf16.gmra.mxu3 %v1223_v63 }
  0x61   :  { %558 = vmatmul.bf16.gmra.mxu0 %v1099_v8  ;;  %638 = vmatmul.bf16.gmra.mxu2 %v1227_v9  ;;  %v1138_v8 = vld [vmem:[%s2291_s0 + $0x90] sm:$0xf]  ;;  %v1403_v9 = vld [vmem:[%s2291_s0 + $0x94] sm:$0xf0] }
  0x62   :  { %727 = vmatmul.bf16.gmra.mxu1 %v1103_v10  ;;  %807 = vmatmul.bf16.gmra.mxu3 %v1231_v11  ;;  %v1266_v10 = vld [vmem:[%s2291_s0 + $0x190] sm:$0xf]  ;;  %v1435_v11 = vld [vmem:[%s2291_s0 + $0x194] sm:$0xf0]  ;;  %v1139_v19 = vor.u32 %v1403_v9, %v1138_v8 }
  0x63   :  { %v1267_v24 = vor.u32 %v1435_v11, %v1266_v10 }
  0x71   :  { %563 = vmatmul.bf16.gmra.mxu0 %v1107_v20  ;;  %643 = vmatmul.bf16.gmra.mxu2 %v1235_v21 }
  0x72   :  { %732 = vmatmul.bf16.gmra.mxu1 %v1111_v22  ;;  %812 = vmatmul.bf16.gmra.mxu3 %v1239_v23 }
  0x81   :  { %568 = vmatmul.bf16.gmra.mxu0 %v1115_v32  ;;  %648 = vmatmul.bf16.gmra.mxu2 %v1243_v33 }
  0x82   :  { %737 = vmatmul.bf16.gmra.mxu1 %v1119_v34  ;;  %817 = vmatmul.bf16.gmra.mxu3 %v1247_v35 }
  0x91   :  { %573 = vmatmul.bf16.gmra.mxu0 %v1123_v44  ;;  %653 = vmatmul.bf16.gmra.mxu2 %v1251_v45  ;;  %v1274_v44 = vld [vmem:[%s2291_s0 + $0x1a0] sm:$0xf]  ;;  %v1437_v45 = vld [vmem:[%s2291_s0 + $0x1a4] sm:$0xf0] }
  0x92   :  { %742 = vmatmul.bf16.gmra.mxu1 %v1127_v46  ;;  %822 = vmatmul.bf16.gmra.mxu3 %v1255_v47  ;;  %v1404_v46 = vld [vmem:[%s2291_s0 + $0xa4] sm:$0xf]  ;;  %v1148_v47 = vld [vmem:[%s2291_s0 + $0xa8] sm:$0xf0] }
  0x9e   :  { %v539_v58 = vpop.f32.mrf.mxu0 }
  0x9f   :  { %v708_v62 = vpop.f32.mrf.mxu1  ;;  %v540_v63 = vadd.f32 %v1959_v61, %v539_v58  ;;  %v1275_v58 = vor.u32 %v1437_v45, %v1274_v44 }
  0xa1   :  { %578 = vmatmul.bf16.gmra.mxu0 %v1131_v56  ;;  %658 = vmatmul.bf16.gmra.mxu2 %v1259_v57  ;;  %v709_v3 = vadd.f32 %v708_v62, %v540_v63  ;;  %v1279_v62 = vor.u32 %v1436_v50, %v1276_v51  ;;  %v1441_v50 = vld [vmem:[%s2291_s0 + $0x1c4] sm:$0xf0]  ;;  %v1408_v51 = vld [vmem:[%s2291_s0 + $0xc4] sm:$0xf] }
  0xa2   :  { %747 = vmatmul.bf16.gmra.mxu1 %v1135_v59  ;;  %827 = vmatmul.bf16.gmra.mxu3 %v1263_v60  ;;  %v1151_v60 = vor.u32 %v1404_v46, %v1148_v47  ;;  %v1162_v47 = vld [vmem:[%s2291_s0 + $0xc0] sm:$0xf] }
  0xa3   :  { %v868_v14 = vmax.f32 %v709_v3, 0.0 }
  0xa4   :  { %v619_v0 = vpop.f32.mrf.mxu2 }
  0xa5   :  { %v788_v1 = vpop.f32.mrf.mxu3  ;;  %v620_v6 = vadd.f32 %v1959_v61, %v619_v0 }
  0xa6   :  { %v541_v2 = vpop.f32.mrf.mxu0 }
  0xa7   :  { %v542_v4 = vadd.f32 %v1959_v61, %v541_v2  ;;  %v710_v5 = vpop.f32.mrf.mxu1  ;;  %v789_v20 = vadd.f32 %v788_v1, %v620_v6 }
  0xa9   :  { %v711_v7 = vadd.f32 %v710_v5, %v542_v4  ;;  %v900_v30 = vmax.f32 %v789_v20, 0.0 }
  0xab   :  { %v869_v15 = vmax.f32 %v711_v7, 0.0 }
  0xac   :  { %v621_v18 = vpop.f32.mrf.mxu2 }
  0xad   :  { %v1467_v21 = vpack.c.bf16 %v869_v15, %v868_v14  ;;  %v622_v22 = vadd.f32 %v1959_v61, %v621_v18  ;;  %v790_v23 = vpop.f32.mrf.mxu3  ;;  %v1407_v14 = vld [vmem:[%s2291_s0 + $0xb4] sm:$0xf0]  ;;  %v1282_v15 = vld [vmem:[%s2291_s0 + $0x1b0] sm:$0xf]  ;;  %v1156_v18 = vld [vmem:[%s2291_s0 + $0xb8] sm:$0xf0] }
  0xae   :  { %v544_v25 = vpop.f32.mrf.mxu0 }
  0xaf   :  { %1468 = vst [vmem:[%s2292_s3] sm:$0xff] %v1467_v21   ;;  %v791_v28 = vadd.f32 %v790_v23, %v622_v22  ;;  %v713_v29 = vpop.f32.mrf.mxu1  ;;  %v545_v33 = vadd.f32 %v1959_v61, %v544_v25  ;;  %v1438_v21 = vld [vmem:[%s2291_s0 + $0x1b4] sm:$0xf]  ;;  %v1284_v22 = vld [vmem:[%s2291_s0 + $0x1b8] sm:$0xf0] }
  0xb1   :  { %v901_v31 = vmax.f32 %v791_v28, 0.0  ;;  %583 = vmatmul.bf16.gmra.mxu0 %v1139_v19  ;;  %663 = vmatmul.bf16.gmra.mxu2 %v1267_v24  ;;  %v714_v37 = vadd.f32 %v713_v29, %v545_v33  ;;  %v1155_v24 = vor.u32 %v1407_v14, %v1154_v13  ;;  %v1283_v29 = vor.u32 %v1439_v16, %v1282_v15 }
  0xb2   :  { %752 = vmatmul.bf16.gmra.mxu1 %v1143_v26  ;;  %832 = vmatmul.bf16.gmra.mxu3 %v1271_v27 }
  0xb3   :  { %v1547_v32 = vpack.c.bf16 %v901_v31, %v900_v30  ;;  %v870_v48 = vmax.f32 %v714_v37, 0.0  ;;  %v1159_v31 = vor.u32 %v1406_v17, %v1156_v18  ;;  %v1170_v18 = vld [vmem:[%s2291_s0 + $0xd0] sm:$0xf] }
  0xb4   :  { %v624_v34 = vpop.f32.mrf.mxu2 }
  0xb5   :  { %1639 = vst [vmem:[%s2292_s3 + $0x80] sm:$0xff] %v1547_v32   ;;  %v793_v35 = vpop.f32.mrf.mxu3  ;;  %v625_v40 = vadd.f32 %v1959_v61, %v624_v34  ;;  %v1287_v32 = vor.u32 %v1438_v21, %v1284_v22  ;;  %v1443_v21 = vld [vmem:[%s2291_s0 + $0x1d4] sm:$0xf0]  ;;  %v1410_v22 = vld [vmem:[%s2291_s0 + $0xd4] sm:$0xf] }
  0xb6   :  { %v546_v36 = vpop.f32.mrf.mxu0 }
  0xb7   :  { %v547_v38 = vadd.f32 %v1959_v61, %v546_v36  ;;  %v715_v39 = vpop.f32.mrf.mxu1  ;;  %v794_v54 = vadd.f32 %v793_v35, %v625_v40 }
  0xb9   :  { %v716_v41 = vadd.f32 %v715_v39, %v547_v38  ;;  %v902_v1 = vmax.f32 %v794_v54, 0.0 }
  0xbb   :  { %v871_v49 = vmax.f32 %v716_v41, 0.0 }
  0xbc   :  { %v626_v52 = vpop.f32.mrf.mxu2 }
  0xbd   :  { %v1472_v55 = vpack.c.bf16 %v871_v49, %v870_v48  ;;  %v627_v56 = vadd.f32 %v1959_v61, %v626_v52  ;;  %v795_v57 = vpop.f32.mrf.mxu3  ;;  %v1409_v48 = vld [vmem:[%s2291_s0 + $0xc4] sm:$0xf0]  ;;  %v1290_v49 = vld [vmem:[%s2291_s0 + $0x1c0] sm:$0xf]  ;;  %v1164_v52 = vld [vmem:[%s2291_s0 + $0xc8] sm:$0xf0] }
  0xbe   :  { %v549_v59 = vpop.f32.mrf.mxu0 }
  0xbf   :  { %1624 = vst [vmem:[%s2292_s3 + $0x8] sm:$0xff] %v1472_v55   ;;  %v796_v63 = vadd.f32 %v795_v57, %v627_v56  ;;  %v718_v0 = vpop.f32.mrf.mxu1  ;;  %v550_v4 = vadd.f32 %v1959_v61, %v549_v59  ;;  %v1440_v55 = vld [vmem:[%s2291_s0 + $0x1c4] sm:$0xf]  ;;  %v1292_v56 = vld [vmem:[%s2291_s0 + $0x1c8] sm:$0xf0] }
  0xc1   :  { %v903_v2 = vmax.f32 %v796_v63, 0.0  ;;  %588 = vmatmul.bf16.gmra.mxu0 %v1147_v53  ;;  %668 = vmatmul.bf16.gmra.mxu2 %v1275_v58  ;;  %v719_v8 = vadd.f32 %v718_v0, %v550_v4  ;;  %v1163_v58 = vor.u32 %v1409_v48, %v1162_v47  ;;  %v1291_v0 = vor.u32 %v1441_v50, %v1290_v49 }
  0xc2   :  { %757 = vmatmul.bf16.gmra.mxu1 %v1151_v60  ;;  %837 = vmatmul.bf16.gmra.mxu3 %v1279_v62 }
  0xc3   :  { %v1552_v3 = vpack.c.bf16 %v903_v2, %v902_v1  ;;  %v872_v19 = vmax.f32 %v719_v8, 0.0  ;;  %v1167_v2 = vor.u32 %v1408_v51, %v1164_v52  ;;  %v1178_v52 = vld [vmem:[%s2291_s0 + $0xe0] sm:$0xf] }
  0xc4   :  { %v629_v5 = vpop.f32.mrf.mxu2 }
  0xc5   :  { %1640 = vst [vmem:[%s2292_s3 + $0x88] sm:$0xff] %v1552_v3   ;;  %v798_v6 = vpop.f32.mrf.mxu3  ;;  %v630_v11 = vadd.f32 %v1959_v61, %v629_v5  ;;  %v1295_v3 = vor.u32 %v1440_v55, %v1292_v56  ;;  %v1445_v55 = vld [vmem:[%s2291_s0 + $0x1e4] sm:$0xf0]  ;;  %v1412_v56 = vld [vmem:[%s2291_s0 + $0xe4] sm:$0xf] }
  0xc6   :  { %v551_v7 = vpop.f32.mrf.mxu0 }
  0xc7   :  { %v552_v9 = vadd.f32 %v1959_v61, %v551_v7  ;;  %v720_v10 = vpop.f32.mrf.mxu1  ;;  %v799_v25 = vadd.f32 %v798_v6, %v630_v11 }
  0xc9   :  { %v721_v12 = vadd.f32 %v720_v10, %v552_v9  ;;  %v904_v35 = vmax.f32 %v799_v25, 0.0 }
  0xcb   :  { %v873_v20 = vmax.f32 %v721_v12, 0.0 }
  0xcc   :  { %v631_v23 = vpop.f32.mrf.mxu2 }
  0xcd   :  { %v1477_v26 = vpack.c.bf16 %v873_v20, %v872_v19  ;;  %v632_v27 = vadd.f32 %v1959_v61, %v631_v23  ;;  %v800_v28 = vpop.f32.mrf.mxu3  ;;  %v1411_v19 = vld [vmem:[%s2291_s0 + $0xd4] sm:$0xf0]  ;;  %v1298_v20 = vld [vmem:[%s2291_s0 + $0x1d0] sm:$0xf]  ;;  %v1172_v23 = vld [vmem:[%s2291_s0 + $0xd8] sm:$0xf0] }
  0xce   :  { %v554_v30 = vpop.f32.mrf.mxu0 }
  0xcf   :  { %1625 = vst [vmem:[%s2292_s3 + $0x10] sm:$0xff] %v1477_v26   ;;  %v801_v33 = vadd.f32 %v800_v28, %v632_v27  ;;  %v723_v34 = vpop.f32.mrf.mxu1  ;;  %v555_v38 = vadd.f32 %v1959_v61, %v554_v30  ;;  %v1442_v26 = vld [vmem:[%s2291_s0 + $0x1d4] sm:$0xf]  ;;  %v1300_v27 = vld [vmem:[%s2291_s0 + $0x1d8] sm:$0xf0] }
  0xd1   :  { %v905_v36 = vmax.f32 %v801_v33, 0.0  ;;  %593 = vmatmul.bf16.gmra.mxu0 %v1155_v24  ;;  %673 = vmatmul.bf16.gmra.mxu2 %v1283_v29  ;;  %v724_v42 = vadd.f32 %v723_v34, %v555_v38  ;;  %v1171_v29 = vor.u32 %v1411_v19, %v1170_v18  ;;  %v1299_v34 = vor.u32 %v1443_v21, %v1298_v20 }
  0xd2   :  { %762 = vmatmul.bf16.gmra.mxu1 %v1159_v31  ;;  %842 = vmatmul.bf16.gmra.mxu3 %v1287_v32 }
  0xd3   :  { %v1557_v37 = vpack.c.bf16 %v905_v36, %v904_v35  ;;  %v874_v53 = vmax.f32 %v724_v42, 0.0  ;;  %v1175_v36 = vor.u32 %v1410_v22, %v1172_v23  ;;  %v1186_v23 = vld [vmem:[%s2291_s0 + $0xf0] sm:$0xf] }
  0xd4   :  { %v634_v39 = vpop.f32.mrf.mxu2 }
  0xd5   :  { %1641 = vst [vmem:[%s2292_s3 + $0x90] sm:$0xff] %v1557_v37   ;;  %v803_v40 = vpop.f32.mrf.mxu3  ;;  %v635_v45 = vadd.f32 %v1959_v61, %v634_v39  ;;  %v1303_v37 = vor.u32 %v1442_v26, %v1300_v27  ;;  %v1447_v26 = vld [vmem:[%s2291_s0 + $0x1f4] sm:$0xf0]  ;;  %v1414_v27 = vld [vmem:[%s2291_s0 + $0xf4] sm:$0xf] }
  0xd6   :  { %v556_v41 = vpop.f32.mrf.mxu0 }
  0xd7   :  { %v557_v43 = vadd.f32 %v1959_v61, %v556_v41  ;;  %v725_v44 = vpop.f32.mrf.mxu1  ;;  %v804_v59 = vadd.f32 %v803_v40, %v635_v45 }
  0xd9   :  { %v726_v46 = vadd.f32 %v725_v44, %v557_v43  ;;  %v906_v6 = vmax.f32 %v804_v59, 0.0 }
  0xdb   :  { %v875_v54 = vmax.f32 %v726_v46, 0.0 }
  0xdc   :  { %v636_v57 = vpop.f32.mrf.mxu2 }
  0xdd   :  { %v1482_v60 = vpack.c.bf16 %v875_v54, %v874_v53  ;;  %v637_v62 = vadd.f32 %v1959_v61, %v636_v57  ;;  %v805_v63 = vpop.f32.mrf.mxu3  ;;  %v1413_v53 = vld [vmem:[%s2291_s0 + $0xe4] sm:$0xf0]  ;;  %v1306_v54 = vld [vmem:[%s2291_s0 + $0x1e0] sm:$0xf]  ;;  %v1180_v57 = vld [vmem:[%s2291_s0 + $0xe8] sm:$0xf0] }
  0xde   :  { %v559_v1 = vpop.f32.mrf.mxu0 }
  0xdf   :  { %1626 = vst [vmem:[%s2292_s3 + $0x18] sm:$0xff] %v1482_v60   ;;  %v806_v4 = vadd.f32 %v805_v63, %v637_v62  ;;  %v728_v5 = vpop.f32.mrf.mxu1  ;;  %v560_v9 = vadd.f32 %v1959_v61, %v559_v1  ;;  %v1444_v60 = vld [vmem:[%s2291_s0 + $0x1e4] sm:$0xf]  ;;  %v1308_v62 = vld [vmem:[%s2291_s0 + $0x1e8] sm:$0xf0] }
  0xe1   :  { %v907_v7 = vmax.f32 %v806_v4, 0.0  ;;  %598 = vmatmul.bf16.gmra.mxu0 %v1163_v58  ;;  %678 = vmatmul.bf16.gmra.mxu2 %v1291_v0  ;;  %v729_v13 = vadd.f32 %v728_v5, %v560_v9  ;;  %v1179_v0 = vor.u32 %v1413_v53, %v1178_v52  ;;  %v1307_v5 = vor.u32 %v1445_v55, %v1306_v54 }
  0xe2   :  { %767 = vmatmul.bf16.gmra.mxu1 %v1167_v2  ;;  %847 = vmatmul.bf16.gmra.mxu3 %v1295_v3 }
  0xe3   :  { %v1562_v8 = vpack.c.bf16 %v907_v7, %v906_v6  ;;  %v876_v24 = vmax.f32 %v729_v13, 0.0  ;;  %v1183_v7 = vor.u32 %v1412_v56, %v1180_v57 }
  0xe4   :  { %v639_v10 = vpop.f32.mrf.mxu2 }
  0xe5   :  { %1642 = vst [vmem:[%s2292_s3 + $0x98] sm:$0xff] %v1562_v8   ;;  %v808_v11 = vpop.f32.mrf.mxu3  ;;  %v640_v16 = vadd.f32 %v1959_v61, %v639_v10  ;;  %v1311_v8 = vor.u32 %v1444_v60, %v1308_v62 }
  0xe6   :  { %v561_v12 = vpop.f32.mrf.mxu0 }
  0xe7   :  { %v562_v14 = vadd.f32 %v1959_v61, %v561_v12  ;;  %v730_v15 = vpop.f32.mrf.mxu1  ;;  %v809_v30 = vadd.f32 %v808_v11, %v640_v16 }
  0xe9   :  { %v731_v17 = vadd.f32 %v730_v15, %v562_v14  ;;  %v908_v40 = vmax.f32 %v809_v30, 0.0 }
  0xeb   :  { %v877_v25 = vmax.f32 %v731_v17, 0.0 }
  0xec   :  { %v641_v28 = vpop.f32.mrf.mxu2 }
  0xed   :  { %v1487_v31 = vpack.c.bf16 %v877_v25, %v876_v24  ;;  %v642_v32 = vadd.f32 %v1959_v61, %v641_v28  ;;  %v810_v33 = vpop.f32.mrf.mxu3  ;;  %v1415_v24 = vld [vmem:[%s2291_s0 + $0xf4] sm:$0xf0]  ;;  %v1314_v25 = vld [vmem:[%s2291_s0 + $0x1f0] sm:$0xf]  ;;  %v1188_v28 = vld [vmem:[%s2291_s0 + $0xf8] sm:$0xf0] }
  0xee   :  { %v564_v35 = vpop.f32.mrf.mxu0 }
  0xef   :  { %1627 = vst [vmem:[%s2292_s3 + $0x20] sm:$0xff] %v1487_v31   ;;  %v811_v38 = vadd.f32 %v810_v33, %v642_v32  ;;  %v733_v39 = vpop.f32.mrf.mxu1  ;;  %v565_v43 = vadd.f32 %v1959_v61, %v564_v35  ;;  %v1446_v31 = vld [vmem:[%s2291_s0 + $0x1f4] sm:$0xf]  ;;  %v1316_v32 = vld [vmem:[%s2291_s0 + $0x1f8] sm:$0xf0] }
  0xf1   :  { %v909_v41 = vmax.f32 %v811_v38, 0.0  ;;  %603 = vmatmul.bf16.gmra.mxu0 %v1171_v29  ;;  %683 = vmatmul.bf16.gmra.mxu2 %v1299_v34  ;;  %v734_v47 = vadd.f32 %v733_v39, %v565_v43  ;;  %v1187_v34 = vor.u32 %v1415_v24, %v1186_v23  ;;  %v1315_v39 = vor.u32 %v1447_v26, %v1314_v25 }
  0xf2   :  { %772 = vmatmul.bf16.gmra.mxu1 %v1175_v36  ;;  %852 = vmatmul.bf16.gmra.mxu3 %v1303_v37 }
  0xf3   :  { %v1567_v42 = vpack.c.bf16 %v909_v41, %v908_v40  ;;  %v878_v58 = vmax.f32 %v734_v47, 0.0  ;;  %v1191_v41 = vor.u32 %v1414_v27, %v1188_v28 }
  0xf4   :  { %v644_v44 = vpop.f32.mrf.mxu2 }
  0xf5   :  { %1643 = vst [vmem:[%s2292_s3 + $0xa0] sm:$0xff] %v1567_v42   ;;  %v813_v45 = vpop.f32.mrf.mxu3  ;;  %v645_v50 = vadd.f32 %v1959_v61, %v644_v44  ;;  %v1319_v42 = vor.u32 %v1446_v31, %v1316_v32 }
  0xf6   :  { %v566_v46 = vpop.f32.mrf.mxu0 }
  0xf7   :  { %v567_v48 = vadd.f32 %v1959_v61, %v566_v46  ;;  %v735_v49 = vpop.f32.mrf.mxu1  ;;  %v814_v1 = vadd.f32 %v813_v45, %v645_v50 }
  0xf9   :  { %v736_v51 = vadd.f32 %v735_v49, %v567_v48  ;;  %v910_v11 = vmax.f32 %v814_v1, 0.0 }
  0xfb   :  { %v879_v59 = vmax.f32 %v736_v51, 0.0 }
  0xfc   :  { %v646_v63 = vpop.f32.mrf.mxu2 }
  0xfd   :  { %v1492_v2 = vpack.c.bf16 %v879_v59, %v878_v58  ;;  %v647_v3 = vadd.f32 %v1959_v61, %v646_v63  ;;  %v815_v4 = vpop.f32.mrf.mxu3 }
  0xfe   :  { %v569_v6 = vpop.f32.mrf.mxu0 }
  0xff   :  { %1628 = vst [vmem:[%s2292_s3 + $0x28] sm:$0xff] %v1492_v2   ;;  %v816_v9 = vadd.f32 %v815_v4, %v647_v3  ;;  %v738_v10 = vpop.f32.mrf.mxu1  ;;  %v570_v14 = vadd.f32 %v1959_v61, %v569_v6 }
 0x101   :  { %v911_v12 = vmax.f32 %v816_v9, 0.0  ;;  %608 = vmatmul.bf16.gmra.mxu0 %v1179_v0  ;;  %688 = vmatmul.bf16.gmra.mxu2 %v1307_v5  ;;  %v739_v18 = vadd.f32 %v738_v10, %v570_v14 }
 0x102   :  { %777 = vmatmul.bf16.gmra.mxu1 %v1183_v7  ;;  %857 = vmatmul.bf16.gmra.mxu3 %v1311_v8 }
 0x103   :  { %v1572_v13 = vpack.c.bf16 %v911_v12, %v910_v11  ;;  %v880_v29 = vmax.f32 %v739_v18, 0.0 }
 0x104   :  { %v649_v15 = vpop.f32.mrf.mxu2 }
 0x105   :  { %1644 = vst [vmem:[%s2292_s3 + $0xa8] sm:$0xff] %v1572_v13   ;;  %v818_v16 = vpop.f32.mrf.mxu3  ;;  %v650_v21 = vadd.f32 %v1959_v61, %v649_v15 }
 0x106   :  { %v571_v17 = vpop.f32.mrf.mxu0 }
 0x107   :  { %v572_v19 = vadd.f32 %v1959_v61, %v571_v17  ;;  %v740_v20 = vpop.f32.mrf.mxu1  ;;  %v819_v35 = vadd.f32 %v818_v16, %v650_v21 }
 0x109   :  { %v741_v22 = vadd.f32 %v740_v20, %v572_v19  ;;  %v912_v45 = vmax.f32 %v819_v35, 0.0 }
 0x10b   :  { %v881_v30 = vmax.f32 %v741_v22, 0.0 }
 0x10c   :  { %v651_v33 = vpop.f32.mrf.mxu2 }
 0x10d   :  { %v1497_v36 = vpack.c.bf16 %v881_v30, %v880_v29  ;;  %v652_v37 = vadd.f32 %v1959_v61, %v651_v33  ;;  %v820_v38 = vpop.f32.mrf.mxu3 }
 0x10e   :  { %v574_v40 = vpop.f32.mrf.mxu0 }
 0x10f   :  { %1629 = vst [vmem:[%s2292_s3 + $0x30] sm:$0xff] %v1497_v36   ;;  %v821_v43 = vadd.f32 %v820_v38, %v652_v37  ;;  %v743_v44 = vpop.f32.mrf.mxu1  ;;  %v575_v48 = vadd.f32 %v1959_v61, %v574_v40 }
 0x111   :  { %v913_v46 = vmax.f32 %v821_v43, 0.0  ;;  %613 = vmatmul.bf16.gmra.mxu0 %v1187_v34  ;;  %693 = vmatmul.bf16.gmra.mxu2 %v1315_v39  ;;  %v744_v52 = vadd.f32 %v743_v44, %v575_v48 }
 0x112   :  { %782 = vmatmul.bf16.gmra.mxu1 %v1191_v41  ;;  %862 = vmatmul.bf16.gmra.mxu3 %v1319_v42 }
 0x113   :  { %v1577_v47 = vpack.c.bf16 %v913_v46, %v912_v45  ;;  %v882_v57 = vmax.f32 %v744_v52, 0.0 }
 0x114   :  { %v654_v49 = vpop.f32.mrf.mxu2 }
 0x115   :  { %1645 = vst [vmem:[%s2292_s3 + $0xb0] sm:$0xff] %v1577_v47   ;;  %v823_v50 = vpop.f32.mrf.mxu3  ;;  %v655_v55 = vadd.f32 %v1959_v61, %v654_v49 }
 0x116   :  { %v576_v51 = vpop.f32.mrf.mxu0 }
 0x117   :  { %v577_v53 = vadd.f32 %v1959_v61, %v576_v51  ;;  %v745_v54 = vpop.f32.mrf.mxu1  ;;  %v824_v60 = vadd.f32 %v823_v50, %v655_v55 }
 0x119   :  { %v746_v56 = vadd.f32 %v745_v54, %v577_v53  ;;  %v914_v4 = vmax.f32 %v824_v60, 0.0 }
 0x11b   :  { %v883_v58 = vmax.f32 %v746_v56, 0.0 }
 0x11c   :  { %v656_v59 = vpop.f32.mrf.mxu2 }
 0x11d   :  { %v1502_v62 = vpack.c.bf16 %v883_v58, %v882_v57  ;;  %v657_v63 = vadd.f32 %v1959_v61, %v656_v59  ;;  %v825_v0 = vpop.f32.mrf.mxu3 }
 0x11e   :  { %v579_v1 = vpop.f32.mrf.mxu0 }
 0x11f   :  { %1630 = vst [vmem:[%s2292_s3 + $0x38] sm:$0xff] %v1502_v62   ;;  %v826_v2 = vadd.f32 %v825_v0, %v657_v63  ;;  %v748_v3 = vpop.f32.mrf.mxu1  ;;  %v580_v7 = vadd.f32 %v1959_v61, %v579_v1 }
 0x121   :  { %v915_v5 = vmax.f32 %v826_v2, 0.0  ;;  %v749_v11 = vadd.f32 %v748_v3, %v580_v7 }
 0x123   :  { %v1582_v6 = vpack.c.bf16 %v915_v5, %v914_v4  ;;  %v884_v16 = vmax.f32 %v749_v11, 0.0 }
 0x124   :  { %v659_v8 = vpop.f32.mrf.mxu2 }
 0x125   :  { %1646 = vst [vmem:[%s2292_s3 + $0xb8] sm:$0xff] %v1582_v6   ;;  %v828_v9 = vpop.f32.mrf.mxu3  ;;  %v660_v14 = vadd.f32 %v1959_v61, %v659_v8 }
 0x126   :  { %v581_v10 = vpop.f32.mrf.mxu0 }
 0x127   :  { %v582_v12 = vadd.f32 %v1959_v61, %v581_v10  ;;  %v750_v13 = vpop.f32.mrf.mxu1  ;;  %v829_v19 = vadd.f32 %v828_v9, %v660_v14 }
 0x129   :  { %v751_v15 = vadd.f32 %v750_v13, %v582_v12  ;;  %v916_v26 = vmax.f32 %v829_v19, 0.0 }
 0x12b   :  { %v885_v17 = vmax.f32 %v751_v15, 0.0 }
 0x12c   :  { %v661_v18 = vpop.f32.mrf.mxu2 }
 0x12d   :  { %v1507_v20 = vpack.c.bf16 %v885_v17, %v884_v16  ;;  %v662_v21 = vadd.f32 %v1959_v61, %v661_v18  ;;  %v830_v22 = vpop.f32.mrf.mxu3 }
 0x12e   :  { %v584_v23 = vpop.f32.mrf.mxu0 }
 0x12f   :  { %1631 = vst [vmem:[%s2292_s3 + $0x40] sm:$0xff] %v1507_v20   ;;  %v831_v24 = vadd.f32 %v830_v22, %v662_v21  ;;  %v753_v25 = vpop.f32.mrf.mxu1  ;;  %v585_v29 = vadd.f32 %v1959_v61, %v584_v23 }
 0x131   :  { %v917_v27 = vmax.f32 %v831_v24, 0.0  ;;  %v754_v33 = vadd.f32 %v753_v25, %v585_v29 }
 0x133   :  { %v1587_v28 = vpack.c.bf16 %v917_v27, %v916_v26  ;;  %v886_v38 = vmax.f32 %v754_v33, 0.0 }
 0x134   :  { %v664_v30 = vpop.f32.mrf.mxu2 }
 0x135   :  { %1647 = vst [vmem:[%s2292_s3 + $0xc0] sm:$0xff] %v1587_v28   ;;  %v833_v31 = vpop.f32.mrf.mxu3  ;;  %v665_v36 = vadd.f32 %v1959_v61, %v664_v30 }
 0x136   :  { %v586_v32 = vpop.f32.mrf.mxu0 }
 0x137   :  { %v587_v34 = vadd.f32 %v1959_v61, %v586_v32  ;;  %v755_v35 = vpop.f32.mrf.mxu1  ;;  %v834_v41 = vadd.f32 %v833_v31, %v665_v36 }
 0x139   :  { %v756_v37 = vadd.f32 %v755_v35, %v587_v34  ;;  %v918_v48 = vmax.f32 %v834_v41, 0.0 }
 0x13b   :  { %v887_v39 = vmax.f32 %v756_v37, 0.0 }
 0x13c   :  { %v666_v40 = vpop.f32.mrf.mxu2 }
 0x13d   :  { %v1512_v42 = vpack.c.bf16 %v887_v39, %v886_v38  ;;  %v667_v43 = vadd.f32 %v1959_v61, %v666_v40  ;;  %v835_v44 = vpop.f32.mrf.mxu3 }
 0x13e   :  { %v589_v45 = vpop.f32.mrf.mxu0 }
 0x13f   :  { %1632 = vst [vmem:[%s2292_s3 + $0x48] sm:$0xff] %v1512_v42   ;;  %v836_v46 = vadd.f32 %v835_v44, %v667_v43  ;;  %v758_v47 = vpop.f32.mrf.mxu1  ;;  %v590_v51 = vadd.f32 %v1959_v61, %v589_v45 }
 0x141   :  { %v919_v49 = vmax.f32 %v836_v46, 0.0  ;;  %v759_v55 = vadd.f32 %v758_v47, %v590_v51 }
 0x143   :  { %v1592_v50 = vpack.c.bf16 %v919_v49, %v918_v48  ;;  %v888_v60 = vmax.f32 %v759_v55, 0.0 }
 0x144   :  { %v669_v52 = vpop.f32.mrf.mxu2 }
 0x145   :  { %1648 = vst [vmem:[%s2292_s3 + $0xc8] sm:$0xff] %v1592_v50   ;;  %v838_v53 = vpop.f32.mrf.mxu3  ;;  %v670_v58 = vadd.f32 %v1959_v61, %v669_v52 }
 0x146   :  { %v591_v54 = vpop.f32.mrf.mxu0 }
 0x147   :  { %v592_v56 = vadd.f32 %v1959_v61, %v591_v54  ;;  %v760_v57 = vpop.f32.mrf.mxu1  ;;  %v839_v0 = vadd.f32 %v838_v53, %v670_v58 }
 0x149   :  { %v761_v59 = vadd.f32 %v760_v57, %v592_v56  ;;  %v920_v7 = vmax.f32 %v839_v0, 0.0 }
 0x14b   :  { %v889_v62 = vmax.f32 %v761_v59, 0.0 }
 0x14c   :  { %v671_v63 = vpop.f32.mrf.mxu2 }
 0x14d   :  { %v1517_v1 = vpack.c.bf16 %v889_v62, %v888_v60  ;;  %v672_v2 = vadd.f32 %v1959_v61, %v671_v63  ;;  %v840_v3 = vpop.f32.mrf.mxu3 }
 0x14e   :  { %v594_v4 = vpop.f32.mrf.mxu0 }
 0x14f   :  { %1633 = vst [vmem:[%s2292_s3 + $0x50] sm:$0xff] %v1517_v1   ;;  %v841_v5 = vadd.f32 %v840_v3, %v672_v2  ;;  %v763_v6 = vpop.f32.mrf.mxu1  ;;  %v595_v10 = vadd.f32 %v1959_v61, %v594_v4 }
 0x151   :  { %v921_v8 = vmax.f32 %v841_v5, 0.0  ;;  %v764_v14 = vadd.f32 %v763_v6, %v595_v10 }
 0x153   :  { %v1597_v9 = vpack.c.bf16 %v921_v8, %v920_v7  ;;  %v890_v19 = vmax.f32 %v764_v14, 0.0 }
 0x154   :  { %v674_v11 = vpop.f32.mrf.mxu2 }
 0x155   :  { %1649 = vst [vmem:[%s2292_s3 + $0xd0] sm:$0xff] %v1597_v9   ;;  %v843_v12 = vpop.f32.mrf.mxu3  ;;  %v675_v17 = vadd.f32 %v1959_v61, %v674_v11 }
 0x156   :  { %v596_v13 = vpop.f32.mrf.mxu0 }
 0x157   :  { %v597_v15 = vadd.f32 %v1959_v61, %v596_v13  ;;  %v765_v16 = vpop.f32.mrf.mxu1  ;;  %v844_v22 = vadd.f32 %v843_v12, %v675_v17 }
 0x159   :  { %v766_v18 = vadd.f32 %v765_v16, %v597_v15  ;;  %v922_v29 = vmax.f32 %v844_v22, 0.0 }
 0x15b   :  { %v891_v20 = vmax.f32 %v766_v18, 0.0 }
 0x15c   :  { %v676_v21 = vpop.f32.mrf.mxu2 }
 0x15d   :  { %v1522_v23 = vpack.c.bf16 %v891_v20, %v890_v19  ;;  %v677_v24 = vadd.f32 %v1959_v61, %v676_v21  ;;  %v845_v25 = vpop.f32.mrf.mxu3 }
 0x15e   :  { %v599_v26 = vpop.f32.mrf.mxu0 }
 0x15f   :  { %1634 = vst [vmem:[%s2292_s3 + $0x58] sm:$0xff] %v1522_v23   ;;  %v846_v27 = vadd.f32 %v845_v25, %v677_v24  ;;  %v768_v28 = vpop.f32.mrf.mxu1  ;;  %v600_v32 = vadd.f32 %v1959_v61, %v599_v26 }
 0x161   :  { %v923_v30 = vmax.f32 %v846_v27, 0.0  ;;  %v769_v36 = vadd.f32 %v768_v28, %v600_v32 }
 0x163   :  { %v1602_v31 = vpack.c.bf16 %v923_v30, %v922_v29  ;;  %v892_v41 = vmax.f32 %v769_v36, 0.0 }
 0x164   :  { %v679_v33 = vpop.f32.mrf.mxu2 }
 0x165   :  { %1650 = vst [vmem:[%s2292_s3 + $0xd8] sm:$0xff] %v1602_v31   ;;  %v848_v34 = vpop.f32.mrf.mxu3  ;;  %v680_v39 = vadd.f32 %v1959_v61, %v679_v33 }
 0x166   :  { %v601_v35 = vpop.f32.mrf.mxu0 }
 0x167   :  { %v602_v37 = vadd.f32 %v1959_v61, %v601_v35  ;;  %v770_v38 = vpop.f32.mrf.mxu1  ;;  %v849_v44 = vadd.f32 %v848_v34, %v680_v39 }
 0x169   :  { %v771_v40 = vadd.f32 %v770_v38, %v602_v37  ;;  %v924_v51 = vmax.f32 %v849_v44, 0.0 }
 0x16b   :  { %v893_v42 = vmax.f32 %v771_v40, 0.0 }
 0x16c   :  { %v681_v43 = vpop.f32.mrf.mxu2 }
 0x16d   :  { %v1527_v45 = vpack.c.bf16 %v893_v42, %v892_v41  ;;  %v682_v46 = vadd.f32 %v1959_v61, %v681_v43  ;;  %v850_v47 = vpop.f32.mrf.mxu3 }
 0x16e   :  { %v604_v48 = vpop.f32.mrf.mxu0 }
 0x16f   :  { %1635 = vst [vmem:[%s2292_s3 + $0x60] sm:$0xff] %v1527_v45   ;;  %v851_v49 = vadd.f32 %v850_v47, %v682_v46  ;;  %v773_v50 = vpop.f32.mrf.mxu1  ;;  %v605_v54 = vadd.f32 %v1959_v61, %v604_v48 }
 0x171   :  { %v925_v52 = vmax.f32 %v851_v49, 0.0  ;;  %v774_v58 = vadd.f32 %v773_v50, %v605_v54 }
 0x173   :  { %v1607_v53 = vpack.c.bf16 %v925_v52, %v924_v51  ;;  %v894_v0 = vmax.f32 %v774_v58, 0.0 }
 0x174   :  { %v684_v55 = vpop.f32.mrf.mxu2 }
 0x175   :  { %1651 = vst [vmem:[%s2292_s3 + $0xe0] sm:$0xff] %v1607_v53   ;;  %v853_v56 = vpop.f32.mrf.mxu3  ;;  %v685_v62 = vadd.f32 %v1959_v61, %v684_v55 }
 0x176   :  { %v606_v57 = vpop.f32.mrf.mxu0 }
 0x177   :  { %v607_v59 = vadd.f32 %v1959_v61, %v606_v57  ;;  %v775_v60 = vpop.f32.mrf.mxu1  ;;  %v854_v3 = vadd.f32 %v853_v56, %v685_v62 }
 0x179   :  { %v776_v63 = vadd.f32 %v775_v60, %v607_v59  ;;  %v926_v10 = vmax.f32 %v854_v3, 0.0 }
 0x17b   :  { %v895_v1 = vmax.f32 %v776_v63, 0.0 }
 0x17c   :  { %v686_v2 = vpop.f32.mrf.mxu2 }
 0x17d   :  { %v1532_v4 = vpack.c.bf16 %v895_v1, %v894_v0  ;;  %v687_v5 = vadd.f32 %v1959_v61, %v686_v2  ;;  %v855_v6 = vpop.f32.mrf.mxu3 }
 0x17e   :  { %v609_v7 = vpop.f32.mrf.mxu0 }
 0x17f   :  { %1636 = vst [vmem:[%s2292_s3 + $0x68] sm:$0xff] %v1532_v4   ;;  %v856_v8 = vadd.f32 %v855_v6, %v687_v5  ;;  %v778_v9 = vpop.f32.mrf.mxu1  ;;  %v610_v13 = vadd.f32 %v1959_v61, %v609_v7 }
 0x181   :  { %v927_v11 = vmax.f32 %v856_v8, 0.0  ;;  %v779_v17 = vadd.f32 %v778_v9, %v610_v13 }
 0x183   :  { %v1612_v12 = vpack.c.bf16 %v927_v11, %v926_v10  ;;  %v896_v22 = vmax.f32 %v779_v17, 0.0 }
 0x184   :  { %v689_v14 = vpop.f32.mrf.mxu2 }
 0x185   :  { %1652 = vst [vmem:[%s2292_s3 + $0xe8] sm:$0xff] %v1612_v12   ;;  %v858_v15 = vpop.f32.mrf.mxu3  ;;  %v690_v20 = vadd.f32 %v1959_v61, %v689_v14 }
 0x186   :  { %v611_v16 = vpop.f32.mrf.mxu0 }
 0x187   :  { %v612_v18 = vadd.f32 %v1959_v61, %v611_v16  ;;  %v780_v19 = vpop.f32.mrf.mxu1  ;;  %v859_v25 = vadd.f32 %v858_v15, %v690_v20 }
 0x189   :  { %v781_v21 = vadd.f32 %v780_v19, %v612_v18  ;;  %v928_v32 = vmax.f32 %v859_v25, 0.0 }
 0x18b   :  { %v897_v23 = vmax.f32 %v781_v21, 0.0 }
 0x18c   :  { %v691_v24 = vpop.f32.mrf.mxu2 }
 0x18d   :  { %v1537_v26 = vpack.c.bf16 %v897_v23, %v896_v22  ;;  %v692_v27 = vadd.f32 %v1959_v61, %v691_v24  ;;  %v860_v28 = vpop.f32.mrf.mxu3 }
 0x18e   :  { %v614_v29 = vpop.f32.mrf.mxu0 }
 0x18f   :  { %1637 = vst [vmem:[%s2292_s3 + $0x70] sm:$0xff] %v1537_v26   ;;  %v861_v30 = vadd.f32 %v860_v28, %v692_v27  ;;  %v783_v31 = vpop.f32.mrf.mxu1  ;;  %v615_v35 = vadd.f32 %v1959_v61, %v614_v29 }
 0x191   :  { %v929_v33 = vmax.f32 %v861_v30, 0.0  ;;  %v784_v39 = vadd.f32 %v783_v31, %v615_v35 }
 0x193   :  { %v1617_v34 = vpack.c.bf16 %v929_v33, %v928_v32  ;;  %v898_v44 = vmax.f32 %v784_v39, 0.0 }
 0x194   :  { %v694_v36 = vpop.f32.mrf.mxu2 }
 0x195   :  { %1653 = vst [vmem:[%s2292_s3 + $0xf0] sm:$0xff] %v1617_v34   ;;  %v863_v37 = vpop.f32.mrf.mxu3  ;;  %v695_v42 = vadd.f32 %v1959_v61, %v694_v36 }
 0x196   :  { %v616_v38 = vpop.f32.mrf.mxu0 }
 0x197   :  { %v617_v40 = vadd.f32 %v1959_v61, %v616_v38  ;;  %v785_v41 = vpop.f32.mrf.mxu1  ;;  %v864_v47 = vadd.f32 %v863_v37, %v695_v42 }
 0x199   :  { %v786_v43 = vadd.f32 %v785_v41, %v617_v40  ;;  %v930_v52 = vmax.f32 %v864_v47, 0.0 }
 0x19b   :  { %v899_v45 = vmax.f32 %v786_v43, 0.0 }
 0x19c   :  { %v696_v46 = vpop.f32.mrf.mxu2 }
 0x19d   :  { %v1542_v48 = vpack.c.bf16 %v899_v45, %v898_v44  ;;  %v697_v49 = vadd.f32 %v1959_v61, %v696_v46  ;;  %v865_v50 = vpop.f32.mrf.mxu3 }
 0x19f   :  { %1638 = vst [vmem:[%s2292_s3 + $0x78] sm:$0xff] %v1542_v48   ;;  %v866_v51 = vadd.f32 %v865_v50, %v697_v49 }
 0x1a1   :  { %v931_v53 = vmax.f32 %v866_v51, 0.0 }
 0x1a3   :  { %v1622_v54 = vpack.c.bf16 %v931_v53, %v930_v52 }
 0x1a5   :  { %1654 = vst [vmem:[%s2292_s3 + $0xf8] sm:$0xff] %v1622_v54  }

// kernel: generator_forward.21
= control target key start
LH: loop header
LB: loop body
LE: loop exit
PB: predicated region body
PF: predicated region fallthrough
CT: control target
= control target key end

     0   :  { %s1382_s12 = smov 0   ;;  %s1384_s13 = smov 0   ;;  %s1615_s0 = inlined_call_operand.vmem [shape: bf16[2048,128], index: 0, kind: input, shape index: {}]   ;;  %s1616_s1 = inlined_call_operand.vmem [shape: bf16[128,128], index: 1, kind: input, shape index: {}]   ;;  %s1617_s2 = inlined_call_operand.vmem [shape: f32[1,128], index: 2, kind: input, shape index: {}]   ;;  %s1618_s3 = inlined_call_operand.vmem [shape: f32[2048,128], index: 3, kind: output, shape index: {}]  }
   0x1   :  { %s1386_s14 = smov 0  }
   0x2 LB: > { %s25_s15 = sadd.s32 1, %s1356_s13  ;;  %p954_p0 = scmp.ge.s32.totalorder %s1360_s14, 1  ;;  %s1360_s14 = sphi %s1386_s14, %s13_s14   ;;  %s1356_s13 = sphi %s1384_s13, %s1620_s13   ;;  %s1352_s12 = sphi %s1382_s12, %s1619_s12  }
   0x3   : > { %p27_p1 = scmp.ge.s32.totalorder %s25_s15, 4  ;;  %p169_p2 = scmp.lt.s32.totalorder %s1360_s14, 5 }
   0x5   : > { %s1622_s15 = smov (%p27_p1, %s25_s15), 0  ;;  %p170_p3 = pnand %p954_p0, %p169_p2 }
   0x6   : > { %s955_s24 = sshll.u32 (!%p170_p3), %s1352_s12, 6 }
   0x7   : > { %173 = sbr.rel (%p170_p3) target bundleno = 308 (0x134), region = 32  ;;  %p204_p4 = scmp.lt.s32.totalorder (!%p170_p3), %s955_s24, 255 }
   0xc   : > { %v1160_v0 = vld [vmem:[%s1616_s1 + $0x38] sm:$0xff]  ;;  %v1159_v1 = vld [vmem:[%s1616_s1 + $0x30] sm:$0xff]  ;;  %v1158_v2 = vld [vmem:[%s1616_s1 + $0x28] sm:$0xff]  ;;  %s1624_s24 = smov (!%p204_p4, %s955_s24), 255 }
   0xd   : > { %549 = vmatpush.bf16.msra.mxu0 %v1160_v0  ;;  %1161 = vmatpush.bf16.msra.mxu1 %v1160_v0  ;;  %v1157_v3 = vld [vmem:[%s1616_s1 + $0x20] sm:$0xff]  ;;  %v1156_v4 = vld [vmem:[%s1616_s1 + $0x18] sm:$0xff]  ;;  %v1155_v5 = vld [vmem:[%s1616_s1 + $0x10] sm:$0xff]  ;;  %s956_s4 = sshll.u32 %s1624_s24, 2  ;;  %s958_s12 = sshll.u32 %s1624_s24, 3 }
   0xe   : > { %1162 = vmatpush.bf16.msra.mxu2 %v1160_v0  ;;  %1163 = vmatpush.bf16.msra.mxu3 %v1160_v0  ;;  %v1154_v6 = vld [vmem:[%s1616_s1 + $0x8] sm:$0xff]  ;;  %v1153_v7 = vld [vmem:[%s1616_s1] sm:$0xff]  ;;  %s1433_s9 = scalar_lea.vmem %s1615_s0, %s956_s4  ;;  %s1478_s18 = scalar_lea.vmem %s1618_s3, %s958_s12 }
   0xf   : > { %v1121_v8 = vld [vmem:[%s1433_s9] sm:$0xff]  ;;  %v1122_v12 = vld [vmem:[%s1433_s9 + $0x8] sm:$0xff]  ;;  %v1123_v16 = vld [vmem:[%s1433_s9 + $0x10] sm:$0xff] }
  0x10   : > { %v1129_v9 = vld [vmem:[%s1433_s9 + $0x40] sm:$0xff]  ;;  %v1130_v13 = vld [vmem:[%s1433_s9 + $0x48] sm:$0xff]  ;;  %v1131_v17 = vld [vmem:[%s1433_s9 + $0x50] sm:$0xff] }
  0x11   : > { %550 = vmatpush.bf16.msra.mxu0 %v1159_v1  ;;  %1164 = vmatpush.bf16.msra.mxu1 %v1159_v1  ;;  %v1137_v10 = vld [vmem:[%s1433_s9 + $0x80] sm:$0xff]  ;;  %v1138_v14 = vld [vmem:[%s1433_s9 + $0x88] sm:$0xff]  ;;  %v1139_v18 = vld [vmem:[%s1433_s9 + $0x90] sm:$0xff] }
  0x12   : > { %1165 = vmatpush.bf16.msra.mxu2 %v1159_v1  ;;  %1166 = vmatpush.bf16.msra.mxu3 %v1159_v1  ;;  %v1145_v11 = vld [vmem:[%s1433_s9 + $0xc0] sm:$0xff]  ;;  %v1146_v15 = vld [vmem:[%s1433_s9 + $0xc8] sm:$0xff]  ;;  %v1147_v19 = vld [vmem:[%s1433_s9 + $0xd0] sm:$0xff] }
  0x13   : > { %v1124_v20 = vld [vmem:[%s1433_s9 + $0x18] sm:$0xff]  ;;  %v1125_v24 = vld [vmem:[%s1433_s9 + $0x20] sm:$0xff]  ;;  %v1126_v28 = vld [vmem:[%s1433_s9 + $0x28] sm:$0xff] }
  0x14   : > { %v1132_v21 = vld [vmem:[%s1433_s9 + $0x58] sm:$0xff]  ;;  %v1133_v25 = vld [vmem:[%s1433_s9 + $0x60] sm:$0xff]  ;;  %v1134_v29 = vld [vmem:[%s1433_s9 + $0x68] sm:$0xff] }
  0x15   : > { %551 = vmatpush.bf16.msra.mxu0 %v1158_v2  ;;  %1167 = vmatpush.bf16.msra.mxu1 %v1158_v2  ;;  %v1140_v22 = vld [vmem:[%s1433_s9 + $0x98] sm:$0xff]  ;;  %v1141_v26 = vld [vmem:[%s1433_s9 + $0xa0] sm:$0xff]  ;;  %v1142_v30 = vld [vmem:[%s1433_s9 + $0xa8] sm:$0xff] }
  0x16   : > { %1168 = vmatpush.bf16.msra.mxu2 %v1158_v2  ;;  %1169 = vmatpush.bf16.msra.mxu3 %v1158_v2  ;;  %v1148_v23 = vld [vmem:[%s1433_s9 + $0xd8] sm:$0xff]  ;;  %v1149_v27 = vld [vmem:[%s1433_s9 + $0xe0] sm:$0xff]  ;;  %v1150_v31 = vld [vmem:[%s1433_s9 + $0xe8] sm:$0xff] }
  0x17   : > { %v1127_v32 = vld [vmem:[%s1433_s9 + $0x30] sm:$0xff]  ;;  %v1128_v36 = vld [vmem:[%s1433_s9 + $0x38] sm:$0xff]  ;;  %v1470_v40 = vld [vmem:[%s1617_s2] ss:$0 sm:$0xff] }
  0x18   : > { %v1135_v33 = vld [vmem:[%s1433_s9 + $0x70] sm:$0xff]  ;;  %v1136_v37 = vld [vmem:[%s1433_s9 + $0x78] sm:$0xff] }
  0x19   : > { %552 = vmatpush.bf16.msra.mxu0 %v1157_v3  ;;  %1170 = vmatpush.bf16.msra.mxu1 %v1157_v3  ;;  %v1143_v34 = vld [vmem:[%s1433_s9 + $0xb0] sm:$0xff]  ;;  %v1144_v38 = vld [vmem:[%s1433_s9 + $0xb8] sm:$0xff] }
  0x1a   : > { %1171 = vmatpush.bf16.msra.mxu2 %v1157_v3  ;;  %1172 = vmatpush.bf16.msra.mxu3 %v1157_v3  ;;  %v1151_v35 = vld [vmem:[%s1433_s9 + $0xf0] sm:$0xff]  ;;  %v1152_v39 = vld [vmem:[%s1433_s9 + $0xf8] sm:$0xff] }
  0x1d   : > { %553 = vmatpush.bf16.msra.mxu0 %v1156_v4  ;;  %1173 = vmatpush.bf16.msra.mxu1 %v1156_v4 }
  0x1e   : > { %1174 = vmatpush.bf16.msra.mxu2 %v1156_v4  ;;  %1175 = vmatpush.bf16.msra.mxu3 %v1156_v4 }
  0x21   : > { %554 = vmatpush.bf16.msra.mxu0 %v1155_v5  ;;  %1176 = vmatpush.bf16.msra.mxu1 %v1155_v5 }
  0x22   : > { %1177 = vmatpush.bf16.msra.mxu2 %v1155_v5  ;;  %1178 = vmatpush.bf16.msra.mxu3 %v1155_v5 }
  0x25   : > { %555 = vmatpush.bf16.msra.mxu0 %v1154_v6  ;;  %1179 = vmatpush.bf16.msra.mxu1 %v1154_v6 }
  0x26   : > { %1180 = vmatpush.bf16.msra.mxu2 %v1154_v6  ;;  %1181 = vmatpush.bf16.msra.mxu3 %v1154_v6 }
  0x29   : > { %556 = vmatpush.bf16.msra.mxu0 %v1153_v7  ;;  %1182 = vmatpush.bf16.msra.mxu1 %v1153_v7 }
  0x2a   : > { %1183 = vmatpush.bf16.msra.mxu2 %v1153_v7  ;;  %1184 = vmatpush.bf16.msra.mxu3 %v1153_v7 }
  0x2c   : > { %557 = vmatmul.bf16.vlgmr.msra.gmra.mxu0 %v1121_v8  ;;  %597 = vmatmul.bf16.vlgmr.msra.gmra.mxu1 %v1129_v9 }
  0x2d   : > { %637 = vmatmul.bf16.vlgmr.msra.gmra.mxu2 %v1137_v10  ;;  %677 = vmatmul.bf16.vlgmr.msra.gmra.mxu3 %v1145_v11 }
  0x3c   : > { %562 = vmatmul.bf16.gmra.mxu0 %v1122_v12  ;;  %602 = vmatmul.bf16.gmra.mxu1 %v1130_v13 }
  0x3d   : > { %642 = vmatmul.bf16.gmra.mxu2 %v1138_v14  ;;  %682 = vmatmul.bf16.gmra.mxu3 %v1146_v15 }
  0x4c   : > { %567 = vmatmul.bf16.gmra.mxu0 %v1123_v16  ;;  %607 = vmatmul.bf16.gmra.mxu1 %v1131_v17 }
  0x4d   : > { %647 = vmatmul.bf16.gmra.mxu2 %v1139_v18  ;;  %687 = vmatmul.bf16.gmra.mxu3 %v1147_v19 }
  0x5c   : > { %572 = vmatmul.bf16.gmra.mxu0 %v1124_v20  ;;  %612 = vmatmul.bf16.gmra.mxu1 %v1132_v21 }
  0x5d   : > { %652 = vmatmul.bf16.gmra.mxu2 %v1140_v22  ;;  %692 = vmatmul.bf16.gmra.mxu3 %v1148_v23 }
  0x6c   : > { %577 = vmatmul.bf16.gmra.mxu0 %v1125_v24  ;;  %617 = vmatmul.bf16.gmra.mxu1 %v1133_v25 }
  0x6d   : > { %657 = vmatmul.bf16.gmra.mxu2 %v1141_v26  ;;  %697 = vmatmul.bf16.gmra.mxu3 %v1149_v27 }
  0x7c   : > { %582 = vmatmul.bf16.gmra.mxu0 %v1126_v28  ;;  %622 = vmatmul.bf16.gmra.mxu1 %v1134_v29 }
  0x7d   : > { %662 = vmatmul.bf16.gmra.mxu2 %v1142_v30  ;;  %702 = vmatmul.bf16.gmra.mxu3 %v1150_v31 }
  0x8c   : > { %587 = vmatmul.bf16.gmra.mxu0 %v1127_v32  ;;  %627 = vmatmul.bf16.gmra.mxu1 %v1135_v33 }
  0x8d   : > { %667 = vmatmul.bf16.gmra.mxu2 %v1143_v34  ;;  %707 = vmatmul.bf16.gmra.mxu3 %v1151_v35 }
  0x9c   : > { %592 = vmatmul.bf16.gmra.mxu0 %v1128_v36  ;;  %632 = vmatmul.bf16.gmra.mxu1 %v1136_v37 }
  0x9d   : > { %672 = vmatmul.bf16.gmra.mxu2 %v1144_v38  ;;  %712 = vmatmul.bf16.gmra.mxu3 %v1152_v39 }
  0xa9   : > { %v558_v41 = vpop.f32.mrf.mxu0  ;;  %v598_v42 = vpop.f32.mrf.mxu1 }
  0xaa   : > { %v559_v43 = vadd.f32 %v1470_v40, %v558_v41  ;;  %v599_v44 = vadd.f32 %v1470_v40, %v598_v42 }
  0xac   : > { %1210 = vtanh.f32 %v559_v43 }
  0xad   : > { %1212 = vtanh.f32 %v599_v44 }
  0xb0   : > { %v638_v45 = vpop.f32.mrf.mxu2  ;;  %v678_v46 = vpop.f32.mrf.mxu3 }
  0xb1   : > { %v639_v47 = vadd.f32 %v1470_v40, %v638_v45  ;;  %v679_v48 = vadd.f32 %v1470_v40, %v678_v46  ;;  %v560_v49 = vpop.f32.mrf.mxu0  ;;  %v600_v50 = vpop.f32.mrf.mxu1 }
  0xb2   : > { %v1211_v51 = vpop.eup %1210  ;;  %v561_v52 = vadd.f32 %v1470_v40, %v560_v49  ;;  %v601_v53 = vadd.f32 %v1470_v40, %v600_v50 }
  0xb3   : > { %v1213_v54 = vpop.eup %1212  ;;  %782 = vst [vmem:[%s1478_s18] sm:$0xff] %v1211_v51  ;;  %1214 = vtanh.f32 %v639_v47 }
  0xb4   : > { %798 = vst [vmem:[%s1478_s18 + $0x80] sm:$0xff] %v1213_v54  ;;  %1216 = vtanh.f32 %v679_v48 }
  0xb5   : > { %1218 = vtanh.f32 %v561_v52 }
  0xb6   : > { %1220 = vtanh.f32 %v601_v53 }
  0xb8   : > { %v640_v55 = vpop.f32.mrf.mxu2  ;;  %v680_v56 = vpop.f32.mrf.mxu3 }
  0xb9   : > { %v1215_v57 = vpop.eup %1214  ;;  %v641_v58 = vadd.f32 %v1470_v40, %v640_v55  ;;  %v681_v59 = vadd.f32 %v1470_v40, %v680_v56  ;;  %v563_v60 = vpop.f32.mrf.mxu0 }
  0xba   : > { %v603_v61 = vpop.f32.mrf.mxu1  ;;  %v1217_v62 = vpop.eup %1216  ;;  %814 = vst [vmem:[%s1478_s18 + $0x100] sm:$0xff] %v1215_v57  ;;  %v564_v63 = vadd.f32 %v1470_v40, %v563_v60 }
  0xbb   : > { %v604_v0 = vadd.f32 %v1470_v40, %v603_v61  ;;  %v1219_v1 = vpop.eup %1218  ;;  %830 = vst [vmem:[%s1478_s18 + $0x180] sm:$0xff] %v1217_v62  ;;  %1222 = vtanh.f32 %v641_v58 }
  0xbc   : > { %v1221_v2 = vpop.eup %1220  ;;  %783 = vst [vmem:[%s1478_s18 + $0x8] sm:$0xff] %v1219_v1  ;;  %1224 = vtanh.f32 %v681_v59 }
  0xbd   : > { %799 = vst [vmem:[%s1478_s18 + $0x88] sm:$0xff] %v1221_v2  ;;  %1226 = vtanh.f32 %v564_v63 }
  0xbe   : > { %1228 = vtanh.f32 %v604_v0 }
  0xc0   : > { %v643_v3 = vpop.f32.mrf.mxu2  ;;  %v683_v4 = vpop.f32.mrf.mxu3 }
  0xc1   : > { %v1223_v5 = vpop.eup %1222  ;;  %v644_v6 = vadd.f32 %v1470_v40, %v643_v3  ;;  %v684_v7 = vadd.f32 %v1470_v40, %v683_v4  ;;  %v565_v8 = vpop.f32.mrf.mxu0 }
  0xc2   : > { %v605_v9 = vpop.f32.mrf.mxu1  ;;  %v1225_v10 = vpop.eup %1224  ;;  %815 = vst [vmem:[%s1478_s18 + $0x108] sm:$0xff] %v1223_v5  ;;  %v566_v11 = vadd.f32 %v1470_v40, %v565_v8 }
  0xc3   : > { %v606_v12 = vadd.f32 %v1470_v40, %v605_v9  ;;  %v1227_v13 = vpop.eup %1226  ;;  %831 = vst [vmem:[%s1478_s18 + $0x188] sm:$0xff] %v1225_v10  ;;  %1230 = vtanh.f32 %v644_v6 }
  0xc4   : > { %v1229_v14 = vpop.eup %1228  ;;  %784 = vst [vmem:[%s1478_s18 + $0x10] sm:$0xff] %v1227_v13  ;;  %1232 = vtanh.f32 %v684_v7 }
  0xc5   : > { %800 = vst [vmem:[%s1478_s18 + $0x90] sm:$0xff] %v1229_v14  ;;  %1234 = vtanh.f32 %v566_v11 }
  0xc6   : > { %1236 = vtanh.f32 %v606_v12 }
  0xc8   : > { %v645_v15 = vpop.f32.mrf.mxu2  ;;  %v685_v16 = vpop.f32.mrf.mxu3 }
  0xc9   : > { %v1231_v17 = vpop.eup %1230  ;;  %v646_v18 = vadd.f32 %v1470_v40, %v645_v15  ;;  %v686_v19 = vadd.f32 %v1470_v40, %v685_v16  ;;  %v568_v20 = vpop.f32.mrf.mxu0 }
  0xca   : > { %v608_v21 = vpop.f32.mrf.mxu1  ;;  %v1233_v22 = vpop.eup %1232  ;;  %816 = vst [vmem:[%s1478_s18 + $0x110] sm:$0xff] %v1231_v17  ;;  %v569_v23 = vadd.f32 %v1470_v40, %v568_v20 }
  0xcb   : > { %v609_v24 = vadd.f32 %v1470_v40, %v608_v21  ;;  %v1235_v25 = vpop.eup %1234  ;;  %832 = vst [vmem:[%s1478_s18 + $0x190] sm:$0xff] %v1233_v22  ;;  %1238 = vtanh.f32 %v646_v18 }
  0xcc   : > { %v1237_v26 = vpop.eup %1236  ;;  %785 = vst [vmem:[%s1478_s18 + $0x18] sm:$0xff] %v1235_v25  ;;  %1240 = vtanh.f32 %v686_v19 }
  0xcd   : > { %801 = vst [vmem:[%s1478_s18 + $0x98] sm:$0xff] %v1237_v26  ;;  %1242 = vtanh.f32 %v569_v23 }
  0xce   : > { %1244 = vtanh.f32 %v609_v24 }
  0xd0   : > { %v648_v27 = vpop.f32.mrf.mxu2  ;;  %v688_v28 = vpop.f32.mrf.mxu3 }
  0xd1   : > { %v1239_v29 = vpop.eup %1238  ;;  %v649_v30 = vadd.f32 %v1470_v40, %v648_v27  ;;  %v689_v31 = vadd.f32 %v1470_v40, %v688_v28  ;;  %v570_v32 = vpop.f32.mrf.mxu0 }
  0xd2   : > { %v610_v33 = vpop.f32.mrf.mxu1  ;;  %v1241_v34 = vpop.eup %1240  ;;  %817 = vst [vmem:[%s1478_s18 + $0x118] sm:$0xff] %v1239_v29  ;;  %v571_v35 = vadd.f32 %v1470_v40, %v570_v32 }
  0xd3   : > { %v611_v36 = vadd.f32 %v1470_v40, %v610_v33  ;;  %v1243_v37 = vpop.eup %1242  ;;  %833 = vst [vmem:[%s1478_s18 + $0x198] sm:$0xff] %v1241_v34  ;;  %1246 = vtanh.f32 %v649_v30 }
  0xd4   : > { %v1245_v38 = vpop.eup %1244  ;;  %786 = vst [vmem:[%s1478_s18 + $0x20] sm:$0xff] %v1243_v37  ;;  %1248 = vtanh.f32 %v689_v31 }
  0xd5   : > { %802 = vst [vmem:[%s1478_s18 + $0xa0] sm:$0xff] %v1245_v38  ;;  %1250 = vtanh.f32 %v571_v35 }
  0xd6   : > { %1252 = vtanh.f32 %v611_v36 }
  0xd8   : > { %v650_v39 = vpop.f32.mrf.mxu2  ;;  %v690_v41 = vpop.f32.mrf.mxu3 }
  0xd9   : > { %v1247_v42 = vpop.eup %1246  ;;  %v651_v43 = vadd.f32 %v1470_v40, %v650_v39  ;;  %v691_v44 = vadd.f32 %v1470_v40, %v690_v41  ;;  %v573_v45 = vpop.f32.mrf.mxu0 }
  0xda   : > { %v613_v46 = vpop.f32.mrf.mxu1  ;;  %v1249_v47 = vpop.eup %1248  ;;  %818 = vst [vmem:[%s1478_s18 + $0x120] sm:$0xff] %v1247_v42  ;;  %v574_v48 = vadd.f32 %v1470_v40, %v573_v45 }
  0xdb   : > { %v614_v49 = vadd.f32 %v1470_v40, %v613_v46  ;;  %v1251_v50 = vpop.eup %1250  ;;  %834 = vst [vmem:[%s1478_s18 + $0x1a0] sm:$0xff] %v1249_v47  ;;  %1254 = vtanh.f32 %v651_v43 }
  0xdc   : > { %v1253_v51 = vpop.eup %1252  ;;  %787 = vst [vmem:[%s1478_s18 + $0x28] sm:$0xff] %v1251_v50  ;;  %1256 = vtanh.f32 %v691_v44 }
  0xdd   : > { %803 = vst [vmem:[%s1478_s18 + $0xa8] sm:$0xff] %v1253_v51  ;;  %1258 = vtanh.f32 %v574_v48 }
  0xde   : > { %1260 = vtanh.f32 %v614_v49 }
  0xe0   : > { %v653_v52 = vpop.f32.mrf.mxu2  ;;  %v693_v53 = vpop.f32.mrf.mxu3 }
  0xe1   : > { %v1255_v54 = vpop.eup %1254  ;;  %v654_v55 = vadd.f32 %v1470_v40, %v653_v52  ;;  %v694_v56 = vadd.f32 %v1470_v40, %v693_v53  ;;  %v575_v57 = vpop.f32.mrf.mxu0 }
  0xe2   : > { %v615_v58 = vpop.f32.mrf.mxu1  ;;  %v1257_v59 = vpop.eup %1256  ;;  %819 = vst [vmem:[%s1478_s18 + $0x128] sm:$0xff] %v1255_v54  ;;  %v576_v60 = vadd.f32 %v1470_v40, %v575_v57 }
  0xe3   : > { %v616_v61 = vadd.f32 %v1470_v40, %v615_v58  ;;  %v1259_v62 = vpop.eup %1258  ;;  %835 = vst [vmem:[%s1478_s18 + $0x1a8] sm:$0xff] %v1257_v59  ;;  %1262 = vtanh.f32 %v654_v55 }
  0xe4   : > { %v1261_v63 = vpop.eup %1260  ;;  %788 = vst [vmem:[%s1478_s18 + $0x30] sm:$0xff] %v1259_v62  ;;  %1264 = vtanh.f32 %v694_v56 }
  0xe5   : > { %804 = vst [vmem:[%s1478_s18 + $0xb0] sm:$0xff] %v1261_v63  ;;  %1266 = vtanh.f32 %v576_v60 }
  0xe6   : > { %1268 = vtanh.f32 %v616_v61 }
  0xe8   : > { %v655_v0 = vpop.f32.mrf.mxu2  ;;  %v695_v1 = vpop.f32.mrf.mxu3 }
  0xe9   : > { %v1263_v2 = vpop.eup %1262  ;;  %v656_v3 = vadd.f32 %v1470_v40, %v655_v0  ;;  %v696_v4 = vadd.f32 %v1470_v40, %v695_v1  ;;  %v578_v5 = vpop.f32.mrf.mxu0 }
  0xea   : > { %v618_v6 = vpop.f32.mrf.mxu1  ;;  %v1265_v7 = vpop.eup %1264  ;;  %820 = vst [vmem:[%s1478_s18 + $0x130] sm:$0xff] %v1263_v2  ;;  %v579_v8 = vadd.f32 %v1470_v40, %v578_v5 }
  0xeb   : > { %v619_v9 = vadd.f32 %v1470_v40, %v618_v6  ;;  %v1267_v10 = vpop.eup %1266  ;;  %836 = vst [vmem:[%s1478_s18 + $0x1b0] sm:$0xff] %v1265_v7  ;;  %1270 = vtanh.f32 %v656_v3 }
  0xec   : > { %v1269_v11 = vpop.eup %1268  ;;  %789 = vst [vmem:[%s1478_s18 + $0x38] sm:$0xff] %v1267_v10  ;;  %1272 = vtanh.f32 %v696_v4 }
  0xed   : > { %805 = vst [vmem:[%s1478_s18 + $0xb8] sm:$0xff] %v1269_v11  ;;  %1274 = vtanh.f32 %v579_v8 }
  0xee   : > { %1276 = vtanh.f32 %v619_v9 }
  0xf0   : > { %v658_v12 = vpop.f32.mrf.mxu2  ;;  %v698_v13 = vpop.f32.mrf.mxu3 }
  0xf1   : > { %v1271_v14 = vpop.eup %1270  ;;  %v659_v15 = vadd.f32 %v1470_v40, %v658_v12  ;;  %v699_v16 = vadd.f32 %v1470_v40, %v698_v13  ;;  %v580_v17 = vpop.f32.mrf.mxu0 }
  0xf2   : > { %v620_v18 = vpop.f32.mrf.mxu1  ;;  %v1273_v19 = vpop.eup %1272  ;;  %821 = vst [vmem:[%s1478_s18 + $0x138] sm:$0xff] %v1271_v14  ;;  %v581_v20 = vadd.f32 %v1470_v40, %v580_v17 }
  0xf3   : > { %v621_v21 = vadd.f32 %v1470_v40, %v620_v18  ;;  %v1275_v22 = vpop.eup %1274  ;;  %837 = vst [vmem:[%s1478_s18 + $0x1b8] sm:$0xff] %v1273_v19  ;;  %1278 = vtanh.f32 %v659_v15 }
  0xf4   : > { %v1277_v23 = vpop.eup %1276  ;;  %790 = vst [vmem:[%s1478_s18 + $0x40] sm:$0xff] %v1275_v22  ;;  %1280 = vtanh.f32 %v699_v16 }
  0xf5   : > { %806 = vst [vmem:[%s1478_s18 + $0xc0] sm:$0xff] %v1277_v23  ;;  %1282 = vtanh.f32 %v581_v20 }
  0xf6   : > { %1284 = vtanh.f32 %v621_v21 }
  0xf8   : > { %v660_v24 = vpop.f32.mrf.mxu2  ;;  %v700_v25 = vpop.f32.mrf.mxu3 }
  0xf9   : > { %v1279_v26 = vpop.eup %1278  ;;  %v661_v27 = vadd.f32 %v1470_v40, %v660_v24  ;;  %v701_v28 = vadd.f32 %v1470_v40, %v700_v25  ;;  %v583_v29 = vpop.f32.mrf.mxu0 }
  0xfa   : > { %v623_v30 = vpop.f32.mrf.mxu1  ;;  %v1281_v31 = vpop.eup %1280  ;;  %822 = vst [vmem:[%s1478_s18 + $0x140] sm:$0xff] %v1279_v26  ;;  %v584_v32 = vadd.f32 %v1470_v40, %v583_v29 }
  0xfb   : > { %v624_v33 = vadd.f32 %v1470_v40, %v623_v30  ;;  %v1283_v34 = vpop.eup %1282  ;;  %838 = vst [vmem:[%s1478_s18 + $0x1c0] sm:$0xff] %v1281_v31  ;;  %1286 = vtanh.f32 %v661_v27 }
  0xfc   : > { %v1285_v35 = vpop.eup %1284  ;;  %791 = vst [vmem:[%s1478_s18 + $0x48] sm:$0xff] %v1283_v34  ;;  %1288 = vtanh.f32 %v701_v28 }
  0xfd   : > { %807 = vst [vmem:[%s1478_s18 + $0xc8] sm:$0xff] %v1285_v35  ;;  %1290 = vtanh.f32 %v584_v32 }
  0xfe   : > { %1292 = vtanh.f32 %v624_v33 }
 0x100   : > { %v663_v36 = vpop.f32.mrf.mxu2  ;;  %v703_v37 = vpop.f32.mrf.mxu3 }
 0x101   : > { %v1287_v38 = vpop.eup %1286  ;;  %v664_v39 = vadd.f32 %v1470_v40, %v663_v36  ;;  %v704_v41 = vadd.f32 %v1470_v40, %v703_v37  ;;  %v585_v42 = vpop.f32.mrf.mxu0 }
 0x102   : > { %v625_v43 = vpop.f32.mrf.mxu1  ;;  %v1289_v44 = vpop.eup %1288  ;;  %823 = vst [vmem:[%s1478_s18 + $0x148] sm:$0xff] %v1287_v38  ;;  %v586_v45 = vadd.f32 %v1470_v40, %v585_v42 }
 0x103   : > { %v626_v46 = vadd.f32 %v1470_v40, %v625_v43  ;;  %v1291_v47 = vpop.eup %1290  ;;  %839 = vst [vmem:[%s1478_s18 + $0x1c8] sm:$0xff] %v1289_v44  ;;  %1294 = vtanh.f32 %v664_v39 }
 0x104   : > { %v1293_v48 = vpop.eup %1292  ;;  %792 = vst [vmem:[%s1478_s18 + $0x50] sm:$0xff] %v1291_v47  ;;  %1296 = vtanh.f32 %v704_v41 }
 0x105   : > { %808 = vst [vmem:[%s1478_s18 + $0xd0] sm:$0xff] %v1293_v48  ;;  %1298 = vtanh.f32 %v586_v45 }
 0x106   : > { %1300 = vtanh.f32 %v626_v46 }
 0x108   : > { %v665_v49 = vpop.f32.mrf.mxu2  ;;  %v705_v50 = vpop.f32.mrf.mxu3 }
 0x109   : > { %v1295_v51 = vpop.eup %1294  ;;  %v666_v52 = vadd.f32 %v1470_v40, %v665_v49  ;;  %v706_v53 = vadd.f32 %v1470_v40, %v705_v50  ;;  %v588_v54 = vpop.f32.mrf.mxu0 }
 0x10a   : > { %v628_v55 = vpop.f32.mrf.mxu1  ;;  %v1297_v56 = vpop.eup %1296  ;;  %824 = vst [vmem:[%s1478_s18 + $0x150] sm:$0xff] %v1295_v51  ;;  %v589_v57 = vadd.f32 %v1470_v40, %v588_v54 }
 0x10b   : > { %v629_v58 = vadd.f32 %v1470_v40, %v628_v55  ;;  %v1299_v59 = vpop.eup %1298  ;;  %840 = vst [vmem:[%s1478_s18 + $0x1d0] sm:$0xff] %v1297_v56  ;;  %1302 = vtanh.f32 %v666_v52 }
 0x10c   : > { %v1301_v60 = vpop.eup %1300  ;;  %793 = vst [vmem:[%s1478_s18 + $0x58] sm:$0xff] %v1299_v59  ;;  %1304 = vtanh.f32 %v706_v53 }
 0x10d   : > { %809 = vst [vmem:[%s1478_s18 + $0xd8] sm:$0xff] %v1301_v60  ;;  %1306 = vtanh.f32 %v589_v57 }
 0x10e   : > { %1308 = vtanh.f32 %v629_v58 }
 0x110   : > { %v668_v61 = vpop.f32.mrf.mxu2  ;;  %v708_v62 = vpop.f32.mrf.mxu3 }
 0x111   : > { %v1303_v63 = vpop.eup %1302  ;;  %v669_v0 = vadd.f32 %v1470_v40, %v668_v61  ;;  %v709_v1 = vadd.f32 %v1470_v40, %v708_v62  ;;  %v590_v2 = vpop.f32.mrf.mxu0 }
 0x112   : > { %v630_v3 = vpop.f32.mrf.mxu1  ;;  %v1305_v4 = vpop.eup %1304  ;;  %825 = vst [vmem:[%s1478_s18 + $0x158] sm:$0xff] %v1303_v63  ;;  %v591_v5 = vadd.f32 %v1470_v40, %v590_v2 }
 0x113   : > { %v631_v6 = vadd.f32 %v1470_v40, %v630_v3  ;;  %v1307_v7 = vpop.eup %1306  ;;  %841 = vst [vmem:[%s1478_s18 + $0x1d8] sm:$0xff] %v1305_v4  ;;  %1310 = vtanh.f32 %v669_v0 }
 0x114   : > { %v1309_v8 = vpop.eup %1308  ;;  %794 = vst [vmem:[%s1478_s18 + $0x60] sm:$0xff] %v1307_v7  ;;  %1312 = vtanh.f32 %v709_v1 }
 0x115   : > { %810 = vst [vmem:[%s1478_s18 + $0xe0] sm:$0xff] %v1309_v8  ;;  %1314 = vtanh.f32 %v591_v5 }
 0x116   : > { %1316 = vtanh.f32 %v631_v6 }
 0x118   : > { %v670_v9 = vpop.f32.mrf.mxu2  ;;  %v710_v10 = vpop.f32.mrf.mxu3 }
 0x119   : > { %v1311_v11 = vpop.eup %1310  ;;  %v671_v12 = vadd.f32 %v1470_v40, %v670_v9  ;;  %v711_v13 = vadd.f32 %v1470_v40, %v710_v10  ;;  %v593_v14 = vpop.f32.mrf.mxu0 }
 0x11a   : > { %v633_v15 = vpop.f32.mrf.mxu1  ;;  %v1313_v16 = vpop.eup %1312  ;;  %826 = vst [vmem:[%s1478_s18 + $0x160] sm:$0xff] %v1311_v11  ;;  %v594_v17 = vadd.f32 %v1470_v40, %v593_v14 }
 0x11b   : > { %v634_v18 = vadd.f32 %v1470_v40, %v633_v15  ;;  %v1315_v19 = vpop.eup %1314  ;;  %842 = vst [vmem:[%s1478_s18 + $0x1e0] sm:$0xff] %v1313_v16  ;;  %1318 = vtanh.f32 %v671_v12 }
 0x11c   : > { %v1317_v20 = vpop.eup %1316  ;;  %795 = vst [vmem:[%s1478_s18 + $0x68] sm:$0xff] %v1315_v19  ;;  %1320 = vtanh.f32 %v711_v13 }
 0x11d   : > { %811 = vst [vmem:[%s1478_s18 + $0xe8] sm:$0xff] %v1317_v20  ;;  %1322 = vtanh.f32 %v594_v17 }
 0x11e   : > { %1324 = vtanh.f32 %v634_v18 }
 0x120   : > { %v673_v21 = vpop.f32.mrf.mxu2  ;;  %v713_v22 = vpop.f32.mrf.mxu3 }
 0x121   : > { %v1319_v23 = vpop.eup %1318  ;;  %v674_v24 = vadd.f32 %v1470_v40, %v673_v21  ;;  %v714_v25 = vadd.f32 %v1470_v40, %v713_v22  ;;  %v595_v26 = vpop.f32.mrf.mxu0 }
 0x122   : > { %v635_v27 = vpop.f32.mrf.mxu1  ;;  %v1321_v28 = vpop.eup %1320  ;;  %827 = vst [vmem:[%s1478_s18 + $0x168] sm:$0xff] %v1319_v23  ;;  %v596_v29 = vadd.f32 %v1470_v40, %v595_v26 }
 0x123   : > { %v636_v30 = vadd.f32 %v1470_v40, %v635_v27  ;;  %v1323_v31 = vpop.eup %1322  ;;  %843 = vst [vmem:[%s1478_s18 + $0x1e8] sm:$0xff] %v1321_v28  ;;  %1326 = vtanh.f32 %v674_v24 }
 0x124   : > { %v1325_v32 = vpop.eup %1324  ;;  %796 = vst [vmem:[%s1478_s18 + $0x70] sm:$0xff] %v1323_v31  ;;  %1328 = vtanh.f32 %v714_v25 }
 0x125   : > { %812 = vst [vmem:[%s1478_s18 + $0xf0] sm:$0xff] %v1325_v32  ;;  %1330 = vtanh.f32 %v596_v29 }
 0x126   : > { %1332 = vtanh.f32 %v636_v30 }
 0x128   : > { %v675_v33 = vpop.f32.mrf.mxu2  ;;  %v715_v34 = vpop.f32.mrf.mxu3 }
 0x129   : > { %v1327_v35 = vpop.eup %1326  ;;  %v676_v36 = vadd.f32 %v1470_v40, %v675_v33  ;;  %v716_v37 = vadd.f32 %v1470_v40, %v715_v34 }
 0x12a   : > { %v1329_v38 = vpop.eup %1328  ;;  %828 = vst [vmem:[%s1478_s18 + $0x170] sm:$0xff] %v1327_v35 }
 0x12b   : > { %v1331_v39 = vpop.eup %1330  ;;  %844 = vst [vmem:[%s1478_s18 + $0x1f0] sm:$0xff] %v1329_v38  ;;  %1334 = vtanh.f32 %v676_v36 }
 0x12c   : > { %v1333_v41 = vpop.eup %1332  ;;  %797 = vst [vmem:[%s1478_s18 + $0x78] sm:$0xff] %v1331_v39  ;;  %1336 = vtanh.f32 %v716_v37 }
 0x12d   : > { %813 = vst [vmem:[%s1478_s18 + $0xf8] sm:$0xff] %v1333_v41 }
 0x131   : > { %v1335_v42 = vpop.eup %1334 }
 0x132   : > { %v1337_v43 = vpop.eup %1336  ;;  %829 = vst [vmem:[%s1478_s18 + $0x178] sm:$0xff] %v1335_v42 }
 0x133   : > { %845 = vst [vmem:[%s1478_s18 + $0x1f8] sm:$0xff] %v1337_v43 }
 0x134 PF: > { %s13_s14 = sadd.s32 1, %s1360_s14   ;;  %s1619_s12 = smov %s1356_s13 }
 0x135   : > { %p10_p5 = scmp.ge.s32.totalorder %s13_s14, 6   ;;  %s1620_s13 = smov %s1622_s15 }
 0x137   :  { %12 = sbr.rel (!%p10_p5) target bundleno = 2 (0x2), region = 68 }

</bundles_post_ra>
